<compile_context>
chip_gen: v7x
topology: tpu7x:2x2x1
jax: 0.10.0
libtpu: 0.0.40
codegen_flags: <defaults>
</compile_context>

<pallas_src>
import functools

import numpy as np
import jax
import jax.numpy as jnp
from jax import lax
from jax.experimental import pallas as pl
from jax.experimental.pallas import tpu as pltpu


# ----------------------------------------------------------------------------
# Static module configuration (AttentionModule_stage3(16, 16, size1=(16, 16)))
# ----------------------------------------------------------------------------
C = 16                     # in_channels == out_channels
CM = C // 4                # bottleneck width (4)
CMP = 8                    # bottleneck padded to one full sublane group
KP = 9 * CMP               # im2col contraction depth (72)
HB, WB = 16, 16            # full resolution (size1)
HS, WS = 8, 8              # after MaxPool2d(3, stride=2, padding=1)
HWB, HWS = HB * WB, HS * WS

# 3x3 tap order t = ky*3 + kx, spatial offset (dy, dx) = (ky-1, kx-1)
OFFSETS = [(dy, dx) for dy in (-1, 0, 1) for dx in (-1, 0, 1)]

BLOCKS = ('first', 'trunk0', 'trunk1', 'soft0', 'soft1', 'last')

# Packed parameter slab layout: one 128-lane chunk per residual block, plus one
# trailing chunk for the softmax2 (BN-ReLU-1x1-BN-ReLU-1x1) parameters.
PB = 128
O_W1 = 0                   # (CMP, C)  1x1 conv1 weight, rows zero-padded 4->8
O_W2 = O_W1 + C            # (CMP, KP) 3x3 conv2 im2col weight, zero-padded
O_W3 = O_W2 + KP           # (C, CMP)  1x1 conv3 weight, cols zero-padded 4->8
O_VEC = O_W3 + CMP         # 6 columns: s1, b1, s2, b2, s3, b3 (folded BN)
O_SA = 2 * C               # in the softmax2 chunk: after w_a, w_b come 4 vectors


# ----------------------------------------------------------------------------
# Structural constants (numpy, built once per batch-block width at trace time)
# ----------------------------------------------------------------------------
def _tap_masks(h, w):
    """(9, h*w) float 0/1 masks: 1 where (y+dy, x+dx) stays inside the image."""
    ys, xs = np.meshgrid(np.arange(h), np.arange(w), indexing='ij')
    rows = []
    for dy, dx in OFFSETS:
        ok = (ys + dy >= 0) & (ys + dy < h) & (xs + dx >= 0) & (xs + dx < w)
        rows.append(ok.reshape(-1))
    return np.stack(rows).astype(np.float32)


def _pool_select(h, w):
    """0/1 matrix (h*w, ho*wo) selecting the stride-2 grid points."""
    ho, wo = (h + 2 - 3) // 2 + 1, (w + 2 - 3) // 2 + 1
    sel = np.zeros((h * w, ho * wo), np.float32)
    for yo in range(ho):
        for xo in range(wo):
            sel[(2 * yo) * w + 2 * xo, yo * wo + xo] = 1.0
    return sel


def _interp_1d(out_size, in_size):
    """1-D bilinear interpolation matrix, align_corners=True (torch semantics)."""
    a = np.zeros((out_size, in_size), np.float32)
    if out_size == 1 or in_size == 1:
        a[:, 0] = 1.0
        return a
    src = np.arange(out_size) * (in_size - 1) / (out_size - 1)
    p0 = np.clip(np.floor(src).astype(np.int64), 0, in_size - 2)
    frac = src - p0
    a[np.arange(out_size), p0] += 1.0 - frac
    a[np.arange(out_size), p0 + 1] += frac
    return a


def _upsample_matrix_t(ho, wo, hi, wi):
    """(hi*wi, ho*wo): flat bilinear operator, applied as x_flat @ B^T."""
    b = np.kron(_interp_1d(ho, hi), _interp_1d(wo, wi))   # (ho*wo, hi*wi)
    return np.ascontiguousarray(b.T).astype(np.float32)


@functools.lru_cache(maxsize=None)
def _structural(bblk):
    """Trace-time constants for a given batch-block width (B_BLK images/step)."""
    mb = np.tile(_tap_masks(HB, WB), (1, bblk))            # (9, bblk*256)
    ms = np.tile(_tap_masks(HS, WS), (1, bblk))            # (9, bblk*64)
    # rows 0:9 = multiplicative conv mask, rows 16:25 = additive maxpool mask
    mask_slab = np.zeros((25, bblk * HWB), np.float32)
    mask_slab[0:9] = mb
    mask_slab[16:25] = (mb - 1.0) * 1.0e30                 # 0 valid / -1e30 invalid
    sel = _pool_select(HB, WB)                             # (256, 64)
    upt = _upsample_matrix_t(HB, WB, HS, WS)               # (64, 256)
    sel_bd = np.zeros((bblk * HWB, bblk * HWS), np.float32)
    up_bd = np.zeros((bblk * HWS, bblk * HWB), np.float32)
    for i in range(bblk):
        sel_bd[i * HWB:(i + 1) * HWB, i * HWS:(i + 1) * HWS] = sel
        up_bd[i * HWS:(i + 1) * HWS, i * HWB:(i + 1) * HWB] = upt
    return mask_slab, ms, sel_bd, up_bd


# ----------------------------------------------------------------------------
# In-kernel helpers (traced inline; everything stays in VMEM / vregs)
# ----------------------------------------------------------------------------
def _shifted(x, off, lanes):
    """Lane-rolled copy so column p picks up x[:, p + off] (row-major H*W flat).

    Wrap-around / cross-image leakage is removed by the caller's mask.
    """
    if off == 0:
        return x
    return pltpu.roll(x, shift=(-off) % lanes, axis=1)     # XLU, not VPU


def _res_block(x, p, conv_mask, lanes, w):
    """ResidualBlock(C, C, stride=1) with folded BN; x, result: (C, lanes)."""
    # bn1 -> relu -> conv1 (1x1); rows CM..CMP-1 are exactly zero (padding)
    h = jnp.maximum(x * p['s1'] + p['b1'], 0.0)
    h = jnp.dot(p['w1'], h, preferred_element_type=jnp.float32)        # (CMP, lanes)
    # bn2 -> relu -> conv2 (3x3, pad 1) as ONE im2col matmul, K = 9*CMP = 72
    h = jnp.maximum(h * p['s2'] + p['b2'], 0.0)
    taps = []
    for t, (dy, dx) in enumerate(OFFSETS):
        tap = _shifted(h, dy * w + dx, lanes)
        taps.append(tap * conv_mask[t:t + 1, :])
    patch = jnp.concatenate(taps, axis=0)        # (KP, lanes), whole-vreg pieces
    h = jnp.dot(p['w2m'], patch, preferred_element_type=jnp.float32)   # (CMP, lanes)
    # bn3 -> relu -> conv3 (1x1) + identity residual (conv4 shortcut unused:
    # in_channels == out_channels and stride == 1)
    h = jnp.maximum(h * p['s3'] + p['b3'], 0.0)
    return jnp.dot(p['w3'], h, preferred_element_type=jnp.float32) + x


def _maxpool_3x3_s2(x, pool_mask_add, sel_bd, lanes, w):
    """MaxPool2d(3, stride=2, padding=1) on (C, lanes) flat data."""
    red = None
    for t, (dy, dx) in enumerate(OFFSETS):
        tap = _shifted(x, dy * w + dx, lanes) + pool_mask_add[t:t + 1, :]
        red = tap if red is None else jnp.maximum(red, tap)
    # stride-2 subsample as a block-diagonal 0/1 selection matmul (MXU, lane-dense)
    return jnp.dot(red, sel_bd, preferred_element_type=jnp.float32)


def _block_params(p_ref, b):
    """Static slices of the packed parameter slab for residual block b."""
    base = b * PB
    return dict(
        w1=p_ref[0:CMP, base + O_W1:base + O_W1 + C],
        w2m=p_ref[0:CMP, base + O_W2:base + O_W2 + KP],
        w3=p_ref[:, base + O_W3:base + O_W3 + CMP],
        s1=p_ref[:, base + O_VEC + 0:base + O_VEC + 1],
        b1=p_ref[:, base + O_VEC + 1:base + O_VEC + 2],
        s2=p_ref[0:CMP, base + O_VEC + 2:base + O_VEC + 3],
        b2=p_ref[0:CMP, base + O_VEC + 3:base + O_VEC + 4],
        s3=p_ref[0:CMP, base + O_VEC + 4:base + O_VEC + 5],
        b3=p_ref[0:CMP, base + O_VEC + 5:base + O_VEC + 6],
    )


# ----------------------------------------------------------------------------
# The fused kernel: full AttentionModule_stage3 forward for B_BLK images
# ----------------------------------------------------------------------------
def _attention_kernel(x_ref, p_ref, mb_ref, ms_ref, sel_ref, up_ref, o_ref, *,
                      lanes_b, lanes_s):
    conv_mb = mb_ref[0:9, :]           # (9, lanes_b) multiplicative conv mask
    pool_mb = mb_ref[16:25, :]         # (9, lanes_b) additive (-1e30) pool mask
    conv_ms = ms_ref[...]              # (9, lanes_s)

    x = x_ref[...]                     # (C, lanes_b): B_BLK images on the lane axis

    # first_residual_blocks
    x = _res_block(x, _block_params(p_ref, 0), conv_mb, lanes_b, WB)
    # trunk_branches
    t = _res_block(x, _block_params(p_ref, 1), conv_mb, lanes_b, WB)
    t = _res_block(t, _block_params(p_ref, 2), conv_mb, lanes_b, WB)
    # mpool1 -> softmax1_blocks (8x8 branch)
    s = _maxpool_3x3_s2(x, pool_mb, sel_ref[...], lanes_b, WB)     # (C, lanes_s)
    s = _res_block(s, _block_params(p_ref, 3), conv_ms, lanes_s, WS)
    s = _res_block(s, _block_params(p_ref, 4), conv_ms, lanes_s, WS)
    # interpolation1 (bilinear, align_corners=True) + out_trunk
    up = jnp.dot(s, up_ref[...], preferred_element_type=jnp.float32) + t
    # softmax2_blocks: BN -> ReLU -> 1x1 -> BN -> ReLU -> 1x1 -> Sigmoid
    base = len(BLOCKS) * PB
    w_a = p_ref[:, base:base + C]
    w_b = p_ref[:, base + C:base + 2 * C]
    s_a = p_ref[:, base + O_SA + 0:base + O_SA + 1]
    b_a = p_ref[:, base + O_SA + 1:base + O_SA + 2]
    s_b = p_ref[:, base + O_SA + 2:base + O_SA + 3]
    b_b = p_ref[:, base + O_SA + 3:base + O_SA + 4]
    h = jnp.maximum(up * s_a + b_a, 0.0)
    h = jnp.dot(w_a, h, preferred_element_type=jnp.float32)
    h = jnp.maximum(h * s_b + b_b, 0.0)
    h = jnp.dot(w_b, h, preferred_element_type=jnp.float32)
    mask = pl.reciprocal(1.0 + jnp.exp(-h), approx=True)   # sigmoid on the EUP slot
    out = (1.0 + mask) * t
    # last_blocks
    o_ref[...] = _res_block(out, _block_params(p_ref, 5), conv_mb, lanes_b, WB)


# ----------------------------------------------------------------------------
# Wrapper
# ----------------------------------------------------------------------------
def _pick_bblk(n, max_bblk=4):
    """Largest batch block <= max_bblk dividing n that keeps >= 2 grid steps
    (so both v7x TensorCores get work); degenerates gracefully for small n."""
    divisors = [d for d in range(1, n + 1) if n % d == 0 and d <= max_bblk]
    two_step = [d for d in divisors if n // d >= 2]
    return max(two_step) if two_step else max(divisors)


def attention_module_stage3(x_nchw, param_slab):
    """x_nchw: (N, 16, 16, 16) float32 -> (N, 16, 16, 16) float32."""
    n, c, h, w = x_nchw.shape
    assert (c, h, w) == (C, HB, WB)
    bblk = _pick_bblk(n)
    lanes_b, lanes_s = bblk * HWB, bblk * HWS
    mask_b, mask_s, sel_bd, up_bd = (jnp.asarray(a) for a in _structural(bblk))

    # (N, C, H, W) -> (C, N*H*W): channel-major, batch concatenated on the lane
    # axis, so each grid step sees a contiguous 128-aligned lane window.
    xf = jnp.transpose(x_nchw.reshape(n, C, HWB), (1, 0, 2))
    xf = xf.reshape(C, n * HWB).astype(jnp.float32)

    kernel = functools.partial(_attention_kernel, lanes_b=lanes_b, lanes_s=lanes_s)

    def rep(arr):  # replicated (grid-invariant) operand
        return pl.BlockSpec(arr.shape, lambda i: (0, 0))

    out = pl.pallas_call(
        kernel,
        out_shape=jax.ShapeDtypeStruct((C, n * HWB), jnp.float32),
        grid=(n // bblk,),
        in_specs=[
            pl.BlockSpec((C, lanes_b), lambda i: (0, i)),
            rep(param_slab), rep(mask_b), rep(mask_s), rep(sel_bd), rep(up_bd),
        ],
        out_specs=pl.BlockSpec((C, lanes_b), lambda i: (0, i)),
        compiler_params=pltpu.CompilerParams(dimension_semantics=("parallel",)),
    )(xf, param_slab, mask_b, mask_s, sel_bd, up_bd)

    return jnp.transpose(out.reshape(C, n, HWB), (1, 0, 2)).reshape(n, C, h, w)


# ----------------------------------------------------------------------------
# Deterministic synthetic parameters (BN folded to inference-mode scale/bias)
# ----------------------------------------------------------------------------
def make_bn_params(key, c):
    kg, kb, km, kv = jax.random.split(key, 4)
    gamma = 1.0 + 0.1 * jax.random.normal(kg, (c,), jnp.float32)
    beta = 0.1 * jax.random.normal(kb, (c,), jnp.float32)
    mean = 0.05 * jax.random.normal(km, (c,), jnp.float32)
    var = 0.9 + 0.2 * jax.random.uniform(kv, (c,), jnp.float32)
    scale = gamma / jnp.sqrt(var + 1e-5)
    bias = beta - mean * scale
    return scale.reshape(c, 1), bias.reshape(c, 1)


def make_resblock_params(key, c):
    cm = c // 4
    ks = jax.random.split(key, 6)
    s1, b1 = make_bn_params(ks[0], c)
    w1 = jax.random.normal(ks[1], (cm, c), jnp.float32) / float(np.sqrt(c))
    s2, b2 = make_bn_params(ks[2], cm)
    w2 = jax.random.normal(ks[3], (3, 3, cm, cm), jnp.float32) / float(np.sqrt(9.0 * cm))
    s3, b3 = make_bn_params(ks[4], cm)
    w3 = jax.random.normal(ks[5], (c, cm), jnp.float32) / float(np.sqrt(cm))
    return dict(w1=w1, s1=s1, b1=b1, w2=w2, s2=s2, b2=b2, s3=s3, b3=b3, w3=w3)


def _pack_param_slab(blocks, sm2):
    """Pack every weight / folded-BN vector into one (C, 7*128) f32 slab."""
    slab = np.zeros((C, (len(blocks) + 1) * PB), np.float32)
    for b, p in enumerate(blocks):
        base = b * PB
        cm = p['w1'].shape[0]
        slab[:cm, base + O_W1:base + O_W1 + C] = np.asarray(p['w1'])
        w2 = np.asarray(p['w2'])                                # (3,3,ci,co) HWIO
        for t in range(9):
            ky, kx = divmod(t, 3)
            slab[:cm, base + O_W2 + t * CMP:base + O_W2 + t * CMP + cm] = w2[ky, kx].T
        slab[:, base + O_W3:base + O_W3 + cm] = np.asarray(p['w3'])
        for j, name in enumerate(('s1', 'b1', 's2', 'b2', 's3', 'b3')):
            v = np.asarray(p[name]).reshape(-1)
            slab[:v.shape[0], base + O_VEC + j] = v
    base = len(blocks) * PB
    slab[:, base:base + C] = np.asarray(sm2['w_a'])
    slab[:, base + C:base + 2 * C] = np.asarray(sm2['w_b'])
    for j, name in enumerate(('s_a', 'b_a', 's_b', 'b_b')):
        slab[:, base + O_SA + j] = np.asarray(sm2[name]).reshape(-1)
    return jnp.asarray(slab)


def make_params(key, c=C):
    kres, ksm = jax.random.split(key)
    blocks = [make_resblock_params(k, c) for k in jax.random.split(kres, len(BLOCKS))]
    kk = jax.random.split(ksm, 4)
    s_a, b_a = make_bn_params(kk[0], c)
    w_a = jax.random.normal(kk[1], (c, c), jnp.float32) / float(np.sqrt(c))
    s_b, b_b = make_bn_params(kk[2], c)
    w_b = jax.random.normal(kk[3], (c, c), jnp.float32) / float(np.sqrt(c))
    sm2 = dict(s_a=s_a, b_a=b_a, w_a=w_a, s_b=s_b, b_b=b_b, w_b=w_b)
    return _pack_param_slab(blocks, sm2), dict(blocks=blocks, sm2=sm2)


# ----------------------------------------------------------------------------
# Pure-JAX NCHW reference (eval-mode BatchNorm) for correctness checking
# ----------------------------------------------------------------------------
def _bn_relu_ref(x, s, b):
    return jnp.maximum(x * s.reshape(1, -1, 1, 1) + b.reshape(1, -1, 1, 1), 0.0)


def _res_block_ref(x, p):
    h = _bn_relu_ref(x, p['s1'], p['b1'])
    h = jnp.einsum('oc,nchw->nohw', p['w1'], h)
    h = _bn_relu_ref(h, p['s2'], p['b2'])
    h = lax.conv_general_dilated(h, p['w2'], (1, 1), 'SAME',
                                 dimension_numbers=('NCHW', 'HWIO', 'NCHW'))
    h = _bn_relu_ref(h, p['s3'], p['b3'])
    h = jnp.einsum('oc,nchw->nohw', p['w3'], h)
    return h + x


def attention_module_stage3_ref(x, raw):
    blocks, sm2 = raw['blocks'], raw['sm2']
    x = _res_block_ref(x, blocks[0])
    t = _res_block_ref(_res_block_ref(x, blocks[1]), blocks[2])
    mp = lax.reduce_window(x, -jnp.inf, lax.max, (1, 1, 3, 3), (1, 1, 2, 2),
                           [(0, 0), (0, 0), (1, 1), (1, 1)])
    s = _res_block_ref(_res_block_ref(mp, blocks[3]), blocks[4])
    ah, aw = jnp.asarray(_interp_1d(HB, HS)), jnp.asarray(_interp_1d(WB, WS))
    up = jnp.einsum('oy,ncyx,px->ncop', ah, s, aw) + t
    h = _bn_relu_ref(up, sm2['s_a'], sm2['b_a'])
    h = jnp.einsum('oc,nchw->nohw', sm2['w_a'], h)
    h = _bn_relu_ref(h, sm2['s_b'], sm2['b_b'])
    h = jnp.einsum('oc,nchw->nohw', sm2['w_b'], h)
    out = (1.0 + jax.nn.sigmoid(h)) * t
    return _res_block_ref(out, blocks[5])


if __name__ == "__main__":
    # AttentionModule_stage3(in_channels=16, out_channels=16, size1=(16, 16))
    N = 8   # -> B_BLK=4 images per grid step, 2 grid steps (both v7x TCs busy)
    x = jax.random.normal(jax.random.PRNGKey(0), (N, C, HB, WB), jnp.float32)
    param_slab, raw_params = make_params(jax.random.PRNGKey(1), C)

    fwd = jax.jit(attention_module_stage3)
    y = fwd(x, param_slab)
    jax.block_until_ready(y)
    assert y.shape == (N, C, HB, WB)
    assert bool(jnp.all(jnp.isfinite(y)))

    # Reference check (loose tolerance: approx-reciprocal sigmoid + MXU f32
    # matmul rounding vs full-precision reference).
    with jax.default_matmul_precision("float32"):
        y_ref = attention_module_stage3_ref(x, raw_params)
    rel = float(jnp.max(jnp.abs(y - y_ref)) / (jnp.max(jnp.abs(y_ref)) + 1e-6))
    assert rel < 5e-2, f"mismatch vs reference: rel={rel}"

    print("KERNEL_OK")
</pallas_src>

<mosaic_0001>
module attributes {stable_mosaic.version = 11 : i64} {
  func.func @_attention_kernel(%arg0: i32, %arg1: memref<16x1024xf32, #tpu.memory_space<vmem>>, %arg2: memref<16x896xf32, #tpu.memory_space<vmem>>, %arg3: memref<25x1024xf32, #tpu.memory_space<vmem>>, %arg4: memref<9x256xf32, #tpu.memory_space<vmem>>, %arg5: memref<1024x256xf32, #tpu.memory_space<vmem>>, %arg6: memref<256x1024xf32, #tpu.memory_space<vmem>>, %arg7: memref<16x1024xf32, #tpu.memory_space<vmem>>) attributes {dimension_semantics = [#tpu.dimension_semantics<parallel>], iteration_bounds = array<i64: 2>, scalar_prefetch = 0 : i64, scratch_operands = 0 : i64, tpu.core_type = #tpu.core_type<tc>, window_params = [{transform_indices = @transform_0, window_bounds = array<i64: 16, 1024>}, {pipeline_mode = #tpu.pipeline_mode<synchronous>, transform_indices = @transform_1, window_bounds = array<i64: 16, 896>}, {pipeline_mode = #tpu.pipeline_mode<synchronous>, transform_indices = @transform_2, window_bounds = array<i64: 25, 1024>}, {pipeline_mode = #tpu.pipeline_mode<synchronous>, transform_indices = @transform_3, window_bounds = array<i64: 9, 256>}, {pipeline_mode = #tpu.pipeline_mode<synchronous>, transform_indices = @transform_4, window_bounds = array<i64: 1024, 256>}, {pipeline_mode = #tpu.pipeline_mode<synchronous>, transform_indices = @transform_5, window_bounds = array<i64: 256, 1024>}, {transform_indices = @transform_6, window_bounds = array<i64: 16, 1024>}]} {
    %c0 = arith.constant 0 : index
    %c0_0 = arith.constant 0 : index
    %0 = vector.load %arg3[%c0, %c0_0] : memref<25x1024xf32, #tpu.memory_space<vmem>>, vector<9x1024xf32>
    %c16 = arith.constant 16 : index
    %c0_1 = arith.constant 0 : index
    %1 = vector.load %arg3[%c16, %c0_1] : memref<25x1024xf32, #tpu.memory_space<vmem>>, vector<9x1024xf32>
    %c0_2 = arith.constant 0 : index
    %c0_3 = arith.constant 0 : index
    %2 = vector.load %arg4[%c0_2, %c0_3] : memref<9x256xf32, #tpu.memory_space<vmem>>, vector<9x256xf32>
    %c0_4 = arith.constant 0 : index
    %c0_5 = arith.constant 0 : index
    %3 = vector.load %arg1[%c0_4, %c0_5] : memref<16x1024xf32, #tpu.memory_space<vmem>>, vector<16x1024xf32>
    %c0_6 = arith.constant 0 : index
    %c0_7 = arith.constant 0 : index
    %4 = vector.load %arg2[%c0_6, %c0_7] : memref<16x896xf32, #tpu.memory_space<vmem>>, vector<8x16xf32>
    %c0_8 = arith.constant 0 : index
    %c16_9 = arith.constant 16 : index
    %5 = vector.load %arg2[%c0_8, %c16_9] : memref<16x896xf32, #tpu.memory_space<vmem>>, vector<8x72xf32>
    %c0_10 = arith.constant 0 : index
    %c88 = arith.constant 88 : index
    %6 = vector.load %arg2[%c0_10, %c88] : memref<16x896xf32, #tpu.memory_space<vmem>>, vector<16x8xf32>
    %c0_11 = arith.constant 0 : index
    %c96 = arith.constant 96 : index
    %7 = vector.load %arg2[%c0_11, %c96] : memref<16x896xf32, #tpu.memory_space<vmem>>, vector<16x1xf32>
    %c0_12 = arith.constant 0 : index
    %c97 = arith.constant 97 : index
    %8 = vector.load %arg2[%c0_12, %c97] : memref<16x896xf32, #tpu.memory_space<vmem>>, vector<16x1xf32>
    %c0_13 = arith.constant 0 : index
    %c98 = arith.constant 98 : index
    %9 = vector.load %arg2[%c0_13, %c98] : memref<16x896xf32, #tpu.memory_space<vmem>>, vector<8x1xf32>
    %c0_14 = arith.constant 0 : index
    %c99 = arith.constant 99 : index
    %10 = vector.load %arg2[%c0_14, %c99] : memref<16x896xf32, #tpu.memory_space<vmem>>, vector<8x1xf32>
    %c0_15 = arith.constant 0 : index
    %c100 = arith.constant 100 : index
    %11 = vector.load %arg2[%c0_15, %c100] : memref<16x896xf32, #tpu.memory_space<vmem>>, vector<8x1xf32>
    %c0_16 = arith.constant 0 : index
    %c101 = arith.constant 101 : index
    %12 = vector.load %arg2[%c0_16, %c101] : memref<16x896xf32, #tpu.memory_space<vmem>>, vector<8x1xf32>
    %13 = vector.broadcast %7 : vector<16x1xf32> to vector<16x1024xf32>
    %14 = arith.mulf %3, %13 : vector<16x1024xf32>
    %15 = vector.broadcast %8 : vector<16x1xf32> to vector<16x1024xf32>
    %16 = arith.addf %14, %15 : vector<16x1024xf32>
    %cst = arith.constant 0.000000e+00 : f32
    %17 = vector.broadcast %cst : f32 to vector<16x1024xf32>
    %18 = arith.maximumf %16, %17 : vector<16x1024xf32>
    %cst_17 = arith.constant dense<0.000000e+00> : vector<8x1024xf32>
    %19 = tpu.matmul %4, %18, %cst_17 {dimension_numbers = #tpu.dot_dimension_numbers<[1], [0], [0], [1], [0, 0, 1, 1], [], []>} : vector<8x16xf32>, vector<16x1024xf32>, vector<8x1024xf32> -> vector<8x1024xf32>
    %20 = vector.broadcast %9 : vector<8x1xf32> to vector<8x1024xf32>
    %21 = arith.mulf %19, %20 : vector<8x1024xf32>
    %22 = vector.broadcast %10 : vector<8x1xf32> to vector<8x1024xf32>
    %23 = arith.addf %21, %22 : vector<8x1024xf32>
    %cst_18 = arith.constant 0.000000e+00 : f32
    %24 = vector.broadcast %cst_18 : f32 to vector<8x1024xf32>
    %25 = arith.maximumf %23, %24 : vector<8x1024xf32>
    %c17_i32 = arith.constant 17 : i32
    %26 = tpu.dynamic_rotate %25 by %c17_i32 dim 1 : vector<8x1024xf32>, i32 -> vector<8x1024xf32>
    %27 = vector.extract_strided_slice %0 {offsets = [0, 0], sizes = [1, 1024], strides = [1, 1]} : vector<9x1024xf32> to vector<1x1024xf32>
    %28 = vector.broadcast %27 : vector<1x1024xf32> to vector<8x1024xf32>
    %29 = arith.mulf %26, %28 : vector<8x1024xf32>
    %c16_i32 = arith.constant 16 : i32
    %30 = tpu.dynamic_rotate %25 by %c16_i32 dim 1 : vector<8x1024xf32>, i32 -> vector<8x1024xf32>
    %31 = vector.extract_strided_slice %0 {offsets = [1, 0], sizes = [1, 1024], strides = [1, 1]} : vector<9x1024xf32> to vector<1x1024xf32>
    %32 = vector.broadcast %31 : vector<1x1024xf32> to vector<8x1024xf32>
    %33 = arith.mulf %30, %32 : vector<8x1024xf32>
    %c15_i32 = arith.constant 15 : i32
    %34 = tpu.dynamic_rotate %25 by %c15_i32 dim 1 : vector<8x1024xf32>, i32 -> vector<8x1024xf32>
    %35 = vector.extract_strided_slice %0 {offsets = [2, 0], sizes = [1, 1024], strides = [1, 1]} : vector<9x1024xf32> to vector<1x1024xf32>
    %36 = vector.broadcast %35 : vector<1x1024xf32> to vector<8x1024xf32>
    %37 = arith.mulf %34, %36 : vector<8x1024xf32>
    %c1_i32 = arith.constant 1 : i32
    %38 = tpu.dynamic_rotate %25 by %c1_i32 dim 1 : vector<8x1024xf32>, i32 -> vector<8x1024xf32>
    %39 = vector.extract_strided_slice %0 {offsets = [3, 0], sizes = [1, 1024], strides = [1, 1]} : vector<9x1024xf32> to vector<1x1024xf32>
    %40 = vector.broadcast %39 : vector<1x1024xf32> to vector<8x1024xf32>
    %41 = arith.mulf %38, %40 : vector<8x1024xf32>
    %42 = vector.extract_strided_slice %0 {offsets = [4, 0], sizes = [1, 1024], strides = [1, 1]} : vector<9x1024xf32> to vector<1x1024xf32>
    %43 = vector.broadcast %42 : vector<1x1024xf32> to vector<8x1024xf32>
    %44 = arith.mulf %25, %43 : vector<8x1024xf32>
    %c1023_i32 = arith.constant 1023 : i32
    %45 = tpu.dynamic_rotate %25 by %c1023_i32 dim 1 : vector<8x1024xf32>, i32 -> vector<8x1024xf32>
    %46 = vector.extract_strided_slice %0 {offsets = [5, 0], sizes = [1, 1024], strides = [1, 1]} : vector<9x1024xf32> to vector<1x1024xf32>
    %47 = vector.broadcast %46 : vector<1x1024xf32> to vector<8x1024xf32>
    %48 = arith.mulf %45, %47 : vector<8x1024xf32>
    %c1009_i32 = arith.constant 1009 : i32
    %49 = tpu.dynamic_rotate %25 by %c1009_i32 dim 1 : vector<8x1024xf32>, i32 -> vector<8x1024xf32>
    %50 = vector.extract_strided_slice %0 {offsets = [6, 0], sizes = [1, 1024], strides = [1, 1]} : vector<9x1024xf32> to vector<1x1024xf32>
    %51 = vector.broadcast %50 : vector<1x1024xf32> to vector<8x1024xf32>
    %52 = arith.mulf %49, %51 : vector<8x1024xf32>
    %c1008_i32 = arith.constant 1008 : i32
    %53 = tpu.dynamic_rotate %25 by %c1008_i32 dim 1 : vector<8x1024xf32>, i32 -> vector<8x1024xf32>
    %54 = vector.extract_strided_slice %0 {offsets = [7, 0], sizes = [1, 1024], strides = [1, 1]} : vector<9x1024xf32> to vector<1x1024xf32>
    %55 = vector.broadcast %54 : vector<1x1024xf32> to vector<8x1024xf32>
    %56 = arith.mulf %53, %55 : vector<8x1024xf32>
    %c1007_i32 = arith.constant 1007 : i32
    %57 = tpu.dynamic_rotate %25 by %c1007_i32 dim 1 : vector<8x1024xf32>, i32 -> vector<8x1024xf32>
    %58 = vector.extract_strided_slice %0 {offsets = [8, 0], sizes = [1, 1024], strides = [1, 1]} : vector<9x1024xf32> to vector<1x1024xf32>
    %59 = vector.broadcast %58 : vector<1x1024xf32> to vector<8x1024xf32>
    %60 = arith.mulf %57, %59 : vector<8x1024xf32>
    %61 = tpu.concatenate %29, %33, %37, %41, %44, %48, %52, %56, %60 in 0 : vector<8x1024xf32>, vector<8x1024xf32>, vector<8x1024xf32>, vector<8x1024xf32>, vector<8x1024xf32>, vector<8x1024xf32>, vector<8x1024xf32>, vector<8x1024xf32>, vector<8x1024xf32> -> vector<72x1024xf32>
    %cst_19 = arith.constant dense<0.000000e+00> : vector<8x1024xf32>
    %62 = tpu.matmul %5, %61, %cst_19 {dimension_numbers = #tpu.dot_dimension_numbers<[1], [0], [0], [1], [0, 0, 1, 1], [], []>} : vector<8x72xf32>, vector<72x1024xf32>, vector<8x1024xf32> -> vector<8x1024xf32>
    %63 = vector.broadcast %11 : vector<8x1xf32> to vector<8x1024xf32>
    %64 = arith.mulf %62, %63 : vector<8x1024xf32>
    %65 = vector.broadcast %12 : vector<8x1xf32> to vector<8x1024xf32>
    %66 = arith.addf %64, %65 : vector<8x1024xf32>
    %cst_20 = arith.constant 0.000000e+00 : f32
    %67 = vector.broadcast %cst_20 : f32 to vector<8x1024xf32>
    %68 = arith.maximumf %66, %67 : vector<8x1024xf32>
    %cst_21 = arith.constant dense<0.000000e+00> : vector<16x1024xf32>
    %69 = tpu.matmul %6, %68, %cst_21 {dimension_numbers = #tpu.dot_dimension_numbers<[1], [0], [0], [1], [0, 0, 1, 1], [], []>} : vector<16x8xf32>, vector<8x1024xf32>, vector<16x1024xf32> -> vector<16x1024xf32>
    %70 = arith.addf %69, %3 : vector<16x1024xf32>
    %c0_22 = arith.constant 0 : index
    %c128 = arith.constant 128 : index
    %71 = vector.load %arg2[%c0_22, %c128] : memref<16x896xf32, #tpu.memory_space<vmem>>, vector<8x16xf32>
    %c0_23 = arith.constant 0 : index
    %c144 = arith.constant 144 : index
    %72 = vector.load %arg2[%c0_23, %c144] : memref<16x896xf32, #tpu.memory_space<vmem>>, vector<8x72xf32>
    %c0_24 = arith.constant 0 : index
    %c216 = arith.constant 216 : index
    %73 = vector.load %arg2[%c0_24, %c216] : memref<16x896xf32, #tpu.memory_space<vmem>>, vector<16x8xf32>
    %c0_25 = arith.constant 0 : index
    %c224 = arith.constant 224 : index
    %74 = vector.load %arg2[%c0_25, %c224] : memref<16x896xf32, #tpu.memory_space<vmem>>, vector<16x1xf32>
    %c0_26 = arith.constant 0 : index
    %c225 = arith.constant 225 : index
    %75 = vector.load %arg2[%c0_26, %c225] : memref<16x896xf32, #tpu.memory_space<vmem>>, vector<16x1xf32>
    %c0_27 = arith.constant 0 : index
    %c226 = arith.constant 226 : index
    %76 = vector.load %arg2[%c0_27, %c226] : memref<16x896xf32, #tpu.memory_space<vmem>>, vector<8x1xf32>
    %c0_28 = arith.constant 0 : index
    %c227 = arith.constant 227 : index
    %77 = vector.load %arg2[%c0_28, %c227] : memref<16x896xf32, #tpu.memory_space<vmem>>, vector<8x1xf32>
    %c0_29 = arith.constant 0 : index
    %c228 = arith.constant 228 : index
    %78 = vector.load %arg2[%c0_29, %c228] : memref<16x896xf32, #tpu.memory_space<vmem>>, vector<8x1xf32>
    %c0_30 = arith.constant 0 : index
    %c229 = arith.constant 229 : index
    %79 = vector.load %arg2[%c0_30, %c229] : memref<16x896xf32, #tpu.memory_space<vmem>>, vector<8x1xf32>
    %80 = vector.broadcast %74 : vector<16x1xf32> to vector<16x1024xf32>
    %81 = arith.mulf %70, %80 : vector<16x1024xf32>
    %82 = vector.broadcast %75 : vector<16x1xf32> to vector<16x1024xf32>
    %83 = arith.addf %81, %82 : vector<16x1024xf32>
    %cst_31 = arith.constant 0.000000e+00 : f32
    %84 = vector.broadcast %cst_31 : f32 to vector<16x1024xf32>
    %85 = arith.maximumf %83, %84 : vector<16x1024xf32>
    %cst_32 = arith.constant dense<0.000000e+00> : vector<8x1024xf32>
    %86 = tpu.matmul %71, %85, %cst_32 {dimension_numbers = #tpu.dot_dimension_numbers<[1], [0], [0], [1], [0, 0, 1, 1], [], []>} : vector<8x16xf32>, vector<16x1024xf32>, vector<8x1024xf32> -> vector<8x1024xf32>
    %87 = vector.broadcast %76 : vector<8x1xf32> to vector<8x1024xf32>
    %88 = arith.mulf %86, %87 : vector<8x1024xf32>
    %89 = vector.broadcast %77 : vector<8x1xf32> to vector<8x1024xf32>
    %90 = arith.addf %88, %89 : vector<8x1024xf32>
    %cst_33 = arith.constant 0.000000e+00 : f32
    %91 = vector.broadcast %cst_33 : f32 to vector<8x1024xf32>
    %92 = arith.maximumf %90, %91 : vector<8x1024xf32>
    %c17_i32_34 = arith.constant 17 : i32
    %93 = tpu.dynamic_rotate %92 by %c17_i32_34 dim 1 : vector<8x1024xf32>, i32 -> vector<8x1024xf32>
    %94 = vector.extract_strided_slice %0 {offsets = [0, 0], sizes = [1, 1024], strides = [1, 1]} : vector<9x1024xf32> to vector<1x1024xf32>
    %95 = vector.broadcast %94 : vector<1x1024xf32> to vector<8x1024xf32>
    %96 = arith.mulf %93, %95 : vector<8x1024xf32>
    %c16_i32_35 = arith.constant 16 : i32
    %97 = tpu.dynamic_rotate %92 by %c16_i32_35 dim 1 : vector<8x1024xf32>, i32 -> vector<8x1024xf32>
    %98 = vector.extract_strided_slice %0 {offsets = [1, 0], sizes = [1, 1024], strides = [1, 1]} : vector<9x1024xf32> to vector<1x1024xf32>
    %99 = vector.broadcast %98 : vector<1x1024xf32> to vector<8x1024xf32>
    %100 = arith.mulf %97, %99 : vector<8x1024xf32>
    %c15_i32_36 = arith.constant 15 : i32
    %101 = tpu.dynamic_rotate %92 by %c15_i32_36 dim 1 : vector<8x1024xf32>, i32 -> vector<8x1024xf32>
    %102 = vector.extract_strided_slice %0 {offsets = [2, 0], sizes = [1, 1024], strides = [1, 1]} : vector<9x1024xf32> to vector<1x1024xf32>
    %103 = vector.broadcast %102 : vector<1x1024xf32> to vector<8x1024xf32>
    %104 = arith.mulf %101, %103 : vector<8x1024xf32>
    %c1_i32_37 = arith.constant 1 : i32
    %105 = tpu.dynamic_rotate %92 by %c1_i32_37 dim 1 : vector<8x1024xf32>, i32 -> vector<8x1024xf32>
    %106 = vector.extract_strided_slice %0 {offsets = [3, 0], sizes = [1, 1024], strides = [1, 1]} : vector<9x1024xf32> to vector<1x1024xf32>
    %107 = vector.broadcast %106 : vector<1x1024xf32> to vector<8x1024xf32>
    %108 = arith.mulf %105, %107 : vector<8x1024xf32>
    %109 = vector.extract_strided_slice %0 {offsets = [4, 0], sizes = [1, 1024], strides = [1, 1]} : vector<9x1024xf32> to vector<1x1024xf32>
    %110 = vector.broadcast %109 : vector<1x1024xf32> to vector<8x1024xf32>
    %111 = arith.mulf %92, %110 : vector<8x1024xf32>
    %c1023_i32_38 = arith.constant 1023 : i32
    %112 = tpu.dynamic_rotate %92 by %c1023_i32_38 dim 1 : vector<8x1024xf32>, i32 -> vector<8x1024xf32>
    %113 = vector.extract_strided_slice %0 {offsets = [5, 0], sizes = [1, 1024], strides = [1, 1]} : vector<9x1024xf32> to vector<1x1024xf32>
    %114 = vector.broadcast %113 : vector<1x1024xf32> to vector<8x1024xf32>
    %115 = arith.mulf %112, %114 : vector<8x1024xf32>
    %c1009_i32_39 = arith.constant 1009 : i32
    %116 = tpu.dynamic_rotate %92 by %c1009_i32_39 dim 1 : vector<8x1024xf32>, i32 -> vector<8x1024xf32>
    %117 = vector.extract_strided_slice %0 {offsets = [6, 0], sizes = [1, 1024], strides = [1, 1]} : vector<9x1024xf32> to vector<1x1024xf32>
    %118 = vector.broadcast %117 : vector<1x1024xf32> to vector<8x1024xf32>
    %119 = arith.mulf %116, %118 : vector<8x1024xf32>
    %c1008_i32_40 = arith.constant 1008 : i32
    %120 = tpu.dynamic_rotate %92 by %c1008_i32_40 dim 1 : vector<8x1024xf32>, i32 -> vector<8x1024xf32>
    %121 = vector.extract_strided_slice %0 {offsets = [7, 0], sizes = [1, 1024], strides = [1, 1]} : vector<9x1024xf32> to vector<1x1024xf32>
    %122 = vector.broadcast %121 : vector<1x1024xf32> to vector<8x1024xf32>
    %123 = arith.mulf %120, %122 : vector<8x1024xf32>
    %c1007_i32_41 = arith.constant 1007 : i32
    %124 = tpu.dynamic_rotate %92 by %c1007_i32_41 dim 1 : vector<8x1024xf32>, i32 -> vector<8x1024xf32>
    %125 = vector.extract_strided_slice %0 {offsets = [8, 0], sizes = [1, 1024], strides = [1, 1]} : vector<9x1024xf32> to vector<1x1024xf32>
    %126 = vector.broadcast %125 : vector<1x1024xf32> to vector<8x1024xf32>
    %127 = arith.mulf %124, %126 : vector<8x1024xf32>
    %128 = tpu.concatenate %96, %100, %104, %108, %111, %115, %119, %123, %127 in 0 : vector<8x1024xf32>, vector<8x1024xf32>, vector<8x1024xf32>, vector<8x1024xf32>, vector<8x1024xf32>, vector<8x1024xf32>, vector<8x1024xf32>, vector<8x1024xf32>, vector<8x1024xf32> -> vector<72x1024xf32>
    %cst_42 = arith.constant dense<0.000000e+00> : vector<8x1024xf32>
    %129 = tpu.matmul %72, %128, %cst_42 {dimension_numbers = #tpu.dot_dimension_numbers<[1], [0], [0], [1], [0, 0, 1, 1], [], []>} : vector<8x72xf32>, vector<72x1024xf32>, vector<8x1024xf32> -> vector<8x1024xf32>
    %130 = vector.broadcast %78 : vector<8x1xf32> to vector<8x1024xf32>
    %131 = arith.mulf %129, %130 : vector<8x1024xf32>
    %132 = vector.broadcast %79 : vector<8x1xf32> to vector<8x1024xf32>
    %133 = arith.addf %131, %132 : vector<8x1024xf32>
    %cst_43 = arith.constant 0.000000e+00 : f32
    %134 = vector.broadcast %cst_43 : f32 to vector<8x1024xf32>
    %135 = arith.maximumf %133, %134 : vector<8x1024xf32>
    %cst_44 = arith.constant dense<0.000000e+00> : vector<16x1024xf32>
    %136 = tpu.matmul %73, %135, %cst_44 {dimension_numbers = #tpu.dot_dimension_numbers<[1], [0], [0], [1], [0, 0, 1, 1], [], []>} : vector<16x8xf32>, vector<8x1024xf32>, vector<16x1024xf32> -> vector<16x1024xf32>
    %137 = arith.addf %136, %70 : vector<16x1024xf32>
    %c0_45 = arith.constant 0 : index
    %c256 = arith.constant 256 : index
    %138 = vector.load %arg2[%c0_45, %c256] : memref<16x896xf32, #tpu.memory_space<vmem>>, vector<8x16xf32>
    %c0_46 = arith.constant 0 : index
    %c272 = arith.constant 272 : index
    %139 = vector.load %arg2[%c0_46, %c272] : memref<16x896xf32, #tpu.memory_space<vmem>>, vector<8x72xf32>
    %c0_47 = arith.constant 0 : index
    %c344 = arith.constant 344 : index
    %140 = vector.load %arg2[%c0_47, %c344] : memref<16x896xf32, #tpu.memory_space<vmem>>, vector<16x8xf32>
    %c0_48 = arith.constant 0 : index
    %c352 = arith.constant 352 : index
    %141 = vector.load %arg2[%c0_48, %c352] : memref<16x896xf32, #tpu.memory_space<vmem>>, vector<16x1xf32>
    %c0_49 = arith.constant 0 : index
    %c353 = arith.constant 353 : index
    %142 = vector.load %arg2[%c0_49, %c353] : memref<16x896xf32, #tpu.memory_space<vmem>>, vector<16x1xf32>
    %c0_50 = arith.constant 0 : index
    %c354 = arith.constant 354 : index
    %143 = vector.load %arg2[%c0_50, %c354] : memref<16x896xf32, #tpu.memory_space<vmem>>, vector<8x1xf32>
    %c0_51 = arith.constant 0 : index
    %c355 = arith.constant 355 : index
    %144 = vector.load %arg2[%c0_51, %c355] : memref<16x896xf32, #tpu.memory_space<vmem>>, vector<8x1xf32>
    %c0_52 = arith.constant 0 : index
    %c356 = arith.constant 356 : index
    %145 = vector.load %arg2[%c0_52, %c356] : memref<16x896xf32, #tpu.memory_space<vmem>>, vector<8x1xf32>
    %c0_53 = arith.constant 0 : index
    %c357 = arith.constant 357 : index
    %146 = vector.load %arg2[%c0_53, %c357] : memref<16x896xf32, #tpu.memory_space<vmem>>, vector<8x1xf32>
    %147 = vector.broadcast %141 : vector<16x1xf32> to vector<16x1024xf32>
    %148 = arith.mulf %137, %147 : vector<16x1024xf32>
    %149 = vector.broadcast %142 : vector<16x1xf32> to vector<16x1024xf32>
    %150 = arith.addf %148, %149 : vector<16x1024xf32>
    %cst_54 = arith.constant 0.000000e+00 : f32
    %151 = vector.broadcast %cst_54 : f32 to vector<16x1024xf32>
    %152 = arith.maximumf %150, %151 : vector<16x1024xf32>
    %cst_55 = arith.constant dense<0.000000e+00> : vector<8x1024xf32>
    %153 = tpu.matmul %138, %152, %cst_55 {dimension_numbers = #tpu.dot_dimension_numbers<[1], [0], [0], [1], [0, 0, 1, 1], [], []>} : vector<8x16xf32>, vector<16x1024xf32>, vector<8x1024xf32> -> vector<8x1024xf32>
    %154 = vector.broadcast %143 : vector<8x1xf32> to vector<8x1024xf32>
    %155 = arith.mulf %153, %154 : vector<8x1024xf32>
    %156 = vector.broadcast %144 : vector<8x1xf32> to vector<8x1024xf32>
    %157 = arith.addf %155, %156 : vector<8x1024xf32>
    %cst_56 = arith.constant 0.000000e+00 : f32
    %158 = vector.broadcast %cst_56 : f32 to vector<8x1024xf32>
    %159 = arith.maximumf %157, %158 : vector<8x1024xf32>
    %c17_i32_57 = arith.constant 17 : i32
    %160 = tpu.dynamic_rotate %159 by %c17_i32_57 dim 1 : vector<8x1024xf32>, i32 -> vector<8x1024xf32>
    %161 = vector.extract_strided_slice %0 {offsets = [0, 0], sizes = [1, 1024], strides = [1, 1]} : vector<9x1024xf32> to vector<1x1024xf32>
    %162 = vector.broadcast %161 : vector<1x1024xf32> to vector<8x1024xf32>
    %163 = arith.mulf %160, %162 : vector<8x1024xf32>
    %c16_i32_58 = arith.constant 16 : i32
    %164 = tpu.dynamic_rotate %159 by %c16_i32_58 dim 1 : vector<8x1024xf32>, i32 -> vector<8x1024xf32>
    %165 = vector.extract_strided_slice %0 {offsets = [1, 0], sizes = [1, 1024], strides = [1, 1]} : vector<9x1024xf32> to vector<1x1024xf32>
    %166 = vector.broadcast %165 : vector<1x1024xf32> to vector<8x1024xf32>
    %167 = arith.mulf %164, %166 : vector<8x1024xf32>
    %c15_i32_59 = arith.constant 15 : i32
    %168 = tpu.dynamic_rotate %159 by %c15_i32_59 dim 1 : vector<8x1024xf32>, i32 -> vector<8x1024xf32>
    %169 = vector.extract_strided_slice %0 {offsets = [2, 0], sizes = [1, 1024], strides = [1, 1]} : vector<9x1024xf32> to vector<1x1024xf32>
    %170 = vector.broadcast %169 : vector<1x1024xf32> to vector<8x1024xf32>
    %171 = arith.mulf %168, %170 : vector<8x1024xf32>
    %c1_i32_60 = arith.constant 1 : i32
    %172 = tpu.dynamic_rotate %159 by %c1_i32_60 dim 1 : vector<8x1024xf32>, i32 -> vector<8x1024xf32>
    %173 = vector.extract_strided_slice %0 {offsets = [3, 0], sizes = [1, 1024], strides = [1, 1]} : vector<9x1024xf32> to vector<1x1024xf32>
    %174 = vector.broadcast %173 : vector<1x1024xf32> to vector<8x1024xf32>
    %175 = arith.mulf %172, %174 : vector<8x1024xf32>
    %176 = vector.extract_strided_slice %0 {offsets = [4, 0], sizes = [1, 1024], strides = [1, 1]} : vector<9x1024xf32> to vector<1x1024xf32>
    %177 = vector.broadcast %176 : vector<1x1024xf32> to vector<8x1024xf32>
    %178 = arith.mulf %159, %177 : vector<8x1024xf32>
    %c1023_i32_61 = arith.constant 1023 : i32
    %179 = tpu.dynamic_rotate %159 by %c1023_i32_61 dim 1 : vector<8x1024xf32>, i32 -> vector<8x1024xf32>
    %180 = vector.extract_strided_slice %0 {offsets = [5, 0], sizes = [1, 1024], strides = [1, 1]} : vector<9x1024xf32> to vector<1x1024xf32>
    %181 = vector.broadcast %180 : vector<1x1024xf32> to vector<8x1024xf32>
    %182 = arith.mulf %179, %181 : vector<8x1024xf32>
    %c1009_i32_62 = arith.constant 1009 : i32
    %183 = tpu.dynamic_rotate %159 by %c1009_i32_62 dim 1 : vector<8x1024xf32>, i32 -> vector<8x1024xf32>
    %184 = vector.extract_strided_slice %0 {offsets = [6, 0], sizes = [1, 1024], strides = [1, 1]} : vector<9x1024xf32> to vector<1x1024xf32>
    %185 = vector.broadcast %184 : vector<1x1024xf32> to vector<8x1024xf32>
    %186 = arith.mulf %183, %185 : vector<8x1024xf32>
    %c1008_i32_63 = arith.constant 1008 : i32
    %187 = tpu.dynamic_rotate %159 by %c1008_i32_63 dim 1 : vector<8x1024xf32>, i32 -> vector<8x1024xf32>
    %188 = vector.extract_strided_slice %0 {offsets = [7, 0], sizes = [1, 1024], strides = [1, 1]} : vector<9x1024xf32> to vector<1x1024xf32>
    %189 = vector.broadcast %188 : vector<1x1024xf32> to vector<8x1024xf32>
    %190 = arith.mulf %187, %189 : vector<8x1024xf32>
    %c1007_i32_64 = arith.constant 1007 : i32
    %191 = tpu.dynamic_rotate %159 by %c1007_i32_64 dim 1 : vector<8x1024xf32>, i32 -> vector<8x1024xf32>
    %192 = vector.extract_strided_slice %0 {offsets = [8, 0], sizes = [1, 1024], strides = [1, 1]} : vector<9x1024xf32> to vector<1x1024xf32>
    %193 = vector.broadcast %192 : vector<1x1024xf32> to vector<8x1024xf32>
    %194 = arith.mulf %191, %193 : vector<8x1024xf32>
    %195 = tpu.concatenate %163, %167, %171, %175, %178, %182, %186, %190, %194 in 0 : vector<8x1024xf32>, vector<8x1024xf32>, vector<8x1024xf32>, vector<8x1024xf32>, vector<8x1024xf32>, vector<8x1024xf32>, vector<8x1024xf32>, vector<8x1024xf32>, vector<8x1024xf32> -> vector<72x1024xf32>
    %cst_65 = arith.constant dense<0.000000e+00> : vector<8x1024xf32>
    %196 = tpu.matmul %139, %195, %cst_65 {dimension_numbers = #tpu.dot_dimension_numbers<[1], [0], [0], [1], [0, 0, 1, 1], [], []>} : vector<8x72xf32>, vector<72x1024xf32>, vector<8x1024xf32> -> vector<8x1024xf32>
    %197 = vector.broadcast %145 : vector<8x1xf32> to vector<8x1024xf32>
    %198 = arith.mulf %196, %197 : vector<8x1024xf32>
    %199 = vector.broadcast %146 : vector<8x1xf32> to vector<8x1024xf32>
    %200 = arith.addf %198, %199 : vector<8x1024xf32>
    %cst_66 = arith.constant 0.000000e+00 : f32
    %201 = vector.broadcast %cst_66 : f32 to vector<8x1024xf32>
    %202 = arith.maximumf %200, %201 : vector<8x1024xf32>
    %cst_67 = arith.constant dense<0.000000e+00> : vector<16x1024xf32>
    %203 = tpu.matmul %140, %202, %cst_67 {dimension_numbers = #tpu.dot_dimension_numbers<[1], [0], [0], [1], [0, 0, 1, 1], [], []>} : vector<16x8xf32>, vector<8x1024xf32>, vector<16x1024xf32> -> vector<16x1024xf32>
    %204 = arith.addf %203, %137 : vector<16x1024xf32>
    %c0_68 = arith.constant 0 : index
    %c0_69 = arith.constant 0 : index
    %205 = vector.load %arg5[%c0_68, %c0_69] : memref<1024x256xf32, #tpu.memory_space<vmem>>, vector<1024x256xf32>
    %c17_i32_70 = arith.constant 17 : i32
    %206 = tpu.dynamic_rotate %70 by %c17_i32_70 dim 1 : vector<16x1024xf32>, i32 -> vector<16x1024xf32>
    %207 = vector.extract_strided_slice %1 {offsets = [0, 0], sizes = [1, 1024], strides = [1, 1]} : vector<9x1024xf32> to vector<1x1024xf32>
    %208 = vector.broadcast %207 : vector<1x1024xf32> to vector<16x1024xf32>
    %209 = arith.addf %206, %208 : vector<16x1024xf32>
    %c16_i32_71 = arith.constant 16 : i32
    %210 = tpu.dynamic_rotate %70 by %c16_i32_71 dim 1 : vector<16x1024xf32>, i32 -> vector<16x1024xf32>
    %211 = vector.extract_strided_slice %1 {offsets = [1, 0], sizes = [1, 1024], strides = [1, 1]} : vector<9x1024xf32> to vector<1x1024xf32>
    %212 = vector.broadcast %211 : vector<1x1024xf32> to vector<16x1024xf32>
    %213 = arith.addf %210, %212 : vector<16x1024xf32>
    %214 = arith.maximumf %209, %213 : vector<16x1024xf32>
    %c15_i32_72 = arith.constant 15 : i32
    %215 = tpu.dynamic_rotate %70 by %c15_i32_72 dim 1 : vector<16x1024xf32>, i32 -> vector<16x1024xf32>
    %216 = vector.extract_strided_slice %1 {offsets = [2, 0], sizes = [1, 1024], strides = [1, 1]} : vector<9x1024xf32> to vector<1x1024xf32>
    %217 = vector.broadcast %216 : vector<1x1024xf32> to vector<16x1024xf32>
    %218 = arith.addf %215, %217 : vector<16x1024xf32>
    %219 = arith.maximumf %214, %218 : vector<16x1024xf32>
    %c1_i32_73 = arith.constant 1 : i32
    %220 = tpu.dynamic_rotate %70 by %c1_i32_73 dim 1 : vector<16x1024xf32>, i32 -> vector<16x1024xf32>
    %221 = vector.extract_strided_slice %1 {offsets = [3, 0], sizes = [1, 1024], strides = [1, 1]} : vector<9x1024xf32> to vector<1x1024xf32>
    %222 = vector.broadcast %221 : vector<1x1024xf32> to vector<16x1024xf32>
    %223 = arith.addf %220, %222 : vector<16x1024xf32>
    %224 = arith.maximumf %219, %223 : vector<16x1024xf32>
    %225 = vector.extract_strided_slice %1 {offsets = [4, 0], sizes = [1, 1024], strides = [1, 1]} : vector<9x1024xf32> to vector<1x1024xf32>
    %226 = vector.broadcast %225 : vector<1x1024xf32> to vector<16x1024xf32>
    %227 = arith.addf %70, %226 : vector<16x1024xf32>
    %228 = arith.maximumf %224, %227 : vector<16x1024xf32>
    %c1023_i32_74 = arith.constant 1023 : i32
    %229 = tpu.dynamic_rotate %70 by %c1023_i32_74 dim 1 : vector<16x1024xf32>, i32 -> vector<16x1024xf32>
    %230 = vector.extract_strided_slice %1 {offsets = [5, 0], sizes = [1, 1024], strides = [1, 1]} : vector<9x1024xf32> to vector<1x1024xf32>
    %231 = vector.broadcast %230 : vector<1x1024xf32> to vector<16x1024xf32>
    %232 = arith.addf %229, %231 : vector<16x1024xf32>
    %233 = arith.maximumf %228, %232 : vector<16x1024xf32>
    %c1009_i32_75 = arith.constant 1009 : i32
    %234 = tpu.dynamic_rotate %70 by %c1009_i32_75 dim 1 : vector<16x1024xf32>, i32 -> vector<16x1024xf32>
    %235 = vector.extract_strided_slice %1 {offsets = [6, 0], sizes = [1, 1024], strides = [1, 1]} : vector<9x1024xf32> to vector<1x1024xf32>
    %236 = vector.broadcast %235 : vector<1x1024xf32> to vector<16x1024xf32>
    %237 = arith.addf %234, %236 : vector<16x1024xf32>
    %238 = arith.maximumf %233, %237 : vector<16x1024xf32>
    %c1008_i32_76 = arith.constant 1008 : i32
    %239 = tpu.dynamic_rotate %70 by %c1008_i32_76 dim 1 : vector<16x1024xf32>, i32 -> vector<16x1024xf32>
    %240 = vector.extract_strided_slice %1 {offsets = [7, 0], sizes = [1, 1024], strides = [1, 1]} : vector<9x1024xf32> to vector<1x1024xf32>
    %241 = vector.broadcast %240 : vector<1x1024xf32> to vector<16x1024xf32>
    %242 = arith.addf %239, %241 : vector<16x1024xf32>
    %243 = arith.maximumf %238, %242 : vector<16x1024xf32>
    %c1007_i32_77 = arith.constant 1007 : i32
    %244 = tpu.dynamic_rotate %70 by %c1007_i32_77 dim 1 : vector<16x1024xf32>, i32 -> vector<16x1024xf32>
    %245 = vector.extract_strided_slice %1 {offsets = [8, 0], sizes = [1, 1024], strides = [1, 1]} : vector<9x1024xf32> to vector<1x1024xf32>
    %246 = vector.broadcast %245 : vector<1x1024xf32> to vector<16x1024xf32>
    %247 = arith.addf %244, %246 : vector<16x1024xf32>
    %248 = arith.maximumf %243, %247 : vector<16x1024xf32>
    %cst_78 = arith.constant dense<0.000000e+00> : vector<16x256xf32>
    %249 = tpu.matmul %248, %205, %cst_78 {dimension_numbers = #tpu.dot_dimension_numbers<[1], [0], [0], [1], [0, 0, 1, 1], [], []>} : vector<16x1024xf32>, vector<1024x256xf32>, vector<16x256xf32> -> vector<16x256xf32>
    %c0_79 = arith.constant 0 : index
    %c384 = arith.constant 384 : index
    %250 = vector.load %arg2[%c0_79, %c384] : memref<16x896xf32, #tpu.memory_space<vmem>>, vector<8x16xf32>
    %c0_80 = arith.constant 0 : index
    %c400 = arith.constant 400 : index
    %251 = vector.load %arg2[%c0_80, %c400] : memref<16x896xf32, #tpu.memory_space<vmem>>, vector<8x72xf32>
    %c0_81 = arith.constant 0 : index
    %c472 = arith.constant 472 : index
    %252 = vector.load %arg2[%c0_81, %c472] : memref<16x896xf32, #tpu.memory_space<vmem>>, vector<16x8xf32>
    %c0_82 = arith.constant 0 : index
    %c480 = arith.constant 480 : index
    %253 = vector.load %arg2[%c0_82, %c480] : memref<16x896xf32, #tpu.memory_space<vmem>>, vector<16x1xf32>
    %c0_83 = arith.constant 0 : index
    %c481 = arith.constant 481 : index
    %254 = vector.load %arg2[%c0_83, %c481] : memref<16x896xf32, #tpu.memory_space<vmem>>, vector<16x1xf32>
    %c0_84 = arith.constant 0 : index
    %c482 = arith.constant 482 : index
    %255 = vector.load %arg2[%c0_84, %c482] : memref<16x896xf32, #tpu.memory_space<vmem>>, vector<8x1xf32>
    %c0_85 = arith.constant 0 : index
    %c483 = arith.constant 483 : index
    %256 = vector.load %arg2[%c0_85, %c483] : memref<16x896xf32, #tpu.memory_space<vmem>>, vector<8x1xf32>
    %c0_86 = arith.constant 0 : index
    %c484 = arith.constant 484 : index
    %257 = vector.load %arg2[%c0_86, %c484] : memref<16x896xf32, #tpu.memory_space<vmem>>, vector<8x1xf32>
    %c0_87 = arith.constant 0 : index
    %c485 = arith.constant 485 : index
    %258 = vector.load %arg2[%c0_87, %c485] : memref<16x896xf32, #tpu.memory_space<vmem>>, vector<8x1xf32>
    %259 = vector.broadcast %253 : vector<16x1xf32> to vector<16x256xf32>
    %260 = arith.mulf %249, %259 : vector<16x256xf32>
    %261 = vector.broadcast %254 : vector<16x1xf32> to vector<16x256xf32>
    %262 = arith.addf %260, %261 : vector<16x256xf32>
    %cst_88 = arith.constant 0.000000e+00 : f32
    %263 = vector.broadcast %cst_88 : f32 to vector<16x256xf32>
    %264 = arith.maximumf %262, %263 : vector<16x256xf32>
    %cst_89 = arith.constant dense<0.000000e+00> : vector<8x256xf32>
    %265 = tpu.matmul %250, %264, %cst_89 {dimension_numbers = #tpu.dot_dimension_numbers<[1], [0], [0], [1], [0, 0, 1, 1], [], []>} : vector<8x16xf32>, vector<16x256xf32>, vector<8x256xf32> -> vector<8x256xf32>
    %266 = vector.broadcast %255 : vector<8x1xf32> to vector<8x256xf32>
    %267 = arith.mulf %265, %266 : vector<8x256xf32>
    %268 = vector.broadcast %256 : vector<8x1xf32> to vector<8x256xf32>
    %269 = arith.addf %267, %268 : vector<8x256xf32>
    %cst_90 = arith.constant 0.000000e+00 : f32
    %270 = vector.broadcast %cst_90 : f32 to vector<8x256xf32>
    %271 = arith.maximumf %269, %270 : vector<8x256xf32>
    %c9_i32 = arith.constant 9 : i32
    %272 = tpu.dynamic_rotate %271 by %c9_i32 dim 1 : vector<8x256xf32>, i32 -> vector<8x256xf32>
    %273 = vector.extract_strided_slice %2 {offsets = [0, 0], sizes = [1, 256], strides = [1, 1]} : vector<9x256xf32> to vector<1x256xf32>
    %274 = vector.broadcast %273 : vector<1x256xf32> to vector<8x256xf32>
    %275 = arith.mulf %272, %274 : vector<8x256xf32>
    %c8_i32 = arith.constant 8 : i32
    %276 = tpu.dynamic_rotate %271 by %c8_i32 dim 1 : vector<8x256xf32>, i32 -> vector<8x256xf32>
    %277 = vector.extract_strided_slice %2 {offsets = [1, 0], sizes = [1, 256], strides = [1, 1]} : vector<9x256xf32> to vector<1x256xf32>
    %278 = vector.broadcast %277 : vector<1x256xf32> to vector<8x256xf32>
    %279 = arith.mulf %276, %278 : vector<8x256xf32>
    %c7_i32 = arith.constant 7 : i32
    %280 = tpu.dynamic_rotate %271 by %c7_i32 dim 1 : vector<8x256xf32>, i32 -> vector<8x256xf32>
    %281 = vector.extract_strided_slice %2 {offsets = [2, 0], sizes = [1, 256], strides = [1, 1]} : vector<9x256xf32> to vector<1x256xf32>
    %282 = vector.broadcast %281 : vector<1x256xf32> to vector<8x256xf32>
    %283 = arith.mulf %280, %282 : vector<8x256xf32>
    %c1_i32_91 = arith.constant 1 : i32
    %284 = tpu.dynamic_rotate %271 by %c1_i32_91 dim 1 : vector<8x256xf32>, i32 -> vector<8x256xf32>
    %285 = vector.extract_strided_slice %2 {offsets = [3, 0], sizes = [1, 256], strides = [1, 1]} : vector<9x256xf32> to vector<1x256xf32>
    %286 = vector.broadcast %285 : vector<1x256xf32> to vector<8x256xf32>
    %287 = arith.mulf %284, %286 : vector<8x256xf32>
    %288 = vector.extract_strided_slice %2 {offsets = [4, 0], sizes = [1, 256], strides = [1, 1]} : vector<9x256xf32> to vector<1x256xf32>
    %289 = vector.broadcast %288 : vector<1x256xf32> to vector<8x256xf32>
    %290 = arith.mulf %271, %289 : vector<8x256xf32>
    %c255_i32 = arith.constant 255 : i32
    %291 = tpu.dynamic_rotate %271 by %c255_i32 dim 1 : vector<8x256xf32>, i32 -> vector<8x256xf32>
    %292 = vector.extract_strided_slice %2 {offsets = [5, 0], sizes = [1, 256], strides = [1, 1]} : vector<9x256xf32> to vector<1x256xf32>
    %293 = vector.broadcast %292 : vector<1x256xf32> to vector<8x256xf32>
    %294 = arith.mulf %291, %293 : vector<8x256xf32>
    %c249_i32 = arith.constant 249 : i32
    %295 = tpu.dynamic_rotate %271 by %c249_i32 dim 1 : vector<8x256xf32>, i32 -> vector<8x256xf32>
    %296 = vector.extract_strided_slice %2 {offsets = [6, 0], sizes = [1, 256], strides = [1, 1]} : vector<9x256xf32> to vector<1x256xf32>
    %297 = vector.broadcast %296 : vector<1x256xf32> to vector<8x256xf32>
    %298 = arith.mulf %295, %297 : vector<8x256xf32>
    %c248_i32 = arith.constant 248 : i32
    %299 = tpu.dynamic_rotate %271 by %c248_i32 dim 1 : vector<8x256xf32>, i32 -> vector<8x256xf32>
    %300 = vector.extract_strided_slice %2 {offsets = [7, 0], sizes = [1, 256], strides = [1, 1]} : vector<9x256xf32> to vector<1x256xf32>
    %301 = vector.broadcast %300 : vector<1x256xf32> to vector<8x256xf32>
    %302 = arith.mulf %299, %301 : vector<8x256xf32>
    %c247_i32 = arith.constant 247 : i32
    %303 = tpu.dynamic_rotate %271 by %c247_i32 dim 1 : vector<8x256xf32>, i32 -> vector<8x256xf32>
    %304 = vector.extract_strided_slice %2 {offsets = [8, 0], sizes = [1, 256], strides = [1, 1]} : vector<9x256xf32> to vector<1x256xf32>
    %305 = vector.broadcast %304 : vector<1x256xf32> to vector<8x256xf32>
    %306 = arith.mulf %303, %305 : vector<8x256xf32>
    %307 = tpu.concatenate %275, %279, %283, %287, %290, %294, %298, %302, %306 in 0 : vector<8x256xf32>, vector<8x256xf32>, vector<8x256xf32>, vector<8x256xf32>, vector<8x256xf32>, vector<8x256xf32>, vector<8x256xf32>, vector<8x256xf32>, vector<8x256xf32> -> vector<72x256xf32>
    %cst_92 = arith.constant dense<0.000000e+00> : vector<8x256xf32>
    %308 = tpu.matmul %251, %307, %cst_92 {dimension_numbers = #tpu.dot_dimension_numbers<[1], [0], [0], [1], [0, 0, 1, 1], [], []>} : vector<8x72xf32>, vector<72x256xf32>, vector<8x256xf32> -> vector<8x256xf32>
    %309 = vector.broadcast %257 : vector<8x1xf32> to vector<8x256xf32>
    %310 = arith.mulf %308, %309 : vector<8x256xf32>
    %311 = vector.broadcast %258 : vector<8x1xf32> to vector<8x256xf32>
    %312 = arith.addf %310, %311 : vector<8x256xf32>
    %cst_93 = arith.constant 0.000000e+00 : f32
    %313 = vector.broadcast %cst_93 : f32 to vector<8x256xf32>
    %314 = arith.maximumf %312, %313 : vector<8x256xf32>
    %cst_94 = arith.constant dense<0.000000e+00> : vector<16x256xf32>
    %315 = tpu.matmul %252, %314, %cst_94 {dimension_numbers = #tpu.dot_dimension_numbers<[1], [0], [0], [1], [0, 0, 1, 1], [], []>} : vector<16x8xf32>, vector<8x256xf32>, vector<16x256xf32> -> vector<16x256xf32>
    %316 = arith.addf %315, %249 : vector<16x256xf32>
    %c0_95 = arith.constant 0 : index
    %c512 = arith.constant 512 : index
    %317 = vector.load %arg2[%c0_95, %c512] : memref<16x896xf32, #tpu.memory_space<vmem>>, vector<8x16xf32>
    %c0_96 = arith.constant 0 : index
    %c528 = arith.constant 528 : index
    %318 = vector.load %arg2[%c0_96, %c528] : memref<16x896xf32, #tpu.memory_space<vmem>>, vector<8x72xf32>
    %c0_97 = arith.constant 0 : index
    %c600 = arith.constant 600 : index
    %319 = vector.load %arg2[%c0_97, %c600] : memref<16x896xf32, #tpu.memory_space<vmem>>, vector<16x8xf32>
    %c0_98 = arith.constant 0 : index
    %c608 = arith.constant 608 : index
    %320 = vector.load %arg2[%c0_98, %c608] : memref<16x896xf32, #tpu.memory_space<vmem>>, vector<16x1xf32>
    %c0_99 = arith.constant 0 : index
    %c609 = arith.constant 609 : index
    %321 = vector.load %arg2[%c0_99, %c609] : memref<16x896xf32, #tpu.memory_space<vmem>>, vector<16x1xf32>
    %c0_100 = arith.constant 0 : index
    %c610 = arith.constant 610 : index
    %322 = vector.load %arg2[%c0_100, %c610] : memref<16x896xf32, #tpu.memory_space<vmem>>, vector<8x1xf32>
    %c0_101 = arith.constant 0 : index
    %c611 = arith.constant 611 : index
    %323 = vector.load %arg2[%c0_101, %c611] : memref<16x896xf32, #tpu.memory_space<vmem>>, vector<8x1xf32>
    %c0_102 = arith.constant 0 : index
    %c612 = arith.constant 612 : index
    %324 = vector.load %arg2[%c0_102, %c612] : memref<16x896xf32, #tpu.memory_space<vmem>>, vector<8x1xf32>
    %c0_103 = arith.constant 0 : index
    %c613 = arith.constant 613 : index
    %325 = vector.load %arg2[%c0_103, %c613] : memref<16x896xf32, #tpu.memory_space<vmem>>, vector<8x1xf32>
    %326 = vector.broadcast %320 : vector<16x1xf32> to vector<16x256xf32>
    %327 = arith.mulf %316, %326 : vector<16x256xf32>
    %328 = vector.broadcast %321 : vector<16x1xf32> to vector<16x256xf32>
    %329 = arith.addf %327, %328 : vector<16x256xf32>
    %cst_104 = arith.constant 0.000000e+00 : f32
    %330 = vector.broadcast %cst_104 : f32 to vector<16x256xf32>
    %331 = arith.maximumf %329, %330 : vector<16x256xf32>
    %cst_105 = arith.constant dense<0.000000e+00> : vector<8x256xf32>
    %332 = tpu.matmul %317, %331, %cst_105 {dimension_numbers = #tpu.dot_dimension_numbers<[1], [0], [0], [1], [0, 0, 1, 1], [], []>} : vector<8x16xf32>, vector<16x256xf32>, vector<8x256xf32> -> vector<8x256xf32>
    %333 = vector.broadcast %322 : vector<8x1xf32> to vector<8x256xf32>
    %334 = arith.mulf %332, %333 : vector<8x256xf32>
    %335 = vector.broadcast %323 : vector<8x1xf32> to vector<8x256xf32>
    %336 = arith.addf %334, %335 : vector<8x256xf32>
    %cst_106 = arith.constant 0.000000e+00 : f32
    %337 = vector.broadcast %cst_106 : f32 to vector<8x256xf32>
    %338 = arith.maximumf %336, %337 : vector<8x256xf32>
    %c9_i32_107 = arith.constant 9 : i32
    %339 = tpu.dynamic_rotate %338 by %c9_i32_107 dim 1 : vector<8x256xf32>, i32 -> vector<8x256xf32>
    %340 = vector.extract_strided_slice %2 {offsets = [0, 0], sizes = [1, 256], strides = [1, 1]} : vector<9x256xf32> to vector<1x256xf32>
    %341 = vector.broadcast %340 : vector<1x256xf32> to vector<8x256xf32>
    %342 = arith.mulf %339, %341 : vector<8x256xf32>
    %c8_i32_108 = arith.constant 8 : i32
    %343 = tpu.dynamic_rotate %338 by %c8_i32_108 dim 1 : vector<8x256xf32>, i32 -> vector<8x256xf32>
    %344 = vector.extract_strided_slice %2 {offsets = [1, 0], sizes = [1, 256], strides = [1, 1]} : vector<9x256xf32> to vector<1x256xf32>
    %345 = vector.broadcast %344 : vector<1x256xf32> to vector<8x256xf32>
    %346 = arith.mulf %343, %345 : vector<8x256xf32>
    %c7_i32_109 = arith.constant 7 : i32
    %347 = tpu.dynamic_rotate %338 by %c7_i32_109 dim 1 : vector<8x256xf32>, i32 -> vector<8x256xf32>
    %348 = vector.extract_strided_slice %2 {offsets = [2, 0], sizes = [1, 256], strides = [1, 1]} : vector<9x256xf32> to vector<1x256xf32>
    %349 = vector.broadcast %348 : vector<1x256xf32> to vector<8x256xf32>
    %350 = arith.mulf %347, %349 : vector<8x256xf32>
    %c1_i32_110 = arith.constant 1 : i32
    %351 = tpu.dynamic_rotate %338 by %c1_i32_110 dim 1 : vector<8x256xf32>, i32 -> vector<8x256xf32>
    %352 = vector.extract_strided_slice %2 {offsets = [3, 0], sizes = [1, 256], strides = [1, 1]} : vector<9x256xf32> to vector<1x256xf32>
    %353 = vector.broadcast %352 : vector<1x256xf32> to vector<8x256xf32>
    %354 = arith.mulf %351, %353 : vector<8x256xf32>
    %355 = vector.extract_strided_slice %2 {offsets = [4, 0], sizes = [1, 256], strides = [1, 1]} : vector<9x256xf32> to vector<1x256xf32>
    %356 = vector.broadcast %355 : vector<1x256xf32> to vector<8x256xf32>
    %357 = arith.mulf %338, %356 : vector<8x256xf32>
    %c255_i32_111 = arith.constant 255 : i32
    %358 = tpu.dynamic_rotate %338 by %c255_i32_111 dim 1 : vector<8x256xf32>, i32 -> vector<8x256xf32>
    %359 = vector.extract_strided_slice %2 {offsets = [5, 0], sizes = [1, 256], strides = [1, 1]} : vector<9x256xf32> to vector<1x256xf32>
    %360 = vector.broadcast %359 : vector<1x256xf32> to vector<8x256xf32>
    %361 = arith.mulf %358, %360 : vector<8x256xf32>
    %c249_i32_112 = arith.constant 249 : i32
    %362 = tpu.dynamic_rotate %338 by %c249_i32_112 dim 1 : vector<8x256xf32>, i32 -> vector<8x256xf32>
    %363 = vector.extract_strided_slice %2 {offsets = [6, 0], sizes = [1, 256], strides = [1, 1]} : vector<9x256xf32> to vector<1x256xf32>
    %364 = vector.broadcast %363 : vector<1x256xf32> to vector<8x256xf32>
    %365 = arith.mulf %362, %364 : vector<8x256xf32>
    %c248_i32_113 = arith.constant 248 : i32
    %366 = tpu.dynamic_rotate %338 by %c248_i32_113 dim 1 : vector<8x256xf32>, i32 -> vector<8x256xf32>
    %367 = vector.extract_strided_slice %2 {offsets = [7, 0], sizes = [1, 256], strides = [1, 1]} : vector<9x256xf32> to vector<1x256xf32>
    %368 = vector.broadcast %367 : vector<1x256xf32> to vector<8x256xf32>
    %369 = arith.mulf %366, %368 : vector<8x256xf32>
    %c247_i32_114 = arith.constant 247 : i32
    %370 = tpu.dynamic_rotate %338 by %c247_i32_114 dim 1 : vector<8x256xf32>, i32 -> vector<8x256xf32>
    %371 = vector.extract_strided_slice %2 {offsets = [8, 0], sizes = [1, 256], strides = [1, 1]} : vector<9x256xf32> to vector<1x256xf32>
    %372 = vector.broadcast %371 : vector<1x256xf32> to vector<8x256xf32>
    %373 = arith.mulf %370, %372 : vector<8x256xf32>
    %374 = tpu.concatenate %342, %346, %350, %354, %357, %361, %365, %369, %373 in 0 : vector<8x256xf32>, vector<8x256xf32>, vector<8x256xf32>, vector<8x256xf32>, vector<8x256xf32>, vector<8x256xf32>, vector<8x256xf32>, vector<8x256xf32>, vector<8x256xf32> -> vector<72x256xf32>
    %cst_115 = arith.constant dense<0.000000e+00> : vector<8x256xf32>
    %375 = tpu.matmul %318, %374, %cst_115 {dimension_numbers = #tpu.dot_dimension_numbers<[1], [0], [0], [1], [0, 0, 1, 1], [], []>} : vector<8x72xf32>, vector<72x256xf32>, vector<8x256xf32> -> vector<8x256xf32>
    %376 = vector.broadcast %324 : vector<8x1xf32> to vector<8x256xf32>
    %377 = arith.mulf %375, %376 : vector<8x256xf32>
    %378 = vector.broadcast %325 : vector<8x1xf32> to vector<8x256xf32>
    %379 = arith.addf %377, %378 : vector<8x256xf32>
    %cst_116 = arith.constant 0.000000e+00 : f32
    %380 = vector.broadcast %cst_116 : f32 to vector<8x256xf32>
    %381 = arith.maximumf %379, %380 : vector<8x256xf32>
    %cst_117 = arith.constant dense<0.000000e+00> : vector<16x256xf32>
    %382 = tpu.matmul %319, %381, %cst_117 {dimension_numbers = #tpu.dot_dimension_numbers<[1], [0], [0], [1], [0, 0, 1, 1], [], []>} : vector<16x8xf32>, vector<8x256xf32>, vector<16x256xf32> -> vector<16x256xf32>
    %383 = arith.addf %382, %316 : vector<16x256xf32>
    %c0_118 = arith.constant 0 : index
    %c0_119 = arith.constant 0 : index
    %384 = vector.load %arg6[%c0_118, %c0_119] : memref<256x1024xf32, #tpu.memory_space<vmem>>, vector<256x1024xf32>
    %cst_120 = arith.constant dense<0.000000e+00> : vector<16x1024xf32>
    %385 = tpu.matmul %383, %384, %cst_120 {dimension_numbers = #tpu.dot_dimension_numbers<[1], [0], [0], [1], [0, 0, 1, 1], [], []>} : vector<16x256xf32>, vector<256x1024xf32>, vector<16x1024xf32> -> vector<16x1024xf32>
    %386 = arith.addf %385, %204 : vector<16x1024xf32>
    %c0_121 = arith.constant 0 : index
    %c768 = arith.constant 768 : index
    %387 = vector.load %arg2[%c0_121, %c768] : memref<16x896xf32, #tpu.memory_space<vmem>>, vector<16x16xf32>
    %c0_122 = arith.constant 0 : index
    %c784 = arith.constant 784 : index
    %388 = vector.load %arg2[%c0_122, %c784] : memref<16x896xf32, #tpu.memory_space<vmem>>, vector<16x16xf32>
    %c0_123 = arith.constant 0 : index
    %c800 = arith.constant 800 : index
    %389 = vector.load %arg2[%c0_123, %c800] : memref<16x896xf32, #tpu.memory_space<vmem>>, vector<16x1xf32>
    %c0_124 = arith.constant 0 : index
    %c801 = arith.constant 801 : index
    %390 = vector.load %arg2[%c0_124, %c801] : memref<16x896xf32, #tpu.memory_space<vmem>>, vector<16x1xf32>
    %c0_125 = arith.constant 0 : index
    %c802 = arith.constant 802 : index
    %391 = vector.load %arg2[%c0_125, %c802] : memref<16x896xf32, #tpu.memory_space<vmem>>, vector<16x1xf32>
    %c0_126 = arith.constant 0 : index
    %c803 = arith.constant 803 : index
    %392 = vector.load %arg2[%c0_126, %c803] : memref<16x896xf32, #tpu.memory_space<vmem>>, vector<16x1xf32>
    %393 = vector.broadcast %389 : vector<16x1xf32> to vector<16x1024xf32>
    %394 = arith.mulf %386, %393 : vector<16x1024xf32>
    %395 = vector.broadcast %390 : vector<16x1xf32> to vector<16x1024xf32>
    %396 = arith.addf %394, %395 : vector<16x1024xf32>
    %cst_127 = arith.constant 0.000000e+00 : f32
    %397 = vector.broadcast %cst_127 : f32 to vector<16x1024xf32>
    %398 = arith.maximumf %396, %397 : vector<16x1024xf32>
    %cst_128 = arith.constant dense<0.000000e+00> : vector<16x1024xf32>
    %399 = tpu.matmul %387, %398, %cst_128 {dimension_numbers = #tpu.dot_dimension_numbers<[1], [0], [0], [1], [0, 0, 1, 1], [], []>} : vector<16x16xf32>, vector<16x1024xf32>, vector<16x1024xf32> -> vector<16x1024xf32>
    %400 = vector.broadcast %391 : vector<16x1xf32> to vector<16x1024xf32>
    %401 = arith.mulf %399, %400 : vector<16x1024xf32>
    %402 = vector.broadcast %392 : vector<16x1xf32> to vector<16x1024xf32>
    %403 = arith.addf %401, %402 : vector<16x1024xf32>
    %cst_129 = arith.constant 0.000000e+00 : f32
    %404 = vector.broadcast %cst_129 : f32 to vector<16x1024xf32>
    %405 = arith.maximumf %403, %404 : vector<16x1024xf32>
    %cst_130 = arith.constant dense<0.000000e+00> : vector<16x1024xf32>
    %406 = tpu.matmul %388, %405, %cst_130 {dimension_numbers = #tpu.dot_dimension_numbers<[1], [0], [0], [1], [0, 0, 1, 1], [], []>} : vector<16x16xf32>, vector<16x1024xf32>, vector<16x1024xf32> -> vector<16x1024xf32>
    %cst_131 = arith.constant 0.000000e+00 : f32
    %407 = vector.broadcast %cst_131 : f32 to vector<16x1024xf32>
    %408 = arith.subf %407, %406 : vector<16x1024xf32>
    %409 = math.exp %408 : vector<16x1024xf32>
    %cst_132 = arith.constant 1.000000e+00 : f32
    %410 = vector.broadcast %cst_132 : f32 to vector<16x1024xf32>
    %411 = arith.addf %410, %409 : vector<16x1024xf32>
    %412 = tpu.reciprocal %411 {approx = true} : vector<16x1024xf32> -> vector<16x1024xf32>
    %cst_133 = arith.constant 1.000000e+00 : f32
    %413 = vector.broadcast %cst_133 : f32 to vector<16x1024xf32>
    %414 = arith.addf %413, %412 : vector<16x1024xf32>
    %415 = arith.mulf %414, %204 : vector<16x1024xf32>
    %c0_134 = arith.constant 0 : index
    %c640 = arith.constant 640 : index
    %416 = vector.load %arg2[%c0_134, %c640] : memref<16x896xf32, #tpu.memory_space<vmem>>, vector<8x16xf32>
    %c0_135 = arith.constant 0 : index
    %c656 = arith.constant 656 : index
    %417 = vector.load %arg2[%c0_135, %c656] : memref<16x896xf32, #tpu.memory_space<vmem>>, vector<8x72xf32>
    %c0_136 = arith.constant 0 : index
    %c728 = arith.constant 728 : index
    %418 = vector.load %arg2[%c0_136, %c728] : memref<16x896xf32, #tpu.memory_space<vmem>>, vector<16x8xf32>
    %c0_137 = arith.constant 0 : index
    %c736 = arith.constant 736 : index
    %419 = vector.load %arg2[%c0_137, %c736] : memref<16x896xf32, #tpu.memory_space<vmem>>, vector<16x1xf32>
    %c0_138 = arith.constant 0 : index
    %c737 = arith.constant 737 : index
    %420 = vector.load %arg2[%c0_138, %c737] : memref<16x896xf32, #tpu.memory_space<vmem>>, vector<16x1xf32>
    %c0_139 = arith.constant 0 : index
    %c738 = arith.constant 738 : index
    %421 = vector.load %arg2[%c0_139, %c738] : memref<16x896xf32, #tpu.memory_space<vmem>>, vector<8x1xf32>
    %c0_140 = arith.constant 0 : index
    %c739 = arith.constant 739 : index
    %422 = vector.load %arg2[%c0_140, %c739] : memref<16x896xf32, #tpu.memory_space<vmem>>, vector<8x1xf32>
    %c0_141 = arith.constant 0 : index
    %c740 = arith.constant 740 : index
    %423 = vector.load %arg2[%c0_141, %c740] : memref<16x896xf32, #tpu.memory_space<vmem>>, vector<8x1xf32>
    %c0_142 = arith.constant 0 : index
    %c741 = arith.constant 741 : index
    %424 = vector.load %arg2[%c0_142, %c741] : memref<16x896xf32, #tpu.memory_space<vmem>>, vector<8x1xf32>
    %425 = vector.broadcast %419 : vector<16x1xf32> to vector<16x1024xf32>
    %426 = arith.mulf %415, %425 : vector<16x1024xf32>
    %427 = vector.broadcast %420 : vector<16x1xf32> to vector<16x1024xf32>
    %428 = arith.addf %426, %427 : vector<16x1024xf32>
    %cst_143 = arith.constant 0.000000e+00 : f32
    %429 = vector.broadcast %cst_143 : f32 to vector<16x1024xf32>
    %430 = arith.maximumf %428, %429 : vector<16x1024xf32>
    %cst_144 = arith.constant dense<0.000000e+00> : vector<8x1024xf32>
    %431 = tpu.matmul %416, %430, %cst_144 {dimension_numbers = #tpu.dot_dimension_numbers<[1], [0], [0], [1], [0, 0, 1, 1], [], []>} : vector<8x16xf32>, vector<16x1024xf32>, vector<8x1024xf32> -> vector<8x1024xf32>
    %432 = vector.broadcast %421 : vector<8x1xf32> to vector<8x1024xf32>
    %433 = arith.mulf %431, %432 : vector<8x1024xf32>
    %434 = vector.broadcast %422 : vector<8x1xf32> to vector<8x1024xf32>
    %435 = arith.addf %433, %434 : vector<8x1024xf32>
    %cst_145 = arith.constant 0.000000e+00 : f32
    %436 = vector.broadcast %cst_145 : f32 to vector<8x1024xf32>
    %437 = arith.maximumf %435, %436 : vector<8x1024xf32>
    %c17_i32_146 = arith.constant 17 : i32
    %438 = tpu.dynamic_rotate %437 by %c17_i32_146 dim 1 : vector<8x1024xf32>, i32 -> vector<8x1024xf32>
    %439 = vector.extract_strided_slice %0 {offsets = [0, 0], sizes = [1, 1024], strides = [1, 1]} : vector<9x1024xf32> to vector<1x1024xf32>
    %440 = vector.broadcast %439 : vector<1x1024xf32> to vector<8x1024xf32>
    %441 = arith.mulf %438, %440 : vector<8x1024xf32>
    %c16_i32_147 = arith.constant 16 : i32
    %442 = tpu.dynamic_rotate %437 by %c16_i32_147 dim 1 : vector<8x1024xf32>, i32 -> vector<8x1024xf32>
    %443 = vector.extract_strided_slice %0 {offsets = [1, 0], sizes = [1, 1024], strides = [1, 1]} : vector<9x1024xf32> to vector<1x1024xf32>
    %444 = vector.broadcast %443 : vector<1x1024xf32> to vector<8x1024xf32>
    %445 = arith.mulf %442, %444 : vector<8x1024xf32>
    %c15_i32_148 = arith.constant 15 : i32
    %446 = tpu.dynamic_rotate %437 by %c15_i32_148 dim 1 : vector<8x1024xf32>, i32 -> vector<8x1024xf32>
    %447 = vector.extract_strided_slice %0 {offsets = [2, 0], sizes = [1, 1024], strides = [1, 1]} : vector<9x1024xf32> to vector<1x1024xf32>
    %448 = vector.broadcast %447 : vector<1x1024xf32> to vector<8x1024xf32>
    %449 = arith.mulf %446, %448 : vector<8x1024xf32>
    %c1_i32_149 = arith.constant 1 : i32
    %450 = tpu.dynamic_rotate %437 by %c1_i32_149 dim 1 : vector<8x1024xf32>, i32 -> vector<8x1024xf32>
    %451 = vector.extract_strided_slice %0 {offsets = [3, 0], sizes = [1, 1024], strides = [1, 1]} : vector<9x1024xf32> to vector<1x1024xf32>
    %452 = vector.broadcast %451 : vector<1x1024xf32> to vector<8x1024xf32>
    %453 = arith.mulf %450, %452 : vector<8x1024xf32>
    %454 = vector.extract_strided_slice %0 {offsets = [4, 0], sizes = [1, 1024], strides = [1, 1]} : vector<9x1024xf32> to vector<1x1024xf32>
    %455 = vector.broadcast %454 : vector<1x1024xf32> to vector<8x1024xf32>
    %456 = arith.mulf %437, %455 : vector<8x1024xf32>
    %c1023_i32_150 = arith.constant 1023 : i32
    %457 = tpu.dynamic_rotate %437 by %c1023_i32_150 dim 1 : vector<8x1024xf32>, i32 -> vector<8x1024xf32>
    %458 = vector.extract_strided_slice %0 {offsets = [5, 0], sizes = [1, 1024], strides = [1, 1]} : vector<9x1024xf32> to vector<1x1024xf32>
    %459 = vector.broadcast %458 : vector<1x1024xf32> to vector<8x1024xf32>
    %460 = arith.mulf %457, %459 : vector<8x1024xf32>
    %c1009_i32_151 = arith.constant 1009 : i32
    %461 = tpu.dynamic_rotate %437 by %c1009_i32_151 dim 1 : vector<8x1024xf32>, i32 -> vector<8x1024xf32>
    %462 = vector.extract_strided_slice %0 {offsets = [6, 0], sizes = [1, 1024], strides = [1, 1]} : vector<9x1024xf32> to vector<1x1024xf32>
    %463 = vector.broadcast %462 : vector<1x1024xf32> to vector<8x1024xf32>
    %464 = arith.mulf %461, %463 : vector<8x1024xf32>
    %c1008_i32_152 = arith.constant 1008 : i32
    %465 = tpu.dynamic_rotate %437 by %c1008_i32_152 dim 1 : vector<8x1024xf32>, i32 -> vector<8x1024xf32>
    %466 = vector.extract_strided_slice %0 {offsets = [7, 0], sizes = [1, 1024], strides = [1, 1]} : vector<9x1024xf32> to vector<1x1024xf32>
    %467 = vector.broadcast %466 : vector<1x1024xf32> to vector<8x1024xf32>
    %468 = arith.mulf %465, %467 : vector<8x1024xf32>
    %c1007_i32_153 = arith.constant 1007 : i32
    %469 = tpu.dynamic_rotate %437 by %c1007_i32_153 dim 1 : vector<8x1024xf32>, i32 -> vector<8x1024xf32>
    %470 = vector.extract_strided_slice %0 {offsets = [8, 0], sizes = [1, 1024], strides = [1, 1]} : vector<9x1024xf32> to vector<1x1024xf32>
    %471 = vector.broadcast %470 : vector<1x1024xf32> to vector<8x1024xf32>
    %472 = arith.mulf %469, %471 : vector<8x1024xf32>
    %473 = tpu.concatenate %441, %445, %449, %453, %456, %460, %464, %468, %472 in 0 : vector<8x1024xf32>, vector<8x1024xf32>, vector<8x1024xf32>, vector<8x1024xf32>, vector<8x1024xf32>, vector<8x1024xf32>, vector<8x1024xf32>, vector<8x1024xf32>, vector<8x1024xf32> -> vector<72x1024xf32>
    %cst_154 = arith.constant dense<0.000000e+00> : vector<8x1024xf32>
    %474 = tpu.matmul %417, %473, %cst_154 {dimension_numbers = #tpu.dot_dimension_numbers<[1], [0], [0], [1], [0, 0, 1, 1], [], []>} : vector<8x72xf32>, vector<72x1024xf32>, vector<8x1024xf32> -> vector<8x1024xf32>
    %475 = vector.broadcast %423 : vector<8x1xf32> to vector<8x1024xf32>
    %476 = arith.mulf %474, %475 : vector<8x1024xf32>
    %477 = vector.broadcast %424 : vector<8x1xf32> to vector<8x1024xf32>
    %478 = arith.addf %476, %477 : vector<8x1024xf32>
    %cst_155 = arith.constant 0.000000e+00 : f32
    %479 = vector.broadcast %cst_155 : f32 to vector<8x1024xf32>
    %480 = arith.maximumf %478, %479 : vector<8x1024xf32>
    %cst_156 = arith.constant dense<0.000000e+00> : vector<16x1024xf32>
    %481 = tpu.matmul %418, %480, %cst_156 {dimension_numbers = #tpu.dot_dimension_numbers<[1], [0], [0], [1], [0, 0, 1, 1], [], []>} : vector<16x8xf32>, vector<8x1024xf32>, vector<16x1024xf32> -> vector<16x1024xf32>
    %482 = arith.addf %481, %415 : vector<16x1024xf32>
    %c0_157 = arith.constant 0 : index
    %c0_158 = arith.constant 0 : index
    %483 = vector.load %arg7[%c0_157, %c0_158] : memref<16x1024xf32, #tpu.memory_space<vmem>>, vector<16x1024xf32>
    tpu.vector_store %arg7[%c0_157, %c0_158], %482 {strides = array<i32>} : memref<16x1024xf32, #tpu.memory_space<vmem>>, vector<16x1024xf32>,
    return
  }
  func.func @transform_0(%arg0: i32) -> (i32, i32) {
    %c0_i32 = arith.constant 0 : i32
    %c0_i32_0 = arith.constant 0 : i32
    return %c0_i32, %arg0 : i32, i32
  }
  func.func @transform_1(%arg0: i32) -> (i32, i32) {
    %c0_i32 = arith.constant 0 : i32
    %c0_i32_0 = arith.constant 0 : i32
    %c0_i32_1 = arith.constant 0 : i32
    return %c0_i32, %c0_i32_0 : i32, i32
  }
  func.func @transform_2(%arg0: i32) -> (i32, i32) {
    %c0_i32 = arith.constant 0 : i32
    %c0_i32_0 = arith.constant 0 : i32
    %c0_i32_1 = arith.constant 0 : i32
    return %c0_i32, %c0_i32_0 : i32, i32
  }
  func.func @transform_3(%arg0: i32) -> (i32, i32) {
    %c0_i32 = arith.constant 0 : i32
    %c0_i32_0 = arith.constant 0 : i32
    %c0_i32_1 = arith.constant 0 : i32
    return %c0_i32, %c0_i32_0 : i32, i32
  }
  func.func @transform_4(%arg0: i32) -> (i32, i32) {
    %c0_i32 = arith.constant 0 : i32
    %c0_i32_0 = arith.constant 0 : i32
    %c0_i32_1 = arith.constant 0 : i32
    return %c0_i32, %c0_i32_0 : i32, i32
  }
  func.func @transform_5(%arg0: i32) -> (i32, i32) {
    %c0_i32 = arith.constant 0 : i32
    %c0_i32_0 = arith.constant 0 : i32
    %c0_i32_1 = arith.constant 0 : i32
    return %c0_i32, %c0_i32_0 : i32, i32
  }
  func.func @transform_6(%arg0: i32) -> (i32, i32) {
    %c0_i32 = arith.constant 0 : i32
    %c0_i32_0 = arith.constant 0 : i32
    return %c0_i32, %arg0 : i32, i32
  }
}

</mosaic_0001>

<bundles_post_ra>
// kernel: attention_module_stage3.1
= control target key start
LH: loop header
LB: loop body
LE: loop exit
PB: predicated region body
PF: predicated region fallthrough
CT: control target
= control target key end

     0   :  { %11 = vsyncpa [#allocation4], 0  ;;  %s11068_s21 = smov 0   ;;  %s11070_s22 = smov 0   ;;  %s17261_s0 = inlined_call_operand.vmem [shape: f32[16,2048], index: 0, kind: input, shape index: {}]   ;;  %s17262_s1 = inlined_call_operand.vmem [shape: f32[16,896], index: 1, kind: input, shape index: {}]   ;;  %s17263_s2 = inlined_call_operand.vmem [shape: f32[25,1024], index: 2, kind: input, shape index: {}]   ;;  %s17264_s3 = inlined_call_operand.vmem [shape: f32[9,256], index: 3, kind: input, shape index: {}]   ;;  %s17265_s4 = inlined_call_operand.hbm [shape: f32[1024,256], index: 4, kind: input, shape index: {}]   ;;  %s17266_s5 = inlined_call_operand.vmem [shape: f32[256,1024], index: 5, kind: input, shape index: {}]   ;;  %s17267_s6 = inlined_call_operand.vmem [shape: f32[16,2048], index: 6, kind: output, shape index: {}]  }
   0x1   :  { %s11072_s23 = smov 0  }
   0x2 LB: > { %s11084_s24 = sadd.s32 4294967295, %s11002_s23   ;;  %s11087_s25 = sadd.s32 1, %s11002_s23   ;;  %s11002_s23 = sphi %s11072_s23, %s18554_s23   ;;  %s10998_s22 = sphi %s11070_s22, %s18553_s22   ;;  %s10994_s21 = sphi %s11068_s21, %s18552_s21  }
   0x3   : > { %s21_s26 = ssub.s32 %s11002_s23, %s11087_s25  ;;  %s24_s27 = sadd.s32 1, %s10998_s22 }
   0x4   : > { %p22_p0 = scmp.eq.s32.totalorder %s21_s26, 0  ;;  %p31_p1 = scmp.ne.s32.totalorder %s10998_s22, %s10994_s21 }
   0x5   : > { %p32_p2 = scmp.eq.s32.totalorder %s11002_s23, 0  ;;  %p166_p3 = scmp.eq.s32.totalorder %s11084_s24, 1 }
   0x6   : > { %s11097_s28 = scalar_select %p22_p0, %s10998_s22, %s24_s27  }
   0x7   : > { %p11099_p4 = por %p32_p2, %p31_p1  ;;  %p11103_p5 = por %p166_p3, %p31_p1 }
   0x8   : > { %p9693_p6 = scmp.ge.s32.totalorder %s11002_s23, 1  ;;  %p179_p7 = scmp.lt.s32.totalorder %s11002_s23, 3 }
   0x9   : > { %s17719_s29 = scalar_select %p11099_p4, 1, 0 }
   0xa   : > { %s17720_s30 = scalar_select %p11103_p5, 1, 0 }
   0xb   : > { %p17268_p8 = scmp.eq.s32.totalorder %s11084_s24, 0  ;;  %p11110_p9 = pnand %p9693_p6, %p179_p7 }
   0xc   : > { %s11004_s8 = smov [#allocation3]   ;;  %s10948_s13 = scalar_lea.hbm %s17265_s4, 32768 }
   0xd   : > { %s17721_s7 = scalar_select %p11110_p9, 1, 0 }
   0xe   : > { %s200_s9 = sshll.u32 %s11004_s8, 4  ;;  %p10736_p10 = pneg %p11110_p9  ;;  %s201_s9 = int_to_ptr.vmem [resolvable:$true] %s200_s9 }
   0xf   : > { %p10949_p12 = scmp.ne.s32.totalorder %s17265_s4, %s10948_s13  ;;  %p10955_p2 = scmp.lt.u32.totalorder %s10948_s13, %s17265_s4 }
  0x10   : > { %p11118_p11 = pnand %p17268_p8, %p10736_p10 }
  0x12   : > { %p10950_p13 = pneg %p11118_p11 }
  0x14   : > { %p10951_p0 = pnand %p10950_p13, %p10949_p12 }
  0x16   : > { %p10952_p1 = pneg %p10951_p0 }
  0x18   : > { %p10957_p3 = pnand %p10955_p2, %p10952_p1 }
  0x1a   : > { %10960 = shalt.err (!%p10957_p3)
}
  0x1b   : > { %s10961_s18 = scalar_lea.vmem %s201_s9, 32768  ;;  %p10969_p8 = scmp.lt.s32.totalorder %s201_s9, %s201_s9 }
  0x1c   : > { %p10962_p6 = scmp.ne.s32.totalorder %s201_s9, %s10961_s18  ;;  %p10970_p5 = scmp.lt.s32.totalorder %s10961_s18, %s10961_s18 }
  0x1e   : > { %p10964_p7 = pnand %p10962_p6, %p10950_p13  ;;  %p10971_p9 = por %p10970_p5, %p10969_p8 }
  0x20   : > { %p10965_p10 = pneg %p10964_p7 }
  0x22   : > { %p10972_p4 = pnand %p10971_p9, %p10965_p10 }
  0x24   : > { %10975 = shalt.err (!%p10972_p4)
}
  0x25   : > { %s11005_s19 = smov 256   ;;  %s11006_s20 = smov 16  }
  0x26   : > { %10739 = dma.hbm_to_vmem [thread:$0]  (!%p11118_p11), %s17265_s4, 32768, %s201_s9, [#allocation4], %s11005_s19, %s11005_s19, %s11006_s20  }
  0x27   : > { %p9695_p12 = scmp.ge.s32.totalorder %s11002_s23, 2 }
  0x28   : > { %p17723_p0 = scmp.ne.s32.totalorder (!%p9695_p12), %s17719_s29, 0 }
  0x29   : > { %213 = sbr.rel (%p9695_p12) target bundleno = 60 (0x3c), region = 36 }
  0x30   : > { %216 = sbr.rel (!%p17723_p0) target bundleno = 60 (0x3c), region = 40  ;;  %s218_s8 = sand.u32 (%p17723_p0), 1, %s10998_s22  }
  0x31   : > { %s9814_s11 = sshll.u32 (%p17723_p0), %s11002_s23, 6  ;;  %s9696_s12 = sshll.u32 (%p17723_p0), %s218_s8, 7 }
  0x32   : > { %s11146_s15 = scalar_lea.vmem (%p17723_p0), %s17261_s0, %s9814_s11  ;;  %s220_s29 = scalar_lea.vmem (%p17723_p0), [#allocation2], %s9696_s12 }
  0x33   : > { %v236_v0 = vld [vmem:[%s11146_s15] sm:$0xff] (%p17723_p0)  ;;  %v238_v1 = vld [vmem:[%s11146_s15 + $0x8] sm:$0xff] (%p17723_p0)  ;;  %v240_v2 = vld [vmem:[%s11146_s15 + $0x10] sm:$0xff] (%p17723_p0) }
  0x34   : > { %237 = vst [vmem:[%s220_s29] sm:$0xff] (%p17723_p0), %v236_v0  ;;  %239 = vst [vmem:[%s220_s29 + $0x8] sm:$0xff] (%p17723_p0), %v238_v1  ;;  %v242_v3 = vld [vmem:[%s11146_s15 + $0x18] sm:$0xff] (%p17723_p0)  ;;  %v244_v4 = vld [vmem:[%s11146_s15 + $0x20] sm:$0xff] (%p17723_p0) }
  0x35   : > { %241 = vst [vmem:[%s220_s29 + $0x10] sm:$0xff] (%p17723_p0), %v240_v2  ;;  %v246_v5 = vld [vmem:[%s11146_s15 + $0x28] sm:$0xff] (%p17723_p0)  ;;  %243 = vst [vmem:[%s220_s29 + $0x18] sm:$0xff] (%p17723_p0), %v242_v3  ;;  %v248_v6 = vld [vmem:[%s11146_s15 + $0x30] sm:$0xff] (%p17723_p0) }
  0x36   : > { %245 = vst [vmem:[%s220_s29 + $0x20] sm:$0xff] (%p17723_p0), %v244_v4  ;;  %247 = vst [vmem:[%s220_s29 + $0x28] sm:$0xff] (%p17723_p0), %v246_v5  ;;  %v250_v7 = vld [vmem:[%s11146_s15 + $0x38] sm:$0xff] (%p17723_p0)  ;;  %v252_v8 = vld [vmem:[%s11146_s15 + $0x80] sm:$0xff] (%p17723_p0) }
  0x37   : > { %249 = vst [vmem:[%s220_s29 + $0x30] sm:$0xff] %v248_v6  ;;  %251 = vst [vmem:[%s220_s29 + $0x38] sm:$0xff] %v250_v7  ;;  %v254_v9 = vld [vmem:[%s11146_s15 + $0x88] sm:$0xff]  ;;  %v256_v10 = vld [vmem:[%s11146_s15 + $0x90] sm:$0xff] }
  0x38   : > { %253 = vst [vmem:[%s220_s29 + $0x40] sm:$0xff] %v252_v8  ;;  %v258_v11 = vld [vmem:[%s11146_s15 + $0x98] sm:$0xff]  ;;  %255 = vst [vmem:[%s220_s29 + $0x48] sm:$0xff] %v254_v9  ;;  %v260_v12 = vld [vmem:[%s11146_s15 + $0xa0] sm:$0xff] }
  0x39   : > { %257 = vst [vmem:[%s220_s29 + $0x50] sm:$0xff] %v256_v10  ;;  %259 = vst [vmem:[%s220_s29 + $0x58] sm:$0xff] %v258_v11  ;;  %v262_v13 = vld [vmem:[%s11146_s15 + $0xa8] sm:$0xff]  ;;  %v264_v14 = vld [vmem:[%s11146_s15 + $0xb0] sm:$0xff] }
  0x3a   : > { %261 = vst [vmem:[%s220_s29 + $0x60] sm:$0xff] %v260_v12  ;;  %263 = vst [vmem:[%s220_s29 + $0x68] sm:$0xff] %v262_v13  ;;  %v266_v15 = vld [vmem:[%s11146_s15 + $0xb8] sm:$0xff] }
  0x3b   : > { %265 = vst [vmem:[%s220_s29 + $0x70] sm:$0xff] %v264_v14  ;;  %267 = vst [vmem:[%s220_s29 + $0x78] sm:$0xff] %v266_v15 }
  0x3c PF: > { %p17724_p4 = scmp.ne.s32.totalorder %s17721_s7, 0 }
  0x3e   : > { %276 = sbr.rel (%p17724_p4) target bundleno = 6504 (0x1968), region = 63 }
  0x45   : > { %s279_s23 = sand.u32 1, %s10994_s21   ;;  %p17725_p5 = scmp.eq.s32.totalorder %s11084_s24, 0 }
  0x46   : > { %s11167_s9 = sshll.u32 %s279_s23, 7 }
  0x47   : > { %s11170_s10 = scalar_lea.vmem [#allocation2], %s11167_s9 }
  0x48   : > { %10989 = dma.done.wait (%p17725_p5), [#allocation4], 32768   ;;  %p17726_p8 = pmov %p17725_p5 }
  0x49   : > { %v17280_v16 = vmov 97   ;;  %v17270_v17 = vmov 96   ;;  %v11181_v18 = vld [vmem:[%s17262_s1] sm:$0xff]  ;;  %v11188_v19 = vld [vmem:[%s17262_s1 + $0x38] sm:$0xff]  ;;  %v17282_v20 = vmov 0.0   ;;  %v17278_v21 = vmov 98  }
  0x4a   : > { %10991 = vsyncadd (%p17726_p8), [#allocation4], 4294934528  ;;  %10796 = vset.pattern.permute.xlu1 %v17280_v16  ;;  %10795 = vset.pattern.permute.xlu0 %v17270_v17  ;;  %v17274_v22 = vmov 99   ;;  %v350_v23 = vld [vmem:[%s11170_s10 + $0x8] sm:$0xff]  ;;  %v352_v24 = vld [vmem:[%s11170_s10 + $0x18] sm:$0xff]  ;;  %vm433_vm0 = vcmask 130048  }
  0x4b   : > { %394 = vperm.xlu1 %10796, %v11181_v18   ;;  %369 = vperm.xlu0 %10795, %v11181_v18   ;;  %v349_v25 = vld [vmem:[%s11170_s10] sm:$0xff]  ;;  %v351_v26 = vld [vmem:[%s11170_s10 + $0x10] sm:$0xff]  ;;  %v354_v27 = vld [vmem:[%s11170_s10 + $0x28] sm:$0xff]  ;;  %s11012_s18 = smov 112   ;;  %s11013_s19 = smov 127   ;;  %vm1316_vm9 = vcmask 588800  }
  0x4c   : > { %500 = vmatprep.mubr.f32.mxu0 %v17282_v20  ;;  %571 = vmatprep.mubr.f32.mxu1 %v17282_v20  ;;  %v356_v28 = vld [vmem:[%s11170_s10 + $0x38] sm:$0xff]  ;;  %v353_v29 = vld [vmem:[%s11170_s10 + $0x20] sm:$0xff]  ;;  %v355_v30 = vld [vmem:[%s11170_s10 + $0x30] sm:$0xff]  ;;  %s11014_s20 = smov 17   ;;  %s17700_s26 = smov 15   ;;  %vm1639_vm10 = vcmask 64512  }
  0x4d   : > { %v358_v37 = vld [vmem:[%s11170_s10 + $0x48] sm:$0xff]  ;;  %v360_v38 = vld [vmem:[%s11170_s10 + $0x58] sm:$0xff]  ;;  %v357_v45 = vld [vmem:[%s11170_s10 + $0x40] sm:$0xff]  ;;  %s11016_s27 = smov 16   ;;  %s11017_s8 = smov 1  }
  0x4e   : > { %v359_v47 = vld [vmem:[%s11170_s10 + $0x50] sm:$0xff]  ;;  %v362_v50 = vld [vmem:[%s11170_s10 + $0x68] sm:$0xff]  ;;  %v364_v57 = vld [vmem:[%s11170_s10 + $0x78] sm:$0xff]  ;;  %s11018_s11 = smov 113   ;;  %s11019_s12 = smov 111  }
  0x4f   : > { %398 = vperm.xlu1 %10796, %v11188_v19   ;;  %374 = vperm.xlu0 %10795, %v11188_v19   ;;  %v361_v0 = vld [vmem:[%s11170_s10 + $0x60] sm:$0xff]  ;;  %v363_v13 = vld [vmem:[%s11170_s10 + $0x70] sm:$0xff]  ;;  %s17703_s13 = smov 40   ;;  %s11023_s7 = smov 9  }
  0x50   : > { %s11024_s16 = smov 8   ;;  %s11025_s21 = smov 7  }
  0x51   : > { %s11026_s17 = smov 121   ;;  %s11027_s14 = smov 120  }
  0x52   : > { %s11028_s15 = smov 119   ;;  %p18551_p9 = scmp.ne.s32.totalorder %s17720_s30, 0 }
  0x53   : > { %10797 = vset.pattern.permute.xlu0 %v17278_v21  ;;  %10798 = vset.pattern.permute.xlu1 %v17274_v22 }
  0x54   : > { %721 = vperm.xlu0 %10797, %v11181_v18   ;;  %733 = vperm.xlu1 %10798, %v11181_v18  }
  0x58   : > { %1314 = vrot.lane.b32.xlu1 %v11181_v18, %s11012_s18 }
  0xca   : > { %v395_v31 = vpop.permute.xlu1 %394  ;;  %v370_v32 = vpop.permute.xlu0 %369 }
  0xcb   : > { %v378_v33 = vmul.f32 %v370_v32, %v350_v23  ;;  %v380_v34 = vmul.f32 %v370_v32, %v352_v24  ;;  %v377_v35 = vmul.f32 %v370_v32, %v349_v25  ;;  %v379_v36 = vmul.f32 %v370_v32, %v351_v26 }
  0xcc   : > { %v382_v39 = vmul.f32 %v370_v32, %v354_v27  ;;  %v384_v40 = vmul.f32 %v370_v32, %v356_v28  ;;  %v381_v41 = vmul.f32 %v370_v32, %v353_v29  ;;  %v383_v42 = vmul.f32 %v370_v32, %v355_v30 }
  0xcd   : > { %v402_v43 = vadd.f32 %v395_v31, %v378_v33  ;;  %v404_v44 = vadd.f32 %v395_v31, %v380_v34  ;;  %v401_v46 = vadd.f32 %v395_v31, %v377_v35  ;;  %v403_v48 = vadd.f32 %v395_v31, %v379_v36 }
  0xce   : > { %v375_v49 = vpop.permute.xlu0 %374  ;;  %v406_v51 = vadd.f32 %v395_v31, %v382_v39  ;;  %v408_v52 = vadd.f32 %v395_v31, %v384_v40  ;;  %v405_v53 = vadd.f32 %v395_v31, %v381_v41  ;;  %v407_v58 = vadd.f32 %v395_v31, %v383_v42  ;;  %v399_v59 = vpop.permute.xlu1 %398 }
  0xcf   : > { %v386_v54 = vmul.f32 %v375_v49, %v358_v37  ;;  %v418_v55 = vmax.f32 %v402_v43, 0.0  ;;  %v388_v56 = vmul.f32 %v375_v49, %v360_v38  ;;  %v420_v60 = vmax.f32 %v404_v44, 0.0 }
  0xd0   : > { %v385_v61 = vmul.f32 %v375_v49, %v357_v45  ;;  %v417_v62 = vmax.f32 %v401_v46, 0.0  ;;  %v387_v63 = vmul.f32 %v375_v49, %v359_v47  ;;  %v419_v3 = vmax.f32 %v403_v48, 0.0 }
  0xd1   : > { %v410_v1 = vadd.f32 %v399_v59, %v386_v54  ;;  %v412_v2 = vadd.f32 %v399_v59, %v388_v56  ;;  %v390_v4 = vmul.f32 %v375_v49, %v362_v50  ;;  %v422_v7 = vmax.f32 %v406_v51, 0.0 }
  0xd2   : > { %v409_v5 = vadd.f32 %v399_v59, %v385_v61  ;;  %v411_v6 = vadd.f32 %v399_v59, %v387_v63  ;;  %v392_v8 = vmul.f32 %v375_v49, %v364_v57  ;;  %v389_v12 = vmul.f32 %v375_v49, %v361_v0 }
  0xd3   : > { %v426_v9 = vmax.f32 %v410_v1, 0.0  ;;  %v428_v10 = vmax.f32 %v412_v2, 0.0  ;;  %v414_v11 = vadd.f32 %v399_v59, %v390_v4  ;;  %v424_v24 = vmax.f32 %v408_v52, 0.0  ;;  %v11228_v42 = vpop.permute.xlu0 %721  ;;  %v11230_v43 = vpop.permute.xlu1 %733 }
  0xd4   : > { %v425_v14 = vmax.f32 %v409_v5, 0.0  ;;  %v427_v15 = vmax.f32 %v411_v6, 0.0  ;;  %v416_v23 = vadd.f32 %v399_v59, %v392_v8  ;;  %v413_v28 = vadd.f32 %v399_v59, %v389_v12 }
  0xd5   : > { %v9816_v25 = vpack.c.bf16 %v426_v9, %v418_v55  ;;  %v9820_v26 = vpack.c.bf16 %v428_v10, %v420_v60  ;;  %v430_v27 = vmax.f32 %v414_v11, 0.0  ;;  %v391_v32 = vmul.f32 %v375_v49, %v363_v13 }
  0xd6   : > { %v9818_v29 = vpack.c.bf16 %v425_v14, %v417_v62  ;;  %v9822_v30 = vpack.c.bf16 %v427_v15, %v419_v3  ;;  %v432_v31 = vmax.f32 %v416_v23, 0.0  ;;  %v429_v34 = vmax.f32 %v413_v28, 0.0 }
  0xd7   : > { %9817 = vmatprep.subr.bf16.mxu0 %v9816_v25  ;;  %9821 = vmatprep.subr.bf16.mxu1 %v9820_v26  ;;  %v9824_v33 = vpack.c.bf16 %v430_v27, %v422_v7  ;;  %v421_v36 = vmax.f32 %v405_v53, 0.0  ;;  %v415_v37 = vadd.f32 %v399_v59, %v391_v32  ;;  %v423_v39 = vmax.f32 %v407_v58, 0.0  ;;  %v11379_v12 = vpop.permute.xlu1 %1314 }
  0xd8   : > { %9819 = vmatpush1.bf16.msra.mxu0 %v9818_v29  ;;  %9823 = vmatpush1.bf16.msra.mxu1 %v9822_v30  ;;  %v9828_v35 = vpack.c.bf16 %v432_v31, %v424_v24  ;;  %v17276_v26 = vmov 100   ;;  %v17272_v27 = vmov 101   ;;  %v768_v30 = vlaneseq }
  0xd9   : > { %9825 = vmatprep.subr.bf16.mxu0 %v9824_v33  ;;  %v9826_v38 = vpack.c.bf16 %v429_v34, %v421_v36  ;;  %v431_v40 = vmax.f32 %v415_v37, 0.0  ;;  %10799 = vset.pattern.permute.xlu0 %v17276_v26 }
  0xda   : > { %9829 = vmatprep.subr.bf16.mxu1 %v9828_v35  ;;  %10800 = vset.pattern.permute.xlu1 %v17272_v27  ;;  %v11419_v33 = vand.u32 127, %v768_v30  ;;  %v11421_v34 = vshrl.u32 %v768_v30, 7 }
  0xdb   : > { %9703 = vmatmul.mubr.msk.f32.vlgmr.msra.gmra.mrb[0].mxu0 %vm433_vm0, %v11181_v18  ;;  %9704 = vmatmul.mubr.msk.f32.vlgmr.msra.gmra.mrb[0].mxu1 %vm433_vm0, %v11181_v18  ;;  %v9830_v41 = vpack.c.bf16 %v431_v40, %v423_v39  ;;  %v11439_v39 = vld [vmem:[%s17263_s2 + $0x8] sm:$0xff] }
  0xdc   : > { %9827 = vmatpush1.bf16.msra.mxu0 %v9826_v38  ;;  %642 = vmatprep.mubr.f32.mxu0 %v17282_v20  ;;  %v11424_v35 = vsub.s32 0, %v11421_v34  ;;  %v11427_v36 = vsub.s32 1, %v11421_v34  ;;  %vm770_vm1 = vcmp.lt.s32.totalorder %v11419_v33, 17  ;;  %vm835_vm2 = vcmp.lt.s32.totalorder %v11419_v33, 16 }
  0xdd   : > { %713 = vmatprep.mubr.f32.mxu1 %v17282_v20  ;;  %9831 = vmatpush1.bf16.msra.mxu1 %v9830_v41  ;;  %vm965_vm3 = vcmp.lt.s32.totalorder %v11419_v33, 1  ;;  %vm900_vm4 = vcmp.lt.s32.totalorder %v11419_v33, 15  ;;  %vm1070_vm5 = vcmp.lt.s32.totalorder %v11419_v33, 127  ;;  %vm1200_vm6 = vcmp.lt.s32.totalorder %v11419_v33, 112 }
  0xde   : > { %17731 = vst [vmem:[#allocation11_spill] sm:$0xff] %v11424_v35  ;;  %17732 = vst [vmem:[#allocation12_spill] sm:$0xff] %v11427_v36  ;;  %v11443_v40 = vrot.slane %v11439_v39, %v11424_v35  ;;  %vm1135_vm7 = vcmp.lt.s32.totalorder %v11419_v33, 113  ;;  %vm17702_vm8 = vcmp.lt.s32.totalorder %v11419_v33, 111  ;;  %vm6155_vm11 = vcmp.lt.s32.totalorder %v11419_v33, 9 }
  0xdf   : > { %9705 = vmatmul.mubr.msk.f32.vlgmr.msra.gmra.mrb[2].mxu0 %vm433_vm0, %v11181_v18  ;;  %vm6172_vm12 = vcmp.lt.s32.totalorder %v11419_v33, 8  ;;  %vm6189_vm13 = vcmp.lt.s32.totalorder %v11419_v33, 7  ;;  %vm6248_vm14 = vcmp.lt.s32.totalorder %v11419_v33, 121  ;;  %vm6265_vm15 = vcmp.lt.s32.totalorder %v11419_v33, 120 }
  0xe0   : > { %1383 = vmatprep.mubr.f32.mxu0 %v17282_v20  ;;  %9706 = vmatmul.mubr.msk.f32.vlgmr.msra.gmra.mrb[2].mxu1 %vm433_vm0, %v11181_v18  ;;  %17733 = vst [vmem:[#allocation13_spill] sm:$0xff] %v11443_v40 }
  0xe1   : > { %1454 = vmatprep.mubr.f32.mxu1 %v17282_v20  ;;  %v11573_v20 = vsub.s32 4, %v11421_v34 }
  0xe3   : > { %17747 = vst [vmem:[#allocation27_spill] sm:$0xff] %v11573_v20 }
 0x1ae   : > { %v502_v44 = vpop.f32.mrb[0].mxu0  ;;  %v573_v45 = vpop.f32.mrb[0].mxu1 }
 0x1af   : > { %v724_v46 = vmul.f32 %v11228_v42, %v502_v44  ;;  %v726_v47 = vmul.f32 %v11228_v42, %v573_v45  ;;  %v504_v48 = vpop.f32.mrb[1].mxu0  ;;  %v575_v49 = vpop.f32.mrb[1].mxu1 }
 0x1b0   : > { %v725_v58 = vmul.f32 %v11228_v42, %v504_v48  ;;  %v727_v61 = vmul.f32 %v11228_v42, %v575_v49 }
 0x1b1   : > { %v736_v50 = vadd.f32 %v11230_v43, %v724_v46  ;;  %v738_v51 = vadd.f32 %v11230_v43, %v726_v47 }
 0x1b2   : > { %v644_v52 = vpop.f32.mrb[2].mxu0  ;;  %v737_v59 = vadd.f32 %v11230_v43, %v725_v58  ;;  %v739_v62 = vadd.f32 %v11230_v43, %v727_v61 }
 0x1b3   : > { %v11236_v53 = vmax.f32 %v736_v50, 0.0  ;;  %v11238_v54 = vmax.f32 %v738_v51, 0.0  ;;  %v11240_v55 = vpop.f32.mrb[3].mxu0  ;;  %v715_v56 = vpop.f32.mrb[2].mxu1  ;;  %v728_v0 = vmul.f32 %v11228_v42, %v644_v52  ;;  %v11471_v51 = vld [vmem:[%s17263_s2 + $0x10] sm:$0xff] }
 0x1b4   : > { %v717_v57 = vpop.f32.mrb[3].mxu1  ;;  %v11264_v60 = vmax.f32 %v737_v59, 0.0  ;;  %v11284_v63 = vmax.f32 %v739_v62, 0.0  ;;  %v730_v3 = vmul.f32 %v11228_v42, %v715_v56  ;;  %v729_v9 = vmul.f32 %v11228_v42, %v11240_v55 }
 0x1b5   : > { %1058 = vrot.lane.b32.xlu0 %v11238_v54, %s11013_s19  ;;  %752 = vrot.lane.b32.xlu1 %v11236_v53, %s11014_s20  ;;  %v740_v1 = vadd.f32 %v11230_v43, %v728_v0  ;;  %v731_v5 = vmul.f32 %v11228_v42, %v717_v57  ;;  %v11479_v56 = vrot.slane %v11471_v51, %v11427_v36  ;;  %v11484_v57 = vld [vmem:[%s17263_s2 + $0x18] sm:$0xff] }
 0x1b6   : > { %v742_v4 = vadd.f32 %v11230_v43, %v730_v3  ;;  %v741_v10 = vadd.f32 %v11230_v43, %v729_v9  ;;  %v11490_v59 = vrot.slane %v11484_v57, %v11424_v35  ;;  %v11494_v61 = vrot.slane %v11484_v57, %v11427_v36 }
 0x1b7   : > { %v11312_v2 = vmax.f32 %v740_v1, 0.0  ;;  %v743_v7 = vadd.f32 %v11230_v43, %v731_v5  ;;  %17737 = vst [vmem:[#allocation17_spill] sm:$0xff] %v11479_v56  ;;  %v11498_v62 = vrot.slane %v11471_v51, %v11424_v35 }
 0x1b8   : > { %v11333_v6 = vmax.f32 %v742_v4, 0.0  ;;  %v11357_v11 = vmax.f32 %v741_v10, 0.0  ;;  %17738 = vst [vmem:[#allocation18_spill] sm:$0xff] %v11490_v59  ;;  %17739 = vst [vmem:[#allocation19_spill] sm:$0xff] %v11494_v61 }
 0x1b9   : > { %888 = vrot.lane.b32.xlu0 %v11238_v54, %s17700_s26  ;;  %819 = vrot.lane.b32.xlu1 %v11236_v53, %s11016_s27  ;;  %v11340_v8 = vmax.f32 %v743_v7, 0.0  ;;  %17740 = vst [vmem:[#allocation20_spill] sm:$0xff] %v11498_v62 }
 0x1ba   : > { %17727 = vst [vmem:[#allocation7_spill] sm:$0xff] %v11333_v6 }
 0x1bb   : > { %17728 = vst [vmem:[#allocation8_spill] sm:$0xff] %v11340_v8 }
 0x1bd   : > { %953 = vrot.lane.b32.xlu0 %v11238_v54, %s11017_s8  ;;  %884 = vrot.lane.b32.xlu1 %v11236_v53, %s17700_s26 }
 0x1c1   : > { %1119 = vrot.lane.b32.xlu0 %v11236_v53, %s11018_s11  ;;  %949 = vrot.lane.b32.xlu1 %v11236_v53, %s11017_s8 }
 0x1c5   : > { %1249 = vrot.lane.b32.xlu0 %v11236_v53, %s11019_s12  ;;  %756 = vrot.lane.b32.xlu1 %v11238_v54, %s11014_s20 }
 0x1c9   : > { %823 = vrot.lane.b32.xlu1 %v11238_v54, %s11016_s27  ;;  %754 = vrot.lane.b32.xlu0 %v11264_v60, %s11014_s20 }
 0x1cd   : > { %1054 = vrot.lane.b32.xlu1 %v11236_v53, %s11013_s19  ;;  %821 = vrot.lane.b32.xlu0 %v11264_v60, %s11016_s27 }
 0x1d1   : > { %1123 = vrot.lane.b32.xlu1 %v11238_v54, %s11018_s11  ;;  %886 = vrot.lane.b32.xlu0 %v11264_v60, %s17700_s26 }
 0x1d5   : > { %1188 = vrot.lane.b32.xlu1 %v11238_v54, %s11012_s18  ;;  %951 = vrot.lane.b32.xlu0 %v11264_v60, %s11017_s8 }
 0x1d9   : > { %1184 = vrot.lane.b32.xlu1 %v11236_v53, %s11012_s18  ;;  %758 = vrot.lane.b32.xlu0 %v11284_v63, %s11014_s20 }
 0x1dd   : > { %1253 = vrot.lane.b32.xlu1 %v11238_v54, %s11019_s12  ;;  %825 = vrot.lane.b32.xlu0 %v11284_v63, %s11016_s27 }
 0x1e1   : > { %1056 = vrot.lane.b32.xlu1 %v11264_v60, %s11013_s19  ;;  %1121 = vrot.lane.b32.xlu0 %v11264_v60, %s11018_s11 }
 0x1e5   : > { %890 = vrot.lane.b32.xlu1 %v11284_v63, %s17700_s26  ;;  %1186 = vrot.lane.b32.xlu0 %v11264_v60, %s11012_s18 }
 0x1e9   : > { %955 = vrot.lane.b32.xlu1 %v11284_v63, %s11017_s8  ;;  %1060 = vrot.lane.b32.xlu0 %v11284_v63, %s11013_s19 }
 0x1ed   : > { %1125 = vrot.lane.b32.xlu1 %v11284_v63, %s11018_s11  ;;  %1251 = vrot.lane.b32.xlu0 %v11264_v60, %s11019_s12 }
 0x1f1   : > { %1190 = vrot.lane.b32.xlu1 %v11284_v63, %s11012_s18  ;;  %760 = vrot.lane.b32.xlu0 %v11312_v2, %s11014_s20 }
 0x1f5   : > { %827 = vrot.lane.b32.xlu0 %v11312_v2, %s11016_s27  ;;  %1062 = vrot.lane.b32.xlu1 %v11312_v2, %s11013_s19 }
 0x1f9   : > { %1127 = vrot.lane.b32.xlu0 %v11312_v2, %s11018_s11  ;;  %892 = vrot.lane.b32.xlu1 %v11312_v2, %s17700_s26 }
 0x1fd   : > { %1192 = vrot.lane.b32.xlu0 %v11312_v2, %s11012_s18  ;;  %957 = vrot.lane.b32.xlu1 %v11312_v2, %s11017_s8 }
 0x201   : > { %764 = vrot.lane.b32.xlu0 %v11333_v6, %s11014_s20  ;;  %1066 = vrot.lane.b32.xlu1 %v11333_v6, %s11013_s19 }
 0x205   : > { %833 = vrot.lane.b32.xlu0 %v11340_v8, %s11016_s27  ;;  %766 = vrot.lane.b32.xlu1 %v11340_v8, %s11014_s20 }
 0x209   : > { %1255 = vrot.lane.b32.xlu0 %v11284_v63, %s11019_s12  ;;  %898 = vrot.lane.b32.xlu1 %v11340_v8, %s17700_s26 }
 0x20d   : > { %963 = vrot.lane.b32.xlu0 %v11340_v8, %s11017_s8  ;;  %831 = vrot.lane.b32.xlu1 %v11333_v6, %s11016_s27 }
 0x211   : > { %896 = vrot.lane.b32.xlu0 %v11333_v6, %s17700_s26  ;;  %762 = vrot.lane.b32.xlu1 %v11357_v11, %s11014_s20 }
 0x215   : > { %894 = vrot.lane.b32.xlu0 %v11357_v11, %s17700_s26  ;;  %829 = vrot.lane.b32.xlu1 %v11357_v11, %s11016_s27 }
 0x219   : > { %959 = vrot.lane.b32.xlu0 %v11357_v11, %s11017_s8  ;;  %1257 = vrot.lane.b32.xlu1 %v11312_v2, %s11019_s12 }
 0x21d   : > { %1064 = vrot.lane.b32.xlu0 %v11357_v11, %s11013_s19  ;;  %1131 = vrot.lane.b32.xlu1 %v11333_v6, %s11018_s11 }
 0x221   : > { %1129 = vrot.lane.b32.xlu0 %v11357_v11, %s11018_s11  ;;  %1196 = vrot.lane.b32.xlu1 %v11333_v6, %s11012_s18 }
 0x225   : > { %1194 = vrot.lane.b32.xlu0 %v11357_v11, %s11012_s18  ;;  %961 = vrot.lane.b32.xlu1 %v11333_v6, %s11017_s8 }
 0x227   : > { %v11385_v13 = vpop.permute.xlu0 %1058  ;;  %v11387_v14 = vpop.permute.xlu1 %752 }
 0x229   : > { %1261 = vrot.lane.b32.xlu0 %v11333_v6, %s11019_s12  ;;  %1259 = vrot.lane.b32.xlu1 %v11357_v11, %s11019_s12 }
 0x22b   : > { %v11393_v15 = vpop.permute.xlu0 %888  ;;  %v11395_v23 = vpop.permute.xlu1 %819 }
 0x22d   : > { %1068 = vrot.lane.b32.xlu0 %v11340_v8, %s11013_s19  ;;  %1133 = vrot.lane.b32.xlu1 %v11340_v8, %s11018_s11 }
 0x22f   : > { %v11401_v24 = vpop.permute.xlu0 %953  ;;  %v11403_v25 = vpop.permute.xlu1 %884 }
 0x231   : > { %1198 = vrot.lane.b32.xlu0 %v11340_v8, %s11012_s18  ;;  %1263 = vrot.lane.b32.xlu1 %v11340_v8, %s11019_s12 }
 0x233   : > { %v11411_v28 = vpop.permute.xlu0 %1119  ;;  %v11413_v29 = vpop.permute.xlu1 %949 }
 0x234   : > { %17729 = vst [vmem:[#allocation9_spill] sm:$0xff] %v11411_v28 }
 0x235   : > { %1604 = vperm.xlu0 %10799, %v11181_v18   ;;  %1616 = vperm.xlu1 %10800, %v11181_v18  }
 0x237   : > { %v11417_v31 = vpop.permute.xlu0 %1249  ;;  %v757_v32 = vpop.permute.xlu1 %756 }
 0x238   : > { %17730 = vst [vmem:[#allocation10_spill] sm:$0xff] %v11417_v31 }
 0x239   : > { %1635 = vrot.lane.b32.xlu1 %v11181_v18, %s17703_s13  ;;  %1637 = vrot.lane.b32.xlu0 %v11188_v19, %s17703_s13  ;;  %v11448_v18 = vrot.slane %v11439_v39, %v11427_v36 }
 0x23a   : > { %10801 = vset.pattern.permute.xlu1 %v17270_v17  ;;  %10802 = vset.pattern.permute.xlu0 %v17270_v17 }
 0x23b   : > { %v824_v37 = vpop.permute.xlu1 %823  ;;  %v755_v38 = vpop.permute.xlu0 %754  ;;  %17734 = vst [vmem:[#allocation14_spill] sm:$0xff] %v11448_v18 }
 0x23c   : > { %v777_v19 = vsel %vm770_vm1, %v11387_v14, %v755_v38  ;;  %v776_v1 = vsel %vm770_vm1, %v755_v38, %v757_v32 }
 0x23d   : > { %v812_v44 = vmul.f32 %v11443_v40, %v777_v19  ;;  %v813_v30 = vmul.f32 %v11498_v62, %v776_v1  ;;  %v11617_v62 = vsub.s32 6, %v11421_v34 }
 0x23f   : > { %v11453_v41 = vpop.permute.xlu1 %1054  ;;  %v822_v42 = vpop.permute.xlu0 %821  ;;  %17754 = vst [vmem:[#allocation34_spill] sm:$0xff] %v11617_v62 }
 0x240   : > { %17735 = vst [vmem:[#allocation15_spill] sm:$0xff] %v11453_v41  ;;  %v842_v43 = vsel %vm835_vm2, %v11395_v23, %v822_v42  ;;  %v841_v58 = vsel %vm835_vm2, %v822_v42, %v824_v37 }
 0x241   : > { %v877_v45 = vmul.f32 %v11448_v18, %v842_v43  ;;  %v878_v5 = vmul.f32 %v11479_v56, %v841_v58  ;;  %v11521_v43 = vsub.s32 3, %v11421_v34  ;;  %v11612_v56 = vsub.s32 7, %v11421_v34 }
 0x243   : > { %v11460_v46 = vpop.permute.xlu1 %1123  ;;  %v11462_v47 = vpop.permute.xlu0 %886  ;;  %v9832_v48 = vpack.c.bf16 %v877_v45, %v812_v44  ;;  %v9850_v38 = vpack.c.bf16 %v878_v5, %v813_v30  ;;  %17741 = vst [vmem:[#allocation21_spill] sm:$0xff] %v11521_v43  ;;  %v11524_v44 = vsub.s32 2, %v11421_v34  ;;  %v11546_v1 = vrot.slane %v11484_v57, %v11521_v43  ;;  %17753 = vst [vmem:[#allocation33_spill] sm:$0xff] %v11612_v56 }
 0x245   : > { %9833 = vmatprep.subr.bf16.mxu0 %v9832_v48  ;;  %17742 = vst [vmem:[#allocation22_spill] sm:$0xff] %v11524_v44  ;;  %v11534_v48 = vrot.slane %v11471_v51, %v11521_v43  ;;  %17745 = vst [vmem:[#allocation25_spill] sm:$0xff] %v11546_v1  ;;  %v11550_v5 = vrot.slane %v11471_v51, %v11524_v44 }
 0x247   : > { %v11464_v49 = vpop.permute.xlu1 %1188  ;;  %v11466_v50 = vpop.permute.xlu0 %951  ;;  %17743 = vst [vmem:[#allocation23_spill] sm:$0xff] %v11534_v48  ;;  %17746 = vst [vmem:[#allocation26_spill] sm:$0xff] %v11550_v5 }
 0x248   : > { %v971_v58 = vsel %vm965_vm3, %v11466_v50, %v11401_v24 }
 0x24b   : > { %v11473_v52 = vpop.permute.xlu1 %1184  ;;  %v11475_v55 = vpop.permute.xlu0 %758 }
 0x24c   : > { %17736 = vst [vmem:[#allocation16_spill] sm:$0xff] %v11473_v52  ;;  %v775_v0 = vsel %vm770_vm1, %v757_v32, %v11475_v55 }
 0x24d   : > { %v814_v9 = vmul.f32 %v11490_v59, %v775_v0  ;;  %v11542_v0 = vrot.slane %v11484_v57, %v11524_v44 }
 0x24f   : > { %v11505_v3 = vpop.permute.xlu1 %1253  ;;  %v11507_v4 = vpop.permute.xlu0 %825  ;;  %17744 = vst [vmem:[#allocation24_spill] sm:$0xff] %v11542_v0 }
 0x250   : > { %v840_v7 = vsel %vm835_vm2, %v824_v37, %v11507_v4 }
 0x251   : > { %v879_v10 = vmul.f32 %v11494_v61, %v840_v7  ;;  %v11667_v61 = vrot.slane %v11439_v39, %v11521_v43 }
 0x253   : > { %v11516_v19 = vpop.permute.xlu1 %1056  ;;  %v11518_v42 = vpop.permute.xlu0 %1121  ;;  %v9848_v32 = vpack.c.bf16 %v879_v10, %v814_v9  ;;  %v906_v9 = vsel %vm900_vm4, %v11462_v47, %v11393_v15  ;;  %17759 = vst [vmem:[#allocation39_spill] sm:$0xff] %v11667_v61 }
 0x254   : > { %v943_v22 = vmul.f32 %v11550_v5, %v906_v9 }
 0x255   : > { %9849 = vmatprep.subr.bf16.mxu1 %v9848_v32  ;;  %v1008_v32 = vmul.f32 %v11534_v48, %v971_v58  ;;  %v11576_v58 = vsub.s32 5, %v11421_v34  ;;  %v11634_v34 = vrot.slane %v11484_v57, %v11617_v62 }
 0x256   : > { %9851 = vmatpush1.bf16.msra.mxu1 %v9850_v38 }
 0x257   : > { %v11527_v37 = vpop.permute.xlu1 %890  ;;  %v11529_v45 = vpop.permute.xlu0 %1186  ;;  %v9854_v16 = vpack.c.bf16 %v1008_v32, %v943_v22  ;;  %17748 = vst [vmem:[#allocation28_spill] sm:$0xff] %v11576_v58  ;;  %v11590_v22 = vrot.slane %v11484_v57, %v11576_v58  ;;  %17756 = vst [vmem:[#allocation36_spill] sm:$0xff] %v11634_v34 }
 0x258   : > { %v905_v7 = vsel %vm900_vm4, %v11393_v15, %v11527_v37 }
 0x259   : > { %v944_v17 = vmul.f32 %v11542_v0, %v905_v7  ;;  %v11583_v7 = vrot.slane %v11471_v51, %v11576_v58  ;;  %17750 = vst [vmem:[#allocation30_spill] sm:$0xff] %v11590_v22 }
 0x25b   : > { %v11560_v10 = vpop.permute.xlu1 %955  ;;  %v1061_v30 = vpop.permute.xlu0 %1060  ;;  %17749 = vst [vmem:[#allocation29_spill] sm:$0xff] %v11583_v7 }
 0x25c   : > { %v970_v38 = vsel %vm965_vm3, %v11401_v24, %v11560_v10 }
 0x25d   : > { %v1009_v27 = vmul.f32 %v11546_v1, %v970_v38 }
 0x25f   : > { %v1126_v26 = vpop.permute.xlu1 %1125  ;;  %v11570_v21 = vpop.permute.xlu0 %1251  ;;  %v9852_v15 = vpack.c.bf16 %v1009_v27, %v944_v17  ;;  %v1075_v17 = vsel %vm1070_vm5, %v11385_v13, %v1061_v30  ;;  %v11598_v27 = vrot.slane %v11471_v51, %v11573_v20 }
 0x260   : > { %v1113_v38 = vmul.f32 %v11583_v7, %v1075_v17 }
 0x261   : > { %9853 = vmatprep.subr.bf16.mxu1 %v9852_v15  ;;  %17752 = vst [vmem:[#allocation32_spill] sm:$0xff] %v11598_v27  ;;  %v1048_v18 = vmul.f32 %v11598_v27, %v11238_v54 }
 0x262   : > { %9855 = vmatpush1.bf16.msra.mxu1 %v9854_v16  ;;  %v11594_v16 = vrot.slane %v11484_v57, %v11573_v20 }
 0x263   : > { %v1191_v24 = vpop.permute.xlu1 %1190  ;;  %v11578_v48 = vpop.permute.xlu0 %760 }
 0x264   : > { %17751 = vst [vmem:[#allocation31_spill] sm:$0xff] %v11594_v16  ;;  %v1049_v0 = vmul.f32 %v11594_v16, %v11284_v63  ;;  %v11626_v63 = vrot.slane %v11471_v51, %v11612_v56  ;;  %v1205_v54 = vsel %vm1200_vm6, %v11464_v49, %v1191_v24 }
 0x266   : > { %17755 = vst [vmem:[#allocation35_spill] sm:$0xff] %v11626_v63 }
 0x267   : > { %v11600_v9 = vpop.permute.xlu0 %827  ;;  %v11602_v32 = vpop.permute.xlu1 %1062 }
 0x268   : > { %v1074_v15 = vsel %vm1070_vm5, %v1061_v30, %v11602_v32  ;;  %v9858_v30 = vpack.c.bf16 %v1113_v38, %v1048_v18  ;;  %v11642_v18 = vrot.slane %v11471_v51, %v11617_v62  ;;  %v1140_v38 = vsel %vm1135_vm7, %v11460_v46, %v1126_v26 }
 0x269   : > { %v1114_v5 = vmul.f32 %v11590_v22, %v1074_v15 }
 0x26a   : > { %17758 = vst [vmem:[#allocation38_spill] sm:$0xff] %v11642_v18 }
 0x26b   : > { %v11619_v40 = vpop.permute.xlu0 %1127  ;;  %v11621_v17 = vpop.permute.xlu1 %892  ;;  %v9856_v7 = vpack.c.bf16 %v1114_v5, %v1049_v0  ;;  %v11638_v0 = vrot.slane %v11484_v57, %v11612_v56  ;;  %v1243_v57 = vmul.f32 %v11626_v63, %v1205_v54  ;;  %v313_v54 = vld [vmem:[%s17263_s2] sm:$0xff] }
 0x26c   : > { %v1139_v5 = vsel %vm1135_vm7, %v1126_v26, %v11619_v40 }
 0x26d   : > { %9857 = vmatprep.subr.bf16.mxu1 %v9856_v7  ;;  %17757 = vst [vmem:[#allocation37_spill] sm:$0xff] %v11638_v0  ;;  %v1179_v16 = vmul.f32 %v11634_v34, %v1139_v5  ;;  %v972_v5 = vsel %vm965_vm3, %v11413_v29, %v11466_v50  ;;  %v907_v50 = vsel %vm900_vm4, %v11403_v25, %v11462_v47 }
 0x26e   : > { %9859 = vmatpush1.bf16.msra.mxu1 %v9858_v30  ;;  %v1178_v30 = vmul.f32 %v11642_v18, %v1140_v38  ;;  %v11677_v38 = vrot.slane %v313_v54, %v11427_v36  ;;  %v11705_v18 = vld [vmem:[%s17263_s2 + $0x28] sm:$0xff]  ;;  %v11718_v34 = vrot.slane %v11439_v39, %v11573_v20 }
 0x26f   : > { %v11650_v15 = vpop.permute.xlu0 %1192  ;;  %v11652_v7 = vpop.permute.xlu1 %957 }
 0x270   : > { %v1204_v51 = vsel %vm1200_vm6, %v1191_v24, %v11650_v15  ;;  %v9862_v24 = vpack.c.bf16 %v1243_v57, %v1178_v30  ;;  %17760 = vst [vmem:[#allocation40_spill] sm:$0xff] %v11677_v38  ;;  %v11689_v57 = vld [vmem:[%s17263_s2 + $0x20] sm:$0xff]  ;;  %17764 = vst [vmem:[#allocation44_spill] sm:$0xff] %v11718_v34 }
 0x271   : > { %v1244_v22 = vmul.f32 %v11638_v0, %v1204_v51  ;;  %v11696_v51 = vrot.slane %v313_v54, %v11573_v20  ;;  %v1007_v0 = vmul.f32 %v11667_v61, %v972_v5  ;;  %v11724_v5 = vrot.slane %v11689_v57, %v11573_v20 }
 0x273   : > { %v11661_v27 = vpop.permute.xlu0 %764  ;;  %v11663_v1 = vpop.permute.xlu1 %1066  ;;  %v9860_v26 = vpack.c.bf16 %v1244_v22, %v1179_v16  ;;  %v11680_v22 = vrot.slane %v313_v54, %v11424_v35  ;;  %v11684_v16 = vrot.slane %v11439_v39, %v11524_v44  ;;  %17763 = vst [vmem:[#allocation43_spill] sm:$0xff] %v11696_v51  ;;  %17765 = vst [vmem:[#allocation45_spill] sm:$0xff] %v11724_v5 }
 0x275   : > { %9861 = vmatprep.subr.bf16.mxu1 %v9860_v26  ;;  %17761 = vst [vmem:[#allocation41_spill] sm:$0xff] %v11680_v22  ;;  %17762 = vst [vmem:[#allocation42_spill] sm:$0xff] %v11684_v16  ;;  %v942_v61 = vmul.f32 %v11684_v16, %v907_v50  ;;  %v1047_v50 = vmul.f32 %v11718_v34, %v11264_v60  ;;  %v11761_v60 = vrot.slane %v313_v54, %v11576_v58 }
 0x276   : > { %9863 = vmatpush1.bf16.msra.mxu1 %v9862_v24  ;;  %v11794_v34 = vrot.slane %v11689_v57, %v11424_v35  ;;  %v11806_v16 = vrot.slane %v11689_v57, %v11427_v36 }
 0x277   : > { %v11698_v30 = vpop.permute.xlu0 %833  ;;  %v11700_v26 = vpop.permute.xlu1 %766  ;;  %17771 = vst [vmem:[#allocation51_spill] sm:$0xff] %v11761_v60 }
 0x278   : > { %v843_v24 = vsel %vm835_vm2, %v11698_v30, %v11395_v23  ;;  %v778_v47 = vsel %vm770_vm1, %v11700_v26, %v11387_v14  ;;  %v11729_v23 = vrot.slane %v11705_v18, %v11573_v20  ;;  %17776 = vst [vmem:[#allocation56_spill] sm:$0xff] %v11794_v34  ;;  %17777 = vst [vmem:[#allocation57_spill] sm:$0xff] %v11806_v16 }
 0x279   : > { %v876_v63 = vmul.f32 %v11677_v38, %v843_v24  ;;  %v811_v59 = vmul.f32 %v11680_v22, %v778_v47  ;;  %v11737_v24 = vmul.f32 %v11696_v51, %v11236_v53  ;;  %v11741_v47 = vrot.slane %v11439_v39, %v11576_v58 }
 0x27a   : > { %17766 = vst [vmem:[#allocation46_spill] sm:$0xff] %v11729_v23  ;;  %v9836_v38 = vpack.c.bf16 %v1007_v0, %v942_v61  ;;  %v11753_v53 = vrot.slane %v313_v54, %v11521_v43  ;;  %v11757_v51 = vmul.f32 %v11724_v5, %v11312_v2  ;;  %v11772_v61 = vrot.slane %v313_v54, %v11617_v62 }
 0x27b   : > { %v9834_v8 = vpack.c.bf16 %v876_v63, %v811_v59  ;;  %v11731_v14 = vpop.permute.xlu0 %1255  ;;  %v11733_v6 = vpop.permute.xlu1 %898  ;;  %17767 = vst [vmem:[#allocation47_spill] sm:$0xff] %v11741_v47  ;;  %v1076_v59 = vsel %vm1070_vm5, %v11516_v19, %v11385_v13  ;;  %v11750_v63 = vrot.slane %v313_v54, %v11524_v44  ;;  %v11776_v2 = vrot.slane %v11439_v39, %v11617_v62 }
 0x27c   : > { %17769 = vst [vmem:[#allocation49_spill] sm:$0xff] %v11753_v53  ;;  %17770 = vst [vmem:[#allocation50_spill] sm:$0xff] %v11757_v51  ;;  %v908_v13 = vsel %vm900_vm4, %v11733_v6, %v11403_v25  ;;  %v11779_v0 = vrot.slane %v313_v54, %v11612_v56  ;;  %v11783_v5 = vrot.slane %v11439_v39, %v11612_v56 }
 0x27d   : > { %17768 = vst [vmem:[#allocation48_spill] sm:$0xff] %v11750_v63  ;;  %9835 = vmatpush1.bf16.msra.mxu0 %v9834_v8  ;;  %v11769_v8 = vmul.f32 %v11729_v23, %v11357_v11  ;;  %17772 = vst [vmem:[#allocation52_spill] sm:$0xff] %v11772_v61  ;;  %v1077_v11 = vsel %vm1070_vm5, %v11453_v41, %v11516_v19  ;;  %v1112_v23 = vmul.f32 %v11741_v47, %v1076_v59  ;;  %v11811_v19 = vld [vmem:[%s17263_s2 + $0x38] sm:$0xff] }
 0x27e   : > { %9837 = vmatprep.subr.bf16.mxu0 %v9836_v38  ;;  %17773 = vst [vmem:[#allocation53_spill] sm:$0xff] %v11776_v2  ;;  %17774 = vst [vmem:[#allocation54_spill] sm:$0xff] %v11779_v0  ;;  %v1206_v54 = vsel %vm1200_vm6, %v11529_v45, %v11464_v49  ;;  %v941_v59 = vmul.f32 %v11750_v63, %v908_v13  ;;  %v11821_v49 = vrot.slane %v11689_v57, %v11524_v44 }
 0x27f   : > { %17775 = vst [vmem:[#allocation55_spill] sm:$0xff] %v11783_v5  ;;  %v11785_v25 = vpop.permute.xlu0 %963  ;;  %v832_v38 = vpop.permute.xlu1 %831  ;;  %v11825_v22 = vrot.slane %v11689_v57, %v11521_v43  ;;  %v11829_v41 = vrot.slane %v11811_v19, %v11424_v35  ;;  %v1111_v13 = vmul.f32 %v11761_v60, %v1077_v11  ;;  %v1142_v20 = vsel %vm1135_vm7, %v11411_v28, %v11518_v42 }
 0x280   : > { %v973_v39 = vsel %vm965_vm3, %v11785_v25, %v11413_v29  ;;  %v1207_v29 = vsel %vm1200_vm6, %v11473_v52, %v11529_v45  ;;  %17778 = vst [vmem:[#allocation58_spill] sm:$0xff] %v11821_v49  ;;  %v1242_v11 = vmul.f32 %v11783_v5, %v1206_v54  ;;  %v11849_v60 = vrot.slane %v11811_v19, %v11524_v44 }
 0x281   : > { %v1006_v47 = vmul.f32 %v11753_v53, %v973_v39  ;;  %17779 = vst [vmem:[#allocation59_spill] sm:$0xff] %v11825_v22  ;;  %17780 = vst [vmem:[#allocation60_spill] sm:$0xff] %v11829_v41  ;;  %v1141_v39 = vsel %vm1135_vm7, %v11518_v42, %v11460_v46  ;;  %v11838_v53 = vrot.slane %v11811_v19, %v11427_v36  ;;  %v11854_v46 = vld [vmem:[%s17263_s2 + $0x30] sm:$0xff] }
 0x282   : > { %17782 = vst [vmem:[#allocation62_spill] sm:$0xff] %v11849_v60  ;;  %v11859_v51 = vrot.slane %v11705_v18, %v11424_v35  ;;  %v11863_v42 = vrot.slane %v11854_v46, %v11424_v35  ;;  %v11867_v54 = vrot.slane %v11705_v18, %v11524_v44  ;;  %v1177_v5 = vmul.f32 %v11776_v2, %v1141_v39  ;;  %v9707_v39 = vld [vmem:[%s17263_s2 + $0x40] ss:$0 sm:$0xff] }
 0x283   : > { %v9838_v45 = vpack.c.bf16 %v1006_v47, %v941_v59  ;;  %17781 = vst [vmem:[#allocation61_spill] sm:$0xff] %v11838_v53  ;;  %v11840_v63 = vpop.permute.xlu0 %896  ;;  %v763_v52 = vpop.permute.xlu1 %762  ;;  %v9840_v47 = vpack.c.bf16 %v1112_v23, %v1047_v50  ;;  %v1241_v59 = vmul.f32 %v11779_v0, %v1207_v29  ;;  %v11872_v23 = vrot.slane %v11854_v46, %v11524_v44 }
 0x284   : > { %17783 = vst [vmem:[#allocation63_spill] sm:$0xff] %v11859_v51  ;;  %17784 = vst [vmem:[#allocation64_spill] sm:$0xff] %v11863_v42  ;;  %v11876_v50 = vrot.slane %v11705_v18, %v11427_v36  ;;  %v11880_v29 = vrot.slane %v11854_v46, %v11427_v36  ;;  %v1176_v35 = vmul.f32 %v11772_v61, %v1142_v20  ;;  %v9708_v20 = vld [vmem:[%s17263_s2 + $0x48] ss:$0 sm:$0xff] }
 0x285   : > { %9839 = vmatpush1.bf16.msra.mxu0 %v9838_v45  ;;  %17785 = vst [vmem:[#allocation65_spill] sm:$0xff] %v11867_v54  ;;  %17786 = vst [vmem:[#allocation66_spill] sm:$0xff] %v11872_v23  ;;  %v9842_v45 = vpack.c.bf16 %v1111_v13, %v11737_v24  ;;  %v1272_v44 = vsel %vm17702_vm8, %v11417_v31, %v11570_v21  ;;  %v836_v24 = vsel %vm835_vm2, %v832_v38, %v11698_v30 }
 0x286   : > { %9841 = vmatprep.subr.bf16.mxu0 %v9840_v47  ;;  %17787 = vst [vmem:[#allocation67_spill] sm:$0xff] %v11876_v50  ;;  %17788 = vst [vmem:[#allocation68_spill] sm:$0xff] %v11880_v29  ;;  %v1271_v47 = vsel %vm17702_vm8, %v11570_v21, %v11505_v3  ;;  %v9844_v13 = vpack.c.bf16 %v1242_v11, %v1177_v5  ;;  %v11905_v61 = vrot.slane %v11705_v18, %v11521_v43 }
 0x287   : > { %v11895_v36 = vpop.permute.xlu0 %894  ;;  %v830_v0 = vpop.permute.xlu1 %829  ;;  %v11909_v2 = vrot.slane %v11689_v57, %v11576_v58  ;;  %v9846_v21 = vpack.c.bf16 %v1241_v59, %v1176_v35  ;;  %v11913_v31 = vrot.slane %v11705_v18, %v11576_v58  ;;  %v11917_v28 = vrot.slane %v11689_v57, %v11617_v62  ;;  %v9710_v59 = vld [vmem:[%s17263_s2 + $0x58] ss:$0 sm:$0xff] }
 0x288   : > { %17789 = vst [vmem:[#allocation69_spill] sm:$0xff] %v11905_v61  ;;  %v1306_v30 = vmul.f32 %v9707_v39, %v1272_v44  ;;  %v837_v5 = vsel %vm835_vm2, %v830_v0, %v832_v38  ;;  %v838_v11 = vsel %vm835_vm2, %v11600_v9, %v830_v0  ;;  %v1307_v35 = vmul.f32 %v9708_v20, %v1271_v47  ;;  %v9709_v0 = vld [vmem:[%s17263_s2 + $0x50] ss:$0 sm:$0xff] }
 0x289   : > { %17790 = vst [vmem:[#allocation70_spill] sm:$0xff] %v11909_v2  ;;  %9843 = vmatpush1.bf16.msra.mxu0 %v9842_v45  ;;  %17791 = vst [vmem:[#allocation71_spill] sm:$0xff] %v11913_v31  ;;  %v839_v45 = vsel %vm835_vm2, %v11507_v4, %v11600_v9  ;;  %v771_v44 = vsel %vm770_vm1, %v11661_v27, %v11700_v26  ;;  %v1270_v38 = vsel %vm17702_vm8, %v11505_v3, %v11731_v14 }
 0x28a   : > { %17792 = vst [vmem:[#allocation72_spill] sm:$0xff] %v11917_v28  ;;  %9845 = vmatprep.subr.bf16.mxu0 %v9844_v13  ;;  %v883_v39 = vmul.f32 %v11838_v53, %v836_v24  ;;  %v772_v4 = vsel %vm770_vm1, %v763_v52, %v11661_v27  ;;  %v773_v9 = vsel %vm770_vm1, %v11578_v48, %v763_v52 }
 0x28b   : > { %v11943_v47 = vpop.permute.xlu0 %959  ;;  %v11945_v20 = vpop.permute.xlu1 %1257  ;;  %v774_v24 = vsel %vm770_vm1, %v11475_v55, %v11578_v48  ;;  %v881_v27 = vmul.f32 %v11876_v50, %v838_v11  ;;  %v882_v13 = vmul.f32 %v11880_v29, %v837_v5  ;;  %v880_v53 = vmul.f32 %v11806_v16, %v839_v45 }
 0x28c   : > { %v968_v26 = vsel %vm965_vm3, %v11652_v7, %v11943_v47  ;;  %v1269_v3 = vsel %vm17702_vm8, %v11731_v14, %v11945_v20  ;;  %v818_v58 = vmul.f32 %v11829_v41, %v771_v44  ;;  %v1308_v28 = vmul.f32 %v9709_v0, %v1270_v38 }
 0x28d   : > { %9847 = vmatpush1.bf16.msra.mxu0 %v9846_v21  ;;  %v1309_v52 = vmul.f32 %v9710_v59, %v1269_v3  ;;  %v903_v14 = vsel %vm900_vm4, %v11621_v17, %v11895_v36  ;;  %v969_v55 = vsel %vm965_vm3, %v11560_v10, %v11652_v7  ;;  %v816_v48 = vmul.f32 %v11859_v51, %v773_v9 }
 0x28e   : > { %1335 = vmatprep.subr.mxu0 %v1307_v35  ;;  %v817_v21 = vmul.f32 %v11863_v42, %v772_v4  ;;  %v1011_v5 = vmul.f32 %v11905_v61, %v968_v26  ;;  %v815_v45 = vmul.f32 %v11794_v34, %v774_v24  ;;  %v904_v35 = vsel %vm900_vm4, %v11527_v37, %v11621_v17  ;;  %v17848_v61 = vld [vmem:[#allocation13_spill] sm:$0xff] }
 0x28f   : > { %v1065_v11 = vpop.permute.xlu0 %1064  ;;  %v11980_v59 = vpop.permute.xlu1 %1131  ;;  %1406 = vmatprep.subr.mxu1 %v1309_v52  ;;  %v9880_v7 = vpack.c.bf16 %v883_v39, %v818_v58  ;;  %v946_v44 = vmul.f32 %v11867_v54, %v903_v14  ;;  %v9864_v38 = vpack.c.bf16 %v881_v27, %v816_v48  ;;  %v1010_v9 = vmul.f32 %v11825_v22, %v969_v55  ;;  %v17849_v22 = vld [vmem:[#allocation20_spill] sm:$0xff]  ;;  %v17851_v34 = vld [vmem:[#allocation17_spill] sm:$0xff] }
 0x290   : > { %v1072_v10 = vsel %vm1070_vm5, %v1065_v11, %v11663_v1  ;;  %1407 = vmatpush1.msra.mxu1 %v1308_v28  ;;  %v9882_v0 = vpack.c.bf16 %v882_v13, %v817_v21  ;;  %v9866_v4 = vpack.c.bf16 %v880_v53, %v815_v45  ;;  %v11998_v37 = vrot.slane %v11705_v18, %v11617_v62 }
 0x291   : > { %1336 = vmatpush1.msra.mxu0 %v1306_v30  ;;  %9716 = vmatmul.mubr.msk.f32.vlgmr.msra.gmra.mrb[4].mxu1 %vm1316_vm9, %v11379_v12  ;;  %v1073_v28 = vsel %vm1070_vm5, %v11602_v32, %v1065_v11  ;;  %v1116_v58 = vmul.f32 %v11913_v31, %v1072_v10  ;;  %v9868_v30 = vpack.c.bf16 %v1011_v5, %v946_v44  ;;  %v17794_v3 = vmov 0.0   ;;  %v17799_v44 = vld [vmem:[#allocation50_spill] sm:$0xff] }
 0x292   : > { %9881 = vmatprep.subr.bf16.mxu1 %v9880_v7  ;;  %9715 = vmatmul.mubr.msk.f32.vlgmr.msra.gmra.mrb[4].mxu0 %vm1316_vm9, %v11379_v12  ;;  %17793 = vst [vmem:[#allocation73_spill] sm:$0xff] %v11998_v37  ;;  %v945_v39 = vmul.f32 %v11821_v49, %v904_v35  ;;  %v901_v26 = vsel %vm900_vm4, %v11840_v63, %v11733_v6 }
 0x293   : > { %9865 = vmatprep.subr.bf16.mxu0 %v9864_v38  ;;  %9883 = vmatpush1.bf16.msra.mxu1 %v9882_v0  ;;  %v1130_v17 = vpop.permute.xlu0 %1129  ;;  %v12004_v53 = vpop.permute.xlu1 %1196  ;;  %v902_v32 = vsel %vm900_vm4, %v11895_v36, %v11840_v63  ;;  %v12018_v24 = vrot.slane %v11705_v18, %v11612_v56  ;;  %v12022_v27 = vrot.slane %v11854_v46, %v11521_v43  ;;  %v17800_v38 = vld [vmem:[#allocation27_spill] sm:$0xff] }
 0x294   : > { %9867 = vmatpush1.bf16.msra.mxu0 %v9866_v4  ;;  %1525 = vmatprep.mubr.f32.mxu0 %v17794_v3  ;;  %v12026_v6 = vrot.slane %v11811_v19, %v11521_v43  ;;  %v9870_v13 = vpack.c.bf16 %v1010_v9, %v945_v39  ;;  %v1115_v36 = vmul.f32 %v11909_v2, %v1073_v28  ;;  %v17803_v39 = vld [vmem:[#allocation72_spill] sm:$0xff]  ;;  %v17847_v2 = vld [vmem:[#allocation25_spill] sm:$0xff] }
 0x295   : > { %9869 = vmatprep.subr.bf16.mxu0 %v9868_v30  ;;  %17795 = vst [vmem:[#allocation74_spill] sm:$0xff] %v12018_v24  ;;  %17796 = vst [vmem:[#allocation75_spill] sm:$0xff] %v12022_v27  ;;  %1596 = vmatprep.mubr.f32.mxu1 %v17794_v3  ;;  %v1137_v63 = vsel %vm1135_vm7, %v1130_v17, %v11980_v59  ;;  %v12035_v18 = vrot.slane %v11689_v57, %v11612_v56 }
 0x296   : > { %17797 = vst [vmem:[#allocation76_spill] sm:$0xff] %v12026_v6  ;;  %v948_v52 = vmul.f32 %v11849_v60, %v901_v26  ;;  %v947_v14 = vmul.f32 %v11872_v23, %v902_v32  ;;  %v1138_v55 = vsel %vm1135_vm7, %v11619_v40, %v1130_v17  ;;  %v9872_v5 = vpack.c.bf16 %v1116_v58, %v11769_v8 }
 0x297   : > { %17798 = vst [vmem:[#allocation77_spill] sm:$0xff] %v12035_v18  ;;  %v1195_v48 = vpop.permute.xlu0 %1194  ;;  %v962_v21 = vpop.permute.xlu1 %961  ;;  %v1181_v35 = vmul.f32 %v11998_v37, %v1137_v63  ;;  %v12070_v30 = vrot.slane %v11811_v19, %v17800_v38  ;;  %v1180_v26 = vmul.f32 %v17803_v39, %v1138_v55  ;;  %v9711_v55 = vld [vmem:[%s17263_s2 + $0x60] ss:$0 sm:$0xff] }
 0x298   : > { %v1202_v11 = vsel %vm1200_vm6, %v1195_v48, %v12004_v53  ;;  %v1203_v57 = vsel %vm1200_vm6, %v11650_v15, %v1195_v48  ;;  %v966_v45 = vsel %vm965_vm3, %v962_v21, %v11785_v25  ;;  %v967_v40 = vsel %vm965_vm3, %v11943_v47, %v962_v21  ;;  %9871 = vmatpush1.bf16.msra.mxu0 %v9870_v13  ;;  %v9712_v47 = vld [vmem:[%s17263_s2 + $0x68] ss:$0 sm:$0xff] }
 0x299   : > { %v1246_v8 = vmul.f32 %v12018_v24, %v1202_v11  ;;  %v1012_v10 = vmul.f32 %v12022_v27, %v967_v40  ;;  %v1013_v7 = vmul.f32 %v12026_v6, %v966_v45  ;;  %9873 = vmatprep.subr.bf16.mxu0 %v9872_v5  ;;  %v9874_v15 = vpack.c.bf16 %v1115_v36, %v17799_v44  ;;  %v17804_v13 = vld [vmem:[#allocation28_spill] sm:$0xff]  ;;  %v17807_v5 = vld [vmem:[#allocation7_spill] sm:$0xff] }
 0x29a   : > { %v1245_v0 = vmul.f32 %v12035_v18, %v1203_v57  ;;  %v12063_v25 = vrot.slane %v11854_v46, %v17800_v38  ;;  %17802 = vst [vmem:[#allocation78_spill] sm:$0xff] %v12070_v30  ;;  %v12077_v36 = vrot.slane %v11854_v46, %v17804_v13  ;;  %v12081_v63 = vrot.slane %v11811_v19, %v17804_v13  ;;  %v17809_v40 = vld [vmem:[#allocation8_spill] sm:$0xff] }
 0x29b   : > { %v9886_v4 = vpack.c.bf16 %v1012_v10, %v947_v14  ;;  %v1262_v9 = vpop.permute.xlu0 %1261  ;;  %v1260_v28 = vpop.permute.xlu1 %1259  ;;  %v9876_v58 = vpack.c.bf16 %v1246_v8, %v1181_v35  ;;  %v9884_v17 = vpack.c.bf16 %v1013_v7, %v948_v52  ;;  %v12093_v45 = vrot.slane %v11854_v46, %v11617_v62  ;;  %v17810_v10 = vld [vmem:[#allocation15_spill] sm:$0xff] }
 0x29c   : > { %17801 = vst [vmem:[#allocation50_spill] sm:$0xff] %v12063_v25  ;;  %v1267_v32 = vsel %vm17702_vm8, %v1260_v28, %v1262_v9  ;;  %9875 = vmatpush1.bf16.msra.mxu0 %v9874_v15  ;;  %17805 = vst [vmem:[#allocation79_spill] sm:$0xff] %v12077_v36  ;;  %v9878_v14 = vpack.c.bf16 %v1245_v0, %v1180_v26  ;;  %v1268_v48 = vsel %vm17702_vm8, %v11945_v20, %v1260_v28  ;;  %v17814_v28 = vld [vmem:[#allocation9_spill] sm:$0xff] }
 0x29d   : > { %9877 = vmatprep.subr.bf16.mxu0 %v9876_v58  ;;  %9885 = vmatprep.subr.bf16.mxu1 %v9884_v17  ;;  %17806 = vst [vmem:[#allocation80_spill] sm:$0xff] %v12081_v63  ;;  %v1311_v52 = vmul.f32 %v9712_v47, %v1267_v32  ;;  %v1052_v11 = vmul.f32 %v12063_v25, %v17807_v5  ;;  %17808 = vst [vmem:[#allocation7_spill] sm:$0xff] %v12093_v45  ;;  %v17816_v5 = vld [vmem:[#allocation10_spill] sm:$0xff] }
 0x29e   : > { %9887 = vmatpush1.bf16.msra.mxu1 %v9886_v4  ;;  %v1053_v35 = vmul.f32 %v12070_v30, %v17809_v40  ;;  %v12105_v7 = vrot.slane %v11811_v19, %v11617_v62  ;;  %v12109_v44 = vrot.slane %v11854_v46, %v11612_v56  ;;  %v12118_v47 = vrot.slane %v11811_v19, %v11612_v56 }
 0x29f   : > { %v1069_v21 = vpop.permute.xlu0 %1068  ;;  %v1134_v57 = vpop.permute.xlu1 %1133  ;;  %v1310_v4 = vmul.f32 %v9711_v55, %v1268_v48 }
 0x2a0   : > { %v1071_v8 = vsel %vm1070_vm5, %v11663_v1, %v1069_v21  ;;  %v1078_v20 = vsel %vm1070_vm5, %v1069_v21, %v17810_v10  ;;  %17811 = vst [vmem:[#allocation8_spill] sm:$0xff] %v12105_v7  ;;  %9879 = vmatpush1.bf16.msra.mxu0 %v9878_v14  ;;  %17812 = vst [vmem:[#allocation15_spill] sm:$0xff] %v12109_v44  ;;  %v1136_v1 = vsel %vm1135_vm7, %v11980_v59, %v1134_v57 }
 0x2a1   : > { %v1117_v15 = vmul.f32 %v12077_v36, %v1071_v8  ;;  %v1118_v0 = vmul.f32 %v12081_v63, %v1078_v20  ;;  %1477 = vmatprep.subr.mxu0 %v1311_v52  ;;  %17813 = vst [vmem:[#allocation81_spill] sm:$0xff] %v12118_v47  ;;  %v1143_v58 = vsel %vm1135_vm7, %v1134_v57, %v17814_v28  ;;  %v17815_v52 = vld [vmem:[#allocation16_spill] sm:$0xff]  ;;  %v17821_v28 = vmov 101  }
 0x2a2   : > { %v1182_v14 = vmul.f32 %v12093_v45, %v1136_v1  ;;  %v1183_v55 = vmul.f32 %v12105_v7, %v1143_v58  ;;  %v17818_v1 = vmov 98   ;;  %v17869_v7 = vld [vmem:[#allocation32_spill] sm:$0xff] }
 0x2a3   : > { %v9890_v46 = vpack.c.bf16 %v1117_v15, %v1052_v11  ;;  %v1199_v17 = vpop.permute.xlu0 %1198  ;;  %v1264_v26 = vpop.permute.xlu1 %1263  ;;  %v9888_v32 = vpack.c.bf16 %v1118_v0, %v1053_v35  ;;  %v9713_v35 = vld [vmem:[%s17263_s2 + $0x70] ss:$0 sm:$0xff]  ;;  %v12153_v15 = vld [vmem:[%s17262_s1 + $0x8] sm:$0xff]  ;;  %v17817_v0 = vmov 97  }
 0x2a4   : > { %v1201_v59 = vsel %vm1200_vm6, %v12004_v53, %v1199_v17  ;;  %v1208_v19 = vsel %vm1200_vm6, %v1199_v17, %v17815_v52  ;;  %1478 = vmatpush1.msra.mxu0 %v1310_v4  ;;  %v1273_v11 = vsel %vm17702_vm8, %v1264_v26, %v17816_v5  ;;  %v9714_v53 = vld [vmem:[%s17263_s2 + $0x78] ss:$0 sm:$0xff]  ;;  %v1266_v8 = vsel %vm17702_vm8, %v1262_v9, %v1264_v26  ;;  %v12158_v9 = vld [vmem:[%s17262_s1 + $0x40] sm:$0xff] }
 0x2a5   : > { %v1247_v48 = vmul.f32 %v12109_v44, %v1201_v59  ;;  %v1248_v21 = vmul.f32 %v12118_v47, %v1208_v19  ;;  %9717 = vmatmul.mubr.msk.f32.vlgmr.msra.gmra.mrb[6].mxu0 %vm1316_vm9, %v11379_v12  ;;  %9889 = vmatprep.subr.bf16.mxu1 %v9888_v32  ;;  %v1313_v10 = vmul.f32 %v9714_v53, %v1273_v11  ;;  %v17820_v4 = vmov 99  }
 0x2a6   : > { %9891 = vmatpush1.bf16.msra.mxu1 %v9890_v46  ;;  %1708 = vmatprep.mubr.f32.mxu0 %v17794_v3  ;;  %v1312_v20 = vmul.f32 %v9713_v35, %v1266_v8 }
 0x2a7   : > { %v9894_v57 = vpack.c.bf16 %v1247_v48, %v1182_v14  ;;  %v9892_v40 = vpack.c.bf16 %v1248_v21, %v1183_v55  ;;  %1956 = vperm.xlu1 %10801, %v12153_v15   ;;  %1961 = vperm.xlu0 %10802, %v12158_v9  }
 0x2a9   : > { %9893 = vmatprep.subr.bf16.mxu1 %v9892_v40 }
 0x2aa   : > { %9895 = vmatpush1.bf16.msra.mxu1 %v9894_v57 }
 0x2ab   : > { %1548 = vmatprep.subr.mxu1 %v1313_v10  ;;  %10803 = vset.pattern.permute.xlu1 %v17817_v0 }
 0x2ac   : > { %10804 = vset.pattern.permute.xlu0 %v17818_v1  ;;  %1981 = vperm.xlu1 %10803, %v12153_v15  }
 0x2ad   : > { %2307 = vperm.xlu0 %10804, %v12153_v15  }
 0x2ae   : > { %1549 = vmatpush1.msra.mxu1 %v1312_v20 }
 0x2af   : > { %9718 = vmatmul.mubr.msk.f32.vlgmr.msra.gmra.mrb[6].mxu1 %vm1316_vm9, %v11379_v12  ;;  %v17819_v12 = vmov 100  }
 0x2b0   : > { %1785 = vmatprep.mubr.f32.mxu1 %v17794_v3  ;;  %1985 = vperm.xlu1 %10803, %v12158_v9  }
 0x2b1   : > { %10806 = vset.pattern.permute.xlu0 %v17819_v12 }
 0x2b4   : > { %10805 = vset.pattern.permute.xlu1 %v17820_v4  ;;  %v1605_v58 = vpop.permute.xlu0 %1604  ;;  %v1617_v17 = vpop.permute.xlu1 %1616 }
 0x2b5   : > { %2319 = vperm.xlu1 %10805, %v12153_v15  }
 0x2b8   : > { %v1636_v40 = vpop.permute.xlu1 %1635  ;;  %v1638_v10 = vpop.permute.xlu0 %1637 }
 0x2b9   : > { %2602 = vrot.lane.b32.xlu1 %v12153_v15, %s11012_s18 }
 0x2ba   : > { %10807 = vset.pattern.permute.xlu1 %v17821_v28 }
 0x364   : > { %v1456_v46 = vpop.f32.mrb[4].mxu1 }
 0x365   : > { %v1609_v26 = vmul.f32 %v1605_v58, %v1456_v46  ;;  %v1385_v32 = vpop.f32.mrb[4].mxu0  ;;  %v1458_v14 = vpop.f32.mrb[5].mxu1 }
 0x366   : > { %v1607_v59 = vmul.f32 %v1605_v58, %v1385_v32  ;;  %v1610_v52 = vmul.f32 %v1605_v58, %v1458_v14  ;;  %v1387_v19 = vpop.f32.mrb[5].mxu0 }
 0x367   : > { %v1608_v55 = vmul.f32 %v1605_v58, %v1387_v19  ;;  %v1621_v48 = vadd.f32 %v1617_v17, %v1609_v26 }
 0x368   : > { %v1622_v21 = vadd.f32 %v1617_v17, %v1610_v52  ;;  %v1619_v5 = vadd.f32 %v1617_v17, %v1607_v59 }
 0x369   : > { %v1620_v11 = vadd.f32 %v1617_v17, %v1608_v55  ;;  %v1629_v35 = vmax.f32 %v1621_v48, 0.0 }
 0x36a   : > { %v1630_v53 = vmax.f32 %v1622_v21, 0.0  ;;  %v1627_v8 = vmax.f32 %v1619_v5, 0.0 }
 0x36b   : > { %v1628_v57 = vmax.f32 %v1620_v11, 0.0 }
 0x36c   : > { %1721 = vmatprep.subr.mxu1 %v1630_v53 }
 0x36d   : > { %1644 = vmatprep.subr.mxu0 %v1628_v57  ;;  %1722 = vmatpush1.msra.mxu1 %v1629_v35 }
 0x36e   : > { %1645 = vmatpush1.msra.mxu0 %v1627_v8  ;;  %9721 = vmatmul.mubr.msk.f32.vlgmr.msra.gmra.mrb[8].mxu1 %vm1639_vm10, %v1636_v40  ;;  %v10908_v8 = vld [vmem:[%s11170_s10 + $0x10] sm:$0xff] }
 0x36f   : > { %9719 = vmatmul.mubr.msk.f32.vlgmr.msra.gmra.mrb[8].mxu0 %vm1639_vm10, %v1636_v40  ;;  %1791 = vmatprep.mubr.f32.mxu1 %v17794_v3 }
 0x370   : > { %1714 = vmatprep.mubr.f32.mxu0 %v17794_v3 }
 0x372   : > { %9722 = vmatmul.mubr.msk.f32.gmra.mrb[10].mxu1 %vm1639_vm10, %v1638_v10 }
 0x373   : > { %9720 = vmatmul.mubr.msk.f32.gmra.mrb[10].mxu0 %vm1639_vm10, %v1638_v10  ;;  %1939 = vmatprep.mubr.f32.mxu1 %v17794_v3 }
 0x374   : > { %1862 = vmatprep.mubr.f32.mxu0 %v17794_v3 }
 0x378   : > { %v1527_v20 = vpop.f32.mrb[6].mxu0 }
 0x379   : > { %v1611_v46 = vmul.f32 %v1605_v58, %v1527_v20  ;;  %v1529_v26 = vpop.f32.mrb[7].mxu0 }
 0x37a   : > { %v1612_v32 = vmul.f32 %v1605_v58, %v1529_v26 }
 0x37b   : > { %v1623_v14 = vadd.f32 %v1617_v17, %v1611_v46 }
 0x37c   : > { %v1624_v59 = vadd.f32 %v1617_v17, %v1612_v32 }
 0x37d   : > { %v1631_v19 = vmax.f32 %v1623_v14, 0.0  ;;  %v10909_v14 = vld [vmem:[%s11170_s10] sm:$0xff] }
 0x37e   : > { %v1632_v52 = vmax.f32 %v1624_v59, 0.0  ;;  %v10910_v59 = vld [vmem:[%s11170_s10 + $0x18] sm:$0xff] }
 0x380   : > { %1798 = vmatprep.subr.mxu0 %v1632_v52 }
 0x381   : > { %1799 = vmatpush1.msra.mxu0 %v1631_v19  ;;  %v10911_v19 = vld [vmem:[%s11170_s10 + $0x8] sm:$0xff] }
 0x382   : > { %9723 = vmatmul.mubr.msk.f32.vlgmr.msra.gmra.mrb[12].mxu0 %vm1639_vm10, %v1636_v40  ;;  %v1598_v55 = vpop.f32.mrb[6].mxu1 }
 0x383   : > { %v1613_v48 = vmul.f32 %v1605_v58, %v1598_v55  ;;  %v1600_v21 = vpop.f32.mrb[7].mxu1  ;;  %1868 = vmatprep.mubr.f32.mxu0 %v17794_v3 }
 0x384   : > { %v1614_v5 = vmul.f32 %v1605_v58, %v1600_v21  ;;  %v12189_v58 = vpop.permute.xlu1 %1956  ;;  %v12205_v21 = vpop.permute.xlu0 %1961 }
 0x385   : > { %v1625_v11 = vadd.f32 %v1617_v17, %v1613_v48 }
 0x386   : > { %v1626_v53 = vadd.f32 %v1617_v17, %v1614_v5  ;;  %9724 = vmatmul.mubr.msk.f32.gmra.mrb[14].mxu0 %vm1639_vm10, %v1638_v10 }
 0x387   : > { %2086 = vmatprep.mubr.f32.mxu0 %v17794_v3  ;;  %v1633_v35 = vmax.f32 %v1625_v11, 0.0  ;;  %v10912_v11 = vld [vmem:[%s11170_s10 + $0x50] sm:$0xff] }
 0x388   : > { %v1634_v57 = vmax.f32 %v1626_v53, 0.0  ;;  %v12194_v32 = vpop.permute.xlu1 %1981 }
 0x38a   : > { %1875 = vmatprep.subr.mxu1 %v1634_v57 }
 0x38b   : > { %1876 = vmatpush1.msra.mxu1 %v1633_v35 }
 0x38c   : > { %9725 = vmatmul.mubr.msk.f32.vlgmr.msra.gmra.mrb[12].mxu1 %vm1639_vm10, %v1636_v40  ;;  %v12229_v62 = vpop.permute.xlu1 %1985 }
 0x38d   : > { %1945 = vmatprep.mubr.f32.mxu1 %v17794_v3 }
 0x390   : > { %9726 = vmatmul.mubr.msk.f32.gmra.mrb[14].mxu1 %vm1639_vm10, %v1638_v10 }
 0x391   : > { %2157 = vmatprep.mubr.f32.mxu1 %v17794_v3 }
 0x441   : > { %v1787_v17 = vpop.f32.mrb[8].mxu1 }
 0x442   : > { %v12192_v20 = vadd.f32 %v10908_v8, %v1787_v17  ;;  %v1710_v46 = vpop.f32.mrb[8].mxu0  ;;  %v1789_v26 = vpop.f32.mrb[9].mxu1 }
 0x443   : > { %v12197_v40 = vadd.f32 %v10909_v14, %v1710_v46  ;;  %v12200_v10 = vadd.f32 %v10910_v59, %v1789_v26  ;;  %v1712_v52 = vpop.f32.mrb[9].mxu0  ;;  %v10913_v46 = vld [vmem:[%s11170_s10 + $0x40] sm:$0xff]  ;;  %v10914_v14 = vld [vmem:[%s11170_s10 + $0x58] sm:$0xff] }
 0x444   : > { %17822 = vst [vmem:[#allocation9_spill] sm:$0xff] %v12192_v20  ;;  %v12203_v55 = vadd.f32 %v10911_v19, %v1712_v52  ;;  %v1966_v8 = vmul.f32 %v12189_v58, %v12192_v20 }
 0x445   : > { %17823 = vst [vmem:[#allocation16_spill] sm:$0xff] %v12197_v40  ;;  %17824 = vst [vmem:[#allocation10_spill] sm:$0xff] %v12200_v10  ;;  %v1793_v48 = vpop.f32.mrb[10].mxu1  ;;  %v1967_v5 = vmul.f32 %v12189_v58, %v12200_v10  ;;  %v1964_v19 = vmul.f32 %v12189_v58, %v12197_v40 }
 0x446   : > { %17825 = vst [vmem:[#allocation82_spill] sm:$0xff] %v12203_v55  ;;  %v12210_v53 = vadd.f32 %v10912_v11, %v1793_v48  ;;  %v1716_v57 = vpop.f32.mrb[10].mxu0  ;;  %v1795_v35 = vpop.f32.mrb[11].mxu1  ;;  %v1965_v17 = vmul.f32 %v12189_v58, %v12203_v55  ;;  %v10915_v48 = vld [vmem:[%s11170_s10 + $0x48] sm:$0xff] }
 0x447   : > { %v12217_v26 = vadd.f32 %v10913_v46, %v1716_v57  ;;  %v12220_v59 = vadd.f32 %v10914_v14, %v1795_v35  ;;  %v1718_v52 = vpop.f32.mrb[11].mxu0  ;;  %v1991_v57 = vadd.f32 %v12194_v32, %v1967_v5  ;;  %v1988_v43 = vadd.f32 %v12194_v32, %v1964_v19 }
 0x448   : > { %17826 = vst [vmem:[#allocation83_spill] sm:$0xff] %v12210_v53  ;;  %v12225_v11 = vadd.f32 %v10915_v48, %v1718_v52  ;;  %v1974_v56 = vmul.f32 %v12205_v21, %v12210_v53  ;;  %v1989_v14 = vadd.f32 %v12194_v32, %v1965_v17  ;;  %v1990_v52 = vadd.f32 %v12194_v32, %v1966_v8 }
 0x449   : > { %17827 = vst [vmem:[#allocation84_spill] sm:$0xff] %v12217_v26  ;;  %17828 = vst [vmem:[#allocation85_spill] sm:$0xff] %v12220_v59  ;;  %v1975_v13 = vmul.f32 %v12205_v21, %v12220_v59  ;;  %v1972_v35 = vmul.f32 %v12205_v21, %v12217_v26  ;;  %v2007_v59 = vmax.f32 %v1991_v57, 0.0  ;;  %v2004_v8 = vmax.f32 %v1988_v43, 0.0  ;;  %v10917_v43 = vld [vmem:[%s11170_s10 + $0x28] sm:$0xff] }
 0x44a   : > { %17829 = vst [vmem:[#allocation86_spill] sm:$0xff] %v12225_v11  ;;  %v1973_v46 = vmul.f32 %v12205_v21, %v12225_v11  ;;  %v1998_v48 = vadd.f32 %v12229_v62, %v1974_v56  ;;  %v2005_v11 = vmax.f32 %v1989_v14, 0.0  ;;  %v2006_v17 = vmax.f32 %v1990_v52, 0.0 }
 0x44b   : > { %v1999_v38 = vadd.f32 %v12229_v62, %v1975_v13  ;;  %v1996_v55 = vadd.f32 %v12229_v62, %v1972_v35 }
 0x44c   : > { %v1997_v5 = vadd.f32 %v12229_v62, %v1973_v46  ;;  %v2014_v40 = vmax.f32 %v1998_v48, 0.0 }
 0x44d   : > { %v2015_v26 = vmax.f32 %v1999_v38, 0.0  ;;  %v2012_v53 = vmax.f32 %v1996_v55, 0.0  ;;  %v10916_v38 = vld [vmem:[%s11170_s10 + $0x20] sm:$0xff] }
 0x44e   : > { %v2013_v10 = vmax.f32 %v1997_v5, 0.0  ;;  %v9902_v28 = vpack.c.bf16 %v2014_v40, %v2006_v17 }
 0x44f   : > { %v9900_v20 = vpack.c.bf16 %v2015_v26, %v2007_v59  ;;  %v9898_v13 = vpack.c.bf16 %v2012_v53, %v2004_v8 }
 0x450   : > { %v9896_v56 = vpack.c.bf16 %v2013_v10, %v2005_v11  ;;  %v10918_v10 = vld [vmem:[%s11170_s10 + $0x60] sm:$0xff]  ;;  %v10919_v11 = vld [vmem:[%s11170_s10 + $0x68] sm:$0xff] }
 0x451   : > { %9901 = vmatprep.subr.bf16.mxu1 %v9900_v20 }
 0x452   : > { %9897 = vmatprep.subr.bf16.mxu0 %v9896_v56  ;;  %9903 = vmatpush1.bf16.msra.mxu1 %v9902_v28  ;;  %v10920_v56 = vld [vmem:[%s11170_s10 + $0x30] sm:$0xff] }
 0x453   : > { %9899 = vmatpush1.bf16.msra.mxu0 %v9898_v13 }
 0x455   : > { %v1864_v19 = vpop.f32.mrb[12].mxu0  ;;  %9728 = vmatmul.mubr.msk.f32.vlgmr.msra.gmra.mrb[16].mxu1 %vm433_vm0, %v12153_v15 }
 0x456   : > { %v12248_v55 = vadd.f32 %v10916_v38, %v1864_v19  ;;  %v1866_v57 = vpop.f32.mrb[13].mxu0  ;;  %9727 = vmatmul.mubr.msk.f32.vlgmr.msra.gmra.mrb[16].mxu0 %vm433_vm0, %v12153_v15  ;;  %2299 = vmatprep.mubr.f32.mxu1 %v17794_v3 }
 0x457   : > { %v12254_v20 = vadd.f32 %v10917_v43, %v1866_v57  ;;  %2228 = vmatprep.mubr.f32.mxu0 %v17794_v3  ;;  %v10921_v57 = vld [vmem:[%s11170_s10 + $0x38] sm:$0xff] }
 0x458   : > { %17830 = vst [vmem:[#allocation87_spill] sm:$0xff] %v12248_v55  ;;  %v1968_v59 = vmul.f32 %v12189_v58, %v12248_v55 }
 0x459   : > { %17831 = vst [vmem:[#allocation88_spill] sm:$0xff] %v12254_v20  ;;  %v1870_v28 = vpop.f32.mrb[14].mxu0  ;;  %v1969_v40 = vmul.f32 %v12189_v58, %v12254_v20  ;;  %v17843_v20 = vld [vmem:[#allocation19_spill] sm:$0xff] }
 0x45a   : > { %v12260_v53 = vadd.f32 %v10918_v10, %v1870_v28  ;;  %v1872_v26 = vpop.f32.mrb[15].mxu0  ;;  %v1992_v48 = vadd.f32 %v12194_v32, %v1968_v59 }
 0x45b   : > { %v12265_v35 = vadd.f32 %v10919_v11, %v1872_v26  ;;  %v1993_v52 = vadd.f32 %v12194_v32, %v1969_v40 }
 0x45c   : > { %17832 = vst [vmem:[#allocation89_spill] sm:$0xff] %v12260_v53  ;;  %v1976_v46 = vmul.f32 %v12205_v21, %v12260_v53  ;;  %v2008_v40 = vmax.f32 %v1992_v48, 0.0 }
 0x45d   : > { %17833 = vst [vmem:[#allocation90_spill] sm:$0xff] %v12265_v35  ;;  %v1977_v14 = vmul.f32 %v12205_v21, %v12265_v35  ;;  %v2009_v28 = vmax.f32 %v1993_v52, 0.0 }
 0x45e   : > { %v2000_v5 = vadd.f32 %v12229_v62, %v1976_v46  ;;  %v10922_v46 = vld [vmem:[%s11170_s10 + $0x70] sm:$0xff] }
 0x45f   : > { %v1941_v17 = vpop.f32.mrb[12].mxu1  ;;  %v2001_v8 = vadd.f32 %v12229_v62, %v1977_v14 }
 0x460   : > { %v12276_v13 = vadd.f32 %v10920_v56, %v1941_v17  ;;  %v1943_v19 = vpop.f32.mrb[13].mxu1  ;;  %v2016_v38 = vmax.f32 %v2000_v5, 0.0  ;;  %v10923_v5 = vld [vmem:[%s11170_s10 + $0x78] sm:$0xff] }
 0x461   : > { %v12279_v43 = vadd.f32 %v10921_v57, %v1943_v19  ;;  %v2017_v10 = vmax.f32 %v2001_v8, 0.0 }
 0x462   : > { %17834 = vst [vmem:[#allocation91_spill] sm:$0xff] %v12276_v13  ;;  %v9906_v17 = vpack.c.bf16 %v2016_v38, %v2008_v40  ;;  %v1970_v56 = vmul.f32 %v12189_v58, %v12276_v13  ;;  %v17845_v13 = vmov 96  }
 0x463   : > { %17835 = vst [vmem:[#allocation92_spill] sm:$0xff] %v12279_v43  ;;  %v1947_v26 = vpop.f32.mrb[14].mxu1  ;;  %v9904_v59 = vpack.c.bf16 %v2017_v10, %v2009_v28  ;;  %v1971_v11 = vmul.f32 %v12189_v58, %v12279_v43 }
 0x464   : > { %v12284_v35 = vadd.f32 %v10922_v46, %v1947_v26  ;;  %v1949_v14 = vpop.f32.mrb[15].mxu1  ;;  %v1994_v19 = vadd.f32 %v12194_v32, %v1970_v56 }
 0x465   : > { %v12289_v53 = vadd.f32 %v10923_v5, %v1949_v14  ;;  %9905 = vmatprep.subr.bf16.mxu0 %v9904_v59  ;;  %v1995_v8 = vadd.f32 %v12194_v32, %v1971_v11  ;;  %v12305_v32 = vpop.permute.xlu0 %2307  ;;  %v12307_v11 = vpop.permute.xlu1 %2319 }
 0x466   : > { %17836 = vst [vmem:[#allocation93_spill] sm:$0xff] %v12284_v35  ;;  %9907 = vmatpush1.bf16.msra.mxu0 %v9906_v17  ;;  %v1978_v52 = vmul.f32 %v12205_v21, %v12284_v35  ;;  %v2010_v40 = vmax.f32 %v1994_v19, 0.0 }
 0x467   : > { %17837 = vst [vmem:[#allocation94_spill] sm:$0xff] %v12289_v53  ;;  %v1979_v48 = vmul.f32 %v12205_v21, %v12289_v53  ;;  %v2011_v28 = vmax.f32 %v1995_v8, 0.0 }
 0x468   : > { %v2002_v38 = vadd.f32 %v12229_v62, %v1978_v52 }
 0x469   : > { %9729 = vmatmul.mubr.msk.f32.vlgmr.msra.gmra.mrb[18].mxu0 %vm433_vm0, %v12153_v15  ;;  %v2003_v58 = vadd.f32 %v12229_v62, %v1979_v48 }
 0x46a   : > { %v2018_v57 = vmax.f32 %v2002_v38, 0.0  ;;  %2670 = vmatprep.mubr.f32.mxu0 %v17794_v3 }
 0x46b   : > { %v2019_v10 = vmax.f32 %v2003_v58, 0.0 }
 0x46c   : > { %v9910_v59 = vpack.c.bf16 %v2018_v57, %v2010_v40 }
 0x46d   : > { %v9908_v26 = vpack.c.bf16 %v2019_v10, %v2011_v28 }
 0x46f   : > { %9909 = vmatprep.subr.bf16.mxu1 %v9908_v26 }
 0x470   : > { %9911 = vmatpush1.bf16.msra.mxu1 %v9910_v59 }
 0x473   : > { %9730 = vmatmul.mubr.msk.f32.vlgmr.msra.gmra.mrb[18].mxu1 %vm433_vm0, %v12153_v15 }
 0x474   : > { %2741 = vmatprep.mubr.f32.mxu1 %v17794_v3 }
 0x528   : > { %v2159_v21 = vpop.f32.mrb[16].mxu1 }
 0x529   : > { %v2312_v62 = vmul.f32 %v12305_v32, %v2159_v21  ;;  %v2088_v46 = vpop.f32.mrb[16].mxu0  ;;  %v2161_v14 = vpop.f32.mrb[17].mxu1 }
 0x52a   : > { %v2090_v17 = vpop.f32.mrb[17].mxu0  ;;  %v2313_v5 = vmul.f32 %v12305_v32, %v2161_v14  ;;  %v2310_v58 = vmul.f32 %v12305_v32, %v2088_v46 }
 0x52b   : > { %v2324_v56 = vadd.f32 %v12307_v11, %v2312_v62  ;;  %v2311_v26 = vmul.f32 %v12305_v32, %v2090_v17 }
 0x52c   : > { %v2325_v48 = vadd.f32 %v12307_v11, %v2313_v5  ;;  %v2322_v57 = vadd.f32 %v12307_v11, %v2310_v58 }
 0x52d   : > { %v12312_v52 = vmax.f32 %v2324_v56, 0.0  ;;  %v2323_v59 = vadd.f32 %v12307_v11, %v2311_v26 }
 0x52e   : > { %v12323_v8 = vmax.f32 %v2325_v48, 0.0  ;;  %v12347_v40 = vmax.f32 %v2322_v57, 0.0 }
 0x52f   : > { %2510 = vrot.lane.b32.xlu0 %v12312_v52, %s11018_s11  ;;  %2342 = vrot.lane.b32.xlu1 %v12312_v52, %s11014_s20  ;;  %v12363_v21 = vmax.f32 %v2323_v59, 0.0 }
 0x533   : > { %2574 = vrot.lane.b32.xlu0 %v12312_v52, %s11019_s12  ;;  %2374 = vrot.lane.b32.xlu1 %v12312_v52, %s11016_s27 }
 0x537   : > { %2406 = vrot.lane.b32.xlu1 %v12312_v52, %s17700_s26  ;;  %2344 = vrot.lane.b32.xlu0 %v12323_v8, %s11014_s20 }
 0x53b   : > { %2438 = vrot.lane.b32.xlu1 %v12312_v52, %s11017_s8  ;;  %2376 = vrot.lane.b32.xlu0 %v12323_v8, %s11016_s27 }
 0x53c   : > { %v2230_v19 = vpop.f32.mrb[18].mxu0 }
 0x53d   : > { %v2232_v38 = vpop.f32.mrb[19].mxu0  ;;  %v2314_v48 = vmul.f32 %v12305_v32, %v2230_v19 }
 0x53e   : > { %v2315_v19 = vmul.f32 %v12305_v32, %v2232_v38 }
 0x53f   : > { %2478 = vrot.lane.b32.xlu1 %v12312_v52, %s11013_s19  ;;  %2408 = vrot.lane.b32.xlu0 %v12323_v8, %s17700_s26  ;;  %v2326_v58 = vadd.f32 %v12307_v11, %v2314_v48 }
 0x541   : > { %v12419_v57 = vmax.f32 %v2326_v58, 0.0 }
 0x543   : > { %2542 = vrot.lane.b32.xlu1 %v12312_v52, %s11012_s18  ;;  %2440 = vrot.lane.b32.xlu0 %v12323_v8, %s11017_s8  ;;  %17838 = vst [vmem:[#allocation95_spill] sm:$0xff] %v12419_v57 }
 0x546   : > { %v2301_v28 = vpop.f32.mrb[18].mxu1 }
 0x547   : > { %2480 = vrot.lane.b32.xlu1 %v12323_v8, %s11013_s19  ;;  %2512 = vrot.lane.b32.xlu0 %v12323_v8, %s11018_s11  ;;  %v2303_v10 = vpop.f32.mrb[19].mxu1  ;;  %v2316_v62 = vmul.f32 %v12305_v32, %v2301_v28  ;;  %v2327_v28 = vadd.f32 %v12307_v11, %v2315_v19  ;;  %v17842_v19 = vld [vmem:[#allocation18_spill] sm:$0xff] }
 0x548   : > { %v2317_v17 = vmul.f32 %v12305_v32, %v2303_v10  ;;  %v12453_v32 = vpop.permute.xlu1 %2602 }
 0x549   : > { %v2328_v46 = vadd.f32 %v12307_v11, %v2316_v62  ;;  %v12435_v10 = vmax.f32 %v2327_v28, 0.0 }
 0x54a   : > { %v2329_v56 = vadd.f32 %v12307_v11, %v2317_v17 }
 0x54b   : > { %2544 = vrot.lane.b32.xlu0 %v12323_v8, %s11012_s18  ;;  %2370 = vrot.lane.b32.xlu1 %v12347_v40, %s11016_s27  ;;  %v12379_v14 = vmax.f32 %v2328_v46, 0.0  ;;  %17839 = vst [vmem:[#allocation96_spill] sm:$0xff] %v12435_v10 }
 0x54c   : > { %v12395_v5 = vmax.f32 %v2329_v56, 0.0 }
 0x54f   : > { %2576 = vrot.lane.b32.xlu0 %v12323_v8, %s11019_s12  ;;  %2402 = vrot.lane.b32.xlu1 %v12347_v40, %s17700_s26 }
 0x553   : > { %2474 = vrot.lane.b32.xlu1 %v12347_v40, %s11013_s19  ;;  %2338 = vrot.lane.b32.xlu0 %v12347_v40, %s11014_s20 }
 0x557   : > { %2434 = vrot.lane.b32.xlu0 %v12347_v40, %s11017_s8  ;;  %2340 = vrot.lane.b32.xlu1 %v12363_v21, %s11014_s20 }
 0x55b   : > { %2506 = vrot.lane.b32.xlu0 %v12347_v40, %s11018_s11  ;;  %2404 = vrot.lane.b32.xlu1 %v12363_v21, %s17700_s26 }
 0x55f   : > { %2372 = vrot.lane.b32.xlu0 %v12363_v21, %s11016_s27  ;;  %2540 = vrot.lane.b32.xlu1 %v12363_v21, %s11012_s18 }
 0x563   : > { %2436 = vrot.lane.b32.xlu0 %v12363_v21, %s11017_s8  ;;  %2414 = vrot.lane.b32.xlu1 %v12379_v14, %s17700_s26 }
 0x567   : > { %2476 = vrot.lane.b32.xlu0 %v12363_v21, %s11013_s19  ;;  %2446 = vrot.lane.b32.xlu1 %v12379_v14, %s11017_s8 }
 0x56b   : > { %2508 = vrot.lane.b32.xlu0 %v12363_v21, %s11018_s11  ;;  %2486 = vrot.lane.b32.xlu1 %v12379_v14, %s11013_s19 }
 0x56f   : > { %2350 = vrot.lane.b32.xlu0 %v12379_v14, %s11014_s20  ;;  %2352 = vrot.lane.b32.xlu1 %v12395_v5, %s11014_s20 }
 0x573   : > { %2382 = vrot.lane.b32.xlu0 %v12379_v14, %s11016_s27  ;;  %2384 = vrot.lane.b32.xlu1 %v12395_v5, %s11016_s27 }
 0x577   : > { %2416 = vrot.lane.b32.xlu0 %v12395_v5, %s17700_s26  ;;  %2520 = vrot.lane.b32.xlu1 %v12395_v5, %s11018_s11 }
 0x57b   : > { %2448 = vrot.lane.b32.xlu0 %v12395_v5, %s11017_s8  ;;  %2552 = vrot.lane.b32.xlu1 %v12395_v5, %s11012_s18 }
 0x57f   : > { %2488 = vrot.lane.b32.xlu0 %v12395_v5, %s11013_s19  ;;  %2550 = vrot.lane.b32.xlu1 %v12379_v14, %s11012_s18 }
 0x583   : > { %2514 = vrot.lane.b32.xlu1 %v12419_v57, %s11018_s11  ;;  %2482 = vrot.lane.b32.xlu0 %v12419_v57, %s11013_s19 }
 0x587   : > { %2546 = vrot.lane.b32.xlu1 %v12419_v57, %s11012_s18  ;;  %2538 = vrot.lane.b32.xlu0 %v12347_v40, %s11012_s18 }
 0x58b   : > { %2578 = vrot.lane.b32.xlu1 %v12419_v57, %s11019_s12  ;;  %2518 = vrot.lane.b32.xlu0 %v12379_v14, %s11018_s11 }
 0x58f   : > { %2380 = vrot.lane.b32.xlu1 %v12435_v10, %s11016_s27  ;;  %2348 = vrot.lane.b32.xlu0 %v12435_v10, %s11014_s20 }
 0x593   : > { %2412 = vrot.lane.b32.xlu1 %v12435_v10, %s17700_s26  ;;  %2444 = vrot.lane.b32.xlu0 %v12435_v10, %s11017_s8 }
 0x597   : > { %2378 = vrot.lane.b32.xlu1 %v12419_v57, %s11016_s27  ;;  %2346 = vrot.lane.b32.xlu0 %v12419_v57, %s11014_s20 }
 0x59b   : > { %2570 = vrot.lane.b32.xlu1 %v12347_v40, %s11019_s12  ;;  %2572 = vrot.lane.b32.xlu0 %v12363_v21, %s11019_s12 }
 0x59f   : > { %2582 = vrot.lane.b32.xlu1 %v12379_v14, %s11019_s12  ;;  %2584 = vrot.lane.b32.xlu0 %v12395_v5, %s11019_s12 }
 0x5a1   : > { %v12459_v11 = vpop.permute.xlu0 %2510  ;;  %v2343_v38 = vpop.permute.xlu1 %2342 }
 0x5a3   : > { %2442 = vrot.lane.b32.xlu1 %v12419_v57, %s11017_s8  ;;  %2410 = vrot.lane.b32.xlu0 %v12419_v57, %s17700_s26 }
 0x5a5   : > { %v12465_v26 = vpop.permute.xlu0 %2574  ;;  %v2375_v59 = vpop.permute.xlu1 %2374 }
 0x5a7   : > { %2516 = vrot.lane.b32.xlu1 %v12435_v10, %s11018_s11  ;;  %2484 = vrot.lane.b32.xlu0 %v12435_v10, %s11013_s19 }
 0x5a9   : > { %v2407_v62 = vpop.permute.xlu1 %2406  ;;  %v12471_v46 = vpop.permute.xlu0 %2344 }
 0x5aa   : > { %17840 = vst [vmem:[#allocation97_spill] sm:$0xff] %v12471_v46  ;;  %v2358_v17 = vsel %vm770_vm1, %v2343_v38, %v12471_v46  ;;  %v17867_v46 = vld [vmem:[#allocation55_spill] sm:$0xff] }
 0x5ab   : > { %2580 = vrot.lane.b32.xlu1 %v12435_v10, %s11019_s12  ;;  %2548 = vrot.lane.b32.xlu0 %v12435_v10, %s11012_s18  ;;  %v2365_v28 = vmul.f32 %v2358_v17, %v17842_v19 }
 0x5ad   : > { %v2439_v56 = vpop.permute.xlu1 %2438  ;;  %v12480_v48 = vpop.permute.xlu0 %2376 }
 0x5ae   : > { %17841 = vst [vmem:[#allocation98_spill] sm:$0xff] %v12480_v48  ;;  %v2390_v58 = vsel %vm835_vm2, %v2375_v59, %v12480_v48 }
 0x5af   : > { %v2397_v55 = vmul.f32 %v2390_v58, %v17843_v20  ;;  %2891 = vperm.xlu0 %10806, %v12153_v15   ;;  %2903 = vperm.xlu1 %10807, %v12153_v15  }
 0x5b1   : > { %v12489_v53 = vpop.permute.xlu1 %2478  ;;  %v12491_v35 = vpop.permute.xlu0 %2408  ;;  %v9928_v43 = vpack.c.bf16 %v2397_v55, %v2365_v28 }
 0x5b2   : > { %17844 = vst [vmem:[#allocation99_spill] sm:$0xff] %v12491_v35  ;;  %v2422_v39 = vsel %vm900_vm4, %v2407_v62, %v12491_v35  ;;  %v17852_v35 = vld [vmem:[#allocation24_spill] sm:$0xff] }
 0x5b3   : > { %9929 = vmatprep.subr.bf16.mxu1 %v9928_v43  ;;  %2922 = vrot.lane.b32.xlu1 %v12153_v15, %s17703_s13  ;;  %v2429_v51 = vmul.f32 %v2422_v39, %v17852_v35 }
 0x5b4   : > { %2924 = vrot.lane.b32.xlu0 %v12158_v9, %s17703_s13  ;;  %10808 = vset.pattern.permute.xlu1 %v17845_v13 }
 0x5b5   : > { %v12498_v17 = vpop.permute.xlu1 %2542  ;;  %v12500_v58 = vpop.permute.xlu0 %2440  ;;  %10809 = vset.pattern.permute.xlu0 %v17845_v13 }
 0x5b6   : > { %17846 = vst [vmem:[#allocation100_spill] sm:$0xff] %v12500_v58  ;;  %v2454_v13 = vsel %vm965_vm3, %v2439_v56, %v12500_v58 }
 0x5b7   : > { %v2461_v57 = vmul.f32 %v2454_v13, %v17847_v2 }
 0x5b9   : > { %v12503_v19 = vpop.permute.xlu1 %2480  ;;  %v12505_v20 = vpop.permute.xlu0 %2512 }
 0x5bd   : > { %v12507_v55 = vpop.permute.xlu0 %2544  ;;  %v2371_v43 = vpop.permute.xlu1 %2370 }
 0x5c1   : > { %v12509_v28 = vpop.permute.xlu0 %2576  ;;  %v2403_v15 = vpop.permute.xlu1 %2402 }
 0x5c5   : > { %v12511_v4 = vpop.permute.xlu1 %2474  ;;  %v2339_v9 = vpop.permute.xlu0 %2338 }
 0x5c9   : > { %v2435_v12 = vpop.permute.xlu0 %2434  ;;  %v2341_v1 = vpop.permute.xlu1 %2340 }
 0x5ca   : > { %v2359_v18 = vsel %vm770_vm1, %v2341_v1, %v2343_v38  ;;  %v2360_v37 = vsel %vm770_vm1, %v2339_v9, %v2341_v1  ;;  %v17850_v1 = vld [vmem:[#allocation14_spill] sm:$0xff] }
 0x5cb   : > { %v2363_v38 = vmul.f32 %v2360_v37, %v17848_v61  ;;  %v2364_v58 = vmul.f32 %v2359_v18, %v17849_v22  ;;  %v9932_v37 = vpack.c.bf16 %v2461_v57, %v2429_v51  ;;  %v17853_v61 = vld [vmem:[#allocation26_spill] sm:$0xff]  ;;  %v17854_v22 = vld [vmem:[#allocation23_spill] sm:$0xff] }
 0x5cd   : > { %v12513_v0 = vpop.permute.xlu0 %2506  ;;  %v2405_v24 = vpop.permute.xlu1 %2404 }
 0x5ce   : > { %v2423_v50 = vsel %vm900_vm4, %v2405_v24, %v2407_v62  ;;  %v2424_v57 = vsel %vm900_vm4, %v2403_v15, %v2405_v24 }
 0x5cf   : > { %v2428_v18 = vmul.f32 %v2423_v50, %v17853_v61 }
 0x5d1   : > { %v2373_v10 = vpop.permute.xlu0 %2372  ;;  %v12525_v31 = vpop.permute.xlu1 %2540 }
 0x5d2   : > { %v2391_v54 = vsel %vm835_vm2, %v2373_v10, %v2375_v59  ;;  %v2392_v49 = vsel %vm835_vm2, %v2371_v43, %v2373_v10 }
 0x5d3   : > { %v2395_v44 = vmul.f32 %v2392_v49, %v17850_v1  ;;  %v2396_v16 = vmul.f32 %v2391_v54, %v17851_v34 }
 0x5d5   : > { %v9930_v13 = vpack.c.bf16 %v2396_v16, %v2364_v58  ;;  %v2437_v2 = vpop.permute.xlu0 %2436  ;;  %v12539_v45 = vpop.permute.xlu1 %2414  ;;  %v9912_v59 = vpack.c.bf16 %v2395_v44, %v2363_v38 }
 0x5d6   : > { %v2455_v10 = vsel %vm965_vm3, %v2437_v2, %v2439_v56  ;;  %v2456_v51 = vsel %vm965_vm3, %v2435_v12, %v2437_v2  ;;  %v17858_v2 = vld [vmem:[#allocation42_spill] sm:$0xff] }
 0x5d7   : > { %v2460_v49 = vmul.f32 %v2455_v10, %v17854_v22  ;;  %9913 = vmatprep.subr.bf16.mxu0 %v9912_v59  ;;  %9931 = vmatpush1.bf16.msra.mxu1 %v9930_v13  ;;  %v17855_v13 = vld [vmem:[#allocation39_spill] sm:$0xff]  ;;  %v2427_v22 = vmul.f32 %v2424_v57, %v17858_v2  ;;  %v17862_v2 = vld [vmem:[#allocation44_spill] sm:$0xff] }
 0x5d8   : > { %9933 = vmatprep.subr.bf16.mxu1 %v9932_v37  ;;  %v2459_v59 = vmul.f32 %v2456_v51, %v17855_v13  ;;  %v17856_v37 = vld [vmem:[#allocation41_spill] sm:$0xff] }
 0x5d9   : > { %v9934_v54 = vpack.c.bf16 %v2460_v49, %v2428_v18  ;;  %v2477_v39 = vpop.permute.xlu0 %2476  ;;  %v12545_v35 = vpop.permute.xlu1 %2446  ;;  %v17857_v49 = vld [vmem:[#allocation40_spill] sm:$0xff] }
 0x5da   : > { %v9916_v24 = vpack.c.bf16 %v2459_v59, %v2427_v22  ;;  %v2495_v1 = vsel %vm1070_vm5, %v2477_v39, %v12489_v53  ;;  %v2496_v57 = vsel %vm1070_vm5, %v12511_v4, %v2477_v39  ;;  %v17860_v59 = vld [vmem:[#allocation48_spill] sm:$0xff]  ;;  %v2559_v39 = vsel %vm1200_vm6, %v12525_v31, %v12498_v17 }
 0x5db   : > { %9935 = vmatpush1.bf16.msra.mxu1 %v9934_v54  ;;  %v2563_v48 = vmul.f32 %v2559_v39, %v17867_v46 }
 0x5dd   : > { %v2509_v16 = vpop.permute.xlu0 %2508  ;;  %v12547_v62 = vpop.permute.xlu1 %2486 }
 0x5e1   : > { %v12549_v44 = vpop.permute.xlu0 %2350  ;;  %v12551_v58 = vpop.permute.xlu1 %2352 }
 0x5e2   : > { %v2361_v50 = vsel %vm770_vm1, %v12551_v58, %v2339_v9 }
 0x5e3   : > { %v2362_v18 = vmul.f32 %v2361_v50, %v17856_v37 }
 0x5e5   : > { %v12560_v56 = vpop.permute.xlu0 %2382  ;;  %v2385_v38 = vpop.permute.xlu1 %2384 }
 0x5e6   : > { %v2393_v10 = vsel %vm835_vm2, %v2385_v38, %v2371_v43 }
 0x5e7   : > { %v2394_v54 = vmul.f32 %v2393_v10, %v17857_v49  ;;  %v17859_v10 = vld [vmem:[#allocation47_spill] sm:$0xff]  ;;  %v2467_v49 = vmul.f32 %v12363_v21, %v17862_v2 }
 0x5e8   : > { %v17866_v2 = vld [vmem:[#allocation43_spill] sm:$0xff] }
 0x5e9   : > { %v9914_v61 = vpack.c.bf16 %v2394_v54, %v2362_v18  ;;  %v12568_v34 = vpop.permute.xlu0 %2416  ;;  %v12570_v9 = vpop.permute.xlu1 %2520  ;;  %v2499_v18 = vmul.f32 %v2495_v1, %v17859_v10  ;;  %v17863_v1 = vld [vmem:[#allocation51_spill] sm:$0xff] }
 0x5ea   : > { %v2425_v43 = vsel %vm900_vm4, %v12568_v34, %v2403_v15  ;;  %v17861_v15 = vld [vmem:[#allocation49_spill] sm:$0xff]  ;;  %v2498_v10 = vmul.f32 %v2496_v57, %v17863_v1 }
 0x5eb   : > { %9915 = vmatpush1.bf16.msra.mxu0 %v9914_v61  ;;  %v2527_v61 = vsel %vm1135_vm7, %v2509_v16, %v12459_v11  ;;  %v2426_v54 = vmul.f32 %v2425_v43, %v17860_v59  ;;  %v2494_v43 = vsel %vm1070_vm5, %v12489_v53, %v12503_v19  ;;  %v9920_v21 = vpack.c.bf16 %v2499_v18, %v2467_v49  ;;  %v17868_v57 = vld [vmem:[#allocation29_spill] sm:$0xff]  ;;  %v17870_v18 = vld [vmem:[#allocation30_spill] sm:$0xff] }
 0x5ec   : > { %9917 = vmatprep.subr.bf16.mxu0 %v9916_v24  ;;  %v2466_v59 = vmul.f32 %v12347_v40, %v17866_v2  ;;  %v2468_v53 = vmul.f32 %v12312_v52, %v17869_v7 }
 0x5ed   : > { %v2449_v51 = vpop.permute.xlu0 %2448  ;;  %v12578_v50 = vpop.permute.xlu1 %2552 }
 0x5ee   : > { %v2457_v22 = vsel %vm965_vm3, %v2449_v51, %v2435_v12 }
 0x5ef   : > { %v2458_v24 = vmul.f32 %v2457_v22, %v17861_v15  ;;  %v17865_v22 = vld [vmem:[#allocation53_spill] sm:$0xff] }
 0x5f0   : > { %v2531_v15 = vmul.f32 %v2527_v61, %v17865_v22 }
 0x5f1   : > { %v9918_v37 = vpack.c.bf16 %v2458_v24, %v2426_v54  ;;  %v12598_v12 = vpop.permute.xlu0 %2488  ;;  %v12600_v13 = vpop.permute.xlu1 %2550  ;;  %v2500_v54 = vmul.f32 %v2494_v43, %v17868_v57  ;;  %v9922_v24 = vpack.c.bf16 %v2498_v10, %v2466_v59  ;;  %v2528_v10 = vsel %vm1135_vm7, %v12513_v0, %v2509_v16  ;;  %v17871_v59 = vld [vmem:[#allocation31_spill] sm:$0xff] }
 0x5f2   : > { %17864 = vst [vmem:[#allocation101_spill] sm:$0xff] %v12600_v13  ;;  %v9924_v40 = vpack.c.bf16 %v2563_v48, %v2531_v15  ;;  %v2469_v52 = vmul.f32 %v12323_v8, %v17871_v59  ;;  %v17872_v43 = vld [vmem:[#allocation35_spill] sm:$0xff] }
 0x5f3   : > { %9919 = vmatpush1.bf16.msra.mxu0 %v9918_v37  ;;  %v2558_v37 = vsel %vm1200_vm6, %v12498_v17, %v12507_v55  ;;  %v2526_v17 = vsel %vm1135_vm7, %v12459_v11, %v12505_v20  ;;  %v17874_v11 = vld [vmem:[#allocation36_spill] sm:$0xff] }
 0x5f4   : > { %9921 = vmatprep.subr.bf16.mxu0 %v9920_v21  ;;  %v2564_v21 = vmul.f32 %v2558_v37, %v17872_v43  ;;  %v17876_v37 = vld [vmem:[#allocation54_spill] sm:$0xff] }
 0x5f5   : > { %v12611_v1 = vpop.permute.xlu1 %2514  ;;  %v12613_v13 = vpop.permute.xlu0 %2482 }
 0x5f6   : > { %v2493_v49 = vsel %vm1070_vm5, %v12503_v19, %v12613_v13  ;;  %v2525_v48 = vsel %vm1135_vm7, %v12505_v20, %v12611_v1  ;;  %v9938_v19 = vpack.c.bf16 %v2500_v54, %v2468_v53  ;;  %v2386_v20 = vsel %vm835_vm2, %v12560_v56, %v2385_v38 }
 0x5f7   : > { %v2501_v61 = vmul.f32 %v2493_v49, %v17870_v18  ;;  %9923 = vmatpush1.bf16.msra.mxu0 %v9922_v24  ;;  %v17873_v24 = vld [vmem:[#allocation52_spill] sm:$0xff]  ;;  %v2533_v53 = vmul.f32 %v2525_v48, %v17874_v11  ;;  %v17878_v11 = vld [vmem:[#allocation61_spill] sm:$0xff] }
 0x5f8   : > { %9925 = vmatprep.subr.bf16.mxu0 %v9924_v40  ;;  %v2530_v8 = vmul.f32 %v2528_v10, %v17873_v24  ;;  %v17875_v40 = vld [vmem:[#allocation37_spill] sm:$0xff]  ;;  %v17877_v10 = vld [vmem:[#allocation38_spill] sm:$0xff] }
 0x5f9   : > { %v12639_v15 = vpop.permute.xlu1 %2546  ;;  %v2539_v16 = vpop.permute.xlu0 %2538  ;;  %v9936_v39 = vpack.c.bf16 %v2501_v61, %v2469_v52  ;;  %v2532_v43 = vmul.f32 %v2526_v17, %v17877_v10  ;;  %v10924_v17 = vld [vmem:[%s17263_s2 + $0x58] ss:$0 sm:$0xff] }
 0x5fa   : > { %v2557_v49 = vsel %vm1200_vm6, %v12507_v55, %v12639_v15  ;;  %v2560_v54 = vsel %vm1200_vm6, %v2539_v16, %v12525_v31  ;;  %v2354_v55 = vsel %vm770_vm1, %v12549_v44, %v12551_v58  ;;  %v2590_v58 = vsel %vm17702_vm8, %v12465_v26, %v12509_v28 }
 0x5fb   : > { %v2565_v61 = vmul.f32 %v2557_v49, %v17875_v40  ;;  %v2562_v52 = vmul.f32 %v2560_v54, %v17876_v37  ;;  %9937 = vmatprep.subr.bf16.mxu1 %v9936_v39  ;;  %v9942_v48 = vpack.c.bf16 %v2564_v21, %v2532_v43  ;;  %v2401_v49 = vmul.f32 %v2386_v20, %v17878_v11  ;;  %v10925_v20 = vld [vmem:[%s17263_s2 + $0x50] ss:$0 sm:$0xff]  ;;  %v17934_v40 = vld [vmem:[#allocation94_spill] sm:$0xff] }
 0x5fc   : > { %9939 = vmatpush1.bf16.msra.mxu1 %v9938_v19  ;;  %v2450_v39 = vsel %vm965_vm3, %v12545_v35, %v2449_v51  ;;  %v2369_v21 = vmul.f32 %v2354_v55, %v11829_v41  ;;  %v2418_v51 = vsel %vm900_vm4, %v12539_v45, %v12568_v34 }
 0x5fd   : > { %v9926_v31 = vpack.c.bf16 %v2562_v52, %v2530_v8  ;;  %v12661_v57 = vpop.permute.xlu1 %2578  ;;  %v12663_v59 = vpop.permute.xlu0 %2518  ;;  %v9940_v38 = vpack.c.bf16 %v2565_v61, %v2533_v53  ;;  %v2465_v8 = vmul.f32 %v2450_v39, %v12026_v6  ;;  %v2596_v53 = vmul.f32 %v10925_v20, %v2590_v58 }
 0x5fe   : > { %v2589_v19 = vsel %vm17702_vm8, %v12509_v28, %v12661_v57  ;;  %v9960_v34 = vpack.c.bf16 %v2401_v49, %v2369_v21  ;;  %v2433_v55 = vmul.f32 %v2418_v51, %v11849_v60  ;;  %v2561_v58 = vsel %vm1200_vm6, %v12578_v50, %v2539_v16 }
 0x5ff   : > { %9927 = vmatpush1.bf16.msra.mxu0 %v9926_v31  ;;  %9941 = vmatprep.subr.bf16.mxu1 %v9940_v38  ;;  %v2597_v43 = vmul.f32 %v10924_v17, %v2589_v19  ;;  %v2497_v31 = vsel %vm1070_vm5, %v12598_v12, %v12511_v4  ;;  %v2529_v16 = vsel %vm1135_vm7, %v12570_v9, %v12513_v0 }
 0x600   : > { %9943 = vmatpush1.bf16.msra.mxu1 %v9942_v48  ;;  %v9964_v4 = vpack.c.bf16 %v2465_v8, %v2433_v55  ;;  %v2505_v19 = vmul.f32 %v2497_v31, %v12081_v63  ;;  %v2569_v8 = vmul.f32 %v2561_v58, %v12118_v47  ;;  %v17879_v55 = vld [vmem:[#allocation8_spill] sm:$0xff]  ;;  %v17903_v47 = vld [vmem:[#allocation77_spill] sm:$0xff] }
 0x601   : > { %2693 = vmatprep.subr.mxu1 %v2597_v43  ;;  %v2381_v54 = vpop.permute.xlu1 %2380  ;;  %v2349_v28 = vpop.permute.xlu0 %2348  ;;  %v2537_v31 = vmul.f32 %v2529_v16, %v17879_v55 }
 0x602   : > { %v2387_v61 = vsel %vm835_vm2, %v2381_v54, %v12560_v56  ;;  %v2355_v52 = vsel %vm770_vm1, %v2349_v28, %v12549_v44  ;;  %v2490_v56 = vsel %vm1070_vm5, %v12547_v62, %v12598_v12 }
 0x603   : > { %v2400_v38 = vmul.f32 %v2387_v61, %v11880_v29  ;;  %v2368_v48 = vmul.f32 %v2355_v52, %v11863_v42  ;;  %v2504_v51 = vmul.f32 %v2490_v56, %v12077_v36  ;;  %v2522_v52 = vsel %vm1135_vm7, %v12663_v59, %v12570_v9  ;;  %v17882_v9 = vld [vmem:[#allocation101_spill] sm:$0xff] }
 0x604   : > { %2694 = vmatpush1.msra.mxu1 %v2596_v53  ;;  %v9972_v16 = vpack.c.bf16 %v2569_v8, %v2537_v31  ;;  %v12775_v8 = vld [vmem:[%s17263_s2 + $0x48] ss:$0 sm:$0xff]  ;;  %v17932_v29 = vld [vmem:[#allocation93_spill] sm:$0xff] }
 0x605   : > { %v9962_v39 = vpack.c.bf16 %v2400_v38, %v2368_v48  ;;  %9732 = vmatmul.mubr.msk.f32.vlgmr.msra.gmra.mrb[20].mxu1 %vm1316_vm9, %v12453_v32  ;;  %9961 = vmatprep.subr.bf16.mxu1 %v9960_v34  ;;  %v12708_v44 = vpop.permute.xlu1 %2412  ;;  %v12710_v49 = vpop.permute.xlu0 %2444  ;;  %v17881_v48 = vld [vmem:[#allocation97_spill] sm:$0xff] }
 0x606   : > { %v2419_v12 = vsel %vm900_vm4, %v12708_v44, %v12539_v45  ;;  %v2451_v17 = vsel %vm965_vm3, %v12710_v49, %v12545_v35  ;;  %2883 = vmatprep.mubr.f32.mxu1 %v17794_v3  ;;  %v2473_v45 = vmul.f32 %v12395_v5, %v12070_v30  ;;  %v2472_v35 = vmul.f32 %v12379_v14, %v12063_v25  ;;  %v17880_v14 = vld [vmem:[#allocation98_spill] sm:$0xff] }
 0x607   : > { %v2432_v43 = vmul.f32 %v2419_v12, %v11872_v23  ;;  %v2464_v21 = vmul.f32 %v2451_v17, %v12022_v27  ;;  %9963 = vmatpush1.bf16.msra.mxu1 %v9962_v39  ;;  %v17885_v12 = vld [vmem:[#allocation63_spill] sm:$0xff]  ;;  %v17920_v27 = vld [vmem:[#allocation16_spill] sm:$0xff] }
 0x608   : > { %9965 = vmatprep.subr.bf16.mxu1 %v9964_v4  ;;  %v9968_v5 = vpack.c.bf16 %v2505_v19, %v2473_v45  ;;  %v9970_v39 = vpack.c.bf16 %v2504_v51, %v2472_v35  ;;  %v17884_v19 = vld [vmem:[#allocation67_spill] sm:$0xff]  ;;  %v17886_v45 = vld [vmem:[#allocation57_spill] sm:$0xff] }
 0x609   : > { %v9966_v20 = vpack.c.bf16 %v2464_v21, %v2432_v43  ;;  %v2379_v53 = vpop.permute.xlu1 %2378  ;;  %v2347_v61 = vpop.permute.xlu0 %2346  ;;  %v12769_v35 = vld [vmem:[%s17263_s2 + $0x40] ss:$0 sm:$0xff] }
 0x60a   : > { %v2388_v0 = vsel %vm835_vm2, %v2379_v53, %v2381_v54  ;;  %v2356_v34 = vsel %vm770_vm1, %v2347_v61, %v2349_v28  ;;  %v2389_v38 = vsel %vm835_vm2, %v17880_v14, %v2379_v53  ;;  %v2357_v56 = vsel %vm770_vm1, %v17881_v48, %v2347_v61  ;;  %v17883_v28 = vld [vmem:[#allocation7_spill] sm:$0xff]  ;;  %v17887_v61 = vld [vmem:[#allocation56_spill] sm:$0xff] }
 0x60b   : > { %9967 = vmatpush1.bf16.msra.mxu1 %v9966_v20  ;;  %v2554_v54 = vsel %vm1200_vm6, %v17882_v9, %v12578_v50  ;;  %v2536_v4 = vmul.f32 %v2522_v52, %v17883_v28  ;;  %v2399_v58 = vmul.f32 %v2388_v0, %v17884_v19  ;;  %v2367_v17 = vmul.f32 %v2356_v34, %v17885_v12  ;;  %v17888_v34 = vld [vmem:[#allocation15_spill] sm:$0xff] }
 0x60c   : > { %9969 = vmatprep.subr.bf16.mxu1 %v9968_v5  ;;  %v2398_v53 = vmul.f32 %v2389_v38, %v17886_v45  ;;  %v2366_v20 = vmul.f32 %v2357_v56, %v17887_v61 }
 0x60d   : > { %v2571_v43 = vpop.permute.xlu1 %2570  ;;  %v2573_v21 = vpop.permute.xlu0 %2572  ;;  %v9944_v14 = vpack.c.bf16 %v2399_v58, %v2367_v17 }
 0x60e   : > { %v2591_v51 = vsel %vm17702_vm8, %v2573_v21, %v12465_v26  ;;  %v2592_v50 = vsel %vm17702_vm8, %v2571_v43, %v2573_v21  ;;  %v2568_v26 = vmul.f32 %v2554_v54, %v17888_v34  ;;  %v9946_v48 = vpack.c.bf16 %v2398_v53, %v2366_v20  ;;  %v10928_v54 = vld [vmem:[%s17263_s2 + $0x78] ss:$0 sm:$0xff]  ;;  %v17889_v53 = vld [vmem:[#allocation100_spill] sm:$0xff] }
 0x60f   : > { %v2594_v52 = vmul.f32 %v12769_v35, %v2592_v50  ;;  %9971 = vmatpush1.bf16.msra.mxu1 %v9970_v39  ;;  %v2595_v0 = vmul.f32 %v12775_v8, %v2591_v51  ;;  %v17890_v50 = vld [vmem:[#allocation99_spill] sm:$0xff] }
 0x610   : > { %9973 = vmatprep.subr.bf16.mxu1 %v9972_v16  ;;  %v9974_v38 = vpack.c.bf16 %v2568_v26, %v2536_v4  ;;  %v10929_v4 = vld [vmem:[%s17263_s2 + $0x70] ss:$0 sm:$0xff] }
 0x611   : > { %v2583_v5 = vpop.permute.xlu1 %2582  ;;  %2622 = vmatprep.subr.mxu0 %v2595_v0  ;;  %v2585_v31 = vpop.permute.xlu0 %2584  ;;  %v17891_v0 = vld [vmem:[#allocation59_spill] sm:$0xff] }
 0x612   : > { %v2586_v56 = vsel %vm17702_vm8, %v2583_v5, %v2585_v31  ;;  %v2593_v39 = vsel %vm17702_vm8, %v2585_v31, %v2571_v43  ;;  %2623 = vmatpush1.msra.mxu0 %v2594_v52  ;;  %v17892_v31 = vld [vmem:[#allocation69_spill] sm:$0xff] }
 0x613   : > { %9731 = vmatmul.mubr.msk.f32.vlgmr.msra.gmra.mrb[20].mxu0 %vm1316_vm9, %v12453_v32  ;;  %9945 = vmatprep.subr.bf16.mxu0 %v9944_v14  ;;  %v2601_v21 = vmul.f32 %v10928_v54, %v2593_v39  ;;  %v2600_v58 = vmul.f32 %v10929_v4, %v2586_v56  ;;  %v17894_v56 = vld [vmem:[#allocation65_spill] sm:$0xff] }
 0x614   : > { %9975 = vmatpush1.bf16.msra.mxu1 %v9974_v38  ;;  %9947 = vmatpush1.bf16.msra.mxu0 %v9946_v48  ;;  %v17893_v38 = vld [vmem:[#allocation58_spill] sm:$0xff] }
 0x615   : > { %v2443_v17 = vpop.permute.xlu1 %2442  ;;  %2835 = vmatprep.subr.mxu1 %v2601_v21  ;;  %v2411_v43 = vpop.permute.xlu0 %2410  ;;  %2812 = vmatprep.mubr.f32.mxu0 %v17794_v3 }
 0x616   : > { %v2452_v16 = vsel %vm965_vm3, %v2443_v17, %v12710_v49  ;;  %v2453_v20 = vsel %vm965_vm3, %v17889_v53, %v2443_v17  ;;  %v2420_v51 = vsel %vm900_vm4, %v2411_v43, %v12708_v44  ;;  %v2421_v52 = vsel %vm900_vm4, %v17890_v50, %v2411_v43  ;;  %v17895_v43 = vld [vmem:[#allocation45_spill] sm:$0xff]  ;;  %v17897_v53 = vld [vmem:[#allocation70_spill] sm:$0xff] }
 0x617   : > { %v2462_v26 = vmul.f32 %v2453_v20, %v17891_v0  ;;  %v2463_v14 = vmul.f32 %v2452_v16, %v17892_v31  ;;  %v2430_v48 = vmul.f32 %v2421_v52, %v17893_v38  ;;  %v2431_v49 = vmul.f32 %v2420_v51, %v17894_v56  ;;  %v17896_v16 = vld [vmem:[#allocation95_spill] sm:$0xff]  ;;  %v17899_v52 = vld [vmem:[#allocation46_spill] sm:$0xff] }
 0x618   : > { %2836 = vmatpush1.msra.mxu1 %v2600_v58  ;;  %v2470_v58 = vmul.f32 %v17896_v16, %v17895_v43  ;;  %v17898_v51 = vld [vmem:[#allocation71_spill] sm:$0xff] }
 0x619   : > { %v9950_v39 = vpack.c.bf16 %v2462_v26, %v2430_v48  ;;  %9734 = vmatmul.mubr.msk.f32.vlgmr.msra.gmra.mrb[22].mxu1 %vm1316_vm9, %v12453_v32  ;;  %v2517_v54 = vpop.permute.xlu1 %2516  ;;  %v2485_v21 = vpop.permute.xlu0 %2484  ;;  %v9948_v44 = vpack.c.bf16 %v2463_v14, %v2431_v49  ;;  %v17900_v26 = vld [vmem:[#allocation96_spill] sm:$0xff] }
 0x61a   : > { %v2491_v4 = vsel %vm1070_vm5, %v2485_v21, %v12547_v62  ;;  %v2492_v17 = vsel %vm1070_vm5, %v12613_v13, %v2485_v21  ;;  %3071 = vmatprep.mubr.f32.mxu1 %v17794_v3  ;;  %v2471_v14 = vmul.f32 %v17900_v26, %v17899_v52  ;;  %v2523_v62 = vsel %vm1135_vm7, %v2517_v54, %v12663_v59  ;;  %v17902_v59 = vld [vmem:[#allocation73_spill] sm:$0xff]  ;;  %v17968_v52 = vld [vmem:[#allocation42_spill] sm:$0xff] }
 0x61b   : > { %v2502_v20 = vmul.f32 %v2492_v17, %v17897_v53  ;;  %v2503_v50 = vmul.f32 %v2491_v4, %v17898_v51  ;;  %9949 = vmatprep.subr.bf16.mxu0 %v9948_v44  ;;  %v2524_v13 = vsel %vm1135_vm7, %v12611_v1, %v2517_v54  ;;  %v17901_v17 = vld [vmem:[#allocation72_spill] sm:$0xff]  ;;  %v2535_v55 = vmul.f32 %v2523_v62, %v17902_v59  ;;  %v17904_v1 = vld [vmem:[#allocation74_spill] sm:$0xff] }
 0x61c   : > { %9951 = vmatpush1.bf16.msra.mxu0 %v9950_v39  ;;  %v2534_v26 = vmul.f32 %v2524_v13, %v17901_v17  ;;  %v17908_v62 = vmov 98   ;;  %v17910_v13 = vmov 99   ;;  %v17964_v17 = vld [vmem:[#allocation39_spill] sm:$0xff] }
 0x61d   : > { %v9954_v48 = vpack.c.bf16 %v2502_v20, %v2470_v58  ;;  %v2581_v49 = vpop.permute.xlu1 %2580  ;;  %v2549_v21 = vpop.permute.xlu0 %2548  ;;  %v9952_v16 = vpack.c.bf16 %v2503_v50, %v2471_v14  ;;  %v17907_v14 = vmov 97  }
 0x61e   : > { %v2555_v44 = vsel %vm1200_vm6, %v2549_v21, %v17882_v9  ;;  %v2556_v4 = vsel %vm1200_vm6, %v12639_v15, %v2549_v21  ;;  %v2587_v54 = vsel %vm17702_vm8, %v2581_v49, %v2583_v5  ;;  %v2588_v9 = vsel %vm17702_vm8, %v12661_v57, %v2581_v49  ;;  %v12847_v15 = vld [vmem:[%s17263_s2 + $0x68] ss:$0 sm:$0xff]  ;;  %v12853_v5 = vld [vmem:[%s17263_s2 + $0x60] ss:$0 sm:$0xff]  ;;  %v12862_v57 = vld [vmem:[%s17262_s1 + $0x10] sm:$0xff] }
 0x61f   : > { %v2566_v34 = vmul.f32 %v2556_v4, %v17903_v47  ;;  %v2567_v39 = vmul.f32 %v2555_v44, %v17904_v1  ;;  %9953 = vmatprep.subr.bf16.mxu0 %v9952_v16  ;;  %17905 = vst [vmem:[#allocation98_spill] sm:$0xff] %v12847_v15  ;;  %v2599_v50 = vmul.f32 %v12847_v15, %v2587_v54  ;;  %17906 = vst [vmem:[#allocation97_spill] sm:$0xff] %v12853_v5 }
 0x620   : > { %9955 = vmatpush1.bf16.msra.mxu0 %v9954_v48  ;;  %3242 = vperm.xlu1 %10808, %v12862_v57   ;;  %v17911_v48 = vmov 101  }
 0x621   : > { %v9958_v58 = vpack.c.bf16 %v2566_v34, %v2534_v26  ;;  %v9956_v20 = vpack.c.bf16 %v2567_v39, %v2535_v55  ;;  %v2598_v55 = vmul.f32 %v12853_v5, %v2588_v9  ;;  %v12867_v34 = vld [vmem:[%s17262_s1 + $0x48] sm:$0xff] }
 0x622   : > { %3247 = vperm.xlu0 %10809, %v12867_v34  }
 0x623   : > { %9957 = vmatprep.subr.bf16.mxu0 %v9956_v20 }
 0x624   : > { %9959 = vmatpush1.bf16.msra.mxu0 %v9958_v58  ;;  %10810 = vset.pattern.permute.xlu1 %v17907_v14 }
 0x625   : > { %2764 = vmatprep.subr.mxu0 %v2599_v50  ;;  %3267 = vperm.xlu1 %10810, %v12862_v57  }
 0x626   : > { %10811 = vset.pattern.permute.xlu0 %v17908_v62 }
 0x627   : > { %3593 = vperm.xlu0 %10811, %v12862_v57  }
 0x628   : > { %2765 = vmatpush1.msra.mxu0 %v2598_v55 }
 0x629   : > { %9733 = vmatmul.mubr.msk.f32.vlgmr.msra.gmra.mrb[22].mxu0 %vm1316_vm9, %v12453_v32  ;;  %3271 = vperm.xlu1 %10810, %v12867_v34   ;;  %v17909_v32 = vmov 100  }
 0x62a   : > { %2994 = vmatprep.mubr.f32.mxu0 %v17794_v3 }
 0x62b   : > { %10813 = vset.pattern.permute.xlu0 %v17909_v32 }
 0x62d   : > { %10812 = vset.pattern.permute.xlu1 %v17910_v13 }
 0x62e   : > { %3605 = vperm.xlu1 %10812, %v12862_v57   ;;  %v2892_v49 = vpop.permute.xlu0 %2891  ;;  %v2904_v16 = vpop.permute.xlu1 %2903 }
 0x632   : > { %3888 = vrot.lane.b32.xlu1 %v12862_v57, %s11012_s18  ;;  %v2923_v20 = vpop.permute.xlu1 %2922  ;;  %v2925_v50 = vpop.permute.xlu0 %2924 }
 0x633   : > { %10814 = vset.pattern.permute.xlu1 %v17911_v48 }
 0x6d8   : > { %v2743_v21 = vpop.f32.mrb[20].mxu1 }
 0x6d9   : > { %v2745_v44 = vpop.f32.mrb[21].mxu1  ;;  %v2896_v4 = vmul.f32 %v2892_v49, %v2743_v21 }
 0x6da   : > { %v2897_v26 = vmul.f32 %v2892_v49, %v2745_v44 }
 0x6db   : > { %v2908_v39 = vadd.f32 %v2904_v16, %v2896_v4 }
 0x6dc   : > { %v2909_v54 = vadd.f32 %v2904_v16, %v2897_v26 }
 0x6dd   : > { %v2916_v9 = vmax.f32 %v2908_v39, 0.0 }
 0x6de   : > { %v2917_v58 = vmax.f32 %v2909_v54, 0.0 }
 0x6e0   : > { %3007 = vmatprep.subr.mxu1 %v2917_v58 }
 0x6e1   : > { %3008 = vmatpush1.msra.mxu1 %v2916_v9 }
 0x6e2   : > { %9737 = vmatmul.mubr.msk.f32.vlgmr.msra.gmra.mrb[24].mxu1 %vm1639_vm10, %v2923_v20 }
 0x6e3   : > { %3077 = vmatprep.mubr.f32.mxu1 %v17794_v3 }
 0x6e6   : > { %v2672_v55 = vpop.f32.mrb[20].mxu0  ;;  %9738 = vmatmul.mubr.msk.f32.gmra.mrb[26].mxu1 %vm1639_vm10, %v2925_v50 }
 0x6e7   : > { %v2894_v48 = vmul.f32 %v2892_v49, %v2672_v55  ;;  %v2674_v13 = vpop.f32.mrb[21].mxu0  ;;  %3225 = vmatprep.mubr.f32.mxu1 %v17794_v3 }
 0x6e8   : > { %v2895_v21 = vmul.f32 %v2892_v49, %v2674_v13 }
 0x6e9   : > { %v2906_v44 = vadd.f32 %v2904_v16, %v2894_v48 }
 0x6ea   : > { %v2907_v4 = vadd.f32 %v2904_v16, %v2895_v21 }
 0x6eb   : > { %v2914_v39 = vmax.f32 %v2906_v44, 0.0 }
 0x6ec   : > { %v2915_v26 = vmax.f32 %v2907_v4, 0.0  ;;  %v2885_v54 = vpop.f32.mrb[22].mxu1 }
 0x6ed   : > { %v2900_v58 = vmul.f32 %v2892_v49, %v2885_v54  ;;  %v2887_v9 = vpop.f32.mrb[23].mxu1 }
 0x6ee   : > { %v2901_v32 = vmul.f32 %v2892_v49, %v2887_v9  ;;  %2930 = vmatprep.subr.mxu0 %v2915_v26 }
 0x6ef   : > { %v2912_v62 = vadd.f32 %v2904_v16, %v2900_v58  ;;  %2931 = vmatpush1.msra.mxu0 %v2914_v39  ;;  %v17914_v58 = vld [vmem:[#allocation10_spill] sm:$0xff] }
 0x6f0   : > { %v2913_v14 = vadd.f32 %v2904_v16, %v2901_v32  ;;  %9735 = vmatmul.mubr.msk.f32.vlgmr.msra.gmra.mrb[24].mxu0 %vm1639_vm10, %v2923_v20 }
 0x6f1   : > { %3000 = vmatprep.mubr.f32.mxu0 %v17794_v3  ;;  %v2920_v28 = vmax.f32 %v2912_v62, 0.0 }
 0x6f2   : > { %v2921_v55 = vmax.f32 %v2913_v14, 0.0 }
 0x6f4   : > { %3161 = vmatprep.subr.mxu1 %v2921_v55  ;;  %9736 = vmatmul.mubr.msk.f32.gmra.mrb[26].mxu0 %vm1639_vm10, %v2925_v50 }
 0x6f5   : > { %3162 = vmatpush1.msra.mxu1 %v2920_v28  ;;  %3148 = vmatprep.mubr.f32.mxu0 %v17794_v3  ;;  %v12898_v28 = vpop.permute.xlu1 %3242 }
 0x6f6   : > { %9741 = vmatmul.mubr.msk.f32.vlgmr.msra.gmra.mrb[28].mxu1 %vm1639_vm10, %v2923_v20 }
 0x6f7   : > { %3231 = vmatprep.mubr.f32.mxu1 %v17794_v3 }
 0x6f9   : > { %v12900_v54 = vpop.permute.xlu1 %3267 }
 0x6fa   : > { %9742 = vmatmul.mubr.msk.f32.gmra.mrb[30].mxu1 %vm1639_vm10, %v2925_v50 }
 0x6fb   : > { %3443 = vmatprep.mubr.f32.mxu1 %v17794_v3 }
 0x6fc   : > { %v2814_v32 = vpop.f32.mrb[22].mxu0 }
 0x6fd   : > { %v2898_v13 = vmul.f32 %v2892_v49, %v2814_v32  ;;  %v2816_v48 = vpop.f32.mrb[23].mxu0  ;;  %v12910_v32 = vpop.permute.xlu0 %3247 }
 0x6fe   : > { %v2899_v21 = vmul.f32 %v2892_v49, %v2816_v48  ;;  %v17912_v49 = vld [vmem:[#allocation9_spill] sm:$0xff] }
 0x6ff   : > { %v2910_v14 = vadd.f32 %v2904_v16, %v2898_v13  ;;  %v17916_v13 = vld [vmem:[#allocation83_spill] sm:$0xff] }
 0x700   : > { %v2911_v62 = vadd.f32 %v2904_v16, %v2899_v21 }
 0x701   : > { %v2918_v4 = vmax.f32 %v2910_v14, 0.0  ;;  %v17918_v14 = vld [vmem:[#allocation85_spill] sm:$0xff] }
 0x702   : > { %v2919_v44 = vmax.f32 %v2911_v62, 0.0 }
 0x704   : > { %3084 = vmatprep.subr.mxu0 %v2919_v44  ;;  %v12920_v44 = vpop.permute.xlu1 %3271 }
 0x705   : > { %3085 = vmatpush1.msra.mxu0 %v2918_v4 }
 0x706   : > { %9739 = vmatmul.mubr.msk.f32.vlgmr.msra.gmra.mrb[28].mxu0 %vm1639_vm10, %v2923_v20 }
 0x707   : > { %3154 = vmatprep.mubr.f32.mxu0 %v17794_v3 }
 0x70a   : > { %9740 = vmatmul.mubr.msk.f32.gmra.mrb[30].mxu0 %vm1639_vm10, %v2925_v50 }
 0x70b   : > { %3372 = vmatprep.mubr.f32.mxu0 %v17794_v3 }
 0x7b5   : > { %v3073_v26 = vpop.f32.mrb[24].mxu1 }
 0x7b6   : > { %v12903_v39 = vadd.f32 %v3073_v26, %v17912_v49  ;;  %v3075_v16 = vpop.f32.mrb[25].mxu1 }
 0x7b7   : > { %v12906_v9 = vadd.f32 %v3075_v16, %v17914_v58 }
 0x7b8   : > { %17913 = vst [vmem:[#allocation101_spill] sm:$0xff] %v12903_v39  ;;  %v3252_v50 = vmul.f32 %v12898_v28, %v12903_v39 }
 0x7b9   : > { %17915 = vst [vmem:[#allocation100_spill] sm:$0xff] %v12906_v9  ;;  %v3253_v20 = vmul.f32 %v12898_v28, %v12906_v9  ;;  %v3079_v55 = vpop.f32.mrb[26].mxu1 }
 0x7ba   : > { %v12915_v48 = vadd.f32 %v3079_v55, %v17916_v13  ;;  %v3081_v21 = vpop.f32.mrb[27].mxu1  ;;  %v3276_v9 = vadd.f32 %v12900_v54, %v3252_v50 }
 0x7bb   : > { %v12918_v62 = vadd.f32 %v3081_v21, %v17918_v14  ;;  %v3277_v16 = vadd.f32 %v12900_v54, %v3253_v20 }
 0x7bc   : > { %17917 = vst [vmem:[#allocation99_spill] sm:$0xff] %v12915_v48  ;;  %v3260_v4 = vmul.f32 %v12910_v32, %v12915_v48  ;;  %v3292_v30 = vmax.f32 %v3276_v9, 0.0  ;;  %v17924_v9 = vld [vmem:[#allocation84_spill] sm:$0xff] }
 0x7bd   : > { %17919 = vst [vmem:[#allocation95_spill] sm:$0xff] %v12918_v62  ;;  %v3261_v26 = vmul.f32 %v12910_v32, %v12918_v62  ;;  %v3293_v36 = vmax.f32 %v3277_v16, 0.0  ;;  %v17922_v62 = vld [vmem:[#allocation82_spill] sm:$0xff] }
 0x7be   : > { %v3284_v39 = vadd.f32 %v12920_v44, %v3260_v4 }
 0x7bf   : > { %v3285_v55 = vadd.f32 %v12920_v44, %v3261_v26 }
 0x7c0   : > { %v3300_v63 = vmax.f32 %v3284_v39, 0.0 }
 0x7c1   : > { %v3301_v21 = vmax.f32 %v3285_v55, 0.0 }
 0x7c2   : > { %v9982_v23 = vpack.c.bf16 %v3300_v63, %v3292_v30 }
 0x7c3   : > { %v2996_v25 = vpop.f32.mrb[24].mxu0  ;;  %v9980_v6 = vpack.c.bf16 %v3301_v21, %v3293_v36  ;;  %v17930_v21 = vld [vmem:[#allocation92_spill] sm:$0xff] }
 0x7c4   : > { %v12931_v60 = vadd.f32 %v2996_v25, %v17920_v27  ;;  %v2998_v48 = vpop.f32.mrb[25].mxu0  ;;  %v17926_v25 = vld [vmem:[#allocation86_spill] sm:$0xff] }
 0x7c5   : > { %v12934_v42 = vadd.f32 %v2998_v48, %v17922_v62  ;;  %9981 = vmatprep.subr.bf16.mxu1 %v9980_v6  ;;  %v17928_v6 = vld [vmem:[#allocation91_spill] sm:$0xff] }
 0x7c6   : > { %17921 = vst [vmem:[#allocation96_spill] sm:$0xff] %v12931_v60  ;;  %9983 = vmatpush1.bf16.msra.mxu1 %v9982_v23  ;;  %v3250_v39 = vmul.f32 %v12898_v28, %v12931_v60 }
 0x7c7   : > { %17923 = vst [vmem:[#allocation10_spill] sm:$0xff] %v12934_v42  ;;  %v3251_v20 = vmul.f32 %v12898_v28, %v12934_v42  ;;  %v3002_v50 = vpop.f32.mrb[26].mxu0 }
 0x7c8   : > { %v12941_v4 = vadd.f32 %v3002_v50, %v17924_v9  ;;  %v3004_v36 = vpop.f32.mrb[27].mxu0 }
 0x7c9   : > { %v12944_v26 = vadd.f32 %v3004_v36, %v17926_v25  ;;  %v3227_v30 = vpop.f32.mrb[28].mxu1  ;;  %9744 = vmatmul.mubr.msk.f32.vlgmr.msra.gmra.mrb[32].mxu1 %vm433_vm0, %v12862_v57  ;;  %v3275_v16 = vadd.f32 %v12900_v54, %v3251_v20  ;;  %v3274_v36 = vadd.f32 %v12900_v54, %v3250_v39 }
 0x7ca   : > { %17925 = vst [vmem:[#allocation102_spill] sm:$0xff] %v12941_v4  ;;  %v3258_v23 = vmul.f32 %v12910_v32, %v12941_v4  ;;  %v12951_v63 = vadd.f32 %v3227_v30, %v17928_v6  ;;  %v3229_v48 = vpop.f32.mrb[29].mxu1  ;;  %3585 = vmatprep.mubr.f32.mxu1 %v17794_v3 }
 0x7cb   : > { %17927 = vst [vmem:[#allocation103_spill] sm:$0xff] %v12944_v26  ;;  %v3259_v55 = vmul.f32 %v12910_v32, %v12944_v26  ;;  %v12958_v50 = vadd.f32 %v3229_v48, %v17930_v21  ;;  %v3291_v48 = vmax.f32 %v3275_v16, 0.0 }
 0x7cc   : > { %17929 = vst [vmem:[#allocation104_spill] sm:$0xff] %v12951_v63  ;;  %v3282_v42 = vadd.f32 %v12920_v44, %v3258_v23  ;;  %v3256_v20 = vmul.f32 %v12898_v28, %v12951_v63  ;;  %v3290_v23 = vmax.f32 %v3274_v36, 0.0 }
 0x7cd   : > { %17931 = vst [vmem:[#allocation105_spill] sm:$0xff] %v12958_v50  ;;  %v3283_v4 = vadd.f32 %v12920_v44, %v3259_v55  ;;  %v3257_v30 = vmul.f32 %v12898_v28, %v12958_v50  ;;  %v3233_v60 = vpop.f32.mrb[30].mxu1 }
 0x7ce   : > { %v3298_v41 = vmax.f32 %v3282_v42, 0.0  ;;  %v12968_v11 = vadd.f32 %v3233_v60, %v17932_v29  ;;  %v3235_v26 = vpop.f32.mrb[31].mxu1  ;;  %v3280_v60 = vadd.f32 %v12900_v54, %v3256_v20 }
 0x7cf   : > { %v3299_v10 = vmax.f32 %v3283_v4, 0.0  ;;  %v12971_v39 = vadd.f32 %v3235_v26, %v17934_v40  ;;  %v3281_v50 = vadd.f32 %v12900_v54, %v3257_v30 }
 0x7d0   : > { %17933 = vst [vmem:[#allocation106_spill] sm:$0xff] %v12968_v11  ;;  %v3264_v55 = vmul.f32 %v12910_v32, %v12968_v11  ;;  %v9978_v63 = vpack.c.bf16 %v3298_v41, %v3290_v23  ;;  %v3296_v29 = vmax.f32 %v3280_v60, 0.0  ;;  %v17940_v23 = vld [vmem:[#allocation89_spill] sm:$0xff] }
 0x7d1   : > { %17935 = vst [vmem:[#allocation107_spill] sm:$0xff] %v12971_v39  ;;  %v3265_v42 = vmul.f32 %v12910_v32, %v12971_v39  ;;  %v9976_v18 = vpack.c.bf16 %v3299_v10, %v3291_v48  ;;  %v3297_v16 = vmax.f32 %v3281_v50, 0.0  ;;  %v17936_v10 = vld [vmem:[#allocation87_spill] sm:$0xff] }
 0x7d2   : > { %v3288_v7 = vadd.f32 %v12920_v44, %v3264_v55 }
 0x7d3   : > { %v3289_v4 = vadd.f32 %v12920_v44, %v3265_v42  ;;  %9977 = vmatprep.subr.bf16.mxu0 %v9976_v18  ;;  %v17938_v18 = vld [vmem:[#allocation88_spill] sm:$0xff] }
 0x7d4   : > { %v3304_v26 = vmax.f32 %v3288_v7, 0.0  ;;  %9979 = vmatpush1.bf16.msra.mxu0 %v9978_v63 }
 0x7d5   : > { %v3305_v36 = vmax.f32 %v3289_v4, 0.0 }
 0x7d6   : > { %v9990_v11 = vpack.c.bf16 %v3304_v26, %v3296_v29 }
 0x7d7   : > { %9743 = vmatmul.mubr.msk.f32.vlgmr.msra.gmra.mrb[32].mxu0 %vm433_vm0, %v12862_v57  ;;  %v9988_v30 = vpack.c.bf16 %v3305_v36, %v3297_v16 }
 0x7d8   : > { %3514 = vmatprep.mubr.f32.mxu0 %v17794_v3 }
 0x7d9   : > { %9989 = vmatprep.subr.bf16.mxu1 %v9988_v30  ;;  %v3150_v41 = vpop.f32.mrb[28].mxu0 }
 0x7da   : > { %v12985_v20 = vadd.f32 %v3150_v41, %v17936_v10  ;;  %9991 = vmatpush1.bf16.msra.mxu1 %v9990_v11  ;;  %v3152_v48 = vpop.f32.mrb[29].mxu0  ;;  %v17942_v11 = vld [vmem:[#allocation90_spill] sm:$0xff] }
 0x7db   : > { %v12988_v7 = vadd.f32 %v3152_v48, %v17938_v18 }
 0x7dc   : > { %17937 = vst [vmem:[#allocation108_spill] sm:$0xff] %v12985_v20  ;;  %v3254_v29 = vmul.f32 %v12898_v28, %v12985_v20 }
 0x7dd   : > { %17939 = vst [vmem:[#allocation109_spill] sm:$0xff] %v12988_v7  ;;  %v3255_v63 = vmul.f32 %v12898_v28, %v12988_v7  ;;  %9746 = vmatmul.mubr.msk.f32.vlgmr.msra.gmra.mrb[34].mxu1 %vm433_vm0, %v12862_v57  ;;  %v3156_v50 = vpop.f32.mrb[30].mxu0 }
 0x7de   : > { %v12997_v55 = vadd.f32 %v3156_v50, %v17940_v23  ;;  %v3158_v42 = vpop.f32.mrb[31].mxu0  ;;  %4027 = vmatprep.mubr.f32.mxu1 %v17794_v3  ;;  %v3278_v36 = vadd.f32 %v12900_v54, %v3254_v29 }
 0x7df   : > { %v13001_v60 = vadd.f32 %v3158_v42, %v17942_v11  ;;  %v3279_v26 = vadd.f32 %v12900_v54, %v3255_v63  ;;  %v3606_v54 = vpop.permute.xlu1 %3605  ;;  %v17954_v11 = vld [vmem:[#allocation13_spill] sm:$0xff] }
 0x7e0   : > { %17941 = vst [vmem:[#allocation110_spill] sm:$0xff] %v12997_v55  ;;  %v3262_v4 = vmul.f32 %v12910_v32, %v12997_v55  ;;  %v3294_v39 = vmax.f32 %v3278_v36, 0.0 }
 0x7e1   : > { %17943 = vst [vmem:[#allocation111_spill] sm:$0xff] %v13001_v60  ;;  %v3263_v16 = vmul.f32 %v12910_v32, %v13001_v60  ;;  %v3295_v48 = vmax.f32 %v3279_v26, 0.0  ;;  %v3594_v32 = vpop.permute.xlu0 %3593 }
 0x7e2   : > { %v3286_v28 = vadd.f32 %v12920_v44, %v3262_v4 }
 0x7e3   : > { %v3287_v30 = vadd.f32 %v12920_v44, %v3263_v16 }
 0x7e4   : > { %v3302_v41 = vmax.f32 %v3286_v28, 0.0 }
 0x7e5   : > { %v3303_v50 = vmax.f32 %v3287_v30, 0.0 }
 0x7e6   : > { %v9986_v7 = vpack.c.bf16 %v3302_v41, %v3294_v39 }
 0x7e7   : > { %v9984_v42 = vpack.c.bf16 %v3303_v50, %v3295_v48 }
 0x7e9   : > { %9985 = vmatprep.subr.bf16.mxu0 %v9984_v42 }
 0x7ea   : > { %9987 = vmatpush1.bf16.msra.mxu0 %v9986_v7 }
 0x7ed   : > { %9745 = vmatmul.mubr.msk.f32.vlgmr.msra.gmra.mrb[34].mxu0 %vm433_vm0, %v12862_v57 }
 0x7ee   : > { %3956 = vmatprep.mubr.f32.mxu0 %v17794_v3 }
 0x89c   : > { %v3445_v63 = vpop.f32.mrb[32].mxu1 }
 0x89d   : > { %v3598_v29 = vmul.f32 %v3594_v32, %v3445_v63  ;;  %v3447_v4 = vpop.f32.mrb[33].mxu1 }
 0x89e   : > { %v3599_v60 = vmul.f32 %v3594_v32, %v3447_v4 }
 0x89f   : > { %v3610_v44 = vadd.f32 %v3606_v54, %v3598_v29 }
 0x8a0   : > { %v3611_v26 = vadd.f32 %v3606_v54, %v3599_v60 }
 0x8a1   : > { %v13014_v16 = vmax.f32 %v3610_v44, 0.0 }
 0x8a2   : > { %v13020_v39 = vmax.f32 %v3611_v26, 0.0 }
 0x8a3   : > { %17944 = vst [vmem:[#allocation112_spill] sm:$0xff] %v13014_v16  ;;  %3796 = vrot.lane.b32.xlu1 %v13014_v16, %s11018_s11  ;;  %3764 = vrot.lane.b32.xlu0 %v13014_v16, %s11013_s19 }
 0x8a4   : > { %17945 = vst [vmem:[#allocation113_spill] sm:$0xff] %v13020_v39 }
 0x8a7   : > { %3828 = vrot.lane.b32.xlu1 %v13014_v16, %s11012_s18  ;;  %3630 = vrot.lane.b32.xlu0 %v13020_v39, %s11014_s20 }
 0x8aa   : > { %v3374_v7 = vpop.f32.mrb[32].mxu0 }
 0x8ab   : > { %v3596_v36 = vmul.f32 %v3594_v32, %v3374_v7  ;;  %3860 = vrot.lane.b32.xlu1 %v13014_v16, %s11019_s12  ;;  %3726 = vrot.lane.b32.xlu0 %v13020_v39, %s11017_s8  ;;  %v3376_v60 = vpop.f32.mrb[33].mxu0  ;;  %v17955_v16 = vld [vmem:[#allocation14_spill] sm:$0xff] }
 0x8ac   : > { %v3597_v41 = vmul.f32 %v3594_v32, %v3376_v60 }
 0x8ad   : > { %v3608_v28 = vadd.f32 %v3606_v54, %v3596_v36 }
 0x8ae   : > { %v3609_v42 = vadd.f32 %v3606_v54, %v3597_v41 }
 0x8af   : > { %v13030_v30 = vmax.f32 %v3608_v28, 0.0  ;;  %3662 = vrot.lane.b32.xlu1 %v13020_v39, %s11016_s27 }
 0x8b0   : > { %v3587_v48 = vpop.f32.mrb[34].mxu1  ;;  %v13040_v63 = vmax.f32 %v3609_v42, 0.0 }
 0x8b1   : > { %v3589_v50 = vpop.f32.mrb[35].mxu1  ;;  %3792 = vrot.lane.b32.xlu0 %v13030_v30, %s11018_s11  ;;  %v3602_v44 = vmul.f32 %v3594_v32, %v3587_v48 }
 0x8b2   : > { %v3603_v7 = vmul.f32 %v3594_v32, %v3589_v50 }
 0x8b3   : > { %3694 = vrot.lane.b32.xlu1 %v13020_v39, %s17700_s26  ;;  %v3614_v26 = vadd.f32 %v3606_v54, %v3602_v44 }
 0x8b4   : > { %v3615_v60 = vadd.f32 %v3606_v54, %v3603_v7 }
 0x8b5   : > { %3856 = vrot.lane.b32.xlu0 %v13030_v30, %s11019_s12  ;;  %v13068_v36 = vmax.f32 %v3614_v26, 0.0 }
 0x8b6   : > { %v13074_v28 = vmax.f32 %v3615_v60, 0.0 }
 0x8b7   : > { %3624 = vrot.lane.b32.xlu1 %v13030_v30, %s11014_s20  ;;  %17946 = vst [vmem:[#allocation114_spill] sm:$0xff] %v13068_v36 }
 0x8b8   : > { %17947 = vst [vmem:[#allocation115_spill] sm:$0xff] %v13074_v28 }
 0x8b9   : > { %3626 = vrot.lane.b32.xlu0 %v13040_v63, %s11014_s20 }
 0x8bb   : > { %3656 = vrot.lane.b32.xlu1 %v13030_v30, %s11016_s27 }
 0x8bd   : > { %3658 = vrot.lane.b32.xlu0 %v13040_v63, %s11016_s27 }
 0x8bf   : > { %3688 = vrot.lane.b32.xlu1 %v13030_v30, %s17700_s26 }
 0x8c0   : > { %v3516_v29 = vpop.f32.mrb[34].mxu0 }
 0x8c1   : > { %3690 = vrot.lane.b32.xlu0 %v13040_v63, %s17700_s26  ;;  %v3518_v4 = vpop.f32.mrb[35].mxu0  ;;  %v3600_v41 = vmul.f32 %v3594_v32, %v3516_v29 }
 0x8c2   : > { %v3601_v42 = vmul.f32 %v3594_v32, %v3518_v4  ;;  %v17949_v32 = vmov 96  }
 0x8c3   : > { %3720 = vrot.lane.b32.xlu1 %v13030_v30, %s11017_s8  ;;  %v3612_v48 = vadd.f32 %v3606_v54, %v3600_v41 }
 0x8c4   : > { %v3613_v29 = vadd.f32 %v3606_v54, %v3601_v42  ;;  %v13140_v54 = vpop.permute.xlu1 %3888 }
 0x8c5   : > { %3722 = vrot.lane.b32.xlu0 %v13040_v63, %s11017_s8  ;;  %v13084_v50 = vmax.f32 %v3612_v48, 0.0 }
 0x8c6   : > { %v13094_v44 = vmax.f32 %v3613_v29, 0.0 }
 0x8c7   : > { %3760 = vrot.lane.b32.xlu1 %v13030_v30, %s11013_s19 }
 0x8c8   : > { %17948 = vst [vmem:[#allocation116_spill] sm:$0xff] %v13094_v44 }
 0x8c9   : > { %3794 = vrot.lane.b32.xlu0 %v13040_v63, %s11018_s11 }
 0x8cb   : > { %3824 = vrot.lane.b32.xlu1 %v13030_v30, %s11012_s18 }
 0x8cd   : > { %3826 = vrot.lane.b32.xlu0 %v13040_v63, %s11012_s18 }
 0x8cf   : > { %3762 = vrot.lane.b32.xlu1 %v13040_v63, %s11013_s19 }
 0x8d1   : > { %3858 = vrot.lane.b32.xlu0 %v13040_v63, %s11019_s12 }
 0x8d3   : > { %3772 = vrot.lane.b32.xlu1 %v13068_v36, %s11013_s19 }
 0x8d5   : > { %3804 = vrot.lane.b32.xlu0 %v13068_v36, %s11018_s11 }
 0x8d7   : > { %3638 = vrot.lane.b32.xlu1 %v13074_v28, %s11014_s20 }
 0x8d9   : > { %3670 = vrot.lane.b32.xlu0 %v13074_v28, %s11016_s27 }
 0x8db   : > { %3702 = vrot.lane.b32.xlu1 %v13074_v28, %s17700_s26 }
 0x8dd   : > { %3734 = vrot.lane.b32.xlu0 %v13074_v28, %s11017_s8 }
 0x8df   : > { %3696 = vrot.lane.b32.xlu1 %v13084_v50, %s17700_s26 }
 0x8e1   : > { %3632 = vrot.lane.b32.xlu0 %v13084_v50, %s11014_s20 }
 0x8e3   : > { %3728 = vrot.lane.b32.xlu1 %v13084_v50, %s11017_s8 }
 0x8e5   : > { %3664 = vrot.lane.b32.xlu0 %v13084_v50, %s11016_s27 }
 0x8e7   : > { %3634 = vrot.lane.b32.xlu1 %v13094_v44, %s11014_s20 }
 0x8e9   : > { %3768 = vrot.lane.b32.xlu0 %v13084_v50, %s11013_s19 }
 0x8eb   : > { %3666 = vrot.lane.b32.xlu1 %v13094_v44, %s11016_s27 }
 0x8ed   : > { %3698 = vrot.lane.b32.xlu0 %v13094_v44, %s17700_s26 }
 0x8ef   : > { %3800 = vrot.lane.b32.xlu1 %v13084_v50, %s11018_s11 }
 0x8f1   : > { %3730 = vrot.lane.b32.xlu0 %v13094_v44, %s11017_s8 }
 0x8f3   : > { %3802 = vrot.lane.b32.xlu1 %v13094_v44, %s11018_s11 }
 0x8f5   : > { %3770 = vrot.lane.b32.xlu0 %v13094_v44, %s11013_s19 }
 0x8f7   : > { %3834 = vrot.lane.b32.xlu1 %v13094_v44, %s11012_s18 }
 0x8f9   : > { %3836 = vrot.lane.b32.xlu0 %v13068_v36, %s11012_s18 }
 0x8fb   : > { %3866 = vrot.lane.b32.xlu1 %v13094_v44, %s11019_s12 }
 0x8fd   : > { %3832 = vrot.lane.b32.xlu0 %v13084_v50, %s11012_s18 }
 0x8ff   : > { %3864 = vrot.lane.b32.xlu1 %v13084_v50, %s11019_s12 }
 0x901   : > { %3868 = vrot.lane.b32.xlu0 %v13068_v36, %s11019_s12 }
 0x903   : > { %4189 = vperm.xlu1 %10814, %v12862_v57  }
 0x905   : > { %4177 = vperm.xlu0 %10813, %v12862_v57  }
 0x907   : > { %4208 = vrot.lane.b32.xlu1 %v12862_v57, %s17703_s13 }
 0x908   : > { %10815 = vset.pattern.permute.xlu1 %v17949_v32 }
 0x909   : > { %4210 = vrot.lane.b32.xlu0 %v12867_v34, %s17703_s13 }
 0x90a   : > { %10816 = vset.pattern.permute.xlu0 %v17949_v32 }
 0x90b   : > { %4780 = vrot.lane.b32.xlu1 %v17920_v27, %s11014_s20 }
 0x90d   : > { %4784 = vrot.lane.b32.xlu0 %v17922_v62, %s11014_s20 }
 0x90f   : > { %4876 = vrot.lane.b32.xlu1 %v17920_v27, %s11016_s27 }
 0x911   : > { %4880 = vrot.lane.b32.xlu0 %v17922_v62, %s11016_s27 }
 0x913   : > { %4808 = vrot.lane.b32.xlu1 %v17930_v21, %s11014_s20 }
 0x915   : > { %v13146_v57 = vpop.permute.xlu1 %3796  ;;  %v13148_v34 = vpop.permute.xlu0 %3764  ;;  %4904 = vrot.lane.b32.xlu0 %v17930_v21, %s11016_s27 }
 0x917   : > { %4988 = vrot.lane.b32.xlu1 %v17920_v27, %s17700_s26 }
 0x919   : > { %v13154_v4 = vpop.permute.xlu1 %3828  ;;  %v13156_v26 = vpop.permute.xlu0 %3630  ;;  %4992 = vrot.lane.b32.xlu0 %v17922_v62, %s17700_s26 }
 0x91b   : > { %5016 = vrot.lane.b32.xlu1 %v17930_v21, %s17700_s26 }
 0x91d   : > { %v13162_v7 = vpop.permute.xlu1 %3860  ;;  %5100 = vrot.lane.b32.xlu0 %v17920_v27, %s11017_s8  ;;  %v13166_v60 = vpop.permute.xlu0 %3726 }
 0x91f   : > { %5104 = vrot.lane.b32.xlu1 %v17922_v62, %s11017_s8 }
 0x921   : > { %v13170_v41 = vpop.permute.xlu1 %3662  ;;  %5128 = vrot.lane.b32.xlu0 %v17930_v21, %s11017_s8 }
 0x923   : > { %v13174_v48 = vpop.permute.xlu0 %3792  ;;  %5280 = vrot.lane.b32.xlu1 %v17922_v62, %s11013_s19 }
 0x924   : > { %17950 = vst [vmem:[#allocation117_spill] sm:$0xff] %v13174_v48 }
 0x925   : > { %v13178_v42 = vpop.permute.xlu1 %3694  ;;  %5284 = vrot.lane.b32.xlu0 %v17912_v49, %s11013_s19 }
 0x927   : > { %v13182_v29 = vpop.permute.xlu0 %3856  ;;  %5276 = vrot.lane.b32.xlu1 %v17920_v27, %s11013_s19 }
 0x928   : > { %17951 = vst [vmem:[#allocation118_spill] sm:$0xff] %v13182_v29 }
 0x929   : > { %v3625_v55 = vpop.permute.xlu1 %3624  ;;  %5392 = vrot.lane.b32.xlu0 %v17922_v62, %s11018_s11 }
 0x92b   : > { %v13188_v20 = vpop.permute.xlu0 %3626  ;;  %5396 = vrot.lane.b32.xlu1 %v17912_v49, %s11018_s11 }
 0x92c   : > { %17952 = vst [vmem:[#allocation119_spill] sm:$0xff] %v13188_v20  ;;  %v3646_v21 = vsel %vm770_vm1, %v3625_v55, %v13188_v20 }
 0x92d   : > { %v3657_v32 = vpop.permute.xlu1 %3656  ;;  %5388 = vrot.lane.b32.xlu0 %v17920_v27, %s11018_s11  ;;  %v3649_v39 = vmul.f32 %v3646_v21, %v17954_v11 }
 0x92f   : > { %v13197_v28 = vpop.permute.xlu0 %3658  ;;  %5504 = vrot.lane.b32.xlu1 %v17922_v62, %s11012_s18 }
 0x930   : > { %17953 = vst [vmem:[#allocation120_spill] sm:$0xff] %v13197_v28  ;;  %v3678_v36 = vsel %vm835_vm2, %v3657_v32, %v13197_v28 }
 0x931   : > { %v3681_v6 = vmul.f32 %v3678_v36, %v17955_v16  ;;  %v3689_v23 = vpop.permute.xlu1 %3688  ;;  %5508 = vrot.lane.b32.xlu0 %v17912_v49, %s11012_s18 }
 0x933   : > { %v13208_v18 = vpop.permute.xlu0 %3690  ;;  %5500 = vrot.lane.b32.xlu1 %v17920_v27, %s11012_s18  ;;  %v9992_v20 = vpack.c.bf16 %v3681_v6, %v3649_v39 }
 0x934   : > { %17956 = vst [vmem:[#allocation121_spill] sm:$0xff] %v13208_v18  ;;  %v3710_v10 = vsel %vm900_vm4, %v3689_v23, %v13208_v18 }
 0x935   : > { %v3721_v14 = vpop.permute.xlu1 %3720  ;;  %9993 = vmatprep.subr.bf16.mxu0 %v9992_v20  ;;  %5616 = vrot.lane.b32.xlu0 %v17922_v62, %s11019_s12  ;;  %v3713_v51 = vmul.f32 %v3710_v10, %v17968_v52  ;;  %v17972_v52 = vld [vmem:[#allocation49_spill] sm:$0xff] }
 0x937   : > { %v13214_v28 = vpop.permute.xlu0 %3722  ;;  %5620 = vrot.lane.b32.xlu1 %v17912_v49, %s11019_s12 }
 0x938   : > { %17957 = vst [vmem:[#allocation122_spill] sm:$0xff] %v13214_v28  ;;  %v3742_v62 = vsel %vm965_vm3, %v3721_v14, %v13214_v28 }
 0x939   : > { %v13218_v21 = vpop.permute.xlu1 %3760  ;;  %5612 = vrot.lane.b32.xlu0 %v17920_v27, %s11019_s12  ;;  %v3745_v28 = vmul.f32 %v3742_v62, %v17964_v17 }
 0x93a   : > { %17958 = vst [vmem:[#allocation123_spill] sm:$0xff] %v13218_v21 }
 0x93b   : > { %v3795_v36 = vpop.permute.xlu0 %3794  ;;  %4782 = vrot.lane.b32.xlu1 %v17924_v9, %s11014_s20 }
 0x93d   : > { %v13224_v6 = vpop.permute.xlu1 %3824  ;;  %4786 = vrot.lane.b32.xlu0 %v17926_v25, %s11014_s20 }
 0x93e   : > { %17959 = vst [vmem:[#allocation124_spill] sm:$0xff] %v13224_v6 }
 0x93f   : > { %v3827_v20 = vpop.permute.xlu0 %3826  ;;  %4878 = vrot.lane.b32.xlu1 %v17924_v9, %s11016_s27 }
 0x941   : > { %v3763_v39 = vpop.permute.xlu1 %3762  ;;  %4882 = vrot.lane.b32.xlu0 %v17926_v25, %s11016_s27 }
 0x942   : > { %v3781_v59 = vsel %vm1070_vm5, %v3763_v39, %v13148_v34 }
 0x943   : > { %v13232_v16 = vpop.permute.xlu0 %3858  ;;  %4810 = vrot.lane.b32.xlu1 %v17934_v40, %s11014_s20 }
 0x945   : > { %v13236_v11 = vpop.permute.xlu1 %3772  ;;  %4906 = vrot.lane.b32.xlu0 %v17934_v40, %s11016_s27 }
 0x946   : > { %17960 = vst [vmem:[#allocation125_spill] sm:$0xff] %v13236_v11 }
 0x947   : > { %v13240_v27 = vpop.permute.xlu0 %3804  ;;  %4990 = vrot.lane.b32.xlu1 %v17924_v9, %s17700_s26 }
 0x948   : > { %17961 = vst [vmem:[#allocation126_spill] sm:$0xff] %v13240_v27  ;;  %v17966_v27 = vld [vmem:[#allocation40_spill] sm:$0xff] }
 0x949   : > { %v13247_v5 = vpop.permute.xlu1 %3638  ;;  %4994 = vrot.lane.b32.xlu0 %v17926_v25, %s17700_s26 }
 0x94a   : > { %17962 = vst [vmem:[#allocation127_spill] sm:$0xff] %v13247_v5  ;;  %v3647_v15 = vsel %vm770_vm1, %v13247_v5, %v3625_v55  ;;  %v17965_v55 = vld [vmem:[#allocation41_spill] sm:$0xff] }
 0x94b   : > { %v13257_v47 = vpop.permute.xlu0 %3670  ;;  %5018 = vrot.lane.b32.xlu1 %v17934_v40, %s17700_s26  ;;  %v3648_v5 = vmul.f32 %v3647_v15, %v17965_v55  ;;  %v17970_v15 = vld [vmem:[#allocation47_spill] sm:$0xff] }
 0x94c   : > { %17963 = vst [vmem:[#allocation128_spill] sm:$0xff] %v13257_v47  ;;  %v3679_v1 = vsel %vm835_vm2, %v13257_v47, %v3657_v32  ;;  %v3785_v55 = vmul.f32 %v3781_v59, %v17970_v15  ;;  %v17973_v59 = vld [vmem:[#allocation44_spill] sm:$0xff] }
 0x94d   : > { %v3680_v44 = vmul.f32 %v3679_v1, %v17966_v27  ;;  %v13270_v18 = vpop.permute.xlu1 %3702  ;;  %4788 = vrot.lane.b32.xlu0 %v17912_v49, %s11014_s20  ;;  %v3782_v1 = vsel %vm1070_vm5, %v13218_v21, %v3763_v39  ;;  %v9996_v27 = vpack.c.bf16 %v3745_v28, %v3713_v51  ;;  %v3753_v39 = vmul.f32 %v13040_v63, %v17973_v59 }
 0x94e   : > { %17967 = vst [vmem:[#allocation129_spill] sm:$0xff] %v13270_v18  ;;  %v3711_v62 = vsel %vm900_vm4, %v13270_v18, %v3689_v23  ;;  %v17971_v23 = vld [vmem:[#allocation48_spill] sm:$0xff]  ;;  %v3813_v51 = vsel %vm1135_vm7, %v3795_v36, %v13146_v57  ;;  %v3752_v63 = vmul.f32 %v13030_v30, %v17866_v2  ;;  %v18014_v2 = vld [vmem:[#allocation91_spill] sm:$0xff] }
 0x94f   : > { %v9994_v32 = vpack.c.bf16 %v3680_v44, %v3648_v5  ;;  %v13278_v17 = vpop.permute.xlu0 %3734  ;;  %4792 = vrot.lane.b32.xlu1 %v17914_v58, %s11014_s20  ;;  %v3845_v5 = vsel %vm1200_vm6, %v3827_v20, %v13154_v4  ;;  %v3712_v44 = vmul.f32 %v3711_v62, %v17971_v23  ;;  %v3846_v62 = vsel %vm1200_vm6, %v13224_v6, %v3827_v20 }
 0x950   : > { %17969 = vst [vmem:[#allocation130_spill] sm:$0xff] %v13278_v17  ;;  %v3743_v10 = vsel %vm965_vm3, %v13278_v17, %v3721_v14  ;;  %v17974_v14 = vld [vmem:[#allocation51_spill] sm:$0xff]  ;;  %v3848_v20 = vmul.f32 %v3846_v62, %v17876_v37  ;;  %v3878_v62 = vsel %vm17702_vm8, %v13182_v29, %v13232_v16 }
 0x951   : > { %v3744_v18 = vmul.f32 %v3743_v10, %v17972_v52  ;;  %9995 = vmatpush1.bf16.msra.mxu0 %v9994_v32  ;;  %v3697_v47 = vpop.permute.xlu1 %3696  ;;  %4884 = vrot.lane.b32.xlu0 %v17912_v49, %s11016_s27  ;;  %v3784_v28 = vmul.f32 %v3782_v1, %v17974_v14  ;;  %v10000_v32 = vpack.c.bf16 %v3785_v55, %v3753_v39 }
 0x952   : > { %9997 = vmatprep.subr.bf16.mxu0 %v9996_v27  ;;  %v3849_v27 = vmul.f32 %v3845_v5, %v17867_v46  ;;  %v3817_v1 = vmul.f32 %v3813_v51, %v17865_v22  ;;  %v18009_v22 = vld [vmem:[#allocation89_spill] sm:$0xff] }
 0x953   : > { %v9998_v15 = vpack.c.bf16 %v3744_v18, %v3712_v44  ;;  %v3633_v21 = vpop.permute.xlu0 %3632  ;;  %4888 = vrot.lane.b32.xlu1 %v17914_v58, %s11016_s27  ;;  %v3814_v18 = vsel %vm1135_vm7, %v13174_v48, %v3795_v36  ;;  %v10002_v44 = vpack.c.bf16 %v3784_v28, %v3752_v63 }
 0x954   : > { %v10004_v30 = vpack.c.bf16 %v3849_v27, %v3817_v1  ;;  %v3816_v55 = vmul.f32 %v3814_v18, %v17873_v24  ;;  %v3643_v63 = vsel %vm770_vm1, %v13156_v26, %v3633_v21 }
 0x955   : > { %9999 = vmatpush1.bf16.msra.mxu0 %v9998_v15  ;;  %v3729_v10 = vpop.permute.xlu1 %3728  ;;  %5102 = vrot.lane.b32.xlu0 %v17924_v9, %s11017_s8  ;;  %v3877_v15 = vsel %vm17702_vm8, %v13232_v16, %v13162_v7 }
 0x956   : > { %10001 = vmatprep.subr.bf16.mxu0 %v10000_v32  ;;  %v10006_v39 = vpack.c.bf16 %v3848_v20, %v3816_v55  ;;  %v3881_v32 = vmul.f32 %v12775_v8, %v3877_v15  ;;  %v3880_v20 = vmul.f32 %v12769_v35, %v3878_v62  ;;  %v3739_v55 = vsel %vm965_vm3, %v13166_v60, %v3729_v10 }
 0x957   : > { %v3665_v5 = vpop.permute.xlu0 %3664  ;;  %5106 = vrot.lane.b32.xlu1 %v17926_v25, %s11017_s8 }
 0x958   : > { %v3675_v51 = vsel %vm835_vm2, %v13170_v41, %v3665_v5 }
 0x959   : > { %10003 = vmatpush1.bf16.msra.mxu0 %v10002_v44  ;;  %5130 = vrot.lane.b32.xlu0 %v17934_v40, %s11017_s8  ;;  %v13326_v36 = vpop.permute.xlu1 %3634  ;;  %v3684_v1 = vmul.f32 %v3675_v51, %v17886_v45  ;;  %v3707_v51 = vsel %vm900_vm4, %v13178_v42, %v3697_v47 }
 0x95a   : > { %10005 = vmatprep.subr.bf16.mxu0 %v10004_v30  ;;  %v3642_v27 = vsel %vm770_vm1, %v3633_v21, %v13326_v36  ;;  %v3652_v30 = vmul.f32 %v3643_v63, %v17887_v61 }
 0x95b   : > { %v13331_v28 = vpop.permute.xlu0 %3768  ;;  %4996 = vrot.lane.b32.xlu1 %v17912_v49, %s17700_s26  ;;  %v3653_v8 = vmul.f32 %v3642_v27, %v17885_v12  ;;  %v3748_v27 = vmul.f32 %v3739_v55, %v17891_v0 }
 0x95c   : > { %v10026_v15 = vpack.c.bf16 %v3684_v1, %v3652_v30 }
 0x95d   : > { %10007 = vmatpush1.bf16.msra.mxu0 %v10006_v39  ;;  %5000 = vrot.lane.b32.xlu0 %v17914_v58, %s17700_s26  ;;  %v13348_v18 = vpop.permute.xlu1 %3666 }
 0x95e   : > { %v3674_v16 = vsel %vm835_vm2, %v3665_v5, %v13348_v18  ;;  %3908 = vmatprep.subr.mxu0 %v3881_v32 }
 0x95f   : > { %v3685_v44 = vmul.f32 %v3674_v16, %v17884_v19  ;;  %v13357_v21 = vpop.permute.xlu0 %3698  ;;  %5108 = vrot.lane.b32.xlu1 %v17912_v49, %s11017_s8  ;;  %v3716_v16 = vmul.f32 %v3707_v51, %v17893_v38 }
 0x960   : > { %v3706_v39 = vsel %vm900_vm4, %v3697_v47, %v13357_v21 }
 0x961   : > { %3909 = vmatpush1.msra.mxu0 %v3880_v20  ;;  %5112 = vrot.lane.b32.xlu0 %v17914_v58, %s11017_s8  ;;  %v13367_v35 = vpop.permute.xlu1 %3800  ;;  %v10024_v5 = vpack.c.bf16 %v3685_v44, %v3653_v8  ;;  %v3717_v63 = vmul.f32 %v3706_v39, %v17894_v56  ;;  %v10030_v44 = vpack.c.bf16 %v3748_v27, %v3716_v16  ;;  %v17977_v27 = vld [vmem:[#allocation46_spill] sm:$0xff] }
 0x962   : > { %9747 = vmatmul.mubr.msk.f32.vlgmr.msra.gmra.mrb[36].mxu0 %vm1316_vm9, %v13140_v54 }
 0x963   : > { %v13377_v62 = vpop.permute.xlu0 %3730  ;;  %5282 = vrot.lane.b32.xlu1 %v17926_v25, %s11013_s19  ;;  %10025 = vmatprep.subr.bf16.mxu0 %v10024_v5 }
 0x964   : > { %17975 = vst [vmem:[#allocation131_spill] sm:$0xff] %v13377_v62  ;;  %v3738_v32 = vsel %vm965_vm3, %v3729_v10, %v13377_v62  ;;  %10027 = vmatpush1.bf16.msra.mxu0 %v10026_v15  ;;  %4098 = vmatprep.mubr.f32.mxu0 %v17794_v3  ;;  %v3756_v10 = vmul.f32 %v13084_v50, %v17895_v43  ;;  %v17976_v15 = vld [vmem:[#allocation71_spill] sm:$0xff]  ;;  %v17999_v43 = vld [vmem:[#allocation88_spill] sm:$0xff] }
 0x965   : > { %v3749_v1 = vmul.f32 %v3738_v32, %v17892_v31  ;;  %5286 = vrot.lane.b32.xlu0 %v17916_v13, %s11013_s19  ;;  %v3803_v47 = vpop.permute.xlu1 %3802  ;;  %v17978_v32 = vld [vmem:[#allocation116_spill] sm:$0xff] }
 0x966   : > { %v3757_v50 = vmul.f32 %v17978_v32, %v17977_v27  ;;  %v18103_v62 = vld [vmem:[#allocation28_spill] sm:$0xff] }
 0x967   : > { %v3771_v20 = vpop.permute.xlu0 %3770  ;;  %5278 = vrot.lane.b32.xlu1 %v17924_v9, %s11013_s19  ;;  %v10028_v8 = vpack.c.bf16 %v3749_v1, %v3717_v63  ;;  %v17979_v63 = vld [vmem:[#allocation126_spill] sm:$0xff] }
 0x968   : > { %v3777_v30 = vsel %vm1070_vm5, %v3771_v20, %v13236_v11  ;;  %v3778_v55 = vsel %vm1070_vm5, %v13331_v28, %v3771_v20  ;;  %v3809_v1 = vsel %vm1135_vm7, %v3803_v47, %v17979_v63 }
 0x969   : > { %v3788_v5 = vmul.f32 %v3778_v55, %v17897_v53  ;;  %v3789_v39 = vmul.f32 %v3777_v30, %v17976_v15  ;;  %5394 = vrot.lane.b32.xlu0 %v17926_v25, %s11018_s11  ;;  %10029 = vmatprep.subr.bf16.mxu0 %v10028_v8  ;;  %v3835_v51 = vpop.permute.xlu1 %3834  ;;  %v17981_v30 = vld [vmem:[#allocation73_spill] sm:$0xff]  ;;  %v17982_v15 = vld [vmem:[#allocation74_spill] sm:$0xff] }
 0x96a   : > { %10031 = vmatpush1.bf16.msra.mxu0 %v10030_v44  ;;  %v3821_v55 = vmul.f32 %v3809_v1, %v17981_v30  ;;  %v3810_v44 = vsel %vm1135_vm7, %v13367_v35, %v3803_v47 }
 0x96b   : > { %v10034_v16 = vpack.c.bf16 %v3788_v5, %v3756_v10  ;;  %v13410_v38 = vpop.permute.xlu0 %3836  ;;  %5398 = vrot.lane.b32.xlu1 %v17916_v13, %s11018_s11  ;;  %v10032_v20 = vpack.c.bf16 %v3789_v39, %v3757_v50  ;;  %v17983_v50 = vld [vmem:[#allocation72_spill] sm:$0xff] }
 0x96c   : > { %17980 = vst [vmem:[#allocation116_spill] sm:$0xff] %v13410_v38  ;;  %v3841_v8 = vsel %vm1200_vm6, %v3835_v51, %v13410_v38  ;;  %v3820_v1 = vmul.f32 %v3810_v44, %v17983_v50 }
 0x96d   : > { %v3853_v32 = vmul.f32 %v3841_v8, %v17982_v15  ;;  %5390 = vrot.lane.b32.xlu0 %v17924_v9, %s11018_s11  ;;  %v3867_v53 = vpop.permute.xlu1 %3866  ;;  %10033 = vmatprep.subr.bf16.mxu0 %v10032_v20  ;;  %v17984_v8 = vld [vmem:[#allocation77_spill] sm:$0xff]  ;;  %v17985_v20 = vld [vmem:[#allocation87_spill] sm:$0xff] }
 0x96e   : > { %10035 = vmatpush1.bf16.msra.mxu0 %v10034_v16 }
 0x96f   : > { %v13424_v10 = vpop.permute.xlu0 %3832  ;;  %5288 = vrot.lane.b32.xlu1 %v17914_v58, %s11013_s19  ;;  %v10036_v5 = vpack.c.bf16 %v3853_v32, %v3821_v55  ;;  %v17987_v32 = vld [vmem:[#allocation98_spill] sm:$0xff] }
 0x970   : > { %v3842_v39 = vsel %vm1200_vm6, %v13424_v10, %v3835_v51 }
 0x971   : > { %v3852_v30 = vmul.f32 %v3842_v39, %v17984_v8  ;;  %5292 = vrot.lane.b32.xlu0 %v17985_v20, %s11013_s19  ;;  %v13435_v15 = vpop.permute.xlu1 %3864  ;;  %10037 = vmatprep.subr.bf16.mxu0 %v10036_v5 }
 0x972   : > { %v3874_v51 = vsel %vm17702_vm8, %v13435_v15, %v3867_v53 }
 0x973   : > { %v10038_v47 = vpack.c.bf16 %v3852_v30, %v3820_v1  ;;  %v13437_v16 = vpop.permute.xlu0 %3868  ;;  %5506 = vrot.lane.b32.xlu1 %v17926_v25, %s11012_s18  ;;  %v17988_v30 = vld [vmem:[#allocation97_spill] sm:$0xff] }
 0x974   : > { %17986 = vst [vmem:[#allocation132_spill] sm:$0xff] %v13437_v16  ;;  %v3873_v55 = vsel %vm17702_vm8, %v3867_v53, %v13437_v16  ;;  %v3884_v5 = vmul.f32 %v17988_v30, %v3874_v51 }
 0x975   : > { %5510 = vrot.lane.b32.xlu0 %v17916_v13, %s11012_s18  ;;  %10039 = vmatpush1.bf16.msra.mxu0 %v10038_v47  ;;  %v3885_v44 = vmul.f32 %v17987_v32, %v3873_v55  ;;  %v17994_v32 = vld [vmem:[#allocation85_spill] sm:$0xff] }
 0x977   : > { %5502 = vrot.lane.b32.xlu1 %v17924_v9, %s11012_s18  ;;  %4050 = vmatprep.subr.mxu0 %v3885_v44 }
 0x979   : > { %5400 = vrot.lane.b32.xlu0 %v17914_v58, %s11018_s11  ;;  %4051 = vmatpush1.msra.mxu0 %v3884_v5 }
 0x97a   : > { %9749 = vmatmul.mubr.msk.f32.vlgmr.msra.gmra.mrb[38].mxu0 %vm1316_vm9, %v13140_v54 }
 0x97b   : > { %5404 = vrot.lane.b32.xlu1 %v17985_v20, %s11018_s11  ;;  %4280 = vmatprep.mubr.f32.mxu0 %v17794_v3 }
 0x97d   : > { %5618 = vrot.lane.b32.xlu0 %v17926_v25, %s11019_s12 }
 0x97f   : > { %5622 = vrot.lane.b32.xlu1 %v17916_v13, %s11019_s12 }
 0x981   : > { %5614 = vrot.lane.b32.xlu0 %v17924_v9, %s11019_s12 }
 0x982   : > { %v13466_v53 = vpop.permute.xlu1 %4189 }
 0x983   : > { %17989 = vst [vmem:[#allocation98_spill] sm:$0xff] %v13466_v53  ;;  %5512 = vrot.lane.b32.xlu1 %v17914_v58, %s11012_s18 }
 0x984   : > { %v13470_v39 = vpop.permute.xlu0 %4177 }
 0x985   : > { %17990 = vst [vmem:[#allocation97_spill] sm:$0xff] %v13470_v39  ;;  %5516 = vrot.lane.b32.xlu0 %v17985_v20, %s11012_s18 }
 0x986   : > { %v13474_v1 = vpop.permute.xlu1 %4208 }
 0x987   : > { %17991 = vst [vmem:[#allocation133_spill] sm:$0xff] %v13474_v1  ;;  %5624 = vrot.lane.b32.xlu1 %v17914_v58, %s11019_s12 }
 0x988   : > { %v13478_v47 = vpop.permute.xlu0 %4210 }
 0x989   : > { %17992 = vst [vmem:[#allocation134_spill] sm:$0xff] %v13478_v47  ;;  %5628 = vrot.lane.b32.xlu0 %v17985_v20, %s11019_s12 }
 0x98a   : > { %v13482_v51 = vpop.permute.xlu1 %4780 }
 0x98b   : > { %4790 = vrot.lane.b32.xlu1 %v17916_v13, %s11014_s20 }
 0x98c   : > { %v13486_v55 = vpop.permute.xlu0 %4784 }
 0x98d   : > { %17993 = vst [vmem:[#allocation135_spill] sm:$0xff] %v13486_v55  ;;  %4794 = vrot.lane.b32.xlu0 %v17994_v32, %s11014_s20 }
 0x98e   : > { %v13490_v44 = vpop.permute.xlu1 %4876 }
 0x98f   : > { %4886 = vrot.lane.b32.xlu1 %v17916_v13, %s11016_s27 }
 0x990   : > { %v13494_v30 = vpop.permute.xlu0 %4880 }
 0x991   : > { %17995 = vst [vmem:[#allocation136_spill] sm:$0xff] %v13494_v30  ;;  %4890 = vrot.lane.b32.xlu0 %v17994_v32, %s11016_s27 }
 0x992   : > { %v13498_v5 = vpop.permute.xlu1 %4808 }
 0x993   : > { %17996 = vst [vmem:[#allocation137_spill] sm:$0xff] %v13498_v5  ;;  %4998 = vrot.lane.b32.xlu1 %v17916_v13, %s17700_s26 }
 0x994   : > { %v13502_v50 = vpop.permute.xlu0 %4904 }
 0x995   : > { %17997 = vst [vmem:[#allocation138_spill] sm:$0xff] %v13502_v50  ;;  %5002 = vrot.lane.b32.xlu0 %v17994_v32, %s17700_s26 }
 0x996   : > { %v13506_v8 = vpop.permute.xlu1 %4988 }
 0x997   : > { %4796 = vrot.lane.b32.xlu1 %v17985_v20, %s11014_s20 }
 0x998   : > { %v13510_v27 = vpop.permute.xlu0 %4992 }
 0x999   : > { %17998 = vst [vmem:[#allocation139_spill] sm:$0xff] %v13510_v27  ;;  %4800 = vrot.lane.b32.xlu0 %v17999_v43, %s11014_s20 }
 0x99a   : > { %v13514_v0 = vpop.permute.xlu1 %5016 }
 0x99b   : > { %18000 = vst [vmem:[#allocation140_spill] sm:$0xff] %v13514_v0  ;;  %4892 = vrot.lane.b32.xlu1 %v17985_v20, %s11016_s27 }
 0x99c   : > { %v13518_v56 = vpop.permute.xlu0 %5100 }
 0x99d   : > { %4896 = vrot.lane.b32.xlu0 %v17999_v43, %s11016_s27 }
 0x99e   : > { %v13522_v31 = vpop.permute.xlu1 %5104 }
 0x99f   : > { %18001 = vst [vmem:[#allocation141_spill] sm:$0xff] %v13522_v31  ;;  %5110 = vrot.lane.b32.xlu1 %v17916_v13, %s11017_s8 }
 0x9a0   : > { %v13526_v19 = vpop.permute.xlu0 %5128 }
 0x9a1   : > { %18002 = vst [vmem:[#allocation142_spill] sm:$0xff] %v13526_v19  ;;  %5114 = vrot.lane.b32.xlu0 %v17994_v32, %s11017_s8 }
 0x9a2   : > { %v13530_v12 = vpop.permute.xlu1 %5280 }
 0x9a3   : > { %18003 = vst [vmem:[#allocation143_spill] sm:$0xff] %v13530_v12  ;;  %5004 = vrot.lane.b32.xlu1 %v17985_v20, %s17700_s26 }
 0x9a4   : > { %v13534_v23 = vpop.permute.xlu0 %5284 }
 0x9a5   : > { %18004 = vst [vmem:[#allocation144_spill] sm:$0xff] %v13534_v23  ;;  %5008 = vrot.lane.b32.xlu0 %v17999_v43, %s17700_s26 }
 0x9a6   : > { %v13538_v52 = vpop.permute.xlu1 %5276 }
 0x9a7   : > { %18005 = vst [vmem:[#allocation145_spill] sm:$0xff] %v13538_v52  ;;  %5116 = vrot.lane.b32.xlu1 %v17985_v20, %s11017_s8 }
 0x9a8   : > { %v13542_v45 = vpop.permute.xlu0 %5392 }
 0x9a9   : > { %18006 = vst [vmem:[#allocation146_spill] sm:$0xff] %v13542_v45  ;;  %5120 = vrot.lane.b32.xlu0 %v17999_v43, %s11017_s8 }
 0x9aa   : > { %v13546_v61 = vpop.permute.xlu1 %5396 }
 0x9ab   : > { %18007 = vst [vmem:[#allocation147_spill] sm:$0xff] %v13546_v61  ;;  %5290 = vrot.lane.b32.xlu1 %v17994_v32, %s11013_s19 }
 0x9ac   : > { %v13550_v46 = vpop.permute.xlu0 %5388 }
 0x9ad   : > { %18008 = vst [vmem:[#allocation148_spill] sm:$0xff] %v13550_v46  ;;  %5294 = vrot.lane.b32.xlu0 %v18009_v22, %s11013_s19 }
 0x9ae   : > { %v13554_v59 = vpop.permute.xlu1 %5504 }
 0x9af   : > { %18010 = vst [vmem:[#allocation149_spill] sm:$0xff] %v13554_v59  ;;  %5402 = vrot.lane.b32.xlu1 %v17994_v32, %s11018_s11 }
 0x9b0   : > { %v13558_v37 = vpop.permute.xlu0 %5508 }
 0x9b1   : > { %18011 = vst [vmem:[#allocation150_spill] sm:$0xff] %v13558_v37  ;;  %5406 = vrot.lane.b32.xlu0 %v18009_v22, %s11018_s11 }
 0x9b2   : > { %v13562_v24 = vpop.permute.xlu1 %5500 }
 0x9b3   : > { %18012 = vst [vmem:[#allocation151_spill] sm:$0xff] %v13562_v24  ;;  %5296 = vrot.lane.b32.xlu1 %v17999_v43, %s11013_s19  ;;  %v18026_v24 = vld [vmem:[#allocation112_spill] sm:$0xff] }
 0x9b4   : > { %v13566_v14 = vpop.permute.xlu0 %5616 }
 0x9b5   : > { %18013 = vst [vmem:[#allocation152_spill] sm:$0xff] %v13566_v14  ;;  %5300 = vrot.lane.b32.xlu0 %v18014_v2, %s11013_s19 }
 0x9b6   : > { %v13570_v20 = vpop.permute.xlu1 %5620 }
 0x9b7   : > { %18015 = vst [vmem:[#allocation153_spill] sm:$0xff] %v13570_v20  ;;  %5514 = vrot.lane.b32.xlu1 %v17994_v32, %s11012_s18 }
 0x9b8   : > { %v13574_v13 = vpop.permute.xlu0 %5612 }
 0x9b9   : > { %18016 = vst [vmem:[#allocation154_spill] sm:$0xff] %v13574_v13  ;;  %5518 = vrot.lane.b32.xlu0 %v18009_v22, %s11012_s18 }
 0x9ba   : > { %v13578_v49 = vpop.permute.xlu1 %4782 }
 0x9bb   : > { %18017 = vst [vmem:[#allocation155_spill] sm:$0xff] %v13578_v49  ;;  %5408 = vrot.lane.b32.xlu1 %v17999_v43, %s11018_s11 }
 0x9bc   : > { %v13582_v29 = vpop.permute.xlu0 %4786 }
 0x9bd   : > { %18018 = vst [vmem:[#allocation156_spill] sm:$0xff] %v13582_v29  ;;  %5412 = vrot.lane.b32.xlu0 %v18014_v2, %s11018_s11 }
 0x9be   : > { %v13586_v16 = vpop.permute.xlu1 %4878 }
 0x9bf   : > { %18019 = vst [vmem:[#allocation157_spill] sm:$0xff] %v13586_v16  ;;  %5626 = vrot.lane.b32.xlu1 %v17994_v32, %s11019_s12 }
 0x9c0   : > { %v13590_v6 = vpop.permute.xlu0 %4882 }
 0x9c1   : > { %18020 = vst [vmem:[#allocation158_spill] sm:$0xff] %v13590_v6  ;;  %5630 = vrot.lane.b32.xlu0 %v18009_v22, %s11019_s12 }
 0x9c2   : > { %v13594_v38 = vpop.permute.xlu1 %4810 }
 0x9c3   : > { %18021 = vst [vmem:[#allocation159_spill] sm:$0xff] %v13594_v38  ;;  %5520 = vrot.lane.b32.xlu1 %v17999_v43, %s11012_s18 }
 0x9c4   : > { %v13598_v48 = vpop.permute.xlu0 %4906 }
 0x9c5   : > { %18022 = vst [vmem:[#allocation160_spill] sm:$0xff] %v13598_v48  ;;  %5524 = vrot.lane.b32.xlu0 %v18014_v2, %s11012_s18 }
 0x9c6   : > { %v13602_v63 = vpop.permute.xlu1 %4990 }
 0x9c7   : > { %18023 = vst [vmem:[#allocation161_spill] sm:$0xff] %v13602_v63  ;;  %5632 = vrot.lane.b32.xlu1 %v17999_v43, %s11019_s12 }
 0x9c8   : > { %v13606_v32 = vpop.permute.xlu0 %4994 }
 0x9c9   : > { %18024 = vst [vmem:[#allocation162_spill] sm:$0xff] %v13606_v32  ;;  %5636 = vrot.lane.b32.xlu0 %v18014_v2, %s11019_s12 }
 0x9ca   : > { %v13610_v13 = vpop.permute.xlu1 %5018 }
 0x9cb   : > { %18025 = vst [vmem:[#allocation163_spill] sm:$0xff] %v13610_v13  ;;  %3628 = vrot.lane.b32.xlu1 %v18026_v24, %s11014_s20  ;;  %v18031_v13 = vld [vmem:[#allocation113_spill] sm:$0xff] }
 0x9cc   : > { %v13614_v11 = vpop.permute.xlu0 %4788 }
 0x9cd   : > { %18027 = vst [vmem:[#allocation112_spill] sm:$0xff] %v13614_v11  ;;  %3660 = vrot.lane.b32.xlu0 %v18026_v24, %s11016_s27 }
 0x9ce   : > { %v13618_v48 = vpop.permute.xlu1 %4792 }
 0x9cf   : > { %18028 = vst [vmem:[#allocation164_spill] sm:$0xff] %v13618_v48  ;;  %3692 = vrot.lane.b32.xlu1 %v18026_v24, %s17700_s26 }
 0x9d0   : > { %v13622_v43 = vpop.permute.xlu0 %4884 }
 0x9d1   : > { %18029 = vst [vmem:[#allocation165_spill] sm:$0xff] %v13622_v43  ;;  %3724 = vrot.lane.b32.xlu0 %v18026_v24, %s11017_s8 }
 0x9d2   : > { %v13626_v63 = vpop.permute.xlu1 %4888 }
 0x9d3   : > { %18030 = vst [vmem:[#allocation166_spill] sm:$0xff] %v13626_v63  ;;  %3766 = vrot.lane.b32.xlu1 %v18031_v13, %s11013_s19  ;;  %v18036_v63 = vld [vmem:[#allocation90_spill] sm:$0xff] }
 0x9d4   : > { %v13630_v32 = vpop.permute.xlu0 %5102 }
 0x9d5   : > { %18032 = vst [vmem:[#allocation113_spill] sm:$0xff] %v13630_v32  ;;  %3798 = vrot.lane.b32.xlu0 %v18031_v13, %s11018_s11 }
 0x9d6   : > { %v13634_v11 = vpop.permute.xlu1 %5106 }
 0x9d7   : > { %18033 = vst [vmem:[#allocation167_spill] sm:$0xff] %v13634_v11  ;;  %3830 = vrot.lane.b32.xlu1 %v18031_v13, %s11012_s18 }
 0x9d8   : > { %v13638_v48 = vpop.permute.xlu0 %5130 }
 0x9d9   : > { %18034 = vst [vmem:[#allocation168_spill] sm:$0xff] %v13638_v48  ;;  %4798 = vrot.lane.b32.xlu0 %v18009_v22, %s11014_s20  ;;  %v18040_v48 = vld [vmem:[#allocation114_spill] sm:$0xff] }
 0x9da   : > { %v13642_v43 = vpop.permute.xlu1 %4996 }
 0x9db   : > { %18035 = vst [vmem:[#allocation169_spill] sm:$0xff] %v13642_v43  ;;  %4802 = vrot.lane.b32.xlu1 %v18036_v63, %s11014_s20 }
 0x9dc   : > { %v13646_v38 = vpop.permute.xlu0 %5000 }
 0x9dd   : > { %18037 = vst [vmem:[#allocation170_spill] sm:$0xff] %v13646_v38  ;;  %4894 = vrot.lane.b32.xlu0 %v18009_v22, %s11016_s27 }
 0x9de   : > { %v13650_v32 = vpop.permute.xlu1 %5108 }
 0x9df   : > { %18038 = vst [vmem:[#allocation171_spill] sm:$0xff] %v13650_v32  ;;  %4898 = vrot.lane.b32.xlu1 %v18036_v63, %s11016_s27 }
 0x9e0   : > { %v13654_v11 = vpop.permute.xlu0 %5112 }
 0x9e1   : > { %18039 = vst [vmem:[#allocation172_spill] sm:$0xff] %v13654_v11  ;;  %3636 = vrot.lane.b32.xlu0 %v18040_v48, %s11014_s20 }
 0x9e2   : > { %v13658_v46 = vpop.permute.xlu1 %5282 }
 0x9e3   : > { %18041 = vst [vmem:[#allocation173_spill] sm:$0xff] %v13658_v46  ;;  %3668 = vrot.lane.b32.xlu1 %v18040_v48, %s11016_s27 }
 0x9e4   : > { %v13662_v43 = vpop.permute.xlu0 %5286 }
 0x9e5   : > { %18042 = vst [vmem:[#allocation174_spill] sm:$0xff] %v13662_v43  ;;  %3862 = vrot.lane.b32.xlu0 %v18031_v13, %s11019_s12 }
 0x9e6   : > { %v13666_v38 = vpop.permute.xlu1 %5278 }
 0x9e7   : > { %18043 = vst [vmem:[#allocation175_spill] sm:$0xff] %v13666_v38  ;;  %5006 = vrot.lane.b32.xlu1 %v18009_v22, %s17700_s26 }
 0x9e8   : > { %v13670_v32 = vpop.permute.xlu0 %5394 }
 0x9e9   : > { %18044 = vst [vmem:[#allocation176_spill] sm:$0xff] %v13670_v32  ;;  %5010 = vrot.lane.b32.xlu0 %v18036_v63, %s17700_s26 }
 0x9ea   : > { %v13674_v11 = vpop.permute.xlu1 %5398 }
 0x9eb   : > { %18045 = vst [vmem:[#allocation177_spill] sm:$0xff] %v13674_v11  ;;  %4804 = vrot.lane.b32.xlu1 %v18014_v2, %s11014_s20 }
 0x9ec   : > { %v13678_v46 = vpop.permute.xlu0 %5390 }
 0x9ed   : > { %18046 = vst [vmem:[#allocation178_spill] sm:$0xff] %v13678_v46  ;;  %4900 = vrot.lane.b32.xlu0 %v18014_v2, %s11016_s27 }
 0x9ee   : > { %v13682_v43 = vpop.permute.xlu1 %5288 }
 0x9ef   : > { %18047 = vst [vmem:[#allocation179_spill] sm:$0xff] %v13682_v43  ;;  %5118 = vrot.lane.b32.xlu1 %v18009_v22, %s11017_s8  ;;  %v18053_v43 = vld [vmem:[#allocation93_spill] sm:$0xff] }
 0x9f0   : > { %v13686_v38 = vpop.permute.xlu0 %5292 }
 0x9f1   : > { %18048 = vst [vmem:[#allocation180_spill] sm:$0xff] %v13686_v38  ;;  %5122 = vrot.lane.b32.xlu0 %v18036_v63, %s11017_s8 }
 0x9f2   : > { %v13690_v32 = vpop.permute.xlu1 %5506 }
 0x9f3   : > { %18049 = vst [vmem:[#allocation181_spill] sm:$0xff] %v13690_v32  ;;  %3700 = vrot.lane.b32.xlu1 %v18040_v48, %s17700_s26 }
 0x9f4   : > { %v13694_v11 = vpop.permute.xlu0 %5510 }
 0x9f5   : > { %18050 = vst [vmem:[#allocation182_spill] sm:$0xff] %v13694_v11  ;;  %3732 = vrot.lane.b32.xlu0 %v18040_v48, %s11017_s8 }
 0x9f6   : > { %v13698_v46 = vpop.permute.xlu1 %5502 }
 0x9f7   : > { %18051 = vst [vmem:[#allocation183_spill] sm:$0xff] %v13698_v46  ;;  %5012 = vrot.lane.b32.xlu1 %v18014_v2, %s17700_s26 }
 0x9f8   : > { %v13702_v22 = vpop.permute.xlu0 %5400 }
 0x9f9   : > { %18052 = vst [vmem:[#allocation184_spill] sm:$0xff] %v13702_v22  ;;  %4806 = vrot.lane.b32.xlu0 %v18053_v43, %s11014_s20 }
 0x9fa   : > { %v13706_v38 = vpop.permute.xlu1 %5404 }
 0x9fb   : > { %18054 = vst [vmem:[#allocation185_spill] sm:$0xff] %v13706_v38  ;;  %4902 = vrot.lane.b32.xlu1 %v18053_v43, %s11016_s27  ;;  %v18059_v38 = vld [vmem:[#allocation115_spill] sm:$0xff] }
 0x9fc   : > { %v13710_v32 = vpop.permute.xlu0 %5618 }
 0x9fd   : > { %18055 = vst [vmem:[#allocation186_spill] sm:$0xff] %v13710_v32  ;;  %5124 = vrot.lane.b32.xlu0 %v18014_v2, %s11017_s8 }
 0x9fe   : > { %v13714_v11 = vpop.permute.xlu1 %5622 }
 0x9ff   : > { %18056 = vst [vmem:[#allocation187_spill] sm:$0xff] %v13714_v11  ;;  %5298 = vrot.lane.b32.xlu1 %v18036_v63, %s11013_s19 }
 0xa00   : > { %v13718_v46 = vpop.permute.xlu0 %5614 }
 0xa01   : > { %18057 = vst [vmem:[#allocation188_spill] sm:$0xff] %v13718_v46  ;;  %5302 = vrot.lane.b32.xlu0 %v18053_v43, %s11013_s19 }
 0xa02   : > { %v13722_v22 = vpop.permute.xlu1 %5512 }
 0xa03   : > { %18058 = vst [vmem:[#allocation189_spill] sm:$0xff] %v13722_v22  ;;  %3774 = vrot.lane.b32.xlu1 %v18059_v38, %s11013_s19 }
 0xa04   : > { %v13726_v49 = vpop.permute.xlu0 %5516 }
 0xa05   : > { %18060 = vst [vmem:[#allocation190_spill] sm:$0xff] %v13726_v49  ;;  %5014 = vrot.lane.b32.xlu0 %v18053_v43, %s17700_s26  ;;  %v18065_v49 = vld [vmem:[#allocation92_spill] sm:$0xff] }
 0xa06   : > { %v13730_v2 = vpop.permute.xlu1 %5624 }
 0xa07   : > { %18061 = vst [vmem:[#allocation191_spill] sm:$0xff] %v13730_v2  ;;  %5410 = vrot.lane.b32.xlu1 %v18036_v63, %s11018_s11 }
 0xa08   : > { %v13734_v32 = vpop.permute.xlu0 %5628 }
 0xa09   : > { %18062 = vst [vmem:[#allocation192_spill] sm:$0xff] %v13734_v32  ;;  %5414 = vrot.lane.b32.xlu0 %v18053_v43, %s11018_s11 }
 0xa0a   : > { %v13738_v46 = vpop.permute.xlu1 %4790 }
 0xa0b   : > { %18063 = vst [vmem:[#allocation193_spill] sm:$0xff] %v13738_v46  ;;  %5126 = vrot.lane.b32.xlu1 %v18053_v43, %s11017_s8 }
 0xa0c   : > { %v13742_v22 = vpop.permute.xlu0 %4794 }
 0xa0d   : > { %18064 = vst [vmem:[#allocation194_spill] sm:$0xff] %v13742_v22  ;;  %5304 = vrot.lane.b32.xlu0 %v18065_v49, %s11013_s19 }
 0xa0e   : > { %v13746_v11 = vpop.permute.xlu1 %4886 }
 0xa0f   : > { %18066 = vst [vmem:[#allocation195_spill] sm:$0xff] %v13746_v11  ;;  %5522 = vrot.lane.b32.xlu1 %v18036_v63, %s11012_s18 }
 0xa10   : > { %v13750_v2 = vpop.permute.xlu0 %4890 }
 0xa11   : > { %18067 = vst [vmem:[#allocation196_spill] sm:$0xff] %v13750_v2  ;;  %5526 = vrot.lane.b32.xlu0 %v18053_v43, %s11012_s18 }
 0xa12   : > { %v13754_v32 = vpop.permute.xlu1 %4998 }
 0xa13   : > { %18068 = vst [vmem:[#allocation197_spill] sm:$0xff] %v13754_v32  ;;  %3806 = vrot.lane.b32.xlu1 %v18059_v38, %s11018_s11 }
 0xa14   : > { %v13758_v46 = vpop.permute.xlu0 %5002 }
 0xa15   : > { %18069 = vst [vmem:[#allocation198_spill] sm:$0xff] %v13758_v46  ;;  %3838 = vrot.lane.b32.xlu0 %v18059_v38, %s11012_s18 }
 0xa16   : > { %v13762_v22 = vpop.permute.xlu1 %4796 }
 0xa17   : > { %18070 = vst [vmem:[#allocation199_spill] sm:$0xff] %v13762_v22  ;;  %5416 = vrot.lane.b32.xlu1 %v18065_v49, %s11018_s11 }
 0xa18   : > { %v13766_v11 = vpop.permute.xlu0 %4800 }
 0xa19   : > { %18071 = vst [vmem:[#allocation200_spill] sm:$0xff] %v13766_v11  ;;  %5634 = vrot.lane.b32.xlu0 %v18036_v63, %s11019_s12 }
 0xa1a   : > { %v13770_v2 = vpop.permute.xlu1 %4892 }
 0xa1b   : > { %18072 = vst [vmem:[#allocation201_spill] sm:$0xff] %v13770_v2  ;;  %5638 = vrot.lane.b32.xlu1 %v18053_v43, %s11019_s12 }
 0xa1c   : > { %v13774_v32 = vpop.permute.xlu0 %4896 }
 0xa1d   : > { %18073 = vst [vmem:[#allocation202_spill] sm:$0xff] %v13774_v32  ;;  %5306 = vrot.lane.b32.xlu0 %v17934_v40, %s11013_s19 }
 0xa1e   : > { %v13778_v46 = vpop.permute.xlu1 %5110 }
 0xa1f   : > { %18074 = vst [vmem:[#allocation203_spill] sm:$0xff] %v13778_v46  ;;  %5528 = vrot.lane.b32.xlu1 %v18065_v49, %s11012_s18 }
 0xa20   : > { %v13782_v22 = vpop.permute.xlu0 %5114 }
 0xa21   : > { %18075 = vst [vmem:[#allocation204_spill] sm:$0xff] %v13782_v22  ;;  %5418 = vrot.lane.b32.xlu0 %v17934_v40, %s11018_s11 }
 0xa22   : > { %v13786_v63 = vpop.permute.xlu1 %5004 }
 0xa23   : > { %18076 = vst [vmem:[#allocation205_spill] sm:$0xff] %v13786_v63  ;;  %5640 = vrot.lane.b32.xlu1 %v18065_v49, %s11019_s12 }
 0xa24   : > { %v13790_v43 = vpop.permute.xlu0 %5008 }
 0xa25   : > { %18077 = vst [vmem:[#allocation206_spill] sm:$0xff] %v13790_v43  ;;  %3870 = vrot.lane.b32.xlu0 %v18059_v38, %s11019_s12 }
 0xa26   : > { %v13794_v11 = vpop.permute.xlu1 %5116 }
 0xa27   : > { %18078 = vst [vmem:[#allocation207_spill] sm:$0xff] %v13794_v11  ;;  %5530 = vrot.lane.b32.xlu1 %v17934_v40, %s11012_s18 }
 0xa28   : > { %v13798_v2 = vpop.permute.xlu0 %5120 }
 0xa29   : > { %18079 = vst [vmem:[#allocation208_spill] sm:$0xff] %v13798_v2  ;;  %5642 = vrot.lane.b32.xlu0 %v17934_v40, %s11019_s12 }
 0xa2a   : > { %v13802_v32 = vpop.permute.xlu1 %5290 }
 0xa2b   : > { %18080 = vst [vmem:[#allocation209_spill] sm:$0xff] %v13802_v32 }
 0xa2c   : > { %v13804_v63 = vpop.permute.xlu0 %5294 }
 0xa2d   : > { %18081 = vst [vmem:[#allocation210_spill] sm:$0xff] %v13804_v63 }
 0xa2e   : > { %v13806_v49 = vpop.permute.xlu1 %5402 }
 0xa2f   : > { %18082 = vst [vmem:[#allocation211_spill] sm:$0xff] %v13806_v49  ;;  %v330_v49 = vld [vmem:[%s17263_s2 + $0x88] sm:$0xff] }
 0xa30   : > { %v13808_v43 = vpop.permute.xlu0 %5406 }
 0xa31   : > { %18083 = vst [vmem:[#allocation212_spill] sm:$0xff] %v13808_v43  ;;  %v18088_v43 = vld [vmem:[#allocation12_spill] sm:$0xff] }
 0xa32   : > { %v13810_v46 = vpop.permute.xlu1 %5296 }
 0xa33   : > { %18084 = vst [vmem:[#allocation213_spill] sm:$0xff] %v13810_v46 }
 0xa34   : > { %v13812_v22 = vpop.permute.xlu0 %5300 }
 0xa35   : > { %18085 = vst [vmem:[#allocation214_spill] sm:$0xff] %v13812_v22  ;;  %v3958_v11 = vpop.f32.mrb[36].mxu0  ;;  %v13826_v22 = vrot.slane %v330_v49, %v18088_v43 }
 0xa36   : > { %v4180_v29 = vmul.f32 %v13470_v39, %v3958_v11  ;;  %v3960_v38 = vpop.f32.mrb[37].mxu0  ;;  %v13815_v2 = vpop.permute.xlu1 %5514 }
 0xa37   : > { %18086 = vst [vmem:[#allocation215_spill] sm:$0xff] %v13815_v2  ;;  %v4181_v40 = vmul.f32 %v13470_v39, %v3960_v38  ;;  %18089 = vst [vmem:[#allocation12_spill] sm:$0xff] %v13826_v22  ;;  %v4920_v38 = vsel %vm835_vm2, %v13490_v44, %v13494_v30  ;;  %v18096_v30 = vld [vmem:[#allocation21_spill] sm:$0xff] }
 0xa38   : > { %v4192_v32 = vadd.f32 %v13466_v53, %v4180_v29  ;;  %v13819_v48 = vpop.permute.xlu0 %5518  ;;  %v18091_v29 = vld [vmem:[#allocation11_spill] sm:$0xff]  ;;  %v13852_v9 = vrot.slane %v330_v49, %v18096_v30 }
 0xa39   : > { %18087 = vst [vmem:[#allocation216_spill] sm:$0xff] %v13819_v48  ;;  %v4193_v46 = vadd.f32 %v13466_v53, %v4181_v40  ;;  %v13835_v2 = vrot.slane %v330_v49, %v18091_v29  ;;  %v18093_v48 = vld [vmem:[#allocation22_spill] sm:$0xff]  ;;  %v4824_v40 = vsel %vm770_vm1, %v13482_v51, %v13486_v55  ;;  %v18101_v55 = vld [vmem:[#allocation27_spill] sm:$0xff] }
 0xa3a   : > { %v13828_v63 = vpop.permute.xlu1 %5408  ;;  %v13838_v16 = vrot.slane %v330_v49, %v18093_v48  ;;  %v4200_v6 = vmax.f32 %v4192_v32, 0.0  ;;  %18097 = vst [vmem:[#allocation220_spill] sm:$0xff] %v13852_v9  ;;  %v5144_v32 = vsel %vm965_vm3, %v13518_v56, %v13522_v31 }
 0xa3b   : > { %18090 = vst [vmem:[#allocation217_spill] sm:$0xff] %v13828_v63  ;;  %v4201_v11 = vmax.f32 %v4193_v46, 0.0  ;;  %18092 = vst [vmem:[#allocation11_spill] sm:$0xff] %v13835_v2  ;;  %v5032_v63 = vsel %vm900_vm4, %v13506_v8, %v13510_v27  ;;  %v4957_v46 = vadd.f32 %v13826_v22, %v4920_v38  ;;  %v13873_v22 = vrot.slane %v330_v49, %v18101_v55 }
 0xa3c   : > { %18094 = vst [vmem:[#allocation218_spill] sm:$0xff] %v13838_v16  ;;  %v13840_v52 = vpop.permute.xlu0 %5412 }
 0xa3d   : > { %18095 = vst [vmem:[#allocation219_spill] sm:$0xff] %v13840_v52  ;;  %4216 = vmatprep.subr.mxu0 %v4201_v11  ;;  %v4861_v52 = vadd.f32 %v13835_v2, %v4824_v40  ;;  %v5069_v11 = vadd.f32 %v13838_v16, %v5032_v63  ;;  %18102 = vst [vmem:[#allocation224_spill] sm:$0xff] %v13873_v22  ;;  %v13876_v40 = vrot.slane %v330_v49, %v18103_v62 }
 0xa3e   : > { %v13854_v25 = vpop.permute.xlu1 %5626  ;;  %4217 = vmatpush1.msra.mxu0 %v4200_v6  ;;  %v5430_v2 = vsel %vm1135_vm7, %v13542_v45, %v13546_v61  ;;  %v18116_v45 = vld [vmem:[#allocation17_spill] sm:$0xff] }
 0xa3f   : > { %18098 = vst [vmem:[#allocation221_spill] sm:$0xff] %v13854_v25  ;;  %9751 = vmatmul.mubr.msk.f32.vlgmr.msra.gmra.mrb[40].mxu0 %vm1639_vm10, %v13474_v1  ;;  %v4973_v38 = vmax.f32 %v4861_v52, %v4957_v46  ;;  %v5181_v25 = vadd.f32 %v13852_v9, %v5144_v32  ;;  %18104 = vst [vmem:[#allocation225_spill] sm:$0xff] %v13876_v40  ;;  %v5318_v52 = vsel %vm1070_vm5, %v13530_v12, %v13534_v23  ;;  %v18109_v9 = vld [vmem:[#allocation34_spill] sm:$0xff] }
 0xa40   : > { %v13864_v27 = vpop.permute.xlu0 %5630  ;;  %4286 = vmatprep.mubr.f32.mxu0 %v17794_v3  ;;  %v13893_v16 = vrot.slane %v330_v49, %v18109_v9 }
 0xa41   : > { %18099 = vst [vmem:[#allocation222_spill] sm:$0xff] %v13864_v27  ;;  %v5085_v31 = vmax.f32 %v4973_v38, %v5069_v11  ;;  %v5357_v38 = vadd.f32 %v13876_v40, %v5318_v52  ;;  %v4527_v40 = vld [vmem:[#allocation3 + $0x18] sm:$0xff] }
 0xa42   : > { %v13868_v6 = vpop.permute.xlu1 %5520  ;;  %18110 = vst [vmem:[#allocation228_spill] sm:$0xff] %v13893_v16  ;;  %v5469_v61 = vadd.f32 %v13893_v16, %v5430_v2  ;;  %v18117_v16 = vld [vmem:[#allocation19_spill] sm:$0xff] }
 0xa43   : > { %18100 = vst [vmem:[#allocation223_spill] sm:$0xff] %v13868_v6  ;;  %9752 = vmatmul.mubr.msk.f32.gmra.mrb[42].mxu0 %vm1639_vm10, %v13478_v47  ;;  %v5197_v46 = vmax.f32 %v5085_v31, %v5181_v25  ;;  %v18107_v6 = vld [vmem:[#allocation82_spill] sm:$0xff]  ;;  %v18111_v31 = vld [vmem:[#allocation119_spill] sm:$0xff] }
 0xa44   : > { %v13878_v63 = vpop.permute.xlu0 %5524  ;;  %4434 = vmatprep.mubr.f32.mxu0 %v17794_v3  ;;  %v5245_v11 = vadd.f32 %v13873_v22, %v18107_v6  ;;  %v18112_v6 = vld [vmem:[#allocation33_spill] sm:$0xff]  ;;  %v18118_v22 = vld [vmem:[#allocation18_spill] sm:$0xff] }
 0xa45   : > { %18105 = vst [vmem:[#allocation226_spill] sm:$0xff] %v13878_v63  ;;  %v13903_v12 = vrot.slane %v330_v49, %v18112_v6 }
 0xa46   : > { %v13885_v32 = vpop.permute.xlu1 %5632  ;;  %v5261_v63 = vmax.f32 %v5197_v46, %v5245_v11  ;;  %v18113_v46 = vld [vmem:[#allocation32_spill] sm:$0xff] }
 0xa47   : > { %18106 = vst [vmem:[#allocation227_spill] sm:$0xff] %v13885_v32  ;;  %v13910_v11 = vmul.f32 %v18026_v24, %v18113_v46  ;;  %v18115_v24 = vld [vmem:[#allocation20_spill] sm:$0xff] }
 0xa48   : > { %v13890_v27 = vpop.permute.xlu0 %5636  ;;  %v5373_v32 = vmax.f32 %v5261_v63, %v5357_v38  ;;  %v18114_v63 = vld [vmem:[#allocation120_spill] sm:$0xff] }
 0xa49   : > { %18108 = vst [vmem:[#allocation82_spill] sm:$0xff] %v13890_v27  ;;  %v4525_v38 = vld [vmem:[#allocation3 + $0x8] sm:$0xff] }
 0xa4a   : > { %v3629_v23 = vpop.permute.xlu1 %3628 }
 0xa4b   : > { %v3645_v25 = vsel %vm770_vm1, %v18111_v31, %v3629_v23  ;;  %v3644_v52 = vsel %vm770_vm1, %v3629_v23, %v13156_v26  ;;  %v5542_v31 = vsel %vm1200_vm6, %v13554_v59, %v13558_v37 }
 0xa4c   : > { %v3661_v27 = vpop.permute.xlu0 %3660  ;;  %v3650_v46 = vmul.f32 %v3645_v25, %v18115_v24  ;;  %v3651_v62 = vmul.f32 %v3644_v52, %v18118_v22  ;;  %v10056_v52 = vpack.c.bf16 %v4527_v40, %v4525_v38  ;;  %v4524_v22 = vld [vmem:[#allocation3] sm:$0xff]  ;;  %v18124_v40 = vld [vmem:[#allocation25_spill] sm:$0xff] }
 0xa4d   : > { %v3676_v49 = vsel %vm835_vm2, %v3661_v27, %v13170_v41  ;;  %v3677_v26 = vsel %vm835_vm2, %v18114_v63, %v3661_v27  ;;  %v4100_v23 = vpop.f32.mrb[38].mxu0  ;;  %v18119_v27 = vld [vmem:[#allocation121_spill] sm:$0xff] }
 0xa4e   : > { %v3682_v2 = vmul.f32 %v3677_v26, %v18116_v45  ;;  %v3683_v6 = vmul.f32 %v3676_v49, %v18117_v16  ;;  %v4184_v9 = vmul.f32 %v13470_v39, %v4100_v23  ;;  %v3693_v37 = vpop.permute.xlu1 %3692  ;;  %v4102_v59 = vpop.f32.mrb[39].mxu0  ;;  %v5654_v49 = vsel %vm17702_vm8, %v13566_v14, %v13570_v20  ;;  %v4526_v45 = vld [vmem:[#allocation3 + $0x10] sm:$0xff] }
 0xa4f   : > { %v3708_v41 = vsel %vm900_vm4, %v3693_v37, %v13178_v42  ;;  %v3709_v63 = vsel %vm900_vm4, %v18119_v27, %v3693_v37  ;;  %v4185_v25 = vmul.f32 %v13470_v39, %v4102_v59  ;;  %v18120_v27 = vld [vmem:[#allocation122_spill] sm:$0xff] }
 0xa50   : > { %v10010_v26 = vpack.c.bf16 %v3682_v2, %v3650_v46  ;;  %v4196_v23 = vadd.f32 %v13466_v53, %v4184_v9  ;;  %v3725_v16 = vpop.permute.xlu0 %3724  ;;  %v10008_v24 = vpack.c.bf16 %v3683_v6, %v3651_v62  ;;  %v18121_v39 = vld [vmem:[#allocation26_spill] sm:$0xff]  ;;  %v18122_v46 = vld [vmem:[#allocation24_spill] sm:$0xff]  ;;  %v18123_v9 = vld [vmem:[#allocation23_spill] sm:$0xff]  ;;  %v10058_v6 = vpack.c.bf16 %v4526_v45, %v4524_v22 }
 0xa51   : > { %v4197_v42 = vadd.f32 %v13466_v53, %v4185_v25  ;;  %v3740_v37 = vsel %vm965_vm3, %v3725_v16, %v13166_v60  ;;  %v3741_v59 = vsel %vm965_vm3, %v18120_v27, %v3725_v16  ;;  %v3714_v20 = vmul.f32 %v3709_v63, %v18121_v39  ;;  %v13954_v25 = vld [vmem:[%s17263_s2 + $0xc8] ss:$0 sm:$0xff]  ;;  %v4531_v63 = vld [vmem:[#allocation3 + $0x38] sm:$0xff]  ;;  %v18126_v39 = vld [vmem:[#allocation31_spill] sm:$0xff] }
 0xa52   : > { %v3715_v2 = vmul.f32 %v3708_v41, %v18122_v46  ;;  %v3746_v14 = vmul.f32 %v3741_v59, %v18123_v9  ;;  %v3747_v38 = vmul.f32 %v3740_v37, %v18124_v40  ;;  %v3767_v17 = vpop.permute.xlu1 %3766  ;;  %10009 = vmatprep.subr.bf16.mxu1 %v10008_v24  ;;  %v4529_v41 = vld [vmem:[#allocation3 + $0x28] sm:$0xff]  ;;  %v4204_v37 = vmax.f32 %v4196_v23, 0.0  ;;  %v18125_v59 = vld [vmem:[#allocation30_spill] sm:$0xff]  ;;  %v4528_v45 = vld [vmem:[#allocation3 + $0x20] sm:$0xff] }
 0xa53   : > { %v4205_v60 = vmax.f32 %v4197_v42, 0.0  ;;  %v3779_v62 = vsel %vm1070_vm5, %v3767_v17, %v13331_v28  ;;  %v3780_v16 = vsel %vm1070_vm5, %v13148_v34, %v3767_v17  ;;  %10011 = vmatpush1.bf16.msra.mxu1 %v10010_v26  ;;  %v5485_v42 = vmax.f32 %v5373_v32, %v5469_v61  ;;  %v4530_v17 = vld [vmem:[#allocation3 + $0x30] sm:$0xff]  ;;  %v18128_v23 = vld [vmem:[#allocation36_spill] sm:$0xff] }
 0xa54   : > { %v10014_v27 = vpack.c.bf16 %v3746_v14, %v3714_v20  ;;  %v3787_v40 = vmul.f32 %v3779_v62, %v18125_v59  ;;  %v3799_v46 = vpop.permute.xlu0 %3798  ;;  %v10012_v9 = vpack.c.bf16 %v3747_v38, %v3715_v2  ;;  %v5581_v24 = vadd.f32 %v13903_v12, %v5542_v31  ;;  %v18127_v14 = vld [vmem:[#allocation29_spill] sm:$0xff]  ;;  %v4533_v31 = vld [vmem:[#allocation3 + $0x48] sm:$0xff] }
 0xa55   : > { %v3811_v28 = vsel %vm1135_vm7, %v3799_v46, %v13367_v35  ;;  %4370 = vmatprep.subr.mxu0 %v4205_v60  ;;  %v3755_v22 = vmul.f32 %v18031_v13, %v18126_v39  ;;  %v5693_v34 = vadd.f32 %v13954_v25, %v5654_v49  ;;  %v3786_v20 = vmul.f32 %v3780_v16, %v18127_v14  ;;  %v4535_v49 = vld [vmem:[#allocation3 + $0x58] sm:$0xff]  ;;  %v4534_v62 = vld [vmem:[#allocation3 + $0x50] sm:$0xff]  ;;  %v4565_v14 = vld [vmem:[#allocation3 + $0x148] sm:$0xff] }
 0xa56   : > { %10013 = vmatprep.subr.bf16.mxu1 %v10012_v9  ;;  %v3831_v26 = vpop.permute.xlu1 %3830  ;;  %4371 = vmatpush1.msra.mxu0 %v4204_v37  ;;  %v10060_v61 = vpack.c.bf16 %v4531_v63, %v4529_v41  ;;  %v3819_v2 = vmul.f32 %v3811_v28, %v18128_v23  ;;  %v18129_v9 = vld [vmem:[#allocation37_spill] sm:$0xff]  ;;  %v18131_v41 = vld [vmem:[#allocation35_spill] sm:$0xff]  ;;  %v4537_v28 = vld [vmem:[#allocation3 + $0x68] sm:$0xff] }
 0xa57   : > { %v3843_v32 = vsel %vm1200_vm6, %v3831_v26, %v13424_v10  ;;  %v3844_v35 = vsel %vm1200_vm6, %v13154_v4, %v3831_v26  ;;  %9755 = vmatmul.mubr.msk.f32.vlgmr.msra.gmra.mrb[44].mxu0 %vm1639_vm10, %v13474_v1  ;;  %10057 = vmatprep.subr.bf16.mxu0 %v10056_v52  ;;  %v10016_v13 = vpack.c.bf16 %v3787_v40, %v3755_v22  ;;  %v4532_v40 = vld [vmem:[#allocation3 + $0x40] sm:$0xff]  ;;  %v4539_v22 = vld [vmem:[#allocation3 + $0x78] sm:$0xff]  ;;  %v18158_v1 = vld [vmem:[#allocation28_spill] sm:$0xff] }
 0xa58   : > { %v3851_v38 = vmul.f32 %v3843_v32, %v18129_v9  ;;  %10015 = vmatpush1.bf16.msra.mxu1 %v10014_v27  ;;  %v13981_v60 = vpop.permute.xlu0 %4798  ;;  %10059 = vmatpush1.bf16.msra.mxu0 %v10058_v6  ;;  %v10062_v10 = vpack.c.bf16 %v4530_v17, %v4528_v45  ;;  %v3812_v4 = vsel %vm1135_vm7, %v13146_v57, %v3799_v46  ;;  %v18133_v46 = vld [vmem:[#allocation38_spill] sm:$0xff]  ;;  %v4536_v17 = vld [vmem:[#allocation3 + $0x60] sm:$0xff]  ;;  %v4541_v32 = vld [vmem:[#allocation3 + $0x88] sm:$0xff] }
 0xa59   : > { %18130 = vst [vmem:[#allocation119_spill] sm:$0xff] %v13981_v60  ;;  %10017 = vmatprep.subr.bf16.mxu1 %v10016_v13  ;;  %4440 = vmatprep.mubr.f32.mxu0 %v17794_v3  ;;  %v5597_v52 = vmax.f32 %v5485_v42, %v5581_v24  ;;  %v10018_v16 = vpack.c.bf16 %v3786_v20, %v13910_v11  ;;  %v4538_v20 = vld [vmem:[#allocation3 + $0x70] sm:$0xff]  ;;  %v18151_v23 = vld [vmem:[#allocation130_spill] sm:$0xff] }
 0xa5a   : > { %v3850_v63 = vmul.f32 %v3844_v35, %v18131_v41  ;;  %v13989_v37 = vpop.permute.xlu1 %4802  ;;  %10061 = vmatprep.subr.bf16.mxu0 %v10060_v61  ;;  %v10020_v27 = vpack.c.bf16 %v3851_v38, %v3819_v2  ;;  %v10064_v6 = vpack.c.bf16 %v4535_v49, %v4533_v31  ;;  %v3818_v45 = vmul.f32 %v3812_v4, %v18133_v46  ;;  %v4543_v35 = vld [vmem:[#allocation3 + $0x98] sm:$0xff]  ;;  %v4540_v49 = vld [vmem:[#allocation3 + $0x80] sm:$0xff]  ;;  %v4542_v2 = vld [vmem:[#allocation3 + $0x90] sm:$0xff] }
 0xa5b   : > { %18132 = vst [vmem:[#allocation120_spill] sm:$0xff] %v13989_v37  ;;  %9756 = vmatmul.mubr.msk.f32.gmra.mrb[46].mxu0 %vm1639_vm10, %v13478_v47  ;;  %v5709_v57 = vmax.f32 %v5597_v52, %v5693_v34  ;;  %v10066_v11 = vpack.c.bf16 %v4534_v62, %v4532_v40  ;;  %v10068_v24 = vpack.c.bf16 %v4539_v22, %v4537_v28  ;;  %v4547_v4 = vld [vmem:[#allocation3 + $0xb8] sm:$0xff]  ;;  %v18136_v52 = vld [vmem:[#allocation127_spill] sm:$0xff]  ;;  %v18137_v62 = vld [vmem:[#allocation128_spill] sm:$0xff] }
 0xa5c   : > { %10019 = vmatpush1.bf16.msra.mxu1 %v10018_v16  ;;  %v13994_v42 = vpop.permute.xlu0 %4894  ;;  %10063 = vmatpush1.bf16.msra.mxu0 %v10062_v10  ;;  %v10022_v26 = vpack.c.bf16 %v3850_v63, %v3818_v45  ;;  %v10070_v13 = vpack.c.bf16 %v4538_v20, %v4536_v17  ;;  %v10072_v31 = vpack.c.bf16 %v4543_v35, %v4541_v32  ;;  %v4545_v10 = vld [vmem:[#allocation3 + $0xa8] sm:$0xff]  ;;  %v4544_v20 = vld [vmem:[#allocation3 + $0xa0] sm:$0xff]  ;;  %v10932_v35 = vld [vmem:[%s17263_s2 + $0x50] ss:$0 sm:$0xff] }
 0xa5d   : > { %18134 = vst [vmem:[#allocation121_spill] sm:$0xff] %v13994_v42  ;;  %10021 = vmatprep.subr.bf16.mxu1 %v10020_v27  ;;  %5788 = vmatprep.mubr.f32.mxu0 %v5709_v57  ;;  %v10074_v57 = vpack.c.bf16 %v4542_v2, %v4540_v49  ;;  %v18139_v45 = vld [vmem:[#allocation68_spill] sm:$0xff]  ;;  %v18152_v41 = vld [vmem:[#allocation131_spill] sm:$0xff]  ;;  %v18154_v46 = vld [vmem:[#allocation62_spill] sm:$0xff] }
 0xa5e   : > { %v13996_v61 = vpop.permute.xlu1 %4898  ;;  %10065 = vmatprep.subr.bf16.mxu0 %v10064_v6  ;;  %v18138_v6 = vld [vmem:[#allocation61_spill] sm:$0xff]  ;;  %v4549_v2 = vld [vmem:[#allocation3 + $0xc8] sm:$0xff]  ;;  %v18181_v37 = vld [vmem:[#allocation11_spill] sm:$0xff] }
 0xa5f   : > { %18135 = vst [vmem:[#allocation122_spill] sm:$0xff] %v13996_v61  ;;  %v18166_v53 = vld [vmem:[#allocation157_spill] sm:$0xff] }
 0xa60   : > { %10023 = vmatpush1.bf16.msra.mxu1 %v10022_v26  ;;  %v3637_v34 = vpop.permute.xlu0 %3636  ;;  %10067 = vmatpush1.bf16.msra.mxu0 %v10066_v11  ;;  %v4546_v26 = vld [vmem:[#allocation3 + $0xb0] sm:$0xff] }
 0xa61   : > { %10069 = vmatprep.subr.bf16.mxu0 %v10068_v24  ;;  %v3640_v40 = vsel %vm770_vm1, %v3637_v34, %v18136_v52  ;;  %v3641_v27 = vsel %vm770_vm1, %v13326_v36, %v3637_v34  ;;  %v18140_v36 = vld [vmem:[#allocation60_spill] sm:$0xff]  ;;  %v10078_v52 = vpack.c.bf16 %v4546_v26, %v4544_v20  ;;  %v14053_v20 = vld [vmem:[%s17263_s2 + $0x98] sm:$0xff] }
 0xa62   : > { %v3669_v38 = vpop.permute.xlu1 %3668  ;;  %v3655_v32 = vmul.f32 %v3640_v40, %v18140_v36  ;;  %v4563_v36 = vld [vmem:[#allocation3 + $0x138] sm:$0xff] }
 0xa63   : > { %v3672_v16 = vsel %vm835_vm2, %v3669_v38, %v18137_v62  ;;  %v3673_v63 = vsel %vm835_vm2, %v13348_v18, %v3669_v38  ;;  %v10076_v18 = vpack.c.bf16 %v4547_v4, %v4545_v10 }
 0xa64   : > { %v3687_v28 = vmul.f32 %v3672_v16, %v18138_v6  ;;  %v3863_v22 = vpop.permute.xlu0 %3862  ;;  %10071 = vmatpush1.bf16.msra.mxu0 %v10070_v13  ;;  %v3686_v11 = vmul.f32 %v3673_v63, %v18139_v45  ;;  %v4548_v16 = vld [vmem:[#allocation3 + $0xc0] sm:$0xff]  ;;  %v4550_v63 = vld [vmem:[#allocation3 + $0xd0] sm:$0xff]  ;;  %v4561_v45 = vld [vmem:[#allocation3 + $0x128] sm:$0xff] }
 0xa65   : > { %v3875_v24 = vsel %vm17702_vm8, %v3863_v22, %v13435_v15  ;;  %v3876_v17 = vsel %vm17702_vm8, %v13162_v7, %v3863_v22  ;;  %10073 = vmatprep.subr.bf16.mxu0 %v10072_v31  ;;  %v10933_v15 = vld [vmem:[%s17263_s2 + $0x58] ss:$0 sm:$0xff]  ;;  %v18142_v31 = vld [vmem:[#allocation64_spill] sm:$0xff] }
 0xa66   : > { %v3882_v34 = vmul.f32 %v10932_v35, %v3876_v17  ;;  %v14022_v13 = vpop.permute.xlu1 %5006  ;;  %v3883_v49 = vmul.f32 %v10933_v15, %v3875_v24  ;;  %v4551_v7 = vld [vmem:[#allocation3 + $0xd8] sm:$0xff]  ;;  %v3654_v38 = vmul.f32 %v3641_v27, %v18142_v31  ;;  %v10040_v4 = vpack.c.bf16 %v3687_v28, %v3655_v32  ;;  %v4553_v24 = vld [vmem:[#allocation3 + $0xe8] sm:$0xff]  ;;  %v4552_v32 = vld [vmem:[#allocation3 + $0xe0] sm:$0xff] }
 0xa67   : > { %18141 = vst [vmem:[#allocation127_spill] sm:$0xff] %v14022_v13  ;;  %v10080_v62 = vpack.c.bf16 %v4551_v7, %v4549_v2  ;;  %v4555_v27 = vld [vmem:[#allocation3 + $0xf8] sm:$0xff]  ;;  %v10082_v17 = vpack.c.bf16 %v4550_v63, %v4548_v16  ;;  %v4554_v35 = vld [vmem:[#allocation3 + $0xf0] sm:$0xff]  ;;  %v18190_v13 = vld [vmem:[#allocation167_spill] sm:$0xff] }
 0xa68   : > { %v14028_v10 = vpop.permute.xlu0 %5010  ;;  %3979 = vmatprep.subr.mxu1 %v3883_v49  ;;  %10075 = vmatpush1.bf16.msra.mxu0 %v10074_v57  ;;  %v10042_v40 = vpack.c.bf16 %v3686_v11, %v3654_v38  ;;  %v14037_v57 = vld [vmem:[%s17263_s2 + $0x80] sm:$0xff]  ;;  %v10084_v26 = vpack.c.bf16 %v4555_v27, %v4553_v24  ;;  %v4557_v49 = vld [vmem:[#allocation3 + $0x108] sm:$0xff]  ;;  %v4559_v2 = vld [vmem:[#allocation3 + $0x118] sm:$0xff] }
 0xa69   : > { %18143 = vst [vmem:[#allocation128_spill] sm:$0xff] %v14028_v10  ;;  %3980 = vmatpush1.msra.mxu1 %v3882_v34  ;;  %10077 = vmatprep.subr.bf16.mxu0 %v10076_v18  ;;  %v14042_v28 = vrot.slane %v14037_v57, %v18088_v43  ;;  %v4922_v18 = vsel %vm835_vm2, %v13502_v50, %v13490_v44  ;;  %v4556_v24 = vld [vmem:[#allocation3 + $0x100] sm:$0xff]  ;;  %v4558_v27 = vld [vmem:[#allocation3 + $0x110] sm:$0xff] }
 0xa6a   : > { %9748 = vmatmul.mubr.msk.f32.vlgmr.msra.gmra.mrb[36].mxu1 %vm1316_vm9, %v13140_v54  ;;  %10041 = vmatprep.subr.bf16.mxu1 %v10040_v4  ;;  %v14032_v22 = vpop.permute.xlu1 %4804  ;;  %v14057_v34 = vrot.slane %v14037_v57, %v18091_v29  ;;  %v4826_v44 = vsel %vm770_vm1, %v13498_v5, %v13482_v51  ;;  %v14067_v7 = vrot.slane %v14037_v57, %v18093_v48  ;;  %v4568_v5 = vld [vmem:[#allocation3 + $0x160] sm:$0xff]  ;;  %v4570_v10 = vld [vmem:[#allocation3 + $0x170] sm:$0xff] }
 0xa6b   : > { %18144 = vst [vmem:[#allocation229_spill] sm:$0xff] %v14032_v22  ;;  %10043 = vmatpush1.bf16.msra.mxu1 %v10042_v40  ;;  %4169 = vmatprep.mubr.f32.mxu1 %v17794_v3  ;;  %v5215_v38 = vrot.slane %v14037_v57, %v18101_v55  ;;  %v4956_v4 = vadd.f32 %v14042_v28, %v4922_v18  ;;  %v18180_v22 = vld [vmem:[#allocation148_spill] sm:$0xff] }
 0xa6c   : > { %v14044_v11 = vpop.permute.xlu0 %4900  ;;  %10079 = vmatpush1.bf16.msra.mxu0 %v10078_v52  ;;  %v5034_v52 = vsel %vm900_vm4, %v13514_v0, %v13506_v8  ;;  %v14078_v40 = vrot.slane %v14053_v20, %v18101_v55  ;;  %v10086_v51 = vpack.c.bf16 %v4554_v35, %v4552_v32  ;;  %v14084_v16 = vrot.slane %v14037_v57, %v18096_v30  ;;  %v18149_v32 = vld [vmem:[#allocation129_spill] sm:$0xff] }
 0xa6d   : > { %18145 = vst [vmem:[#allocation230_spill] sm:$0xff] %v14044_v11  ;;  %10081 = vmatprep.subr.bf16.mxu0 %v10080_v62  ;;  %v10088_v63 = vpack.c.bf16 %v4559_v2, %v4557_v49  ;;  %v4860_v18 = vadd.f32 %v14057_v34, %v4826_v44  ;;  %v5146_v8 = vsel %vm965_vm3, %v13526_v19, %v13518_v56  ;;  %v18150_v2 = vld [vmem:[#allocation16_spill] sm:$0xff]  ;;  %v18167_v19 = vld [vmem:[#allocation50_spill] sm:$0xff] }
 0xa6e   : > { %v14059_v15 = vpop.permute.xlu1 %5118  ;;  %18147 = vst [vmem:[#allocation232_spill] sm:$0xff] %v14078_v40  ;;  %v5244_v44 = vadd.f32 %v5215_v38, %v18150_v2  ;;  %v14101_v6 = vadd.f32 %v14078_v40, %v17914_v58  ;;  %v10090_v9 = vpack.c.bf16 %v4558_v27, %v4556_v24  ;;  %v18153_v2 = vld [vmem:[#allocation66_spill] sm:$0xff]  ;;  %v18156_v27 = vld [vmem:[#allocation76_spill] sm:$0xff] }
 0xa6f   : > { %18146 = vst [vmem:[#allocation231_spill] sm:$0xff] %v14059_v15  ;;  %v4972_v49 = vmax.f32 %v4860_v18, %v4956_v4  ;;  %v4560_v4 = vld [vmem:[#allocation3 + $0x120] sm:$0xff]  ;;  %v4562_v18 = vld [vmem:[#allocation3 + $0x130] sm:$0xff]  ;;  %v18179_v15 = vld [vmem:[#allocation146_spill] sm:$0xff] }
 0xa70   : > { %v14080_v62 = vpop.permute.xlu0 %5122  ;;  %10083 = vmatpush1.bf16.msra.mxu0 %v10082_v17  ;;  %v5068_v17 = vadd.f32 %v14067_v7, %v5034_v52  ;;  %v5180_v52 = vadd.f32 %v14084_v16, %v5146_v8 }
 0xa71   : > { %18148 = vst [vmem:[#allocation233_spill] sm:$0xff] %v14080_v62  ;;  %10085 = vmatprep.subr.bf16.mxu0 %v10084_v26  ;;  %v18168_v62 = vld [vmem:[#allocation114_spill] sm:$0xff] }
 0xa72   : > { %v3701_v31 = vpop.permute.xlu1 %3700  ;;  %v5084_v47 = vmax.f32 %v4972_v49, %v5068_v17  ;;  %v10094_v49 = vpack.c.bf16 %v4562_v18, %v4560_v4  ;;  %v18172_v4 = vld [vmem:[#allocation78_spill] sm:$0xff] }
 0xa73   : > { %v3704_v35 = vsel %vm900_vm4, %v3701_v31, %v18149_v32  ;;  %v3705_v26 = vsel %vm900_vm4, %v13357_v21, %v3701_v31  ;;  %v10092_v31 = vpack.c.bf16 %v4563_v36, %v4561_v45  ;;  %v18159_v45 = vld [vmem:[#allocation86_spill] sm:$0xff]  ;;  %v18160_v36 = vld [vmem:[#allocation224_spill] sm:$0xff] }
 0xa74   : > { %v3733_v56 = vpop.permute.xlu0 %3732  ;;  %10087 = vmatpush1.bf16.msra.mxu0 %v10086_v51  ;;  %v3718_v58 = vmul.f32 %v3705_v26, %v18153_v2  ;;  %v3719_v39 = vmul.f32 %v3704_v35, %v18154_v46  ;;  %v18155_v51 = vld [vmem:[#allocation75_spill] sm:$0xff]  ;;  %v18161_v26 = vld [vmem:[#allocation84_spill] sm:$0xff]  ;;  %v18165_v46 = vld [vmem:[#allocation158_spill] sm:$0xff] }
 0xa75   : > { %v3736_v32 = vsel %vm965_vm3, %v3733_v56, %v18151_v23  ;;  %v3737_v21 = vsel %vm965_vm3, %v18152_v41, %v3733_v56  ;;  %10089 = vmatprep.subr.bf16.mxu0 %v10088_v63  ;;  %v4567_v23 = vld [vmem:[#allocation3 + $0x158] sm:$0xff]  ;;  %v14118_v41 = vrot.slane %v14037_v57, %v18158_v1  ;;  %v14122_v63 = vadd.f32 %v18160_v36, %v18159_v45  ;;  %v18162_v35 = vld [vmem:[#allocation143_spill] sm:$0xff] }
 0xa76   : > { %v3750_v24 = vmul.f32 %v3737_v21, %v18155_v51  ;;  %v3751_v8 = vmul.f32 %v3736_v32, %v18156_v27  ;;  %v14114_v59 = vpop.permute.xlu1 %5012  ;;  %v14125_v56 = vadd.f32 %v5215_v38, %v18161_v26  ;;  %v18163_v21 = vld [vmem:[#allocation145_spill] sm:$0xff]  ;;  %v5196_v27 = vmax.f32 %v5084_v47, %v5180_v52  ;;  %v4564_v36 = vld [vmem:[#allocation3 + $0x140] sm:$0xff]  ;;  %v4569_v52 = vld [vmem:[#allocation3 + $0x168] sm:$0xff] }
 0xa77   : > { %18157 = vst [vmem:[#allocation129_spill] sm:$0xff] %v14114_v59  ;;  %v5320_v32 = vsel %vm1070_vm5, %v18163_v21, %v18162_v35  ;;  %v4921_v45 = vsel %vm835_vm2, %v18166_v53, %v18165_v46  ;;  %v10096_v38 = vpack.c.bf16 %v4567_v23, %v4565_v14  ;;  %v4566_v26 = vld [vmem:[#allocation3 + $0x150] sm:$0xff]  ;;  %v14139_v59 = vmul.f32 %v18168_v62, %v18167_v19  ;;  %v18173_v62 = vld [vmem:[#allocation115_spill] sm:$0xff]  ;;  %v18174_v23 = vld [vmem:[#allocation156_spill] sm:$0xff] }
 0xa78   : > { %v10046_v2 = vpack.c.bf16 %v3750_v24, %v3718_v58  ;;  %v14131_v51 = vpop.permute.xlu0 %4806  ;;  %10091 = vmatpush1.bf16.msra.mxu0 %v10090_v9  ;;  %v10044_v17 = vpack.c.bf16 %v3751_v8, %v3719_v39  ;;  %v18169_v58 = vld [vmem:[#allocation34_spill] sm:$0xff]  ;;  %v18170_v39 = vld [vmem:[#allocation33_spill] sm:$0xff]  ;;  %v14151_v9 = vrot.slane %v14053_v20, %v18091_v29  ;;  %v14157_v18 = vmul.f32 %v18173_v62, %v18172_v4  ;;  %v18175_v35 = vld [vmem:[#allocation155_spill] sm:$0xff] }
 0xa79   : > { %18164 = vst [vmem:[#allocation16_spill] sm:$0xff] %v14131_v51  ;;  %10093 = vmatprep.subr.bf16.mxu0 %v10092_v31  ;;  %v14143_v24 = vrot.slane %v14037_v57, %v18169_v58  ;;  %v14147_v47 = vrot.slane %v14037_v57, %v18170_v39  ;;  %v4571_v31 = vld [vmem:[#allocation3 + $0x178] sm:$0xff]  ;;  %v14160_v8 = vadd.f32 %v14118_v41, %v5320_v32  ;;  %v18177_v51 = vld [vmem:[#allocation12_spill] sm:$0xff] }
 0xa7a   : > { %10045 = vmatprep.subr.bf16.mxu1 %v10044_v17  ;;  %v14153_v14 = vpop.permute.xlu1 %4902  ;;  %v4825_v57 = vsel %vm770_vm1, %v18175_v35, %v18174_v23  ;;  %v14168_v19 = vrot.slane %v14053_v20, %v18088_v43  ;;  %v14172_v17 = vrot.slane %v14053_v20, %v18093_v48  ;;  %v4965_v62 = vadd.f32 %v18177_v51, %v4921_v45  ;;  %v4574_v23 = vld [vmem:[#allocation3 + $0x190] sm:$0xff]  ;;  %v18195_v46 = vld [vmem:[#allocation112_spill] sm:$0xff] }
 0xa7b   : > { %18171 = vst [vmem:[#allocation130_spill] sm:$0xff] %v14153_v14  ;;  %10047 = vmatpush1.bf16.msra.mxu1 %v10046_v2  ;;  %v14177_v32 = vrot.slane %v14053_v20, %v18096_v30  ;;  %v14181_v4 = vrot.slane %v14053_v20, %v18158_v1  ;;  %v10098_v21 = vpack.c.bf16 %v4566_v26, %v4564_v36  ;;  %v18184_v36 = vld [vmem:[#allocation162_spill] sm:$0xff]  ;;  %v18185_v26 = vld [vmem:[#allocation161_spill] sm:$0xff] }
 0xa7c   : > { %18176 = vst [vmem:[#allocation131_spill] sm:$0xff] %v14168_v19  ;;  %v14183_v14 = vpop.permute.xlu0 %5124  ;;  %10095 = vmatpush1.bf16.msra.mxu0 %v10094_v49  ;;  %v14185_v0 = vmax.f32 %v5196_v27, %v5244_v44  ;;  %v5432_v2 = vsel %vm1135_vm7, %v18180_v22, %v18179_v15  ;;  %v14193_v51 = vrot.slane %v14053_v20, %v18169_v58  ;;  %v18182_v49 = vld [vmem:[#allocation159_spill] sm:$0xff]  ;;  %v18183_v27 = vld [vmem:[#allocation160_spill] sm:$0xff]  ;;  %v4575_v22 = vld [vmem:[#allocation3 + $0x198] sm:$0xff] }
 0xa7d   : > { %18178 = vst [vmem:[#allocation86_spill] sm:$0xff] %v14183_v14  ;;  %10097 = vmatprep.subr.bf16.mxu0 %v10096_v38  ;;  %v10100_v45 = vpack.c.bf16 %v4571_v31, %v4569_v52  ;;  %v4869_v11 = vadd.f32 %v18181_v37, %v4825_v57  ;;  %v4827_v44 = vsel %vm770_vm1, %v18182_v49, %v18175_v35  ;;  %v4573_v31 = vld [vmem:[#allocation3 + $0x188] sm:$0xff]  ;;  %v18187_v57 = vld [vmem:[#allocation163_spill] sm:$0xff]  ;;  %v18188_v49 = vld [vmem:[#allocation166_spill] sm:$0xff] }
 0xa7e   : > { %v4923_v15 = vsel %vm835_vm2, %v18183_v27, %v18166_v53  ;;  %v5033_v38 = vsel %vm900_vm4, %v18185_v26, %v18184_v36  ;;  %v14208_v52 = vpop.permute.xlu1 %5298  ;;  %v5035_v35 = vsel %vm900_vm4, %v18187_v57, %v18185_v26  ;;  %v18189_v14 = vld [vmem:[#allocation165_spill] sm:$0xff]  ;;  %v14222_v27 = vrot.slane %v14053_v20, %v18170_v39 }
 0xa7f   : > { %18186 = vst [vmem:[#allocation224_spill] sm:$0xff] %v14208_v52  ;;  %v4916_v53 = vsel %vm835_vm2, %v18189_v14, %v18188_v49  ;;  %v14225_v52 = vadd.f32 %v14143_v24, %v5432_v2  ;;  %v4981_v50 = vmax.f32 %v4869_v11, %v4965_v62  ;;  %v18191_v37 = vld [vmem:[#allocation113_spill] sm:$0xff]  ;;  %v10102_v26 = vpack.c.bf16 %v4570_v10, %v4568_v5  ;;  %v18193_v49 = vld [vmem:[#allocation218_spill] sm:$0xff]  ;;  %v4572_v2 = vld [vmem:[#allocation3 + $0x180] sm:$0xff] }
 0xa80   : > { %v5145_v61 = vsel %vm965_vm3, %v18191_v37, %v18190_v13  ;;  %v14231_v42 = vpop.permute.xlu0 %5302  ;;  %10099 = vmatpush1.bf16.msra.mxu0 %v10098_v21  ;;  %v4868_v57 = vadd.f32 %v14057_v34, %v4827_v44  ;;  %v4964_v60 = vadd.f32 %v14042_v28, %v4923_v15  ;;  %v5077_v20 = vadd.f32 %v18193_v49, %v5033_v38  ;;  %v18194_v62 = vld [vmem:[#allocation164_spill] sm:$0xff]  ;;  %v18196_v5 = vld [vmem:[#allocation170_spill] sm:$0xff]  ;;  %v18197_v10 = vld [vmem:[#allocation169_spill] sm:$0xff] }
 0xa81   : > { %18192 = vst [vmem:[#allocation84_spill] sm:$0xff] %v14231_v42  ;;  %10101 = vmatprep.subr.bf16.mxu0 %v10100_v45  ;;  %v10104_v36 = vpack.c.bf16 %v4575_v22, %v4573_v31  ;;  %v5076_v11 = vadd.f32 %v14067_v7, %v5035_v35  ;;  %v4820_v13 = vsel %vm770_vm1, %v18195_v46, %v18194_v62  ;;  %v4577_v49 = vld [vmem:[#allocation3 + $0x1a8] sm:$0xff]  ;;  %v4579_v45 = vld [vmem:[#allocation3 + $0x1b8] sm:$0xff]  ;;  %v18200_v38 = vld [vmem:[#allocation125_spill] sm:$0xff] }
 0xa82   : > { %v4959_v21 = vadd.f32 %v14168_v19, %v4916_v53  ;;  %v5028_v28 = vsel %vm900_vm4, %v18197_v10, %v18196_v5  ;;  %v3775_v34 = vpop.permute.xlu1 %3774  ;;  %v18198_v22 = vld [vmem:[#allocation220_spill] sm:$0xff]  ;;  %v18201_v35 = vld [vmem:[#allocation123_spill] sm:$0xff]  ;;  %v4578_v1 = vld [vmem:[#allocation3 + $0x1b0] sm:$0xff]  ;;  %v5093_v30 = vmax.f32 %v4981_v50, %v5077_v20 }
 0xa83   : > { %v5189_v44 = vadd.f32 %v18198_v22, %v5145_v61  ;;  %v18199_v15 = vld [vmem:[#allocation168_spill] sm:$0xff]  ;;  %v3776_v31 = vsel %vm1070_vm5, %v18200_v38, %v3775_v34  ;;  %v3783_v53 = vsel %vm1070_vm5, %v3775_v34, %v18201_v35  ;;  %v18203_v5 = vld [vmem:[#allocation171_spill] sm:$0xff]  ;;  %v4863_v38 = vadd.f32 %v14151_v9, %v4820_v13  ;;  %v18210_v20 = vld [vmem:[#allocation174_spill] sm:$0xff] }
 0xa84   : > { %v5147_v7 = vsel %vm965_vm3, %v18199_v15, %v18191_v37  ;;  %v18202_v42 = vld [vmem:[#allocation172_spill] sm:$0xff]  ;;  %v18204_v19 = vld [vmem:[#allocation79_spill] sm:$0xff]  ;;  %v14263_v40 = vpop.permute.xlu0 %5014  ;;  %10103 = vmatpush1.bf16.msra.mxu0 %v10102_v26  ;;  %v10106_v37 = vpack.c.bf16 %v4574_v23, %v4572_v2  ;;  %v4980_v15 = vmax.f32 %v4868_v57, %v4964_v60  ;;  %v5071_v58 = vadd.f32 %v14172_v17, %v5028_v28  ;;  %v4583_v23 = vld [vmem:[#allocation3 + $0x1d8] sm:$0xff] }
 0xa85   : > { %v5140_v62 = vsel %vm965_vm3, %v18203_v5, %v18202_v42  ;;  %v3790_v61 = vmul.f32 %v3776_v31, %v18204_v19  ;;  %v18205_v22 = vld [vmem:[#allocation80_spill] sm:$0xff]  ;;  %18206 = vst [vmem:[#allocation143_spill] sm:$0xff] %v14263_v40  ;;  %10105 = vmatprep.subr.bf16.mxu0 %v10104_v36  ;;  %v10108_v34 = vpack.c.bf16 %v4579_v45, %v4577_v49  ;;  %v4576_v35 = vld [vmem:[#allocation3 + $0x1a0] sm:$0xff]  ;;  %v18208_v60 = vld [vmem:[#allocation149_spill] sm:$0xff] }
 0xa86   : > { %v3791_v39 = vmul.f32 %v3783_v53, %v18205_v22  ;;  %v5188_v42 = vadd.f32 %v14084_v16, %v5147_v7  ;;  %v14269_v19 = vpop.permute.xlu1 %5410  ;;  %v4581_v26 = vld [vmem:[#allocation3 + $0x1c8] sm:$0xff]  ;;  %v18209_v57 = vld [vmem:[#allocation151_spill] sm:$0xff]  ;;  %v5092_v36 = vmax.f32 %v4980_v15, %v5076_v11  ;;  %v4975_v2 = vmax.f32 %v4863_v38, %v4959_v21  ;;  %v18211_v16 = vld [vmem:[#allocation173_spill] sm:$0xff] }
 0xa87   : > { %v10050_v31 = vpack.c.bf16 %v3790_v61, %v14139_v59  ;;  %18207 = vst [vmem:[#allocation157_spill] sm:$0xff] %v14269_v19  ;;  %v5544_v13 = vsel %vm1200_vm6, %v18209_v57, %v18208_v60  ;;  %v5183_v28 = vadd.f32 %v14177_v32, %v5140_v62  ;;  %v5205_v50 = vmax.f32 %v5093_v30, %v5189_v44  ;;  %v18213_v45 = vld [vmem:[#allocation175_spill] sm:$0xff]  ;;  %v4582_v21 = vld [vmem:[#allocation3 + $0x1d0] sm:$0xff]  ;;  %v18214_v7 = vld [vmem:[#allocation152_spill] sm:$0xff] }
 0xa88   : > { %v10048_v53 = vpack.c.bf16 %v3791_v39, %v14157_v18  ;;  %v5319_v59 = vsel %vm1070_vm5, %v18211_v16, %v18210_v20  ;;  %v14281_v49 = vpop.permute.xlu0 %5414  ;;  %10107 = vmatpush1.bf16.msra.mxu0 %v10106_v37  ;;  %v10110_v39 = vpack.c.bf16 %v4578_v1, %v4576_v35  ;;  %v5087_v18 = vmax.f32 %v4975_v2, %v5071_v58  ;;  %v4580_v30 = vld [vmem:[#allocation3 + $0x1c0] sm:$0xff]  ;;  %v18215_v61 = vld [vmem:[#allocation154_spill] sm:$0xff]  ;;  %v18216_v37 = vld [vmem:[#allocation177_spill] sm:$0xff] }
 0xa89   : > { %18212 = vst [vmem:[#allocation114_spill] sm:$0xff] %v14281_v49  ;;  %v5321_v11 = vsel %vm1070_vm5, %v18213_v45, %v18211_v16  ;;  %10109 = vmatprep.subr.bf16.mxu0 %v10108_v34  ;;  %v10112_v62 = vpack.c.bf16 %v4583_v23, %v4581_v26  ;;  %v5580_v44 = vadd.f32 %v14147_v47, %v5544_v13  ;;  %v9759_v15 = vld [vmem:[%s17263_s2 + $0xc0] ss:$0 sm:$0xff]  ;;  %v18217_v38 = vld [vmem:[#allocation176_spill] sm:$0xff]  ;;  %v18219_v23 = vld [vmem:[#allocation225_spill] sm:$0xff] }
 0xa8a   : > { %10049 = vmatprep.subr.bf16.mxu1 %v10048_v53  ;;  %v5656_v1 = vsel %vm17702_vm8, %v18215_v61, %v18214_v7  ;;  %v5204_v58 = vmax.f32 %v5092_v36, %v5188_v42  ;;  %v5431_v34 = vsel %vm1135_vm7, %v18217_v38, %v18216_v37  ;;  %v14299_v35 = vpop.permute.xlu1 %5126  ;;  %v4587_v53 = vld [vmem:[#allocation3 + $0x1f8] sm:$0xff]  ;;  %v5199_v26 = vmax.f32 %v5087_v18, %v5183_v28  ;;  %v18221_v16 = vld [vmem:[#allocation180_spill] sm:$0xff]  ;;  %v18222_v7 = vld [vmem:[#allocation179_spill] sm:$0xff] }
 0xa8b   : > { %10051 = vmatpush1.bf16.msra.mxu1 %v10050_v31  ;;  %18218 = vst [vmem:[#allocation115_spill] sm:$0xff] %v14299_v35  ;;  %v4585_v31 = vld [vmem:[#allocation3 + $0x1e8] sm:$0xff]  ;;  %v5365_v60 = vadd.f32 %v18219_v23, %v5319_v59  ;;  %v18220_v13 = vld [vmem:[#allocation178_spill] sm:$0xff]  ;;  %v5314_v42 = vsel %vm1070_vm5, %v18222_v7, %v18221_v16  ;;  %v18223_v36 = vmax.f32 %v14185_v0, %v14160_v8  ;;  %v18225_v18 = vld [vmem:[#allocation181_spill] sm:$0xff] }
 0xa8c   : > { %v5433_v2 = vsel %vm1135_vm7, %v18220_v13, %v18217_v38  ;;  %v5364_v45 = vadd.f32 %v14118_v41, %v5321_v11  ;;  %v18224_v28 = vld [vmem:[#allocation182_spill] sm:$0xff]  ;;  %v14319_v23 = vpop.permute.xlu0 %5304  ;;  %10111 = vmatpush1.bf16.msra.mxu0 %v10110_v39  ;;  %v10114_v38 = vpack.c.bf16 %v4582_v21, %v4580_v30  ;;  %v5692_v13 = vadd.f32 %v9759_v15, %v5656_v1  ;;  %v18227_v40 = vld [vmem:[#allocation228_spill] sm:$0xff]  ;;  %v4584_v0 = vld [vmem:[#allocation3 + $0x1e0] sm:$0xff] }
 0xa8d   : > { %v5484_v22 = vmax.f32 %v18223_v36, %v14225_v52  ;;  %v5543_v59 = vsel %vm1200_vm6, %v18225_v18, %v18224_v28  ;;  %18226 = vst [vmem:[#allocation155_spill] sm:$0xff] %v14319_v23  ;;  %v5269_v35 = vmax.f32 %v5205_v50, %v14122_v63  ;;  %v5477_v61 = vadd.f32 %v18227_v40, %v5431_v34  ;;  %v4586_v8 = vld [vmem:[#allocation3 + $0x1f0] sm:$0xff]  ;;  %v4589_v39 = vld [vmem:[#allocation3 + $0x208] sm:$0xff]  ;;  %v4591_v30 = vld [vmem:[#allocation3 + $0x218] sm:$0xff] }
 0xa8e   : > { %10113 = vmatprep.subr.bf16.mxu0 %v10112_v62  ;;  %v10116_v57 = vpack.c.bf16 %v4587_v53, %v4585_v31  ;;  %v5268_v41 = vmax.f32 %v5204_v58, %v14125_v56  ;;  %v5476_v11 = vadd.f32 %v14143_v24, %v5433_v2  ;;  %v5359_v36 = vadd.f32 %v14181_v4, %v5314_v42  ;;  %v14326_v19 = vpop.permute.xlu1 %5522  ;;  %v18229_v50 = vld [vmem:[#allocation187_spill] sm:$0xff]  ;;  %v18230_v62 = vld [vmem:[#allocation186_spill] sm:$0xff]  ;;  %v18232_v1 = vld [vmem:[#allocation185_spill] sm:$0xff] }
 0xa8f   : > { %v5596_v52 = vmax.f32 %v5484_v22, %v5580_v44  ;;  %18228 = vst [vmem:[#allocation12_spill] sm:$0xff] %v14326_v19  ;;  %v5381_v21 = vmax.f32 %v5269_v35, %v5365_v60  ;;  %v5263_v63 = vmax.f32 %v5199_v26, %v14101_v6  ;;  %v5589_v40 = vadd.f32 %v13903_v12, %v5543_v59  ;;  %v18231_v56 = vld [vmem:[#allocation183_spill] sm:$0xff]  ;;  %v18233_v58 = vld [vmem:[#allocation184_spill] sm:$0xff]  ;;  %v4590_v2 = vld [vmem:[#allocation3 + $0x210] sm:$0xff] }
 0xa90   : > { %v5655_v22 = vsel %vm17702_vm8, %v18230_v62, %v18229_v50  ;;  %v5380_v44 = vmax.f32 %v5268_v41, %v5364_v45  ;;  %v5545_v24 = vsel %vm1200_vm6, %v18231_v56, %v18225_v18  ;;  %v5426_v34 = vsel %vm1135_vm7, %v18233_v58, %v18232_v1  ;;  %v14342_v35 = vpop.permute.xlu0 %5526  ;;  %10115 = vmatpush1.bf16.msra.mxu0 %v10114_v38  ;;  %v18235_v53 = vld [vmem:[#allocation188_spill] sm:$0xff]  ;;  %v4588_v60 = vld [vmem:[#allocation3 + $0x200] sm:$0xff]  ;;  %v18236_v41 = vld [vmem:[#allocation190_spill] sm:$0xff] }
 0xa91   : > { %18234 = vst [vmem:[#allocation146_spill] sm:$0xff] %v14342_v35  ;;  %v10118_v12 = vpack.c.bf16 %v4586_v8, %v4584_v0  ;;  %v5708_v6 = vmax.f32 %v5596_v52, %v5692_v13  ;;  %v5493_v31 = vmax.f32 %v5381_v21, %v5477_v61  ;;  %v5657_v45 = vsel %vm17702_vm8, %v18235_v53, %v18230_v62  ;;  %v18237_v56 = vld [vmem:[#allocation189_spill] sm:$0xff]  ;;  %v4593_v61 = vld [vmem:[#allocation3 + $0x228] sm:$0xff]  ;;  %v4595_v0 = vld [vmem:[#allocation3 + $0x238] sm:$0xff] }
 0xa92   : > { %10117 = vmatprep.subr.bf16.mxu0 %v10116_v57  ;;  %v10120_v26 = vpack.c.bf16 %v4591_v30, %v4589_v39  ;;  %v5492_v42 = vmax.f32 %v5380_v44, %v5476_v11  ;;  %v5375_v18 = vmax.f32 %v5263_v63, %v5359_v36  ;;  %v5701_v59 = vadd.f32 %v13954_v25, %v5655_v22  ;;  %v3807_v13 = vpop.permute.xlu1 %3806  ;;  %v18238_v57 = vld [vmem:[#allocation126_spill] sm:$0xff]  ;;  %v18239_v30 = vld [vmem:[#allocation192_spill] sm:$0xff]  ;;  %v18240_v21 = vld [vmem:[#allocation191_spill] sm:$0xff] }
 0xa93   : > { %v5538_v38 = vsel %vm1200_vm6, %v18237_v56, %v18236_v41  ;;  %v5588_v8 = vadd.f32 %v14147_v47, %v5545_v24  ;;  %v5471_v52 = vadd.f32 %v14193_v51, %v5426_v34  ;;  %v3808_v39 = vsel %vm1135_vm7, %v18238_v57, %v3807_v13  ;;  %v14361_v25 = vld [vmem:[%s17263_s2 + $0xd8] ss:$0 sm:$0xff]  ;;  %v18241_v62 = vld [vmem:[#allocation117_spill] sm:$0xff]  ;;  %v18243_v34 = vld [vmem:[#allocation124_spill] sm:$0xff] }
 0xa94   : > { %v5605_v11 = vmax.f32 %v5493_v31, %v5589_v40  ;;  %v5700_v36 = vadd.f32 %v9759_v15, %v5657_v45  ;;  %v5650_v63 = vsel %vm17702_vm8, %v18240_v21, %v18239_v30  ;;  %v3815_v47 = vsel %vm1135_vm7, %v3807_v13, %v18241_v62  ;;  %v3839_v22 = vpop.permute.xlu0 %3838  ;;  %10119 = vmatpush1.bf16.msra.mxu0 %v10118_v12  ;;  %v18242_v15 = vld [vmem:[#allocation116_spill] sm:$0xff]  ;;  %v4592_v57 = vld [vmem:[#allocation3 + $0x220] sm:$0xff]  ;;  %v4594_v53 = vld [vmem:[#allocation3 + $0x230] sm:$0xff] }
 0xa95   : > { %v10122_v44 = vpack.c.bf16 %v4590_v2, %v4588_v60  ;;  %v5583_v40 = vadd.f32 %v14222_v27, %v5538_v38  ;;  %v3840_v24 = vsel %vm1200_vm6, %v18242_v15, %v3839_v22  ;;  %v3847_v31 = vsel %vm1200_vm6, %v3839_v22, %v18243_v34  ;;  %10121 = vmatprep.subr.bf16.mxu0 %v10120_v26  ;;  %v18244_v19 = vld [vmem:[#allocation7_spill] sm:$0xff]  ;;  %v18246_v12 = vld [vmem:[#allocation81_spill] sm:$0xff]  ;;  %v4597_v38 = vld [vmem:[#allocation3 + $0x248] sm:$0xff] }
 0xa96   : > { %v10124_v45 = vpack.c.bf16 %v4595_v0, %v4593_v61  ;;  %v3822_v35 = vmul.f32 %v3808_v39, %v18244_v19  ;;  %v18245_v13 = vld [vmem:[#allocation15_spill] sm:$0xff]  ;;  %v3855_v60 = vmul.f32 %v3847_v31, %v18246_v12  ;;  %v5717_v2 = vmax.f32 %v5605_v11, %v5701_v59  ;;  %v4599_v23 = vld [vmem:[#allocation3 + $0x258] sm:$0xff]  ;;  %v18247_v30 = vld [vmem:[#allocation8_spill] sm:$0xff] }
 0xa97   : > { %v3854_v62 = vmul.f32 %v3840_v24, %v18245_v13  ;;  %v5487_v49 = vmax.f32 %v5375_v18, %v5471_v52  ;;  %v5695_v15 = vadd.f32 %v14361_v25, %v5650_v63  ;;  %v3823_v41 = vmul.f32 %v3815_v47, %v18247_v30  ;;  %5789 = vmatmul.mubr.f32.vlgmr.msra.gmra.mrb[48].mxu0 %v5708_v6  ;;  %v4596_v11 = vld [vmem:[#allocation3 + $0x240] sm:$0xff]  ;;  %v4598_v31 = vld [vmem:[#allocation3 + $0x250] sm:$0xff]  ;;  %v4601_v18 = vld [vmem:[#allocation3 + $0x268] sm:$0xff] }
 0xa98   : > { %v5604_v22 = vmax.f32 %v5492_v42, %v5588_v8  ;;  %v14382_v61 = vpop.permute.xlu0 %5634  ;;  %5794 = vmatprep.mubr.f32.mxu0 %v5717_v2  ;;  %10123 = vmatpush1.bf16.msra.mxu0 %v10122_v44  ;;  %v10126_v0 = vpack.c.bf16 %v4594_v53, %v4592_v57  ;;  %v10128_v59 = vpack.c.bf16 %v4599_v23, %v4597_v38  ;;  %v4603_v52 = vld [vmem:[#allocation3 + $0x278] sm:$0xff]  ;;  %v4600_v42 = vld [vmem:[#allocation3 + $0x260] sm:$0xff]  ;;  %v4605_v8 = vld [vmem:[#allocation3 + $0x288] sm:$0xff] }
 0xa99   : > { %v10054_v26 = vpack.c.bf16 %v3854_v62, %v3822_v35  ;;  %18248 = vst [vmem:[#allocation11_spill] sm:$0xff] %v14382_v61  ;;  %v10052_v39 = vpack.c.bf16 %v3855_v60, %v3823_v41  ;;  %10125 = vmatprep.subr.bf16.mxu0 %v10124_v45  ;;  %v5599_v34 = vmax.f32 %v5487_v49, %v5583_v40  ;;  %v4602_v41 = vld [vmem:[#allocation3 + $0x270] sm:$0xff]  ;;  %v4607_v49 = vld [vmem:[#allocation3 + $0x298] sm:$0xff]  ;;  %v4604_v44 = vld [vmem:[#allocation3 + $0x280] sm:$0xff] }
 0xa9a   : > { %v5716_v24 = vmax.f32 %v5604_v22, %v5700_v36  ;;  %v10130_v35 = vpack.c.bf16 %v4598_v31, %v4596_v11  ;;  %v10132_v53 = vpack.c.bf16 %v4603_v52, %v4601_v18  ;;  %v10134_v36 = vpack.c.bf16 %v4602_v41, %v4600_v42  ;;  %v4606_v40 = vld [vmem:[#allocation3 + $0x290] sm:$0xff]  ;;  %v4609_v45 = vld [vmem:[#allocation3 + $0x2a8] sm:$0xff]  ;;  %v4611_v57 = vld [vmem:[#allocation3 + $0x2b8] sm:$0xff] }
 0xa9b   : > { %10053 = vmatprep.subr.bf16.mxu1 %v10052_v39  ;;  %v5711_v63 = vmax.f32 %v5599_v34, %v5695_v15  ;;  %v10136_v47 = vpack.c.bf16 %v4607_v49, %v4605_v8  ;;  %v10138_v60 = vpack.c.bf16 %v4606_v40, %v4604_v44  ;;  %v18251_v2 = vld [vmem:[#allocation132_spill] sm:$0xff]  ;;  %v18252_v15 = vld [vmem:[#allocation118_spill] sm:$0xff]  ;;  %v4610_v39 = vld [vmem:[#allocation3 + $0x2b0] sm:$0xff] }
 0xa9c   : > { %5795 = vmatmul.mubr.f32.gmra.mrb[50].mxu0 %v5716_v24  ;;  %10055 = vmatpush1.bf16.msra.mxu1 %v10054_v26  ;;  %v14384_v6 = vpop.permute.xlu0 %5306  ;;  %v10140_v26 = vpack.c.bf16 %v4611_v57, %v4609_v45  ;;  %v10934_v24 = vld [vmem:[%s17263_s2 + $0x70] ss:$0 sm:$0xff]  ;;  %v4613_v31 = vld [vmem:[#allocation3 + $0x2c8] sm:$0xff]  ;;  %v4615_v18 = vld [vmem:[#allocation3 + $0x2d8] sm:$0xff] }
 0xa9d   : > { %18249 = vst [vmem:[#allocation161_spill] sm:$0xff] %v14384_v6  ;;  %10127 = vmatpush1.bf16.msra.mxu0 %v10126_v0  ;;  %5865 = vmatprep.mubr.f32.mxu0 %v5711_v63  ;;  %v4608_v0 = vld [vmem:[#allocation3 + $0x2a0] sm:$0xff]  ;;  %v10144_v63 = vpack.c.bf16 %v4615_v18, %v4613_v31  ;;  %v4617_v42 = vld [vmem:[#allocation3 + $0x2e8] sm:$0xff]  ;;  %v4619_v41 = vld [vmem:[#allocation3 + $0x2f8] sm:$0xff] }
 0xa9e   : > { %10129 = vmatprep.subr.bf16.mxu0 %v10128_v59  ;;  %v10935_v59 = vld [vmem:[%s17263_s2 + $0x78] ss:$0 sm:$0xff]  ;;  %v10142_v52 = vpack.c.bf16 %v4610_v39, %v4608_v0  ;;  %v10148_v49 = vpack.c.bf16 %v4619_v41, %v4617_v42  ;;  %v4621_v44 = vld [vmem:[#allocation3 + $0x308] sm:$0xff]  ;;  %v18268_v19 = vld [vmem:[#allocation33_spill] sm:$0xff] }
 0xa9f   : > { %v4623_v40 = vld [vmem:[#allocation3 + $0x318] sm:$0xff]  ;;  %v18253_v0 = vld [vmem:[#allocation136_spill] sm:$0xff]  ;;  %v18279_v16 = vld [vmem:[#allocation203_spill] sm:$0xff] }
 0xaa0   : > { %v14386_v23 = vpop.permute.xlu0 %5418  ;;  %v10152_v57 = vpack.c.bf16 %v4623_v40, %v4621_v44  ;;  %v4918_v39 = vsel %vm835_vm2, %v18253_v0, %v18189_v14  ;;  %v18255_v14 = vld [vmem:[#allocation139_spill] sm:$0xff]  ;;  %v18258_v44 = vld [vmem:[#allocation141_spill] sm:$0xff]  ;;  %v18269_v13 = vld [vmem:[#allocation144_spill] sm:$0xff] }
 0xaa1   : > { %18250 = vst [vmem:[#allocation165_spill] sm:$0xff] %v14386_v23  ;;  %10131 = vmatpush1.bf16.msra.mxu0 %v10130_v35  ;;  %v4612_v35 = vld [vmem:[#allocation3 + $0x2c0] sm:$0xff]  ;;  %v5030_v42 = vsel %vm900_vm4, %v18255_v14, %v18197_v10  ;;  %v4630_v10 = vld [vmem:[#allocation3 + $0x350] sm:$0xff]  ;;  %v18274_v6 = vld [vmem:[#allocation198_spill] sm:$0xff] }
 0xaa2   : > { %10133 = vmatprep.subr.bf16.mxu0 %v10132_v53  ;;  %v4614_v53 = vld [vmem:[#allocation3 + $0x2d0] sm:$0xff]  ;;  %v18277_v1 = vld [vmem:[#allocation162_spill] sm:$0xff] }
 0xaa3   : > { %v10146_v8 = vpack.c.bf16 %v4614_v53, %v4612_v35  ;;  %v18254_v35 = vld [vmem:[#allocation135_spill] sm:$0xff] }
 0xaa4   : > { %v3871_v62 = vpop.permute.xlu0 %3870  ;;  %v4822_v53 = vsel %vm770_vm1, %v18254_v35, %v18195_v46  ;;  %v5142_v46 = vsel %vm965_vm3, %v18258_v44, %v18203_v5  ;;  %v18262_v35 = vld [vmem:[#allocation34_spill] sm:$0xff]  ;;  %v18266_v44 = vld [vmem:[#allocation196_spill] sm:$0xff] }
 0xaa5   : > { %10135 = vmatpush1.bf16.msra.mxu0 %v10134_v36  ;;  %v3872_v38 = vsel %vm17702_vm8, %v18251_v2, %v3871_v62  ;;  %v3879_v22 = vsel %vm17702_vm8, %v3871_v62, %v18252_v15  ;;  %v4616_v36 = vld [vmem:[#allocation3 + $0x2e0] sm:$0xff]  ;;  %v4625_v2 = vld [vmem:[#allocation3 + $0x328] sm:$0xff] }
 0xaa6   : > { %10137 = vmatprep.subr.bf16.mxu0 %v10136_v47  ;;  %v3886_v34 = vmul.f32 %v10934_v24, %v3872_v38  ;;  %v3887_v11 = vmul.f32 %v10935_v59, %v3879_v22  ;;  %v4618_v47 = vld [vmem:[#allocation3 + $0x2f0] sm:$0xff]  ;;  %v4620_v62 = vld [vmem:[#allocation3 + $0x300] sm:$0xff]  ;;  %v14412_v22 = vld [vmem:[%s17263_s2 + $0xa8] sm:$0xff] }
 0xaa7   : > { %v10150_v45 = vpack.c.bf16 %v4618_v47, %v4616_v36  ;;  %v331_v38 = vld [vmem:[%s17263_s2 + $0x90] sm:$0xff]  ;;  %v14435_v41 = vrot.slane %v14412_v22, %v18101_v55  ;;  %v14491_v23 = vrot.slane %v14412_v22, %v18093_v48 }
 0xaa8   : > { %4121 = vmatprep.subr.mxu1 %v3887_v11  ;;  %v14407_v15 = vrot.slane %v331_v38, %v18088_v43  ;;  %v4626_v59 = vld [vmem:[#allocation3 + $0x330] sm:$0xff]  ;;  %v14419_v11 = vrot.slane %v331_v38, %v18091_v29  ;;  %v14422_v31 = vrot.slane %v331_v38, %v18093_v48  ;;  %v5223_v18 = vrot.slane %v331_v38, %v18101_v55  ;;  %v4636_v55 = vld [vmem:[#allocation3 + $0x380] sm:$0xff] }
 0xaa9   : > { %10139 = vmatpush1.bf16.msra.mxu0 %v10138_v60  ;;  %4122 = vmatpush1.msra.mxu1 %v3886_v34  ;;  %v4622_v60 = vld [vmem:[#allocation3 + $0x310] sm:$0xff]  ;;  %v4624_v34 = vld [vmem:[#allocation3 + $0x320] sm:$0xff]  ;;  %18256 = vst [vmem:[#allocation113_spill] sm:$0xff] %v14435_v41  ;;  %v14455_v5 = vrot.slane %v331_v38, %v18262_v35  ;;  %v14471_v12 = vrot.slane %v331_v38, %v18268_v19 }
 0xaaa   : > { %10141 = vmatprep.subr.bf16.mxu0 %v10140_v26  ;;  %9750 = vmatmul.mubr.msk.f32.vlgmr.msra.gmra.mrb[38].mxu1 %vm1316_vm9, %v13140_v54  ;;  %v4627_v54 = vld [vmem:[#allocation3 + $0x338] sm:$0xff]  ;;  %v10154_v26 = vpack.c.bf16 %v4622_v60, %v4620_v62  ;;  %v10158_v47 = vpack.c.bf16 %v4626_v59, %v4624_v34  ;;  %v5070_v62 = vadd.f32 %v14422_v31, %v5030_v42  ;;  %v18259_v60 = vld [vmem:[#allocation9_spill] sm:$0xff]  ;;  %v18261_v34 = vld [vmem:[#allocation28_spill] sm:$0xff] }
 0xaab   : > { %4357 = vmatprep.mubr.f32.mxu1 %v17794_v3  ;;  %v10156_v24 = vpack.c.bf16 %v4627_v54, %v4625_v2  ;;  %v5246_v2 = vadd.f32 %v5223_v18, %v18259_v60  ;;  %v18260_v54 = vld [vmem:[#allocation83_spill] sm:$0xff]  ;;  %v14452_v59 = vrot.slane %v331_v38, %v18261_v34  ;;  %v4637_v3 = vld [vmem:[#allocation3 + $0x388] sm:$0xff] }
 0xaac   : > { %v14449_v0 = vadd.f32 %v5223_v18, %v18260_v54  ;;  %v18267_v60 = vld [vmem:[#allocation195_spill] sm:$0xff] }
 0xaad   : > { %10143 = vmatpush1.bf16.msra.mxu0 %v10142_v52  ;;  %v4629_v52 = vld [vmem:[#allocation3 + $0x348] sm:$0xff]  ;;  %v4917_v54 = vsel %vm835_vm2, %v18267_v60, %v18266_v44 }
 0xaae   : > { %10145 = vmatprep.subr.bf16.mxu0 %v10144_v63  ;;  %v4631_v63 = vld [vmem:[#allocation3 + $0x358] sm:$0xff]  ;;  %v18276_v44 = vld [vmem:[#allocation156_spill] sm:$0xff] }
 0xaaf   : > { %v10160_v40 = vpack.c.bf16 %v4631_v63, %v4629_v52  ;;  %v18264_v52 = vld [vmem:[#allocation232_spill] sm:$0xff] }
 0xab1   : > { %10147 = vmatpush1.bf16.msra.mxu0 %v10146_v8  ;;  %v4958_v8 = vadd.f32 %v14407_v15, %v4918_v39  ;;  %v4635_v39 = vld [vmem:[#allocation3 + $0x378] sm:$0xff] }
 0xab2   : > { %10149 = vmatprep.subr.bf16.mxu0 %v10148_v49  ;;  %v18257_v49 = vld [vmem:[#allocation21_spill] sm:$0xff] }
 0xab3   : > { %v14439_v36 = vrot.slane %v331_v38, %v18257_v49  ;;  %v18270_v38 = vld [vmem:[#allocation194_spill] sm:$0xff]  ;;  %v14504_v61 = vrot.slane %v14412_v22, %v18257_v49 }
 0xab5   : > { %10151 = vmatpush1.bf16.msra.mxu0 %v10150_v45  ;;  %v4628_v45 = vld [vmem:[#allocation3 + $0x340] sm:$0xff]  ;;  %v5182_v18 = vadd.f32 %v14439_v36, %v5142_v46 }
 0xab6   : > { %10153 = vmatprep.subr.bf16.mxu0 %v10152_v57  ;;  %v4862_v57 = vadd.f32 %v14419_v11, %v4822_v53  ;;  %v18265_v53 = vld [vmem:[#allocation88_spill] sm:$0xff]  ;;  %v10162_v30 = vpack.c.bf16 %v4630_v10, %v4628_v45  ;;  %v4632_v46 = vld [vmem:[#allocation3 + $0x360] sm:$0xff]  ;;  %v18271_v45 = vld [vmem:[#allocation193_spill] sm:$0xff] }
 0xab7   : > { %v14463_v14 = vadd.f32 %v14435_v41, %v18265_v53  ;;  %v4821_v10 = vsel %vm770_vm1, %v18271_v45, %v18270_v38  ;;  %v4823_v38 = vsel %vm770_vm1, %v18276_v44, %v18271_v45  ;;  %v4638_v44 = vld [vmem:[#allocation3 + $0x390] sm:$0xff]  ;;  %v18280_v45 = vld [vmem:[#allocation147_spill] sm:$0xff] }
 0xab8   : > { %v4974_v42 = vmax.f32 %v4862_v57, %v4958_v8  ;;  %v4634_v57 = vld [vmem:[#allocation3 + $0x370] sm:$0xff] }
 0xab9   : > { %10155 = vmatpush1.bf16.msra.mxu0 %v10154_v26  ;;  %v4633_v26 = vld [vmem:[#allocation3 + $0x368] sm:$0xff] }
 0xaba   : > { %10157 = vmatprep.subr.bf16.mxu0 %v10156_v24  ;;  %v18263_v24 = vld [vmem:[#allocation85_spill] sm:$0xff]  ;;  %v10164_v8 = vpack.c.bf16 %v4635_v39, %v4633_v26  ;;  %v5086_v53 = vmax.f32 %v4974_v42, %v5070_v62  ;;  %v18272_v26 = vld [vmem:[#allocation158_spill] sm:$0xff]  ;;  %v18273_v39 = vld [vmem:[#allocation131_spill] sm:$0xff] }
 0xabb   : > { %v14459_v63 = vadd.f32 %v18264_v52, %v18263_v24  ;;  %v14475_v24 = vrot.slane %v14412_v22, %v18091_v29  ;;  %v14479_v52 = vrot.slane %v14412_v22, %v18088_v43  ;;  %v4919_v62 = vsel %vm835_vm2, %v18272_v26, %v18267_v60 }
 0xabc   : > { %v4967_v42 = vadd.f32 %v18273_v39, %v4917_v54  ;;  %v5198_v41 = vmax.f32 %v5086_v53, %v5182_v18  ;;  %v10166_v54 = vpack.c.bf16 %v4634_v57, %v4632_v46  ;;  %v4871_v39 = vadd.f32 %v14151_v9, %v4821_v10  ;;  %v18281_v57 = vld [vmem:[#allocation202_spill] sm:$0xff]  ;;  %v18282_v9 = vld [vmem:[#allocation201_spill] sm:$0xff]  ;;  %v4641_v10 = vld [vmem:[#allocation3 + $0x3a8] sm:$0xff] }
 0xabd   : > { %10159 = vmatpush1.bf16.msra.mxu0 %v10158_v47  ;;  %v5316_v47 = vsel %vm1070_vm5, %v18269_v13, %v18222_v7  ;;  %v18275_v7 = vld [vmem:[#allocation197_spill] sm:$0xff] }
 0xabe   : > { %10161 = vmatprep.subr.bf16.mxu0 %v10160_v40  ;;  %v4639_v40 = vld [vmem:[#allocation3 + $0x398] sm:$0xff]  ;;  %v5029_v13 = vsel %vm900_vm4, %v18275_v7, %v18274_v6  ;;  %v5031_v60 = vsel %vm900_vm4, %v18277_v1, %v18275_v7  ;;  %v5358_v26 = vadd.f32 %v14452_v59, %v5316_v47  ;;  %v18278_v6 = vld [vmem:[#allocation204_spill] sm:$0xff]  ;;  %v5428_v1 = vsel %vm1135_vm7, %v18280_v45, %v18233_v58 }
 0xabf   : > { %v5141_v18 = vsel %vm965_vm3, %v18279_v16, %v18278_v6  ;;  %v10168_v53 = vpack.c.bf16 %v4639_v40, %v4637_v3  ;;  %v5079_v46 = vadd.f32 %v14172_v17, %v5029_v13  ;;  %v4912_v47 = vsel %vm835_vm2, %v18282_v9, %v18281_v57  ;;  %v4643_v7 = vld [vmem:[#allocation3 + $0x3b8] sm:$0xff]  ;;  %v18283_v6 = vld [vmem:[#allocation167_spill] sm:$0xff]  ;;  %v18287_v57 = vld [vmem:[#allocation205_spill] sm:$0xff] }
 0xac0   : > { %v4870_v3 = vadd.f32 %v14419_v11, %v4823_v38  ;;  %v5078_v40 = vadd.f32 %v14422_v31, %v5031_v60  ;;  %v5143_v58 = vsel %vm965_vm3, %v18283_v6, %v18279_v16  ;;  %v5191_v13 = vadd.f32 %v14177_v32, %v5141_v18  ;;  %v18286_v45 = vld [vmem:[#allocation206_spill] sm:$0xff]  ;;  %v4640_v6 = vld [vmem:[#allocation3 + $0x3a0] sm:$0xff]  ;;  %v18288_v18 = vld [vmem:[#allocation208_spill] sm:$0xff] }
 0xac1   : > { %10163 = vmatpush1.bf16.msra.mxu0 %v10162_v30  ;;  %v4966_v30 = vadd.f32 %v14407_v15, %v4919_v62  ;;  %v18284_v15 = vld [vmem:[#allocation200_spill] sm:$0xff]  ;;  %v18285_v62 = vld [vmem:[#allocation199_spill] sm:$0xff]  ;;  %v5024_v11 = vsel %vm900_vm4, %v18287_v57, %v18286_v45  ;;  %v10170_v38 = vpack.c.bf16 %v4638_v44, %v4636_v55  ;;  %v5262_v31 = vmax.f32 %v5198_v41, %v5246_v2  ;;  %v4647_v55 = vld [vmem:[#allocation3 + $0x3d8] sm:$0xff] }
 0xac2   : > { %10165 = vmatprep.subr.bf16.mxu0 %v10164_v8  ;;  %v4983_v8 = vmax.f32 %v4871_v39, %v4967_v42  ;;  %v4816_v17 = vsel %vm770_vm1, %v18285_v62, %v18284_v15  ;;  %v5470_v42 = vadd.f32 %v14455_v5, %v5428_v1  ;;  %v4961_v60 = vadd.f32 %v14479_v52, %v4912_v47  ;;  %v4642_v39 = vld [vmem:[#allocation3 + $0x3b0] sm:$0xff]  ;;  %v18289_v62 = vld [vmem:[#allocation207_spill] sm:$0xff] }
 0xac3   : > { %v10172_v16 = vpack.c.bf16 %v4643_v7, %v4641_v10  ;;  %v4982_v49 = vmax.f32 %v4870_v3, %v4966_v30  ;;  %v5190_v32 = vadd.f32 %v14439_v36, %v5143_v58  ;;  %v5136_v45 = vsel %vm965_vm3, %v18289_v62, %v18288_v18  ;;  %v18291_v36 = vld [vmem:[#allocation209_spill] sm:$0xff]  ;;  %v18292_v7 = vld [vmem:[#allocation150_spill] sm:$0xff] }
 0xac4   : > { %v5095_v15 = vmax.f32 %v4983_v8, %v5079_v46  ;;  %v5374_v41 = vmax.f32 %v5262_v31, %v5358_v26  ;;  %v4865_v2 = vadd.f32 %v14475_v24, %v4816_v17  ;;  %v5073_v44 = vadd.f32 %v14491_v23, %v5024_v11  ;;  %v18290_v46 = vld [vmem:[#allocation210_spill] sm:$0xff]  ;;  %v4644_v17 = vld [vmem:[#allocation3 + $0x3c0] sm:$0xff] }
 0xac5   : > { %10167 = vmatpush1.bf16.msra.mxu0 %v10166_v54  ;;  %v4645_v54 = vld [vmem:[#allocation3 + $0x3c8] sm:$0xff]  ;;  %v5094_v1 = vmax.f32 %v4982_v49, %v5078_v40  ;;  %v5315_v47 = vsel %vm1070_vm5, %v18291_v36, %v18290_v46  ;;  %v10174_v10 = vpack.c.bf16 %v4642_v39, %v4640_v6  ;;  %v5540_v26 = vsel %vm1200_vm6, %v18292_v7, %v18237_v56  ;;  %v4646_v49 = vld [vmem:[#allocation3 + $0x3d0] sm:$0xff]  ;;  %v4651_v31 = vld [vmem:[#allocation3 + $0x3f8] sm:$0xff] }
 0xac6   : > { %10169 = vmatprep.subr.bf16.mxu0 %v10168_v53  ;;  %v14556_v53 = vrot.slane %v14412_v22, %v18261_v34  ;;  %v5207_v30 = vmax.f32 %v5095_v15, %v5191_v13  ;;  %v4977_v3 = vmax.f32 %v4865_v2, %v4961_v60  ;;  %v5185_v8 = vadd.f32 %v14504_v61, %v5136_v45  ;;  %v9761_v56 = vld [vmem:[%s17263_s2 + $0xd0] ss:$0 sm:$0xff]  ;;  %v18294_v6 = vld [vmem:[#allocation212_spill] sm:$0xff]  ;;  %v18295_v39 = vld [vmem:[#allocation211_spill] sm:$0xff] }
 0xac7   : > { %v10176_v58 = vpack.c.bf16 %v4647_v55, %v4645_v54  ;;  %v5486_v40 = vmax.f32 %v5374_v41, %v5470_v42  ;;  %v5206_v15 = vmax.f32 %v5094_v1, %v5190_v32  ;;  %v14569_v13 = vrot.slane %v14412_v22, %v18262_v35  ;;  %v18293_v45 = vld [vmem:[#allocation153_spill] sm:$0xff]  ;;  %v18296_v2 = vld [vmem:[#allocation214_spill] sm:$0xff]  ;;  %v18298_v1 = vld [vmem:[#allocation216_spill] sm:$0xff] }
 0xac8   : > { %v14573_v11 = vrot.slane %v14412_v22, %v18268_v19  ;;  %v5652_v42 = vsel %vm17702_vm8, %v18293_v45, %v18240_v21  ;;  %v5089_v60 = vmax.f32 %v4977_v3, %v5073_v44  ;;  %v5427_v22 = vsel %vm1135_vm7, %v18295_v39, %v18294_v6  ;;  %v18297_v44 = vld [vmem:[#allocation213_spill] sm:$0xff]  ;;  %v4648_v3 = vld [vmem:[#allocation3 + $0x3e0] sm:$0xff] }
 0xac9   : > { %10171 = vmatpush1.bf16.msra.mxu0 %v10170_v38  ;;  %v4649_v38 = vld [vmem:[#allocation3 + $0x3e8] sm:$0xff]  ;;  %v5582_v32 = vadd.f32 %v14471_v12, %v5540_v26  ;;  %v5317_v54 = vsel %vm1070_vm5, %v18210_v20, %v18291_v36  ;;  %v5271_v55 = vmax.f32 %v5207_v30, %v14459_v63  ;;  %v10178_v41 = vpack.c.bf16 %v4646_v49, %v4644_v17  ;;  %v4650_v45 = vld [vmem:[#allocation3 + $0x3f0] sm:$0xff] }
 0xaca   : > { %10173 = vmatprep.subr.bf16.mxu0 %v10172_v16  ;;  %v5367_v16 = vadd.f32 %v14181_v4, %v5315_v47  ;;  %v5201_v21 = vmax.f32 %v5089_v60, %v5185_v8  ;;  %v5310_v4 = vsel %vm1070_vm5, %v18297_v44, %v18296_v2  ;;  %v18299_v47 = vld [vmem:[#allocation215_spill] sm:$0xff]  ;;  %v10180_v26 = vpack.c.bf16 %v4651_v31, %v4649_v38  ;;  %v4655_v8 = vld [vmem:[#allocation3 + $0x418] sm:$0xff]  ;;  %v4654_v2 = vld [vmem:[#allocation3 + $0x410] sm:$0xff] }
 0xacb   : > { %v5539_v7 = vsel %vm1200_vm6, %v18299_v47, %v18298_v1  ;;  %v5694_v20 = vadd.f32 %v9761_v56, %v5652_v42  ;;  %v5270_v63 = vmax.f32 %v5206_v15, %v14449_v0  ;;  %v5429_v30 = vsel %vm1135_vm7, %v18216_v37, %v18295_v39  ;;  %v18300_v60 = vld [vmem:[#allocation219_spill] sm:$0xff]  ;;  %v18302_v31 = vld [vmem:[#allocation222_spill] sm:$0xff]  ;;  %v18303_v42 = vld [vmem:[#allocation221_spill] sm:$0xff] }
 0xacc   : > { %v5479_v36 = vadd.f32 %v14193_v51, %v5427_v22  ;;  %v5366_v17 = vadd.f32 %v14452_v59, %v5317_v54  ;;  %v5383_v49 = vmax.f32 %v5271_v55, %v5367_v16  ;;  %v5651_v0 = vsel %vm17702_vm8, %v18303_v42, %v18302_v31  ;;  %v18304_v22 = vld [vmem:[#allocation226_spill] sm:$0xff]  ;;  %v18305_v54 = vld [vmem:[#allocation223_spill] sm:$0xff] }
 0xacd   : > { %10175 = vmatpush1.bf16.msra.mxu0 %v10174_v10  ;;  %v4653_v10 = vld [vmem:[#allocation3 + $0x408] sm:$0xff]  ;;  %v5361_v15 = vadd.f32 %v14556_v53, %v5310_v4  ;;  %v5541_v51 = vsel %vm1200_vm6, %v18224_v28, %v18299_v47  ;;  %v5591_v37 = vadd.f32 %v14222_v27, %v5539_v7  ;;  %v10182_v59 = vpack.c.bf16 %v4650_v45, %v4648_v3  ;;  %v18306_v3 = vld [vmem:[#allocation82_spill] sm:$0xff]  ;;  %v18307_v45 = vld [vmem:[#allocation227_spill] sm:$0xff] }
 0xace   : > { %10177 = vmatprep.subr.bf16.mxu0 %v10176_v58  ;;  %v18301_v58 = vld [vmem:[#allocation217_spill] sm:$0xff]  ;;  %v5478_v16 = vadd.f32 %v14455_v5, %v5429_v30  ;;  %v5265_v39 = vmax.f32 %v5201_v21, %v14463_v14  ;;  %v5534_v55 = vsel %vm1200_vm6, %v18305_v54, %v18304_v22  ;;  %v10184_v4 = vpack.c.bf16 %v4655_v8, %v4653_v10  ;;  %v4657_v14 = vld [vmem:[#allocation3 + $0x428] sm:$0xff]  ;;  %v4656_v8 = vld [vmem:[#allocation3 + $0x420] sm:$0xff] }
 0xacf   : > { %v5422_v38 = vsel %vm1135_vm7, %v18301_v58, %v18300_v60  ;;  %v4652_v60 = vld [vmem:[#allocation3 + $0x400] sm:$0xff]  ;;  %v5495_v18 = vmax.f32 %v5383_v49, %v5479_v36  ;;  %v5653_v27 = vsel %vm17702_vm8, %v18229_v50, %v18303_v42  ;;  %v5703_v5 = vadd.f32 %v14361_v25, %v5651_v0  ;;  %v4661_v0 = vld [vmem:[#allocation3 + $0x448] sm:$0xff] }
 0xad0   : > { %v5473_v28 = vadd.f32 %v14569_v13, %v5422_v38  ;;  %v5598_v21 = vmax.f32 %v5486_v40, %v5582_v32  ;;  %v5382_v47 = vmax.f32 %v5270_v63, %v5366_v17  ;;  %v5590_v7 = vadd.f32 %v14471_v12, %v5541_v51  ;;  %v4658_v17 = vld [vmem:[#allocation3 + $0x430] sm:$0xff]  ;;  %v4663_v51 = vld [vmem:[#allocation3 + $0x458] sm:$0xff] }
 0xad1   : > { %10179 = vmatpush1.bf16.msra.mxu0 %v10178_v41  ;;  %v4659_v41 = vld [vmem:[#allocation3 + $0x438] sm:$0xff]  ;;  %v5646_v30 = vsel %vm17702_vm8, %v18307_v45, %v18306_v3  ;;  %v5377_v36 = vmax.f32 %v5265_v39, %v5361_v15  ;;  %v5585_v50 = vadd.f32 %v14573_v11, %v5534_v55  ;;  %v5607_v25 = vmax.f32 %v5495_v18, %v5591_v37 }
 0xad2   : > { %10181 = vmatprep.subr.bf16.mxu0 %v10180_v26  ;;  %v14638_v26 = vld [vmem:[%s17263_s2 + $0xe8] ss:$0 sm:$0xff]  ;;  %v10186_v10 = vpack.c.bf16 %v4654_v2, %v4652_v60  ;;  %v5710_v40 = vmax.f32 %v5598_v21, %v5694_v20  ;;  %v5494_v32 = vmax.f32 %v5382_v47, %v5478_v16  ;;  %v5702_v63 = vadd.f32 %v9761_v56, %v5653_v27  ;;  %v4660_v56 = vld [vmem:[#allocation3 + $0x440] sm:$0xff]  ;;  %v4662_v60 = vld [vmem:[#allocation3 + $0x450] sm:$0xff] }
 0xad3   : > { %v10188_v12 = vpack.c.bf16 %v4659_v41, %v4657_v14  ;;  %v5489_v49 = vmax.f32 %v5377_v36, %v5473_v28  ;;  %v5697_v38 = vadd.f32 %v14638_v26, %v5646_v30  ;;  %v5719_v42 = vmax.f32 %v5607_v25, %v5703_v5  ;;  %v4665_v16 = vld [vmem:[#allocation3 + $0x468] sm:$0xff]  ;;  %v4667_v39 = vld [vmem:[#allocation3 + $0x478] sm:$0xff]  ;;  %v4664_v28 = vld [vmem:[#allocation3 + $0x460] sm:$0xff] }
 0xad4   : > { %v5606_v15 = vmax.f32 %v5494_v32, %v5590_v7  ;;  %v10192_v20 = vpack.c.bf16 %v4663_v51, %v4661_v0  ;;  %v10194_v55 = vpack.c.bf16 %v4662_v60, %v4660_v56  ;;  %v4666_v27 = vld [vmem:[#allocation3 + $0x470] sm:$0xff]  ;;  %v4669_v5 = vld [vmem:[#allocation3 + $0x488] sm:$0xff]  ;;  %v4671_v14 = vld [vmem:[#allocation3 + $0x498] sm:$0xff] }
 0xad5   : > { %10183 = vmatpush1.bf16.msra.mxu0 %v10182_v59  ;;  %v10190_v59 = vpack.c.bf16 %v4658_v17, %v4656_v8  ;;  %v5601_v18 = vmax.f32 %v5489_v49, %v5585_v50  ;;  %v10198_v41 = vpack.c.bf16 %v4666_v27, %v4664_v28  ;;  %v10200_v21 = vpack.c.bf16 %v4671_v14, %v4669_v5  ;;  %v4668_v47 = vld [vmem:[#allocation3 + $0x480] sm:$0xff]  ;;  %v4670_v7 = vld [vmem:[#allocation3 + $0x490] sm:$0xff]  ;;  %v4673_v30 = vld [vmem:[#allocation3 + $0x4a8] sm:$0xff] }
 0xad6   : > { %10185 = vmatprep.subr.bf16.mxu0 %v10184_v4  ;;  %v5718_v2 = vmax.f32 %v5606_v15, %v5702_v63  ;;  %v10196_v4 = vpack.c.bf16 %v4667_v39, %v4665_v16  ;;  %v4675_v36 = vld [vmem:[#allocation3 + $0x4b8] sm:$0xff]  ;;  %v10202_v50 = vpack.c.bf16 %v4670_v7, %v4668_v47  ;;  %v4677_v32 = vld [vmem:[#allocation3 + $0x4c8] sm:$0xff]  ;;  %v4676_v17 = vld [vmem:[#allocation3 + $0x4c0] sm:$0xff] }
 0xad7   : > { %v5713_v37 = vmax.f32 %v5601_v18, %v5697_v38  ;;  %v10204_v25 = vpack.c.bf16 %v4675_v36, %v4673_v30  ;;  %v4679_v63 = vld [vmem:[#allocation3 + $0x4d8] sm:$0xff]  ;;  %v4678_v49 = vld [vmem:[#allocation3 + $0x4d0] sm:$0xff]  ;;  %v4681_v38 = vld [vmem:[#allocation3 + $0x4e8] sm:$0xff] }
 0xad8   : > { %5866 = vmatmul.mubr.f32.vlgmr.msra.gmra.mrb[48].mxu0 %v5710_v40  ;;  %v4674_v40 = vld [vmem:[#allocation3 + $0x4b0] sm:$0xff]  ;;  %v10208_v8 = vpack.c.bf16 %v4679_v63, %v4677_v32  ;;  %v10210_v0 = vpack.c.bf16 %v4678_v49, %v4676_v17  ;;  %v333_v51 = vld [vmem:[%s17263_s2 + $0xa0] sm:$0xff]  ;;  %v4687_v56 = vld [vmem:[#allocation3 + $0x518] sm:$0xff] }
 0xad9   : > { %5871 = vmatprep.mubr.f32.mxu0 %v5719_v42  ;;  %10187 = vmatpush1.bf16.msra.mxu0 %v10186_v10  ;;  %v4672_v10 = vld [vmem:[#allocation3 + $0x4a0] sm:$0xff]  ;;  %v4683_v42 = vld [vmem:[#allocation3 + $0x4f8] sm:$0xff]  ;;  %v4682_v18 = vld [vmem:[#allocation3 + $0x4f0] sm:$0xff]  ;;  %v14657_v16 = vrot.slane %v333_v51, %v18091_v29  ;;  %v14660_v39 = vrot.slane %v333_v51, %v18093_v48 }
 0xada   : > { %10189 = vmatprep.subr.bf16.mxu0 %v10188_v12  ;;  %v10206_v12 = vpack.c.bf16 %v4674_v40, %v4672_v10  ;;  %v10212_v15 = vpack.c.bf16 %v4683_v42, %v4681_v38  ;;  %v18308_v60 = vld [vmem:[#allocation166_spill] sm:$0xff]  ;;  %v18310_v28 = vld [vmem:[#allocation164_spill] sm:$0xff]  ;;  %v18312_v7 = vld [vmem:[#allocation21_spill] sm:$0xff] }
 0xadb   : > { %v18311_v5 = vld [vmem:[#allocation170_spill] sm:$0xff]  ;;  %v14672_v30 = vrot.slane %v333_v51, %v18312_v7  ;;  %v4689_v36 = vld [vmem:[#allocation3 + $0x528] sm:$0xff]  ;;  %v18314_v38 = vld [vmem:[#allocation27_spill] sm:$0xff] }
 0xadc   : > { %5872 = vmatmul.mubr.f32.gmra.mrb[50].mxu0 %v5718_v2  ;;  %v14650_v2 = vrot.slane %v333_v51, %v18088_v43  ;;  %v5026_v14 = vsel %vm900_vm4, %v18311_v5, %v18287_v57  ;;  %v5231_v42 = vrot.slane %v333_v51, %v18314_v38  ;;  %v14696_v5 = vrot.slane %v333_v51, %v18262_v35 }
 0xadd   : > { %10191 = vmatpush1.bf16.msra.mxu0 %v10190_v59  ;;  %5942 = vmatprep.mubr.f32.mxu0 %v5713_v37  ;;  %v4680_v59 = vld [vmem:[#allocation3 + $0x4e0] sm:$0xff]  ;;  %v4914_v37 = vsel %vm835_vm2, %v18308_v60, %v18282_v9  ;;  %v5072_v57 = vadd.f32 %v14660_v39, %v5026_v14  ;;  %v4697_v14 = vld [vmem:[#allocation3 + $0x568] sm:$0xff] }
 0xade   : > { %10193 = vmatprep.subr.bf16.mxu0 %v10192_v20  ;;  %v4685_v20 = vld [vmem:[#allocation3 + $0x508] sm:$0xff]  ;;  %v4960_v47 = vadd.f32 %v14650_v2, %v4914_v37  ;;  %v4692_v60 = vld [vmem:[#allocation3 + $0x540] sm:$0xff]  ;;  %v4694_v37 = vld [vmem:[#allocation3 + $0x550] sm:$0xff] }
 0xadf   : > { %v10216_v9 = vpack.c.bf16 %v4687_v56, %v4685_v20 }
 0xae1   : > { %10195 = vmatpush1.bf16.msra.mxu0 %v10194_v55  ;;  %v10214_v55 = vpack.c.bf16 %v4682_v18, %v4680_v59 }
 0xae2   : > { %10197 = vmatprep.subr.bf16.mxu0 %v10196_v4  ;;  %v18309_v4 = vld [vmem:[#allocation199_spill] sm:$0xff] }
 0xae3   : > { %v4818_v27 = vsel %vm770_vm1, %v18310_v28, %v18309_v4  ;;  %v18315_v4 = vld [vmem:[#allocation87_spill] sm:$0xff] }
 0xae4   : > { %v4864_v40 = vadd.f32 %v14657_v16, %v4818_v27  ;;  %v5248_v28 = vadd.f32 %v5231_v42, %v18315_v4  ;;  %v14693_v27 = vrot.slane %v333_v51, %v18261_v34 }
 0xae5   : > { %10199 = vmatpush1.bf16.msra.mxu0 %v10198_v41  ;;  %v4684_v41 = vld [vmem:[#allocation3 + $0x500] sm:$0xff] }
 0xae6   : > { %10201 = vmatprep.subr.bf16.mxu0 %v10200_v21  ;;  %v4686_v21 = vld [vmem:[#allocation3 + $0x510] sm:$0xff]  ;;  %v4976_v17 = vmax.f32 %v4864_v40, %v4960_v47  ;;  %v18319_v40 = vld [vmem:[#allocation119_spill] sm:$0xff] }
 0xae7   : > { %v10218_v32 = vpack.c.bf16 %v4686_v21, %v4684_v41  ;;  %v18316_v41 = vld [vmem:[#allocation180_spill] sm:$0xff]  ;;  %v18317_v47 = vld [vmem:[#allocation185_spill] sm:$0xff] }
 0xae8   : > { %v5088_v59 = vmax.f32 %v4976_v17, %v5072_v57  ;;  %v5312_v21 = vsel %vm1070_vm5, %v18316_v41, %v18297_v44  ;;  %v18320_v57 = vld [vmem:[#allocation194_spill] sm:$0xff]  ;;  %v14742_v41 = vpop.permute.xlu1 %5416 }
 0xae9   : > { %10203 = vmatpush1.bf16.msra.mxu0 %v10202_v50  ;;  %v4691_v50 = vld [vmem:[#allocation3 + $0x538] sm:$0xff] }
 0xaea   : > { %10205 = vmatprep.subr.bf16.mxu0 %v10204_v25  ;;  %v18313_v25 = vld [vmem:[#allocation172_spill] sm:$0xff]  ;;  %v10220_v63 = vpack.c.bf16 %v4691_v50, %v4689_v36  ;;  %v5424_v36 = vsel %vm1135_vm7, %v18317_v47, %v18301_v58  ;;  %v14707_v50 = vrot.slane %v333_v51, %v18268_v19  ;;  %v10226_v58 = vpack.c.bf16 %v4694_v37, %v4692_v60  ;;  %v18323_v51 = vld [vmem:[#allocation122_spill] sm:$0xff] }
 0xaeb   : > { %v5138_v10 = vsel %vm965_vm3, %v18313_v25, %v18289_v62  ;;  %v4693_v62 = vld [vmem:[#allocation3 + $0x548] sm:$0xff]  ;;  %v18318_v25 = vld [vmem:[#allocation89_spill] sm:$0xff]  ;;  %v5472_v60 = vadd.f32 %v14696_v5, %v5424_v36 }
 0xaec   : > { %v5184_v49 = vadd.f32 %v14672_v30, %v5138_v10  ;;  %v14710_v10 = vadd.f32 %v5231_v42, %v18318_v25  ;;  %v4701_v47 = vld [vmem:[#allocation3 + $0x588] sm:$0xff]  ;;  %v4703_v25 = vld [vmem:[#allocation3 + $0x598] sm:$0xff] }
 0xaed   : > { %10207 = vmatpush1.bf16.msra.mxu0 %v10206_v12  ;;  %v4688_v12 = vld [vmem:[#allocation3 + $0x520] sm:$0xff] }
 0xaee   : > { %10209 = vmatprep.subr.bf16.mxu0 %v10208_v8  ;;  %v4690_v8 = vld [vmem:[#allocation3 + $0x530] sm:$0xff] }
 0xaef   : > { %v10222_v18 = vpack.c.bf16 %v4690_v8, %v4688_v12  ;;  %v18322_v12 = vld [vmem:[#allocation196_spill] sm:$0xff] }
 0xaf1   : > { %10211 = vmatpush1.bf16.msra.mxu0 %v10210_v0  ;;  %v14685_v0 = vld [vmem:[%s17263_s2 + $0xb8] sm:$0xff] }
 0xaf2   : > { %10213 = vmatprep.subr.bf16.mxu0 %v10212_v15  ;;  %v4695_v15 = vld [vmem:[#allocation3 + $0x558] sm:$0xff]  ;;  %v14689_v20 = vrot.slane %v14685_v0, %v18314_v38  ;;  %v14722_v8 = vrot.slane %v14685_v0, %v18091_v29  ;;  %v14734_v42 = vrot.slane %v14685_v0, %v18093_v48  ;;  %v14740_v37 = vrot.slane %v14685_v0, %v18312_v7  ;;  %v18338_v48 = vld [vmem:[#allocation233_spill] sm:$0xff]  ;;  %v4705_v38 = vld [vmem:[#allocation3 + $0x5a8] sm:$0xff] }
 0xaf3   : > { %v10224_v56 = vpack.c.bf16 %v4695_v15, %v4693_v62  ;;  %v4696_v15 = vld [vmem:[#allocation3 + $0x560] sm:$0xff] }
 0xaf4   : > { %18324 = vst [vmem:[#allocation218_spill] sm:$0xff] %v14734_v42 }
 0xaf5   : > { %10215 = vmatpush1.bf16.msra.mxu0 %v10214_v55  ;;  %v5200_v55 = vmax.f32 %v5088_v59, %v5184_v49  ;;  %v14730_v49 = vrot.slane %v14685_v0, %v18088_v43  ;;  %v4698_v59 = vld [vmem:[#allocation3 + $0x570] sm:$0xff] }
 0xaf6   : > { %10217 = vmatprep.subr.bf16.mxu0 %v10216_v9  ;;  %v4699_v9 = vld [vmem:[#allocation3 + $0x578] sm:$0xff] }
 0xaf7   : > { %v10228_v62 = vpack.c.bf16 %v4699_v9, %v4697_v14  ;;  %v5264_v4 = vmax.f32 %v5200_v55, %v5248_v28  ;;  %v18325_v14 = vld [vmem:[#allocation127_spill] sm:$0xff]  ;;  %v18326_v9 = vld [vmem:[#allocation198_spill] sm:$0xff] }
 0xaf8   : > { %v5027_v55 = vsel %vm900_vm4, %v18326_v9, %v18325_v14  ;;  %v18327_v28 = vld [vmem:[#allocation138_spill] sm:$0xff]  ;;  %v18332_v9 = vld [vmem:[#allocation229_spill] sm:$0xff] }
 0xaf9   : > { %10219 = vmatpush1.bf16.msra.mxu0 %v10218_v32  ;;  %v4819_v32 = vsel %vm770_vm1, %v18320_v57, %v18319_v40 }
 0xafa   : > { %10221 = vmatprep.subr.bf16.mxu0 %v10220_v63  ;;  %v18321_v63 = vld [vmem:[#allocation121_spill] sm:$0xff]  ;;  %v4872_v57 = vadd.f32 %v14657_v16, %v4819_v32  ;;  %v18330_v16 = vld [vmem:[#allocation128_spill] sm:$0xff]  ;;  %v10230_v32 = vpack.c.bf16 %v4698_v59, %v4696_v15  ;;  %v18337_v15 = vld [vmem:[#allocation190_spill] sm:$0xff] }
 0xafb   : > { %v4915_v44 = vsel %vm835_vm2, %v18322_v12, %v18321_v63  ;;  %v4913_v17 = vsel %vm835_vm2, %v18321_v63, %v18323_v51  ;;  %v18329_v63 = vld [vmem:[#allocation120_spill] sm:$0xff]  ;;  %v5536_v59 = vsel %vm1200_vm6, %v18337_v15, %v18305_v54  ;;  %v14794_v15 = vpop.permute.xlu1 %5638 }
 0xafc   : > { %v4817_v12 = vsel %vm770_vm1, %v18319_v40, %v18329_v63  ;;  %v4969_v3 = vadd.f32 %v14479_v52, %v4913_v17  ;;  %v18334_v51 = vld [vmem:[#allocation204_spill] sm:$0xff]  ;;  %v18336_v63 = vld [vmem:[#allocation129_spill] sm:$0xff]  ;;  %v10232_v17 = vpack.c.bf16 %v4703_v25, %v4701_v47 }
 0xafd   : > { %10223 = vmatpush1.bf16.msra.mxu0 %v10222_v18  ;;  %v5360_v18 = vadd.f32 %v14693_v27, %v5312_v21  ;;  %v18328_v21 = vld [vmem:[#allocation230_spill] sm:$0xff]  ;;  %v18335_v40 = vld [vmem:[#allocation140_spill] sm:$0xff] }
 0xafe   : > { %10225 = vmatprep.subr.bf16.mxu0 %v10224_v56  ;;  %v4968_v56 = vadd.f32 %v14650_v2, %v4915_v44  ;;  %v4908_v36 = vsel %vm835_vm2, %v18328_v21, %v18327_v28  ;;  %v5025_v2 = vsel %vm900_vm4, %v18325_v14, %v18330_v16  ;;  %v18331_v44 = vld [vmem:[#allocation137_spill] sm:$0xff]  ;;  %v18333_v28 = vld [vmem:[#allocation231_spill] sm:$0xff]  ;;  %v5020_v52 = vsel %vm900_vm4, %v18336_v63, %v18335_v40  ;;  %v4707_v40 = vld [vmem:[#allocation3 + $0x5b8] sm:$0xff] }
 0xaff   : > { %v4812_v22 = vsel %vm770_vm1, %v18332_v9, %v18331_v44  ;;  %v5139_v7 = vsel %vm965_vm3, %v18334_v51, %v18333_v28  ;;  %v4700_v14 = vld [vmem:[#allocation3 + $0x580] sm:$0xff]  ;;  %v5080_v44 = vadd.f32 %v14660_v39, %v5027_v55  ;;  %v4963_v16 = vadd.f32 %v14730_v49, %v4908_v36  ;;  %v18339_v63 = vld [vmem:[#allocation142_spill] sm:$0xff] }
 0xb00   : > { %v5137_v51 = vsel %vm965_vm3, %v18333_v28, %v18338_v48  ;;  %v4984_v47 = vmax.f32 %v4872_v57, %v4968_v56  ;;  %v5081_v25 = vadd.f32 %v14491_v23, %v5025_v2  ;;  %v18340_v9 = vld [vmem:[#allocation86_spill] sm:$0xff]  ;;  %v4867_v39 = vadd.f32 %v14722_v8, %v4812_v22  ;;  %v4704_v56 = vld [vmem:[#allocation3 + $0x5a0] sm:$0xff] }
 0xb01   : > { %10227 = vmatpush1.bf16.msra.mxu0 %v10226_v58  ;;  %v4702_v58 = vld [vmem:[#allocation3 + $0x590] sm:$0xff]  ;;  %v5132_v54 = vsel %vm965_vm3, %v18340_v9, %v18339_v63  ;;  %v5192_v55 = vadd.f32 %v14672_v30, %v5139_v7  ;;  %v5075_v36 = vadd.f32 %v14734_v42, %v5020_v52  ;;  %v5376_v48 = vmax.f32 %v5264_v4, %v5360_v18  ;;  %v4709_v30 = vld [vmem:[#allocation3 + $0x5c8] sm:$0xff]  ;;  %v4711_v52 = vld [vmem:[#allocation3 + $0x5d8] sm:$0xff] }
 0xb02   : > { %10229 = vmatprep.subr.bf16.mxu0 %v10228_v62  ;;  %v4873_v62 = vadd.f32 %v14475_v24, %v4817_v12  ;;  %v10234_v28 = vpack.c.bf16 %v4702_v58, %v4700_v14  ;;  %v5193_v57 = vadd.f32 %v14504_v61, %v5137_v51  ;;  %v10236_v23 = vpack.c.bf16 %v4707_v40, %v4705_v38  ;;  %v4706_v12 = vld [vmem:[#allocation3 + $0x5b0] sm:$0xff]  ;;  %v18341_v4 = vld [vmem:[#allocation192_spill] sm:$0xff]  ;;  %v18342_v38 = vld [vmem:[#allocation90_spill] sm:$0xff] }
 0xb03   : > { %v14798_v63 = vadd.f32 %v14707_v50, %v5536_v59  ;;  %v5096_v22 = vmax.f32 %v4984_v47, %v5080_v44  ;;  %v4979_v2 = vmax.f32 %v4867_v39, %v4963_v16  ;;  %v5187_v7 = vadd.f32 %v14740_v37, %v5132_v54  ;;  %v18343_v18 = vld [vmem:[#allocation113_spill] sm:$0xff]  ;;  %v18344_v58 = vld [vmem:[#allocation84_spill] sm:$0xff]  ;;  %v4708_v47 = vld [vmem:[#allocation3 + $0x5c0] sm:$0xff] }
 0xb04   : > { %v4985_v24 = vmax.f32 %v4873_v62, %v4969_v3  ;;  %v14801_v42 = vmax.f32 %v5376_v48, %v5472_v60  ;;  %v5648_v61 = vsel %vm17702_vm8, %v18341_v4, %v18307_v45  ;;  %v18345_v59 = vld [vmem:[#allocation224_spill] sm:$0xff]  ;;  %v10238_v60 = vpack.c.bf16 %v4706_v12, %v4704_v56  ;;  %v18347_v12 = vld [vmem:[#allocation114_spill] sm:$0xff] }
 0xb05   : > { %10231 = vmatpush1.bf16.msra.mxu0 %v10230_v32  ;;  %v5257_v32 = vadd.f32 %v18343_v18, %v18342_v38  ;;  %v5208_v16 = vmax.f32 %v5096_v22, %v5192_v55  ;;  %v5091_v14 = vmax.f32 %v4979_v2, %v5075_v36  ;;  %v5311_v48 = vsel %vm1070_vm5, %v18345_v59, %v18344_v58  ;;  %v18346_v45 = vld [vmem:[#allocation92_spill] sm:$0xff]  ;;  %v14854_v2 = vld [vmem:[%s17262_s1 + $0x50] sm:$0xff] }
 0xb06   : > { %10233 = vmatprep.subr.bf16.mxu0 %v10232_v17  ;;  %v5097_v3 = vmax.f32 %v4985_v24, %v5081_v25  ;;  %v14812_v17 = vld [vmem:[%s17263_s2 + $0xe0] ss:$0 sm:$0xff]  ;;  %v5251_v51 = vadd.f32 %v14689_v20, %v18346_v45  ;;  %v14822_v40 = vrot.slane %v14685_v0, %v18261_v34  ;;  %v10240_v62 = vpack.c.bf16 %v4711_v52, %v4709_v30  ;;  %v4710_v25 = vld [vmem:[#allocation3 + $0x5d0] sm:$0xff]  ;;  %v4713_v24 = vld [vmem:[#allocation3 + $0x5e8] sm:$0xff] }
 0xb07   : > { %v5600_v54 = vmax.f32 %v14801_v42, %v14798_v63  ;;  %v5203_v39 = vmax.f32 %v5091_v14, %v5187_v7  ;;  %v14828_v55 = vrot.slane %v14685_v0, %v18262_v35  ;;  %v14832_v36 = vrot.slane %v14685_v0, %v18268_v19  ;;  %v18348_v63 = vld [vmem:[#allocation157_spill] sm:$0xff]  ;;  %v14849_v0 = vld [vmem:[%s17262_s1 + $0x18] sm:$0xff]  ;;  %v18350_v30 = vld [vmem:[#allocation155_spill] sm:$0xff]  ;;  %6041 = vperm.xlu0 %10816, %v14854_v2  }
 0xb08   : > { %v5209_v44 = vmax.f32 %v5097_v3, %v5193_v57  ;;  %v4715_v57 = vld [vmem:[#allocation3 + $0x5f8] sm:$0xff]  ;;  %v5313_v42 = vsel %vm1070_vm5, %v18290_v46, %v18345_v59  ;;  %v5369_v56 = vadd.f32 %v14556_v53, %v5311_v48  ;;  %v5423_v22 = vsel %vm1135_vm7, %v18348_v63, %v18347_v12  ;;  %v18349_v46 = vld [vmem:[#allocation145_spill] sm:$0xff]  ;;  %6036 = vperm.xlu1 %10815, %v14849_v0   ;;  %v18352_v3 = vld [vmem:[#allocation12_spill] sm:$0xff] }
 0xb09   : > { %10235 = vmatpush1.bf16.msra.mxu0 %v10234_v28  ;;  %v14834_v28 = vpop.permute.xlu1 %5528  ;;  %v5272_v7 = vmax.f32 %v5208_v16, %v14710_v10  ;;  %v5322_v53 = vsel %vm1070_vm5, %v18350_v30, %v18349_v46  ;;  %v10242_v52 = vpack.c.bf16 %v4710_v25, %v4708_v47  ;;  %v10244_v18 = vpack.c.bf16 %v4715_v57, %v4713_v24  ;;  %v4712_v14 = vld [vmem:[#allocation3 + $0x5e0] sm:$0xff]  ;;  %v4714_v59 = vld [vmem:[#allocation3 + $0x5f0] sm:$0xff]  ;;  %v18353_v47 = vld [vmem:[#allocation148_spill] sm:$0xff] }
 0xb0a   : > { %10237 = vmatprep.subr.bf16.mxu0 %v10236_v23  ;;  %v5696_v23 = vadd.f32 %v14812_v17, %v5648_v61  ;;  %v5273_v4 = vmax.f32 %v5209_v44, %v5257_v32  ;;  %v18351_v61 = vld [vmem:[#allocation146_spill] sm:$0xff]  ;;  %v5368_v10 = vadd.f32 %v14693_v27, %v5313_v42  ;;  %v5425_v16 = vsel %vm1135_vm7, %v18294_v6, %v18348_v63  ;;  %v18354_v27 = vld [vmem:[#allocation11_spill] sm:$0xff] }
 0xb0b   : > { %v5535_v38 = vsel %vm1200_vm6, %v18352_v3, %v18351_v61  ;;  %v5481_v32 = vadd.f32 %v14569_v13, %v5423_v22  ;;  %v5267_v48 = vmax.f32 %v5203_v39, %v5251_v51  ;;  %v4719_v44 = vld [vmem:[#allocation3 + $0x618] sm:$0xff]  ;;  %v5434_v25 = vsel %vm1135_vm7, %v14742_v41, %v18353_v47  ;;  %v4716_v46 = vld [vmem:[#allocation3 + $0x600] sm:$0xff] }
 0xb0c   : > { %v5385_v45 = vmax.f32 %v5273_v4, %v5369_v56  ;;  %v5647_v24 = vsel %vm17702_vm8, %v18354_v27, %v14794_v15  ;;  %v5537_v13 = vsel %vm1200_vm6, %v18298_v1, %v18352_v3  ;;  %v5593_v6 = vadd.f32 %v14573_v11, %v5535_v38  ;;  %v18356_v56 = vld [vmem:[#allocation151_spill] sm:$0xff]  ;;  %v4721_v3 = vld [vmem:[#allocation3 + $0x628] sm:$0xff]  ;;  %v4723_v38 = vld [vmem:[#allocation3 + $0x638] sm:$0xff] }
 0xb0d   : > { %10239 = vmatpush1.bf16.msra.mxu0 %v10238_v60  ;;  %v4717_v60 = vld [vmem:[#allocation3 + $0x608] sm:$0xff]  ;;  %v14887_v51 = vpop.permute.xlu1 %5640  ;;  %v10246_v39 = vpack.c.bf16 %v4714_v59, %v4712_v14  ;;  %v18355_v57 = vmov 97   ;;  %v5480_v42 = vadd.f32 %v14696_v5, %v5425_v16  ;;  %v5546_v63 = vsel %vm1200_vm6, %v14834_v28, %v18356_v56  ;;  %v4720_v47 = vld [vmem:[#allocation3 + $0x620] sm:$0xff]  ;;  %v4727_v56 = vld [vmem:[#allocation3 + $0x658] sm:$0xff] }
 0xb0e   : > { %10241 = vmatprep.subr.bf16.mxu0 %v10240_v62  ;;  %v5363_v62 = vadd.f32 %v14822_v40, %v5322_v53  ;;  %10817 = vset.pattern.permute.xlu1 %v18355_v57  ;;  %v10248_v22 = vpack.c.bf16 %v4719_v44, %v4717_v60  ;;  %v4718_v53 = vld [vmem:[#allocation3 + $0x610] sm:$0xff]  ;;  %v5497_v11 = vmax.f32 %v5385_v45, %v5481_v32  ;;  %v14909_v32 = vld [vmem:[%s17263_s2 + $0xf8] ss:$0 sm:$0xff] }
 0xb0f   : > { %6049 = vperm.xlu1 %10817, %v14849_v0   ;;  %v5475_v1 = vadd.f32 %v14828_v55, %v5434_v25  ;;  %v5705_v5 = vadd.f32 %v14638_v26, %v5647_v24  ;;  %v5712_v14 = vmax.f32 %v5600_v54, %v5696_v23  ;;  %v5384_v59 = vmax.f32 %v5272_v7, %v5368_v10  ;;  %v18359_v60 = vld [vmem:[#allocation154_spill] sm:$0xff]  ;;  %v4722_v25 = vld [vmem:[#allocation3 + $0x630] sm:$0xff] }
 0xb10   : > { %v5592_v16 = vadd.f32 %v14707_v50, %v5537_v13  ;;  %v5379_v44 = vmax.f32 %v5267_v48, %v5363_v62  ;;  %v5587_v54 = vadd.f32 %v14832_v36, %v5546_v63  ;;  %v5609_v23 = vmax.f32 %v5497_v11, %v5593_v6  ;;  %v4725_v62 = vld [vmem:[#allocation3 + $0x648] sm:$0xff]  ;;  %v4726_v11 = vld [vmem:[#allocation3 + $0x650] sm:$0xff]  ;;  %v18392_v57 = vld [vmem:[#allocation218_spill] sm:$0xff] }
 0xb11   : > { %10243 = vmatpush1.bf16.msra.mxu0 %v10242_v52  ;;  %v5649_v52 = vsel %vm17702_vm8, %v18302_v31, %v18354_v27  ;;  %v5658_v31 = vsel %vm17702_vm8, %v14887_v51, %v18359_v60  ;;  %v10250_v50 = vpack.c.bf16 %v4718_v53, %v4716_v46  ;;  %v5496_v7 = vmax.f32 %v5384_v59, %v5480_v42  ;;  %v4724_v53 = vld [vmem:[#allocation3 + $0x640] sm:$0xff]  ;;  %v4733_v60 = vld [vmem:[#allocation3 + $0x688] sm:$0xff] }
 0xb12   : > { %10245 = vmatprep.subr.bf16.mxu0 %v10244_v18  ;;  %v14902_v4 = vpop.f32.mrb[40].mxu0  ;;  %v18358_v18 = vmov 98   ;;  %v5704_v10 = vadd.f32 %v14812_v17, %v5649_v52  ;;  %v10252_v45 = vpack.c.bf16 %v4723_v38, %v4721_v3  ;;  %v5491_v27 = vmax.f32 %v5379_v44, %v5475_v1  ;;  %v4731_v3 = vld [vmem:[#allocation3 + $0x678] sm:$0xff]  ;;  %v4728_v59 = vld [vmem:[#allocation3 + $0x660] sm:$0xff] }
 0xb13   : > { %18357 = vst [vmem:[#allocation112_spill] sm:$0xff] %v14902_v4  ;;  %10818 = vset.pattern.permute.xlu0 %v18358_v18  ;;  %v14915_v26 = vpop.f32.mrb[41].mxu0  ;;  %6053 = vperm.xlu1 %10817, %v14854_v2   ;;  %v5699_v24 = vadd.f32 %v14909_v32, %v5658_v31  ;;  %v5721_v48 = vmax.f32 %v5609_v23, %v5705_v5  ;;  %v18363_v42 = vmov 100   ;;  %v18364_v1 = vmov 99   ;;  %v4729_v5 = vld [vmem:[#allocation3 + $0x668] sm:$0xff]  ;;  %v4735_v31 = vld [vmem:[#allocation3 + $0x698] sm:$0xff] }
 0xb14   : > { %18360 = vst [vmem:[#allocation169_spill] sm:$0xff] %v14915_v26  ;;  %6138 = vperm.xlu0 %10818, %v14849_v0   ;;  %v5608_v6 = vmax.f32 %v5496_v7, %v5592_v16  ;;  %v10254_v17 = vpack.c.bf16 %v4722_v25, %v4720_v47  ;;  %v5603_v63 = vmax.f32 %v5491_v27, %v5587_v54  ;;  %v4730_v16 = vld [vmem:[#allocation3 + $0x670] sm:$0xff]  ;;  %v18365_v44 = vmov 101   ;;  %v4736_v27 = vld [vmem:[#allocation3 + $0x6a0] sm:$0xff]  ;;  %v4765_v26 = vld [vmem:[#allocation3 + $0x788] sm:$0xff] }
 0xb15   : > { %10247 = vmatpush1.bf16.msra.mxu0 %v10246_v39  ;;  %v10256_v46 = vpack.c.bf16 %v4727_v56, %v4725_v62  ;;  %v10258_v38 = vpack.c.bf16 %v4726_v11, %v4724_v53  ;;  %v10262_v54 = vpack.c.bf16 %v4730_v16, %v4728_v59  ;;  %v10264_v23 = vpack.c.bf16 %v4735_v31, %v4733_v60  ;;  %v4734_v7 = vld [vmem:[#allocation3 + $0x690] sm:$0xff]  ;;  %v4743_v62 = vld [vmem:[#allocation3 + $0x6d8] sm:$0xff]  ;;  %v4749_v59 = vld [vmem:[#allocation3 + $0x708] sm:$0xff] }
 0xb16   : > { %10249 = vmatprep.subr.bf16.mxu0 %v10248_v22  ;;  %v14922_v13 = vpop.f32.mrb[42].mxu0  ;;  %v5720_v22 = vmax.f32 %v5608_v6, %v5704_v10  ;;  %v5715_v52 = vmax.f32 %v5603_v63, %v5699_v24  ;;  %v4737_v10 = vld [vmem:[#allocation3 + $0x6a8] sm:$0xff]  ;;  %v4738_v24 = vld [vmem:[#allocation3 + $0x6b0] sm:$0xff]  ;;  %v4747_v53 = vld [vmem:[#allocation3 + $0x6f8] sm:$0xff] }
 0xb17   : > { %18361 = vst [vmem:[#allocation220_spill] sm:$0xff] %v14922_v13  ;;  %v14924_v39 = vpop.f32.mrb[43].mxu0  ;;  %10819 = vset.pattern.permute.xlu1 %v18364_v1  ;;  %v10270_v56 = vpack.c.bf16 %v4738_v24, %v4736_v27  ;;  %v4742_v63 = vld [vmem:[#allocation3 + $0x6d0] sm:$0xff]  ;;  %v4751_v16 = vld [vmem:[#allocation3 + $0x718] sm:$0xff]  ;;  %v4752_v24 = vld [vmem:[#allocation3 + $0x720] sm:$0xff] }
 0xb18   : > { %18362 = vst [vmem:[#allocation125_spill] sm:$0xff] %v14924_v39  ;;  %5943 = vmatmul.mubr.f32.vlgmr.msra.gmra.mrb[48].mxu0 %v5712_v14  ;;  %10820 = vset.pattern.permute.xlu0 %v18363_v42  ;;  %v10260_v14 = vpack.c.bf16 %v4731_v3, %v4729_v5  ;;  %v4744_v3 = vld [vmem:[#allocation3 + $0x6e0] sm:$0xff]  ;;  %v18382_v13 = vld [vmem:[#allocation16_spill] sm:$0xff]  ;;  %v4767_v4 = vld [vmem:[#allocation3 + $0x798] sm:$0xff] }
 0xb19   : > { %5948 = vmatprep.mubr.f32.mxu0 %v5721_v48  ;;  %10251 = vmatpush1.bf16.msra.mxu0 %v10250_v50  ;;  %v4732_v50 = vld [vmem:[#allocation3 + $0x680] sm:$0xff]  ;;  %v4741_v48 = vld [vmem:[#allocation3 + $0x6c8] sm:$0xff] }
 0xb1a   : > { %10253 = vmatprep.subr.bf16.mxu0 %v10252_v45  ;;  %6144 = vperm.xlu1 %10819, %v14849_v0   ;;  %v4739_v45 = vld [vmem:[#allocation3 + $0x6b8] sm:$0xff]  ;;  %v10266_v47 = vpack.c.bf16 %v4734_v7, %v4732_v50  ;;  %v10272_v6 = vpack.c.bf16 %v4743_v62, %v4741_v48  ;;  %v4750_v50 = vld [vmem:[#allocation3 + $0x710] sm:$0xff]  ;;  %v4753_v7 = vld [vmem:[#allocation3 + $0x728] sm:$0xff] }
 0xb1b   : > { %v10268_v25 = vpack.c.bf16 %v4739_v45, %v4737_v10  ;;  %v4755_v10 = vld [vmem:[#allocation3 + $0x738] sm:$0xff]  ;;  %v14941_v45 = vld [vmem:[%s17263_s2 + $0xb0] sm:$0xff]  ;;  %v18381_v39 = vld [vmem:[#allocation159_spill] sm:$0xff] }
 0xb1c   : > { %5949 = vmatmul.mubr.f32.gmra.mrb[50].mxu0 %v5720_v22  ;;  %v10284_v27 = vpack.c.bf16 %v4755_v10, %v4753_v7  ;;  %v4754_v48 = vld [vmem:[#allocation3 + $0x730] sm:$0xff]  ;;  %v18370_v62 = vld [vmem:[#allocation202_spill] sm:$0xff]  ;;  %v18389_v1 = vld [vmem:[#allocation168_spill] sm:$0xff] }
 0xb1d   : > { %10255 = vmatpush1.bf16.msra.mxu0 %v10254_v17  ;;  %6019 = vmatprep.mubr.f32.mxu0 %v5715_v52  ;;  %v4740_v17 = vld [vmem:[#allocation3 + $0x6c0] sm:$0xff]  ;;  %v4763_v7 = vld [vmem:[#allocation3 + $0x778] sm:$0xff] }
 0xb1e   : > { %10257 = vmatprep.subr.bf16.mxu0 %v10256_v46  ;;  %10821 = vset.pattern.permute.xlu1 %v18365_v44  ;;  %v4745_v46 = vld [vmem:[#allocation3 + $0x6e8] sm:$0xff]  ;;  %v10274_v52 = vpack.c.bf16 %v4742_v63, %v4740_v17  ;;  %v4759_v17 = vld [vmem:[#allocation3 + $0x758] sm:$0xff]  ;;  %v4855_v63 = vrot.slane %v14941_v45, %v18091_v29  ;;  %v18390_v42 = vld [vmem:[#allocation115_spill] sm:$0xff] }
 0xb1f   : > { %v10276_v5 = vpack.c.bf16 %v4747_v53, %v4745_v46  ;;  %v18371_v46 = vld [vmem:[#allocation229_spill] sm:$0xff]  ;;  %v18372_v53 = vld [vmem:[#allocation200_spill] sm:$0xff]  ;;  %v5133_v18 = vsel %vm965_vm3, %v18390_v42, %v18389_v1 }
 0xb21   : > { %10259 = vmatpush1.bf16.msra.mxu0 %v10258_v38  ;;  %v4746_v38 = vld [vmem:[#allocation3 + $0x6f0] sm:$0xff] }
 0xb22   : > { %10261 = vmatprep.subr.bf16.mxu0 %v10260_v14  ;;  %v10278_v31 = vpack.c.bf16 %v4746_v38, %v4744_v3  ;;  %v18373_v38 = vld [vmem:[#allocation27_spill] sm:$0xff] }
 0xb25   : > { %10263 = vmatpush1.bf16.msra.mxu0 %v10262_v54  ;;  %v10280_v54 = vpack.c.bf16 %v4751_v16, %v4749_v59  ;;  %v14960_v59 = vrot.slane %v14941_v45, %v18373_v38  ;;  %v4756_v16 = vld [vmem:[#allocation3 + $0x740] sm:$0xff] }
 0xb26   : > { %10265 = vmatprep.subr.bf16.mxu0 %v10264_v23  ;;  %v4748_v23 = vld [vmem:[#allocation3 + $0x700] sm:$0xff] }
 0xb27   : > { %v4764_v38 = vld [vmem:[#allocation3 + $0x780] sm:$0xff] }
 0xb29   : > { %10267 = vmatpush1.bf16.msra.mxu0 %v10266_v47  ;;  %v10282_v47 = vpack.c.bf16 %v4750_v50, %v4748_v23  ;;  %v4761_v50 = vld [vmem:[#allocation3 + $0x768] sm:$0xff] }
 0xb2a   : > { %10269 = vmatprep.subr.bf16.mxu0 %v10268_v25  ;;  %v14930_v22 = vpop.f32.mrb[44].mxu0  ;;  %v14945_v25 = vrot.slane %v14941_v45, %v18088_v43 }
 0xb2b   : > { %18366 = vst [vmem:[#allocation123_spill] sm:$0xff] %v14930_v22  ;;  %v14932_v11 = vpop.f32.mrb[45].mxu0  ;;  %v4760_v22 = vld [vmem:[#allocation3 + $0x760] sm:$0xff] }
 0xb2c   : > { %18367 = vst [vmem:[#allocation171_spill] sm:$0xff] %v14932_v11  ;;  %v10292_v11 = vpack.c.bf16 %v4763_v7, %v4761_v50 }
 0xb2d   : > { %10271 = vmatpush1.bf16.msra.mxu0 %v10270_v56  ;;  %v4910_v56 = vsel %vm835_vm2, %v18370_v62, %v18328_v21  ;;  %v18375_v62 = vld [vmem:[#allocation129_spill] sm:$0xff] }
 0xb2e   : > { %10273 = vmatprep.subr.bf16.mxu0 %v10272_v6  ;;  %v14934_v14 = vpop.f32.mrb[46].mxu0  ;;  %v4757_v6 = vld [vmem:[#allocation3 + $0x748] sm:$0xff]  ;;  %v4962_v3 = vadd.f32 %v14945_v25, %v4910_v56 }
 0xb2f   : > { %18368 = vst [vmem:[#allocation149_spill] sm:$0xff] %v14934_v14  ;;  %v14936_v60 = vpop.f32.mrb[47].mxu0  ;;  %v10288_v21 = vpack.c.bf16 %v4759_v17, %v4757_v6  ;;  %v18379_v17 = vld [vmem:[#allocation21_spill] sm:$0xff] }
 0xb30   : > { %18369 = vst [vmem:[#allocation174_spill] sm:$0xff] %v14936_v60  ;;  %v18380_v60 = vld [vmem:[#allocation91_spill] sm:$0xff] }
 0xb31   : > { %10275 = vmatpush1.bf16.msra.mxu0 %v10274_v52  ;;  %v4814_v52 = vsel %vm770_vm1, %v18372_v53, %v18371_v46  ;;  %v18376_v46 = vld [vmem:[#allocation206_spill] sm:$0xff]  ;;  %v5175_v53 = vrot.slane %v14941_v45, %v18379_v17  ;;  %v14976_v14 = vadd.f32 %v14960_v59, %v18380_v60  ;;  %v4766_v17 = vld [vmem:[#allocation3 + $0x790] sm:$0xff] }
 0xb32   : > { %10277 = vmatprep.subr.bf16.mxu0 %v10276_v5  ;;  %v10286_v5 = vpack.c.bf16 %v4754_v48, %v4752_v24  ;;  %v4866_v10 = vadd.f32 %v4855_v63, %v4814_v52  ;;  %v18377_v24 = vld [vmem:[#allocation160_spill] sm:$0xff]  ;;  %v18378_v48 = vld [vmem:[#allocation130_spill] sm:$0xff] }
 0xb33   : > { %v4909_v56 = vsel %vm835_vm2, %v18378_v48, %v18377_v24 }
 0xb34   : > { %v4978_v6 = vmax.f32 %v4866_v10, %v4962_v3  ;;  %v18384_v3 = vld [vmem:[#allocation143_spill] sm:$0xff]  ;;  %v18385_v10 = vld [vmem:[#allocation97_spill] sm:$0xff]  ;;  %v4971_v7 = vadd.f32 %v14730_v49, %v4909_v56 }
 0xb35   : > { %10279 = vmatpush1.bf16.msra.mxu0 %v10278_v31  ;;  %v4758_v31 = vld [vmem:[#allocation3 + $0x750] sm:$0xff] }
 0xb36   : > { %10281 = vmatprep.subr.bf16.mxu0 %v10280_v54  ;;  %v18374_v54 = vld [vmem:[#allocation22_spill] sm:$0xff] }
 0xb37   : > { %v5063_v23 = vrot.slane %v14941_v45, %v18374_v54  ;;  %v18393_v54 = vld [vmem:[#allocation128_spill] sm:$0xff] }
 0xb38   : > { %v5023_v1 = vsel %vm900_vm4, %v18393_v54, %v18384_v3  ;;  %v10298_v54 = vpack.c.bf16 %v4766_v17, %v4764_v38  ;;  %v4773_v38 = vld [vmem:[#allocation3 + $0x7c8] sm:$0xff] }
 0xb39   : > { %10283 = vmatpush1.bf16.msra.mxu0 %v10282_v47  ;;  %v5022_v47 = vsel %vm900_vm4, %v18376_v46, %v18375_v62  ;;  %v4762_v62 = vld [vmem:[#allocation3 + $0x770] sm:$0xff] }
 0xb3a   : > { %10285 = vmatprep.subr.bf16.mxu0 %v10284_v27  ;;  %v10290_v27 = vpack.c.bf16 %v4758_v31, %v4756_v16  ;;  %v5074_v46 = vadd.f32 %v5063_v23, %v5022_v47  ;;  %v18383_v16 = vld [vmem:[#allocation163_spill] sm:$0xff]  ;;  %v18387_v47 = vld [vmem:[#allocation208_spill] sm:$0xff]  ;;  %v10294_v49 = vpack.c.bf16 %v4762_v62, %v4760_v22  ;;  %v15015_v22 = vrot.slane %v14941_v45, %v18261_v34 }
 0xb3b   : > { %v5021_v31 = vsel %vm900_vm4, %v18384_v3, %v18383_v16  ;;  %v18388_v16 = vld [vmem:[#allocation122_spill] sm:$0xff] }
 0xb3d   : > { %10287 = vmatpush1.bf16.msra.mxu0 %v10286_v5  ;;  %v4029_v52 = vpop.f32.mrb[36].mxu1  ;;  %v4813_v5 = vsel %vm770_vm1, %v18382_v13, %v18381_v39  ;;  %v5134_v39 = vsel %vm965_vm3, %v18387_v47, %v18340_v9  ;;  %v5083_v9 = vadd.f32 %v18392_v57, %v5021_v31  ;;  %v10296_v47 = vpack.c.bf16 %v4767_v4, %v4765_v26 }
 0xb3e   : > { %10289 = vmatprep.subr.bf16.mxu0 %v10288_v21  ;;  %v4182_v24 = vmul.f32 %v18385_v10, %v4029_v52  ;;  %v4031_v60 = vpop.f32.mrb[37].mxu1  ;;  %v18386_v21 = vld [vmem:[#allocation120_spill] sm:$0xff]  ;;  %v4911_v52 = vsel %vm835_vm2, %v18388_v16, %v18378_v48  ;;  %v4875_v56 = vadd.f32 %v14722_v8, %v4813_v5  ;;  %v5090_v48 = vmax.f32 %v4978_v6, %v5074_v46  ;;  %v18394_v6 = vld [vmem:[#allocation233_spill] sm:$0xff] }
 0xb3f   : > { %v4815_v50 = vsel %vm770_vm1, %v18386_v21, %v18382_v13  ;;  %v4183_v44 = vmul.f32 %v18385_v10, %v4031_v60  ;;  %v18391_v13 = vld [vmem:[#allocation98_spill] sm:$0xff]  ;;  %v5186_v16 = vadd.f32 %v5175_v53, %v5134_v39  ;;  %v4769_v8 = vld [vmem:[#allocation3 + $0x7a8] sm:$0xff]  ;;  %v4970_v57 = vadd.f32 %v14945_v25, %v4911_v52  ;;  %v4770_v25 = vld [vmem:[#allocation3 + $0x7b0] sm:$0xff] }
 0xb40   : > { %v4194_v21 = vadd.f32 %v18391_v13, %v4182_v24  ;;  %v5195_v4 = vadd.f32 %v14740_v37, %v5133_v18  ;;  %v5135_v62 = vsel %vm965_vm3, %v18394_v6, %v18390_v42  ;;  %v5082_v5 = vadd.f32 %v5063_v23, %v5023_v1  ;;  %v4768_v24 = vld [vmem:[#allocation3 + $0x7a0] sm:$0xff]  ;;  %v18395_v37 = vld [vmem:[#allocation214_spill] sm:$0xff] }
 0xb41   : > { %10291 = vmatpush1.bf16.msra.mxu0 %v10290_v27  ;;  %v4195_v60 = vadd.f32 %v18391_v13, %v4183_v44  ;;  %v4771_v27 = vld [vmem:[#allocation3 + $0x7b8] sm:$0xff]  ;;  %v4987_v44 = vmax.f32 %v4875_v56, %v4971_v7  ;;  %v5202_v7 = vmax.f32 %v5090_v48, %v5186_v16  ;;  %v5308_v18 = vsel %vm1070_vm5, %v18395_v37, %v18350_v30  ;;  %v18399_v56 = vld [vmem:[#allocation161_spill] sm:$0xff] }
 0xb42   : > { %10293 = vmatprep.subr.bf16.mxu0 %v10292_v11  ;;  %v4874_v11 = vadd.f32 %v4855_v63, %v4815_v50  ;;  %v4202_v46 = vmax.f32 %v4194_v21, 0.0  ;;  %v10300_v31 = vpack.c.bf16 %v4771_v27, %v4769_v8  ;;  %v18396_v63 = vld [vmem:[#allocation93_spill] sm:$0xff]  ;;  %v18397_v42 = vld [vmem:[#allocation94_spill] sm:$0xff]  ;;  %v5194_v52 = vadd.f32 %v5175_v53, %v5135_v62 }
 0xb43   : > { %v4203_v26 = vmax.f32 %v4195_v60, 0.0  ;;  %v5099_v3 = vmax.f32 %v4987_v44, %v5083_v9  ;;  %v5258_v50 = vadd.f32 %v14960_v59, %v18396_v63  ;;  %v5259_v39 = vadd.f32 %v14689_v20, %v18397_v42  ;;  %v4775_v23 = vld [vmem:[#allocation3 + $0x7d8] sm:$0xff]  ;;  %v18400_v60 = vld [vmem:[#allocation133_spill] sm:$0xff]  ;;  %v5531_v59 = vpop.permute.xlu1 %5530  ;;  %v4772_v44 = vld [vmem:[#allocation3 + $0x7c0] sm:$0xff] }
 0xb44   : > { %v4986_v17 = vmax.f32 %v4874_v11, %v4970_v57  ;;  %v5463_v30 = vrot.slane %v14941_v45, %v18262_v35  ;;  %v5575_v20 = vrot.slane %v14941_v45, %v18268_v19  ;;  %v10302_v53 = vpack.c.bf16 %v4770_v25, %v4768_v24  ;;  %v18402_v1 = vld [vmem:[#allocation178_spill] sm:$0xff]  ;;  %v18403_v8 = vld [vmem:[#allocation165_spill] sm:$0xff]  ;;  %v18404_v45 = vld [vmem:[#allocation219_spill] sm:$0xff] }
 0xb45   : > { %10295 = vmatpush1.bf16.msra.mxu0 %v10294_v49  ;;  %4293 = vmatprep.subr.mxu1 %v4203_v26  ;;  %v5211_v21 = vmax.f32 %v5099_v3, %v5195_v4  ;;  %v18398_v49 = vld [vmem:[#allocation175_spill] sm:$0xff]  ;;  %v5362_v16 = vadd.f32 %v15015_v22, %v5308_v18  ;;  %v5435_v27 = vsel %vm1135_vm7, %v18403_v8, %v18402_v1  ;;  %v4774_v4 = vld [vmem:[#allocation3 + $0x7d0] sm:$0xff]  ;;  %v18407_v25 = vld [vmem:[#allocation134_spill] sm:$0xff] }
 0xb46   : > { %10297 = vmatprep.subr.bf16.mxu0 %v10296_v47  ;;  %4294 = vmatpush1.msra.mxu1 %v4202_v46  ;;  %v5323_v9 = vsel %vm1070_vm5, %v18399_v56, %v18398_v49  ;;  %v18401_v47 = vmov 0.0   ;;  %v5098_v48 = vmax.f32 %v4986_v17, %v5082_v5  ;;  %v10304_v57 = vpack.c.bf16 %v4775_v23, %v4773_v38  ;;  %v4777_v46 = vld [vmem:[#allocation3 + $0x7e8] sm:$0xff]  ;;  %v18406_v24 = vld [vmem:[#allocation183_spill] sm:$0xff]  ;;  %v4778_v38 = vld [vmem:[#allocation3 + $0x7f0] sm:$0xff] }
 0xb47   : > { %9753 = vmatmul.mubr.msk.f32.vlgmr.msra.gmra.mrb[40].mxu1 %vm1639_vm10, %v18400_v60  ;;  %v5266_v26 = vmax.f32 %v5202_v7, %v14976_v14  ;;  %v5420_v11 = vsel %vm1135_vm7, %v18404_v45, %v14742_v41  ;;  %v5309_v6 = vsel %vm1070_vm5, %v18344_v58, %v18399_v56  ;;  %v5371_v62 = vadd.f32 %v14822_v40, %v5323_v9  ;;  %v5643_v7 = vpop.permute.xlu0 %5642  ;;  %v18409_v9 = vld [vmem:[#allocation188_spill] sm:$0xff] }
 0xb48   : > { %4363 = vmatprep.mubr.f32.mxu1 %v18401_v47  ;;  %v5210_v5 = vmax.f32 %v5098_v48, %v5194_v52  ;;  %v5275_v3 = vmax.f32 %v5211_v21, %v5259_v39  ;;  %v5547_v41 = vsel %vm1200_vm6, %v5531_v59, %v18406_v24  ;;  %v5421_v58 = vsel %vm1135_vm7, %v18347_v12, %v18403_v8  ;;  %v4776_v39 = vld [vmem:[#allocation3 + $0x7e0] sm:$0xff]  ;;  %v9765_v12 = vld [vmem:[%s17263_s2 + $0xf0] ss:$0 sm:$0xff] }
 0xb49   : > { %10299 = vmatpush1.bf16.msra.mxu0 %v10298_v54  ;;  %v4779_v54 = vld [vmem:[#allocation3 + $0x7f8] sm:$0xff]  ;;  %v5483_v40 = vadd.f32 %v14828_v55, %v5435_v27  ;;  %v10306_v37 = vpack.c.bf16 %v4774_v4, %v4772_v44  ;;  %v5474_v18 = vadd.f32 %v5463_v30, %v5420_v11  ;;  %v5370_v63 = vadd.f32 %v15015_v22, %v5309_v6 }
 0xb4a   : > { %10301 = vmatprep.subr.bf16.mxu0 %v10300_v31  ;;  %v18405_v31 = vld [vmem:[#allocation226_spill] sm:$0xff]  ;;  %v10308_v42 = vpack.c.bf16 %v4779_v54, %v4777_v46  ;;  %v5387_v23 = vmax.f32 %v5275_v3, %v5371_v62  ;;  %v5533_v52 = vsel %vm1200_vm6, %v18351_v61, %v5531_v59  ;;  %v5595_v22 = vadd.f32 %v14832_v36, %v5547_v41 }
 0xb4b   : > { %v5532_v14 = vsel %vm1200_vm6, %v18405_v31, %v14834_v28  ;;  %9754 = vmatmul.mubr.msk.f32.gmra.mrb[42].mxu1 %vm1639_vm10, %v18407_v25  ;;  %v5378_v28 = vmax.f32 %v5266_v26, %v5362_v16  ;;  %v18408_v55 = vld [vmem:[#allocation82_spill] sm:$0xff]  ;;  %v5274_v21 = vmax.f32 %v5210_v5, %v5258_v50  ;;  %v5482_v56 = vadd.f32 %v5463_v30, %v5421_v58 }
 0xb4c   : > { %4511 = vmatprep.mubr.f32.mxu1 %v18401_v47  ;;  %v5644_v17 = vsel %vm17702_vm8, %v18408_v55, %v14887_v51  ;;  %v5586_v49 = vadd.f32 %v5575_v20, %v5532_v14  ;;  %v5499_v48 = vmax.f32 %v5387_v23, %v5483_v40  ;;  %v10310_v16 = vpack.c.bf16 %v4778_v38, %v4776_v39 }
 0xb4d   : > { %10303 = vmatpush1.bf16.msra.mxu0 %v10302_v53  ;;  %v5659_v53 = vsel %vm17702_vm8, %v5643_v7, %v18409_v9  ;;  %v5490_v1 = vmax.f32 %v5378_v28, %v5474_v18  ;;  %v5386_v8 = vmax.f32 %v5274_v21, %v5370_v63  ;;  %v5698_v27 = vadd.f32 %v9765_v12, %v5644_v17 }
 0xb4e   : > { %10305 = vmatprep.subr.bf16.mxu0 %v10304_v57  ;;  %v5594_v51 = vadd.f32 %v5575_v20, %v5533_v52  ;;  %v5645_v61 = vsel %vm17702_vm8, %v14794_v15, %v5643_v7  ;;  %v5707_v36 = vadd.f32 %v14909_v32, %v5659_v53  ;;  %v5611_v50 = vmax.f32 %v5499_v48, %v5595_v22 }
 0xb4f   : > { %v5602_v30 = vmax.f32 %v5490_v1, %v5586_v49  ;;  %v5498_v59 = vmax.f32 %v5386_v8, %v5482_v56  ;;  %v5706_v44 = vadd.f32 %v9765_v12, %v5645_v61  ;;  %vm6282_vm8 = vcmp.lt.s32.totalorder %v11419_v33, 119 }
 0xb50   : > { %v5723_v26 = vmax.f32 %v5611_v50, %v5707_v36 }
 0xb51   : > { %10307 = vmatpush1.bf16.msra.mxu0 %v10306_v37  ;;  %v5714_v57 = vmax.f32 %v5602_v30, %v5698_v27  ;;  %v5610_v4 = vmax.f32 %v5498_v59, %v5594_v51  ;;  %v18410_v30 = vmov 96  }
 0xb52   : > { %10309 = vmatprep.subr.bf16.mxu0 %v10308_v42 }
 0xb53   : > { %v5722_v45 = vmax.f32 %v5610_v4, %v5706_v44 }
 0xb55   : > { %10311 = vmatpush1.bf16.msra.mxu0 %v10310_v16 }
 0xb58   : > { %6020 = vmatmul.mubr.f32.vlgmr.msra.gmra.mrb[48].mxu0 %v5714_v57  ;;  %v15182_v57 = vld [vmem:[%s17264_s3] sm:$0xff] }
 0xb59   : > { %6025 = vmatprep.mubr.f32.mxu0 %v5723_v26  ;;  %v15192_v4 = vrot.slane %v15182_v57, %v18091_v29  ;;  %v15201_v26 = vrot.slane %v15182_v57, %v18088_v43 }
 0xb5c   : > { %6026 = vmatmul.mubr.f32.gmra.mrb[50].mxu0 %v5722_v45 }
 0xb5d   : > { %7528 = vmatprep.mubr.f32.mxu0 %v18401_v47 }
 0xb7d   : > { %v4171_v20 = vpop.f32.mrb[38].mxu1 }
 0xb7e   : > { %v4186_v11 = vmul.f32 %v18385_v10, %v4171_v20  ;;  %v4173_v15 = vpop.f32.mrb[39].mxu1 }
 0xb7f   : > { %v4187_v32 = vmul.f32 %v18385_v10, %v4173_v15 }
 0xb80   : > { %v4198_v6 = vadd.f32 %v18391_v13, %v4186_v11 }
 0xb81   : > { %v4199_v62 = vadd.f32 %v18391_v13, %v4187_v32 }
 0xb82   : > { %v4206_v54 = vmax.f32 %v4198_v6, 0.0 }
 0xb83   : > { %v4207_v46 = vmax.f32 %v4199_v62, 0.0 }
 0xb85   : > { %4447 = vmatprep.subr.mxu1 %v4207_v46 }
 0xb86   : > { %4448 = vmatpush1.msra.mxu1 %v4206_v54  ;;  %v6042_v58 = vpop.permute.xlu0 %6041 }
 0xb87   : > { %9757 = vmatmul.mubr.msk.f32.vlgmr.msra.gmra.mrb[44].mxu1 %vm1639_vm10, %v18400_v60  ;;  %v6037_v31 = vpop.permute.xlu1 %6036 }
 0xb88   : > { %4517 = vmatprep.mubr.f32.mxu1 %v18401_v47 }
 0xb8b   : > { %9758 = vmatmul.mubr.msk.f32.gmra.mrb[46].mxu1 %vm1639_vm10, %v18407_v25 }
 0xb8c   : > { %6130 = vmatprep.mubr.f32.mxu1 %v18401_v47 }
 0xb8e   : > { %v6050_v14 = vpop.permute.xlu1 %6049 }
 0xb92   : > { %v6054_v63 = vpop.permute.xlu1 %6053 }
 0xb93   : > { %v6139_v53 = vpop.permute.xlu0 %6138 }
 0xb99   : > { %v6145_v16 = vpop.permute.xlu1 %6144 }
 0xc1a   : > { %v15102_v5 = vpop.f32.mrb[40].mxu1 }
 0xc1b   : > { %v15104_v10 = vpop.f32.mrb[41].mxu1 }
 0xc1e   : > { %v15106_v3 = vpop.f32.mrb[42].mxu1 }
 0xc1f   : > { %v15108_v13 = vpop.f32.mrb[43].mxu1 }
 0xc2b   : > { %v15110_v24 = vpop.f32.mrb[48].mxu0 }
 0xc2c   : > { %v6044_v60 = vmul.f32 %v6037_v31, %v15110_v24  ;;  %v15113_v41 = vpop.f32.mrb[49].mxu0 }
 0xc2d   : > { %v6045_v25 = vmul.f32 %v6037_v31, %v15113_v41 }
 0xc2e   : > { %v6056_v7 = vadd.f32 %v6050_v14, %v6044_v60 }
 0xc2f   : > { %v15116_v40 = vpop.f32.mrb[50].mxu0  ;;  %v6057_v18 = vadd.f32 %v6050_v14, %v6045_v25 }
 0xc30   : > { %v6046_v37 = vmul.f32 %v6042_v58, %v15116_v40  ;;  %v15119_v28 = vpop.f32.mrb[51].mxu0  ;;  %v6060_v23 = vmax.f32 %v6056_v7, 0.0 }
 0xc31   : > { %v6047_v42 = vmul.f32 %v6042_v58, %v15119_v28  ;;  %v6061_v55 = vmax.f32 %v6057_v18, 0.0  ;;  %v18411_v58 = vld [vmem:[#allocation22_spill] sm:$0xff]  ;;  %v18412_v18 = vld [vmem:[#allocation21_spill] sm:$0xff] }
 0xc32   : > { %v6058_v39 = vadd.f32 %v6054_v63, %v6046_v37  ;;  %v15222_v7 = vrot.slane %v15182_v57, %v18411_v58 }
 0xc33   : > { %v6059_v38 = vadd.f32 %v6054_v63, %v6047_v42  ;;  %v15230_v63 = vrot.slane %v15182_v57, %v18412_v18 }
 0xc34   : > { %v6062_v12 = vmax.f32 %v6058_v39, 0.0 }
 0xc35   : > { %v6063_v17 = vmax.f32 %v6059_v38, 0.0 }
 0xc36   : > { %v10314_v52 = vpack.c.bf16 %v6062_v12, %v6060_v23 }
 0xc37   : > { %v10312_v22 = vpack.c.bf16 %v6063_v17, %v6061_v55  ;;  %v18413_v55 = vld [vmem:[#allocation27_spill] sm:$0xff] }
 0xc38   : > { %v15242_v17 = vrot.slane %v15182_v57, %v18413_v55 }
 0xc39   : > { %10313 = vmatprep.subr.bf16.mxu1 %v10312_v22 }
 0xc3a   : > { %10315 = vmatpush1.bf16.msra.mxu1 %v10314_v52 }
 0xc3d   : > { %9767 = vmatmul.mubr.msk.f32.vlgmr.msra.gmra.mrb[48].mxu1 %vm433_vm0, %v14849_v0 }
 0xc3e   : > { %6363 = vmatprep.mubr.f32.mxu1 %v18401_v47 }
 0xc5a   : > { %v15125_v21 = vpop.f32.mrb[44].mxu1 }
 0xc5b   : > { %v15127_v49 = vpop.f32.mrb[45].mxu1 }
 0xc5e   : > { %v15129_v56 = vpop.f32.mrb[46].mxu1 }
 0xc5f   : > { %v15131_v9 = vpop.f32.mrb[47].mxu1 }
 0xd10   : > { %v6132_v48 = vpop.f32.mrb[48].mxu1 }
 0xd11   : > { %v6141_v1 = vmul.f32 %v6139_v53, %v6132_v48  ;;  %v6134_v8 = vpop.f32.mrb[49].mxu1  ;;  %v15254_v48 = vrot.slane %v15182_v57, %v18261_v34 }
 0xd12   : > { %v6142_v27 = vmul.f32 %v6139_v53, %v6134_v8 }
 0xd13   : > { %v6147_v51 = vadd.f32 %v6145_v16, %v6141_v1 }
 0xd14   : > { %v6148_v61 = vadd.f32 %v6145_v16, %v6142_v27 }
 0xd15   : > { %v15133_v36 = vmax.f32 %v6147_v51, 0.0 }
 0xd16   : > { %v15135_v50 = vmax.f32 %v6148_v61, 0.0 }
 0xd17   : > { %6151 = vrot.lane.b32.xlu1 %v15133_v36, %s11023_s7 }
 0xd18   : > { %6153 = vrot.lane.b32.xlu0 %v15135_v50, %s11023_s7 }
 0xd1b   : > { %6168 = vrot.lane.b32.xlu1 %v15133_v36, %s11024_s16 }
 0xd1c   : > { %6170 = vrot.lane.b32.xlu0 %v15135_v50, %s11024_s16 }
 0xd1f   : > { %6185 = vrot.lane.b32.xlu1 %v15133_v36, %s11025_s21 }
 0xd20   : > { %6187 = vrot.lane.b32.xlu0 %v15135_v50, %s11025_s21 }
 0xd23   : > { %6202 = vrot.lane.b32.xlu1 %v15133_v36, %s11017_s8 }
 0xd24   : > { %6204 = vrot.lane.b32.xlu0 %v15135_v50, %s11017_s8 }
 0xd27   : > { %6228 = vrot.lane.b32.xlu1 %v15133_v36, %s11013_s19 }
 0xd28   : > { %6230 = vrot.lane.b32.xlu0 %v15135_v50, %s11013_s19 }
 0xd2b   : > { %6244 = vrot.lane.b32.xlu1 %v15133_v36, %s11026_s17 }
 0xd2c   : > { %6246 = vrot.lane.b32.xlu0 %v15135_v50, %s11026_s17 }
 0xd2f   : > { %6261 = vrot.lane.b32.xlu1 %v15133_v36, %s11027_s14 }
 0xd30   : > { %6263 = vrot.lane.b32.xlu0 %v15135_v50, %s11027_s14 }
 0xd33   : > { %6278 = vrot.lane.b32.xlu1 %v15133_v36, %s11028_s15 }
 0xd34   : > { %6280 = vrot.lane.b32.xlu0 %v15135_v50, %s11028_s15 }
 0xd37   : > { %6295 = vrot.lane.b32.xlu1 %v14849_v0, %s11012_s18 }
 0xd38   : > { %6371 = vperm.xlu0 %10820, %v14849_v0  }
 0xd3b   : > { %6377 = vperm.xlu1 %10821, %v14849_v0  }
 0xd3c   : > { %6386 = vrot.lane.b32.xlu0 %v14854_v2, %s17703_s13  ;;  %v15188_v2 = vld [vmem:[%s17264_s3 + $0x8] sm:$0xff] }
 0xd3d   : > { %10823 = vset.pattern.permute.xlu0 %v18410_v30  ;;  %v15205_v45 = vrot.slane %v15188_v2, %v18088_v43  ;;  %v15226_v37 = vrot.slane %v15188_v2, %v18411_v58  ;;  %v15234_v42 = vrot.slane %v15188_v2, %v18412_v18  ;;  %v15246_v52 = vrot.slane %v15188_v2, %v18413_v55 }
 0xd3e   : > { %v15258_v16 = vrot.slane %v15188_v2, %v18261_v34  ;;  %v6226_v34 = vmul.f32 %v15242_v17, %v15133_v36  ;;  %v15281_v36 = vrot.slane %v15188_v2, %v18262_v35 }
 0xd3f   : > { %6384 = vrot.lane.b32.xlu1 %v14849_v0, %s17703_s13  ;;  %v15196_v0 = vrot.slane %v15188_v2, %v18091_v29 }
 0xd40   : > { %10822 = vset.pattern.permute.xlu1 %v18410_v30 }
 0xd89   : > { %v6152_v59 = vpop.permute.xlu1 %6151 }
 0xd8a   : > { %v6154_v44 = vpop.permute.xlu0 %6153 }
 0xd8b   : > { %v6156_v20 = vsel %vm6155_vm11, %v6152_v59, %v6154_v44  ;;  %v6157_v11 = vsel %vm6155_vm11, %v6154_v44, %v6152_v59 }
 0xd8c   : > { %v6166_v62 = vmul.f32 %v15192_v4, %v6157_v11  ;;  %v6167_v46 = vmul.f32 %v15196_v0, %v6156_v20 }
 0xd8d   : > { %v6169_v15 = vpop.permute.xlu1 %6168 }
 0xd8e   : > { %v6171_v32 = vpop.permute.xlu0 %6170 }
 0xd8f   : > { %v6173_v29 = vsel %vm6172_vm12, %v6169_v15, %v6171_v32  ;;  %v6174_v6 = vsel %vm6172_vm12, %v6171_v32, %v6169_v15 }
 0xd90   : > { %v6183_v43 = vmul.f32 %v15201_v26, %v6174_v6  ;;  %v6184_v54 = vmul.f32 %v15205_v45, %v6173_v29  ;;  %v6227_v6 = vmul.f32 %v15246_v52, %v15135_v50  ;;  %v15286_v50 = vrot.slane %v15182_v57, %v18268_v19 }
 0xd91   : > { %v6186_v31 = vpop.permute.xlu1 %6185 }
 0xd92   : > { %v10318_v14 = vpack.c.bf16 %v6183_v43, %v6166_v62  ;;  %v6188_v60 = vpop.permute.xlu0 %6187  ;;  %v10316_v25 = vpack.c.bf16 %v6184_v54, %v6167_v46 }
 0xd93   : > { %v6190_v39 = vsel %vm6189_vm13, %v6186_v31, %v6188_v60  ;;  %v6191_v38 = vsel %vm6189_vm13, %v6188_v60, %v6186_v31  ;;  %v15277_v31 = vrot.slane %v15182_v57, %v18262_v35 }
 0xd94   : > { %10317 = vmatprep.subr.bf16.mxu1 %v10316_v25  ;;  %v6200_v1 = vmul.f32 %v15222_v7, %v6191_v38  ;;  %v6201_v8 = vmul.f32 %v15226_v37, %v6190_v39 }
 0xd95   : > { %v6203_v23 = vpop.permute.xlu1 %6202  ;;  %10319 = vmatpush1.bf16.msra.mxu1 %v10318_v14  ;;  %v15290_v14 = vrot.slane %v15188_v2, %v18268_v19 }
 0xd96   : > { %v6205_v12 = vpop.permute.xlu0 %6204 }
 0xd97   : > { %v6206_v22 = vsel %vm965_vm3, %v6203_v23, %v6205_v12  ;;  %v6207_v53 = vsel %vm965_vm3, %v6205_v12, %v6203_v23  ;;  %v15308_v12 = vld [vmem:[%s17264_s3 + $0x18] ss:$0 sm:$0xff] }
 0xd98   : > { %v6216_v27 = vmul.f32 %v15230_v63, %v6207_v53  ;;  %v6217_v51 = vmul.f32 %v15234_v42, %v6206_v22 }
 0xd99   : > { %v6229_v61 = vpop.permute.xlu1 %6228 }
 0xd9a   : > { %v10322_v59 = vpack.c.bf16 %v6216_v27, %v6200_v1  ;;  %v6231_v44 = vpop.permute.xlu0 %6230  ;;  %v10320_v20 = vpack.c.bf16 %v6217_v51, %v6201_v8  ;;  %v15315_v8 = vld [vmem:[%s17264_s3 + $0x10] ss:$0 sm:$0xff] }
 0xd9b   : > { %v6232_v11 = vsel %vm1070_vm5, %v6229_v61, %v6231_v44  ;;  %v6233_v15 = vsel %vm1070_vm5, %v6231_v44, %v6229_v61  ;;  %v15326_v44 = vld [vmem:[%s17262_s1 + $0x20] sm:$0xff] }
 0xd9c   : > { %v6242_v32 = vmul.f32 %v15254_v48, %v6232_v11  ;;  %v6243_v29 = vmul.f32 %v15258_v16, %v6233_v15  ;;  %10321 = vmatprep.subr.bf16.mxu1 %v10320_v20  ;;  %v15331_v20 = vld [vmem:[%s17262_s1 + $0x58] sm:$0xff]  ;;  %6473 = vperm.xlu1 %10822, %v15326_v44   ;;  %v18414_v11 = vmov 97   ;;  %v18415_v15 = vmov 98  }
 0xd9d   : > { %v6245_v62 = vpop.permute.xlu1 %6244  ;;  %10323 = vmatpush1.bf16.msra.mxu1 %v10322_v59  ;;  %6478 = vperm.xlu0 %10823, %v15331_v20  }
 0xd9e   : > { %v10326_v46 = vpack.c.bf16 %v6242_v32, %v6226_v34  ;;  %v6247_v43 = vpop.permute.xlu0 %6246  ;;  %v10324_v54 = vpack.c.bf16 %v6243_v29, %v6227_v6  ;;  %v18416_v34 = vmov 100   ;;  %v18417_v32 = vmov 99  }
 0xd9f   : > { %v6249_v60 = vsel %vm6248_vm14, %v6245_v62, %v6247_v43  ;;  %v6250_v25 = vsel %vm6248_vm14, %v6247_v43, %v6245_v62  ;;  %v18418_v29 = vmov 101  }
 0xda0   : > { %10325 = vmatprep.subr.bf16.mxu1 %v10324_v54  ;;  %v6259_v19 = vmul.f32 %v15277_v31, %v6249_v60  ;;  %v6260_v2 = vmul.f32 %v15281_v36, %v6250_v25  ;;  %10824 = vset.pattern.permute.xlu1 %v18414_v11 }
 0xda1   : > { %v6262_v58 = vpop.permute.xlu1 %6261  ;;  %10327 = vmatpush1.bf16.msra.mxu1 %v10326_v46  ;;  %10825 = vset.pattern.permute.xlu0 %v18415_v15 }
 0xda2   : > { %v6264_v35 = vpop.permute.xlu0 %6263  ;;  %6486 = vperm.xlu1 %10824, %v15326_v44   ;;  %6575 = vperm.xlu0 %10825, %v15326_v44  }
 0xda3   : > { %v6266_v18 = vsel %vm6265_vm15, %v6262_v58, %v6264_v35  ;;  %v6267_v57 = vsel %vm6265_vm15, %v6264_v35, %v6262_v58 }
 0xda4   : > { %v6276_v39 = vmul.f32 %v15286_v50, %v6266_v18  ;;  %v6277_v38 = vmul.f32 %v15290_v14, %v6267_v57 }
 0xda5   : > { %v6279_v23 = vpop.permute.xlu1 %6278 }
 0xda6   : > { %v10330_v55 = vpack.c.bf16 %v6276_v39, %v6259_v19  ;;  %v6281_v22 = vpop.permute.xlu0 %6280  ;;  %v10328_v53 = vpack.c.bf16 %v6277_v38, %v6260_v2  ;;  %6490 = vperm.xlu1 %10824, %v15331_v20   ;;  %10827 = vset.pattern.permute.xlu0 %v18416_v34 }
 0xda7   : > { %v6284_v1 = vsel %vm6282_vm8, %v6281_v22, %v6279_v23  ;;  %v6283_v27 = vsel %vm6282_vm8, %v6279_v23, %v6281_v22 }
 0xda8   : > { %10329 = vmatprep.subr.bf16.mxu1 %v10328_v53  ;;  %v6294_v51 = vmul.f32 %v15308_v12, %v6284_v1  ;;  %v6293_v61 = vmul.f32 %v15315_v8, %v6283_v27 }
 0xda9   : > { %10331 = vmatpush1.bf16.msra.mxu1 %v10330_v55  ;;  %v6296_v59 = vpop.permute.xlu1 %6295 }
 0xdaa   : > { %6315 = vmatprep.subr.mxu1 %v6294_v51  ;;  %10826 = vset.pattern.permute.xlu1 %v18417_v32 }
 0xdab   : > { %6581 = vperm.xlu1 %10826, %v15326_v44  }
 0xdad   : > { %6316 = vmatpush1.msra.mxu1 %v6293_v61 }
 0xdae   : > { %9770 = vmatmul.mubr.msk.f32.vlgmr.msra.gmra.mrb[50].mxu1 %vm1316_vm9, %v6296_v59 }
 0xdaf   : > { %6456 = vmatprep.mubr.f32.mxu1 %v18401_v47  ;;  %10828 = vset.pattern.permute.xlu1 %v18418_v29 }
 0xdb7   : > { %v6372_v6 = vpop.permute.xlu0 %6371 }
 0xdba   : > { %v6378_v46 = vpop.permute.xlu1 %6377 }
 0xdbb   : > { %v6387_v19 = vpop.permute.xlu0 %6386 }
 0xdbe   : > { %v6385_v57 = vpop.permute.xlu1 %6384 }
 0xe1b   : > { %v6474_v2 = vpop.permute.xlu1 %6473 }
 0xe1c   : > { %v6479_v27 = vpop.permute.xlu0 %6478 }
 0xe21   : > { %v6487_v55 = vpop.permute.xlu1 %6486 }
 0xe81   : > { %v6365_v62 = vpop.f32.mrb[50].mxu1 }
 0xe82   : > { %v6374_v43 = vmul.f32 %v6372_v6, %v6365_v62  ;;  %v6367_v54 = vpop.f32.mrb[51].mxu1 }
 0xe83   : > { %v6375_v60 = vmul.f32 %v6372_v6, %v6367_v54 }
 0xe84   : > { %v6380_v25 = vadd.f32 %v6378_v46, %v6374_v43 }
 0xe85   : > { %v6381_v58 = vadd.f32 %v6378_v46, %v6375_v60  ;;  %v6491_v46 = vpop.permute.xlu1 %6490 }
 0xe86   : > { %v6382_v18 = vmax.f32 %v6380_v25, 0.0 }
 0xe87   : > { %v6383_v35 = vmax.f32 %v6381_v58, 0.0 }
 0xe89   : > { %6392 = vmatprep.subr.mxu1 %v6383_v35 }
 0xe8a   : > { %6393 = vmatpush1.msra.mxu1 %v6382_v18 }
 0xe8b   : > { %9771 = vmatmul.mubr.msk.f32.vlgmr.msra.gmra.mrb[52].mxu1 %vm1639_vm10, %v6385_v57 }
 0xe8c   : > { %6462 = vmatprep.mubr.f32.mxu1 %v18401_v47 }
 0xe8f   : > { %9772 = vmatmul.mubr.msk.f32.gmra.mrb[54].mxu1 %vm1639_vm10, %v6387_v19 }
 0xe90   : > { %6567 = vmatprep.mubr.f32.mxu1 %v18401_v47 }
 0xf5e   : > { %v6458_v39 = vpop.f32.mrb[52].mxu1 }
 0xf5f   : > { %v15349_v38 = vadd.f32 %v6458_v39, %v15110_v24  ;;  %v6460_v23 = vpop.f32.mrb[53].mxu1 }
 0xf60   : > { %v15352_v22 = vadd.f32 %v6460_v23, %v15113_v41 }
 0xf61   : > { %v6481_v51 = vmul.f32 %v6474_v2, %v15349_v38 }
 0xf62   : > { %v6482_v53 = vmul.f32 %v6474_v2, %v15352_v22  ;;  %v6464_v1 = vpop.f32.mrb[54].mxu1  ;;  %v6582_v2 = vpop.permute.xlu1 %6581 }
 0xf63   : > { %v15357_v61 = vadd.f32 %v6464_v1, %v15116_v40  ;;  %v6466_v59 = vpop.f32.mrb[55].mxu1  ;;  %v6493_v43 = vadd.f32 %v6487_v55, %v6481_v51 }
 0xf64   : > { %v15360_v6 = vadd.f32 %v6466_v59, %v15119_v28  ;;  %v6494_v62 = vadd.f32 %v6487_v55, %v6482_v53  ;;  %v6576_v28 = vpop.permute.xlu0 %6575 }
 0xf65   : > { %v6483_v24 = vmul.f32 %v6479_v27, %v15357_v61  ;;  %v6497_v18 = vmax.f32 %v6493_v43, 0.0 }
 0xf66   : > { %v6484_v41 = vmul.f32 %v6479_v27, %v15360_v6  ;;  %v6498_v58 = vmax.f32 %v6494_v62, 0.0 }
 0xf67   : > { %v6495_v54 = vadd.f32 %v6491_v46, %v6483_v24 }
 0xf68   : > { %v6496_v60 = vadd.f32 %v6491_v46, %v6484_v41 }
 0xf69   : > { %v6499_v25 = vmax.f32 %v6495_v54, 0.0 }
 0xf6a   : > { %v6500_v35 = vmax.f32 %v6496_v60, 0.0 }
 0xf6b   : > { %v10334_v40 = vpack.c.bf16 %v6499_v25, %v6497_v18 }
 0xf6c   : > { %v10332_v57 = vpack.c.bf16 %v6500_v35, %v6498_v58 }
 0xf6e   : > { %10333 = vmatprep.subr.bf16.mxu1 %v10332_v57 }
 0xf6f   : > { %10335 = vmatpush1.bf16.msra.mxu1 %v10334_v40 }
 0xf72   : > { %9773 = vmatmul.mubr.msk.f32.vlgmr.msra.gmra.mrb[56].mxu1 %vm433_vm0, %v15326_v44 }
 0xf73   : > { %6722 = vmatprep.mubr.f32.mxu1 %v18401_v47 }
0x1045   : > { %v6569_v19 = vpop.f32.mrb[56].mxu1 }
0x1046   : > { %v6578_v39 = vmul.f32 %v6576_v28, %v6569_v19  ;;  %v6571_v23 = vpop.f32.mrb[57].mxu1 }
0x1047   : > { %v6579_v55 = vmul.f32 %v6576_v28, %v6571_v23 }
0x1048   : > { %v6584_v53 = vadd.f32 %v6582_v2, %v6578_v39 }
0x1049   : > { %v6585_v1 = vadd.f32 %v6582_v2, %v6579_v55 }
0x104a   : > { %v6586_v27 = vmax.f32 %v6584_v53, 0.0 }
0x104b   : > { %v6587_v51 = vmax.f32 %v6585_v1, 0.0 }
0x104c   : > { %6588 = vrot.lane.b32.xlu1 %v6586_v27, %s11023_s7 }
0x104d   : > { %6590 = vrot.lane.b32.xlu0 %v6587_v51, %s11023_s7 }
0x1050   : > { %6596 = vrot.lane.b32.xlu1 %v6586_v27, %s11024_s16 }
0x1051   : > { %6598 = vrot.lane.b32.xlu0 %v6587_v51, %s11024_s16 }
0x1054   : > { %6604 = vrot.lane.b32.xlu1 %v6586_v27, %s11025_s21 }
0x1055   : > { %6606 = vrot.lane.b32.xlu0 %v6587_v51, %s11025_s21 }
0x1058   : > { %6612 = vrot.lane.b32.xlu1 %v6586_v27, %s11017_s8 }
0x1059   : > { %6614 = vrot.lane.b32.xlu0 %v6587_v51, %s11017_s8 }
0x105c   : > { %6622 = vrot.lane.b32.xlu1 %v6586_v27, %s11013_s19 }
0x105d   : > { %6624 = vrot.lane.b32.xlu0 %v6587_v51, %s11013_s19 }
0x1060   : > { %6630 = vrot.lane.b32.xlu1 %v6586_v27, %s11026_s17 }
0x1061   : > { %6632 = vrot.lane.b32.xlu0 %v6587_v51, %s11026_s17 }
0x1064   : > { %6638 = vrot.lane.b32.xlu1 %v6586_v27, %s11027_s14 }
0x1065   : > { %6640 = vrot.lane.b32.xlu0 %v6587_v51, %s11027_s14 }
0x1068   : > { %6646 = vrot.lane.b32.xlu1 %v6586_v27, %s11028_s15 }
0x1069   : > { %6648 = vrot.lane.b32.xlu0 %v6587_v51, %s11028_s15 }
0x106c   : > { %6654 = vrot.lane.b32.xlu1 %v15326_v44, %s11012_s18 }
0x106d   : > { %6730 = vperm.xlu0 %10827, %v15326_v44  }
0x1070   : > { %6736 = vperm.xlu1 %10828, %v15326_v44  }
0x1071   : > { %6745 = vrot.lane.b32.xlu0 %v15331_v20, %s17703_s13 }
0x1074   : > { %6743 = vrot.lane.b32.xlu1 %v15326_v44, %s17703_s13  ;;  %s18457_s13 = smov 15  }
0x10be   : > { %v6589_v59 = vpop.permute.xlu1 %6588 }
0x10bf   : > { %v6591_v24 = vpop.permute.xlu0 %6590 }
0x10c0   : > { %v6592_v62 = vsel %vm6155_vm11, %v6589_v59, %v6591_v24  ;;  %v6593_v46 = vsel %vm6155_vm11, %v6591_v24, %v6589_v59 }
0x10c1   : > { %v6594_v20 = vmul.f32 %v6593_v46, %v15192_v4  ;;  %v6595_v44 = vmul.f32 %v6592_v62, %v15196_v0 }
0x10c2   : > { %v6597_v41 = vpop.permute.xlu1 %6596 }
0x10c3   : > { %v6599_v43 = vpop.permute.xlu0 %6598 }
0x10c4   : > { %v6600_v54 = vsel %vm6172_vm12, %v6597_v41, %v6599_v43  ;;  %v6601_v60 = vsel %vm6172_vm12, %v6599_v43, %v6597_v41  ;;  %v6620_v41 = vmul.f32 %v6586_v27, %v15242_v17 }
0x10c5   : > { %v6602_v25 = vmul.f32 %v6601_v60, %v15201_v26  ;;  %v6603_v58 = vmul.f32 %v6600_v54, %v15205_v45 }
0x10c6   : > { %v6605_v35 = vpop.permute.xlu1 %6604 }
0x10c7   : > { %v10338_v18 = vpack.c.bf16 %v6602_v25, %v6594_v20  ;;  %v6607_v57 = vpop.permute.xlu0 %6606  ;;  %v10336_v40 = vpack.c.bf16 %v6603_v58, %v6595_v44 }
0x10c8   : > { %v6608_v28 = vsel %vm6189_vm13, %v6605_v35, %v6607_v57  ;;  %v6609_v19 = vsel %vm6189_vm13, %v6607_v57, %v6605_v35 }
0x10c9   : > { %10337 = vmatprep.subr.bf16.mxu1 %v10336_v40  ;;  %v6610_v45 = vmul.f32 %v6609_v19, %v15222_v7  ;;  %v6611_v39 = vmul.f32 %v6608_v28, %v15226_v37 }
0x10ca   : > { %v6613_v2 = vpop.permute.xlu1 %6612  ;;  %10339 = vmatpush1.bf16.msra.mxu1 %v10338_v18 }
0x10cb   : > { %v6615_v4 = vpop.permute.xlu0 %6614 }
0x10cc   : > { %v6616_v0 = vsel %vm965_vm3, %v6613_v2, %v6615_v4  ;;  %v6617_v26 = vsel %vm965_vm3, %v6615_v4, %v6613_v2 }
0x10cd   : > { %v6618_v23 = vmul.f32 %v6617_v26, %v15230_v63  ;;  %v6619_v55 = vmul.f32 %v6616_v0, %v15234_v42  ;;  %v6621_v63 = vmul.f32 %v6587_v51, %v15246_v52 }
0x10ce   : > { %v6623_v53 = vpop.permute.xlu1 %6622 }
0x10cf   : > { %v10342_v1 = vpack.c.bf16 %v6618_v23, %v6610_v45  ;;  %v6625_v59 = vpop.permute.xlu0 %6624  ;;  %v10340_v24 = vpack.c.bf16 %v6619_v55, %v6611_v39  ;;  %v6828_v55 = vld [vmem:[%s17266_s5] sm:$0xff] }
0x10d0   : > { %v6626_v62 = vsel %vm1070_vm5, %v6623_v53, %v6625_v59  ;;  %v6627_v46 = vsel %vm1070_vm5, %v6625_v59, %v6623_v53  ;;  %v6836_v53 = vld [vmem:[%s17266_s5 + $0x40] sm:$0xff]  ;;  %v6853_v59 = vld [vmem:[%s17266_s5 + $0xc8] sm:$0xff] }
0x10d1   : > { %v6628_v7 = vmul.f32 %v6626_v62, %v15254_v48  ;;  %v6629_v37 = vmul.f32 %v6627_v46, %v15258_v16  ;;  %10341 = vmatprep.subr.bf16.mxu1 %v10340_v24 }
0x10d2   : > { %v6631_v42 = vpop.permute.xlu1 %6630  ;;  %10343 = vmatpush1.bf16.msra.mxu1 %v10342_v1  ;;  %v6845_v1 = vld [vmem:[%s17266_s5 + $0x88] sm:$0xff] }
0x10d3   : > { %v10346_v43 = vpack.c.bf16 %v6628_v7, %v6620_v41  ;;  %v6633_v54 = vpop.permute.xlu0 %6632  ;;  %v10344_v60 = vpack.c.bf16 %v6629_v37, %v6621_v63  ;;  %v10354_v7 = vpack.c.bf16 %v6836_v53, %v6828_v55  ;;  %v10356_v37 = vpack.c.bf16 %v6853_v59, %v6845_v1  ;;  %v6844_v63 = vld [vmem:[%s17266_s5 + $0x80] sm:$0xff]  ;;  %v6949_v55 = vld [vmem:[%s17266_s5 + $0x3c8] sm:$0xff] }
0x10d4   : > { %v6634_v20 = vsel %vm6248_vm14, %v6631_v42, %v6633_v54  ;;  %v6635_v44 = vsel %vm6248_vm14, %v6633_v54, %v6631_v42  ;;  %v6852_v42 = vld [vmem:[%s17266_s5 + $0xc0] sm:$0xff]  ;;  %v6869_v54 = vld [vmem:[%s17266_s5 + $0x148] sm:$0xff] }
0x10d5   : > { %10345 = vmatprep.subr.bf16.mxu1 %v10344_v60  ;;  %v6636_v27 = vmul.f32 %v6634_v20, %v15277_v31  ;;  %v6637_v51 = vmul.f32 %v6635_v44, %v15281_v36  ;;  %v10358_v20 = vpack.c.bf16 %v6852_v42, %v6844_v63  ;;  %v6940_v59 = vld [vmem:[%s17266_s5 + $0x380] sm:$0xff]  ;;  %v6973_v42 = vld [vmem:[%s17266_s5 + $0x488] sm:$0xff] }
0x10d6   : > { %v6639_v17 = vpop.permute.xlu1 %6638  ;;  %10347 = vmatpush1.bf16.msra.mxu1 %v10346_v43  ;;  %v6861_v43 = vld [vmem:[%s17266_s5 + $0x108] sm:$0xff]  ;;  %v6964_v63 = vld [vmem:[%s17266_s5 + $0x440] sm:$0xff] }
0x10d7   : > { %v6641_v48 = vpop.permute.xlu0 %6640  ;;  %v10360_v44 = vpack.c.bf16 %v6869_v54, %v6861_v43  ;;  %v6981_v43 = vld [vmem:[%s17266_s5 + $0x4c8] sm:$0xff] }
0x10d8   : > { %v6642_v16 = vsel %vm6265_vm15, %v6639_v17, %v6641_v48  ;;  %v6643_v52 = vsel %vm6265_vm15, %v6641_v48, %v6639_v17  ;;  %v6860_v17 = vld [vmem:[%s17266_s5 + $0x100] sm:$0xff] }
0x10d9   : > { %v6644_v25 = vmul.f32 %v6642_v16, %v15286_v50  ;;  %v6645_v58 = vmul.f32 %v6643_v52, %v15290_v14  ;;  %v6868_v48 = vld [vmem:[%s17266_s5 + $0x140] sm:$0xff]  ;;  %v6877_v16 = vld [vmem:[%s17266_s5 + $0x188] sm:$0xff] }
0x10da   : > { %v6647_v35 = vpop.permute.xlu1 %6646  ;;  %v6885_v52 = vld [vmem:[%s17266_s5 + $0x1c8] sm:$0xff] }
0x10db   : > { %v10350_v18 = vpack.c.bf16 %v6644_v25, %v6636_v27  ;;  %v6649_v57 = vpop.permute.xlu0 %6648  ;;  %v10348_v40 = vpack.c.bf16 %v6645_v58, %v6637_v51  ;;  %v10362_v27 = vpack.c.bf16 %v6868_v48, %v6860_v17  ;;  %v10364_v51 = vpack.c.bf16 %v6885_v52, %v6877_v16  ;;  %v6876_v25 = vld [vmem:[%s17266_s5 + $0x180] sm:$0xff]  ;;  %v6989_v17 = vld [vmem:[%s17266_s5 + $0x508] sm:$0xff] }
0x10dc   : > { %v6651_v28 = vsel %vm6282_vm8, %v6649_v57, %v6647_v35  ;;  %v6650_v19 = vsel %vm6282_vm8, %v6647_v35, %v6649_v57  ;;  %v6884_v58 = vld [vmem:[%s17266_s5 + $0x1c0] sm:$0xff]  ;;  %v6893_v35 = vld [vmem:[%s17266_s5 + $0x208] sm:$0xff] }
0x10dd   : > { %v6653_v2 = vmul.f32 %v15308_v12, %v6651_v28  ;;  %10349 = vmatprep.subr.bf16.mxu1 %v10348_v40  ;;  %v6652_v31 = vmul.f32 %v15315_v8, %v6650_v19  ;;  %v6829_v12 = vld [vmem:[%s17266_s5 + $0x8] sm:$0xff]  ;;  %v10366_v57 = vpack.c.bf16 %v6884_v58, %v6876_v25  ;;  %v6892_v28 = vld [vmem:[%s17266_s5 + $0x200] sm:$0xff] }
0x10de   : > { %10351 = vmatpush1.bf16.msra.mxu1 %v10350_v18  ;;  %v6655_v36 = vpop.permute.xlu1 %6654  ;;  %v6837_v8 = vld [vmem:[%s17266_s5 + $0x48] sm:$0xff]  ;;  %v6900_v19 = vld [vmem:[%s17266_s5 + $0x240] sm:$0xff] }
0x10df   : > { %6674 = vmatprep.subr.mxu1 %v6653_v2  ;;  %v10352_v62 = vpack.c.bf16 %v6837_v8, %v6829_v12  ;;  %v6901_v18 = vld [vmem:[%s17266_s5 + $0x248] sm:$0xff]  ;;  %v6924_v12 = vld [vmem:[%s17266_s5 + $0x300] sm:$0xff] }
0x10e0   : > { %v10368_v40 = vpack.c.bf16 %v6901_v18, %v6893_v35  ;;  %v6909_v2 = vld [vmem:[%s17266_s5 + $0x288] sm:$0xff]  ;;  %v6932_v8 = vld [vmem:[%s17266_s5 + $0x340] sm:$0xff] }
0x10e1   : > { %v10378_v53 = vpack.c.bf16 %v6932_v8, %v6924_v12  ;;  %v6997_v48 = vld [vmem:[%s17266_s5 + $0x548] sm:$0xff] }
0x10e2   : > { %6675 = vmatpush1.msra.mxu1 %v6652_v31  ;;  %v6917_v31 = vld [vmem:[%s17266_s5 + $0x2c8] sm:$0xff]  ;;  %v10392_v52 = vpack.c.bf16 %v6997_v48, %v6989_v17  ;;  %v6830_v17 = vld [vmem:[%s17266_s5 + $0x10] sm:$0xff] }
0x10e3   : > { %9774 = vmatmul.mubr.msk.f32.vlgmr.msra.gmra.mrb[58].mxu1 %vm1316_vm9, %v6655_v36  ;;  %v10370_v36 = vpack.c.bf16 %v6900_v19, %v6892_v28  ;;  %v7005_v25 = vld [vmem:[%s17266_s5 + $0x588] sm:$0xff]  ;;  %v6838_v48 = vld [vmem:[%s17266_s5 + $0x50] sm:$0xff] }
0x10e4   : > { %6815 = vmatprep.mubr.f32.mxu1 %v18401_v47  ;;  %v7013_v58 = vld [vmem:[%s17266_s5 + $0x5c8] sm:$0xff] }
0x10e5   : > { %v10396_v18 = vpack.c.bf16 %v7013_v58, %v7005_v25  ;;  %v7021_v28 = vld [vmem:[%s17266_s5 + $0x608] sm:$0xff]  ;;  %v10418_v58 = vpack.c.bf16 %v6838_v48, %v6830_v17  ;;  %v6943_v17 = vld [vmem:[%s17266_s5 + $0x398] sm:$0xff] }
0x10e6   : > { %v7029_v19 = vld [vmem:[%s17266_s5 + $0x648] sm:$0xff]  ;;  %v6951_v48 = vld [vmem:[%s17266_s5 + $0x3d8] sm:$0xff] }
0x10e7   : > { %v7053_v12 = vld [vmem:[%s17266_s5 + $0x708] sm:$0xff] }
0x10e8   : > { %v7061_v8 = vld [vmem:[%s17266_s5 + $0x748] sm:$0xff] }
0x10ec   : > { %v6731_v50 = vpop.permute.xlu0 %6730 }
0x10ef   : > { %v6737_v4 = vpop.permute.xlu1 %6736 }
0x10f0   : > { %v6746_v60 = vpop.permute.xlu0 %6745 }
0x10f3   : > { %v6744_v41 = vpop.permute.xlu1 %6743 }
0x11b6   : > { %v6724_v14 = vpop.f32.mrb[58].mxu1 }
0x11b7   : > { %v6733_v0 = vmul.f32 %v6731_v50, %v6724_v14  ;;  %v6726_v26 = vpop.f32.mrb[59].mxu1  ;;  %v6908_v14 = vld [vmem:[%s17266_s5 + $0x280] sm:$0xff] }
0x11b8   : > { %v6734_v45 = vmul.f32 %v6731_v50, %v6726_v26  ;;  %v10372_v50 = vpack.c.bf16 %v6917_v31, %v6909_v2  ;;  %v6933_v26 = vld [vmem:[%s17266_s5 + $0x348] sm:$0xff]  ;;  %v10400_v31 = vpack.c.bf16 %v7029_v19, %v7021_v28 }
0x11b9   : > { %v6739_v39 = vadd.f32 %v6737_v4, %v6733_v0  ;;  %v6925_v0 = vld [vmem:[%s17266_s5 + $0x308] sm:$0xff] }
0x11ba   : > { %v6740_v23 = vadd.f32 %v6737_v4, %v6734_v45  ;;  %v6916_v4 = vld [vmem:[%s17266_s5 + $0x2c0] sm:$0xff] }
0x11bb   : > { %v6741_v46 = vmax.f32 %v6739_v39, 0.0  ;;  %v10374_v45 = vpack.c.bf16 %v6916_v4, %v6908_v14  ;;  %v10376_v39 = vpack.c.bf16 %v6933_v26, %v6925_v0  ;;  %v7037_v14 = vld [vmem:[%s17266_s5 + $0x688] sm:$0xff] }
0x11bc   : > { %v6742_v24 = vmax.f32 %v6740_v23, 0.0  ;;  %v6941_v23 = vld [vmem:[%s17266_s5 + $0x388] sm:$0xff] }
0x11bd   : > { %v10380_v1 = vpack.c.bf16 %v6949_v55, %v6941_v23  ;;  %v7045_v4 = vld [vmem:[%s17266_s5 + $0x6c8] sm:$0xff]  ;;  %v10408_v55 = vpack.c.bf16 %v7061_v8, %v7053_v12  ;;  %v6895_v12 = vld [vmem:[%s17266_s5 + $0x218] sm:$0xff] }
0x11be   : > { %6751 = vmatprep.subr.mxu1 %v6742_v24  ;;  %v6948_v24 = vld [vmem:[%s17266_s5 + $0x3c0] sm:$0xff]  ;;  %v10404_v26 = vpack.c.bf16 %v7045_v4, %v7037_v14  ;;  %v6862_v14 = vld [vmem:[%s17266_s5 + $0x110] sm:$0xff]  ;;  %v6903_v8 = vld [vmem:[%s17266_s5 + $0x258] sm:$0xff] }
0x11bf   : > { %6752 = vmatpush1.msra.mxu1 %v6741_v46  ;;  %v6965_v46 = vld [vmem:[%s17266_s5 + $0x448] sm:$0xff]  ;;  %v6870_v4 = vld [vmem:[%s17266_s5 + $0x150] sm:$0xff] }
0x11c0   : > { %9775 = vmatmul.mubr.msk.f32.vlgmr.msra.gmra.mrb[60].mxu1 %vm1639_vm10, %v6744_v41  ;;  %10353 = vmatprep.subr.bf16.mxu1 %v10352_v62  ;;  %v6957_v62 = vld [vmem:[%s17266_s5 + $0x408] sm:$0xff]  ;;  %v10382_v41 = vpack.c.bf16 %v6948_v24, %v6940_v59 }
0x11c1   : > { %6821 = vmatprep.mubr.f32.mxu1 %v18401_v47  ;;  %10355 = vmatpush1.bf16.msra.mxu1 %v10354_v7  ;;  %v10384_v7 = vpack.c.bf16 %v6965_v46, %v6957_v62  ;;  %v7069_v24 = vld [vmem:[%s17266_s5 + $0x788] sm:$0xff] }
0x11c2   : > { %10357 = vmatprep.subr.bf16.mxu1 %v10356_v37  ;;  %v6956_v37 = vld [vmem:[%s17266_s5 + $0x400] sm:$0xff]  ;;  %v7077_v62 = vld [vmem:[%s17266_s5 + $0x7c8] sm:$0xff] }
0x11c3   : > { %v10386_v54 = vpack.c.bf16 %v6964_v63, %v6956_v37  ;;  %v10412_v46 = vpack.c.bf16 %v7077_v62, %v7069_v24  ;;  %v6831_v63 = vld [vmem:[%s17266_s5 + $0x18] sm:$0xff] }
0x11c4   : > { %9776 = vmatmul.mubr.msk.f32.gmra.mrb[62].mxu1 %vm1639_vm10, %v6746_v60  ;;  %v10388_v60 = vpack.c.bf16 %v6981_v43, %v6973_v42  ;;  %v6839_v42 = vld [vmem:[%s17266_s5 + $0x58] sm:$0xff] }
0x11c5   : > { %10359 = vmatpush1.bf16.msra.mxu1 %v10358_v20  ;;  %v6972_v20 = vld [vmem:[%s17266_s5 + $0x480] sm:$0xff]  ;;  %v10416_v43 = vpack.c.bf16 %v6839_v42, %v6831_v63  ;;  %v6919_v24 = vld [vmem:[%s17266_s5 + $0x2d8] sm:$0xff] }
0x11c6   : > { %10361 = vmatprep.subr.bf16.mxu1 %v10360_v44  ;;  %v6980_v44 = vld [vmem:[%s17266_s5 + $0x4c0] sm:$0xff]  ;;  %v6935_v63 = vld [vmem:[%s17266_s5 + $0x358] sm:$0xff] }
0x11c7   : > { %v10390_v16 = vpack.c.bf16 %v6980_v44, %v6972_v20  ;;  %v11030_v20 = vmov 33   ;;  %v15654_v44 = vld [vmem:[%s17262_s1 + $0x68] sm:$0xff] }
0x11c9   : > { %10363 = vmatpush1.bf16.msra.mxu1 %v10362_v27  ;;  %v6988_v27 = vld [vmem:[%s17266_s5 + $0x500] sm:$0xff] }
0x11ca   : > { %10365 = vmatprep.subr.bf16.mxu1 %v10364_v51  ;;  %v6996_v51 = vld [vmem:[%s17266_s5 + $0x540] sm:$0xff] }
0x11cb   : > { %v10394_v35 = vpack.c.bf16 %v6996_v51, %v6988_v27  ;;  %v6855_v27 = vld [vmem:[%s17266_s5 + $0xd8] sm:$0xff] }
0x11cd   : > { %10367 = vmatpush1.bf16.msra.mxu1 %v10366_v57  ;;  %v7004_v57 = vld [vmem:[%s17266_s5 + $0x580] sm:$0xff] }
0x11ce   : > { %10369 = vmatprep.subr.bf16.mxu1 %v10368_v40  ;;  %v7012_v40 = vld [vmem:[%s17266_s5 + $0x5c0] sm:$0xff] }
0x11cf   : > { %v10398_v2 = vpack.c.bf16 %v7012_v40, %v7004_v57  ;;  %v6846_v57 = vld [vmem:[%s17266_s5 + $0x90] sm:$0xff] }
0x11d0   : > { %v6854_v40 = vld [vmem:[%s17266_s5 + $0xd0] sm:$0xff] }
0x11d1   : > { %10371 = vmatpush1.bf16.msra.mxu1 %v10370_v36  ;;  %v7020_v36 = vld [vmem:[%s17266_s5 + $0x600] sm:$0xff] }
0x11d2   : > { %10373 = vmatprep.subr.bf16.mxu1 %v10372_v50  ;;  %v7028_v50 = vld [vmem:[%s17266_s5 + $0x640] sm:$0xff] }
0x11d3   : > { %v10402_v0 = vpack.c.bf16 %v7028_v50, %v7020_v36 }
0x11d5   : > { %10375 = vmatpush1.bf16.msra.mxu1 %v10374_v45  ;;  %v7036_v45 = vld [vmem:[%s17266_s5 + $0x680] sm:$0xff] }
0x11d6   : > { %10377 = vmatprep.subr.bf16.mxu1 %v10376_v39  ;;  %v7044_v39 = vld [vmem:[%s17266_s5 + $0x6c0] sm:$0xff] }
0x11d7   : > { %v10406_v23 = vpack.c.bf16 %v7044_v39, %v7036_v45  ;;  %v6878_v45 = vld [vmem:[%s17266_s5 + $0x190] sm:$0xff] }
0x11d8   : > { %v6886_v39 = vld [vmem:[%s17266_s5 + $0x1d0] sm:$0xff] }
0x11d9   : > { %10379 = vmatpush1.bf16.msra.mxu1 %v10378_v53  ;;  %v7052_v53 = vld [vmem:[%s17266_s5 + $0x700] sm:$0xff] }
0x11da   : > { %10381 = vmatprep.subr.bf16.mxu1 %v10380_v1  ;;  %v7060_v1 = vld [vmem:[%s17266_s5 + $0x740] sm:$0xff] }
0x11db   : > { %v10410_v59 = vpack.c.bf16 %v7060_v1, %v7052_v53  ;;  %v6894_v53 = vld [vmem:[%s17266_s5 + $0x210] sm:$0xff] }
0x11dc   : > { %v6902_v1 = vld [vmem:[%s17266_s5 + $0x250] sm:$0xff] }
0x11dd   : > { %10383 = vmatpush1.bf16.msra.mxu1 %v10382_v41  ;;  %v7068_v41 = vld [vmem:[%s17266_s5 + $0x780] sm:$0xff]  ;;  %v10434_v62 = vpack.c.bf16 %v6902_v1, %v6894_v53  ;;  %v7006_v53 = vld [vmem:[%s17266_s5 + $0x590] sm:$0xff] }
0x11de   : > { %10385 = vmatprep.subr.bf16.mxu1 %v10384_v7  ;;  %v7076_v7 = vld [vmem:[%s17266_s5 + $0x7c0] sm:$0xff]  ;;  %v7014_v1 = vld [vmem:[%s17266_s5 + $0x5d0] sm:$0xff] }
0x11df   : > { %v10414_v37 = vpack.c.bf16 %v7076_v7, %v7068_v41  ;;  %v6910_v41 = vld [vmem:[%s17266_s5 + $0x290] sm:$0xff] }
0x11e0   : > { %v6918_v7 = vld [vmem:[%s17266_s5 + $0x2d0] sm:$0xff] }
0x11e1   : > { %10387 = vmatpush1.bf16.msra.mxu1 %v10386_v54  ;;  %v15647_v54 = vld [vmem:[%s17262_s1 + $0x30] sm:$0xff]  ;;  %v10438_v42 = vpack.c.bf16 %v6918_v7, %v6910_v41 }
0x11e2   : > { %10389 = vmatprep.subr.bf16.mxu1 %v10388_v60  ;;  %v11029_v60 = vmov 32   ;;  %v7022_v41 = vld [vmem:[%s17266_s5 + $0x610] sm:$0xff] }
0x11e3   : > { %10829 = vset.pattern.permute.xlu1 %v11029_v60  ;;  %10830 = vset.pattern.permute.xlu0 %v11029_v60  ;;  %v6926_v60 = vld [vmem:[%s17266_s5 + $0x310] sm:$0xff] }
0x11e4   : > { %7396 = vperm.xlu1 %10829, %v15647_v54   ;;  %7401 = vperm.xlu0 %10830, %v15654_v44   ;;  %v7030_v7 = vld [vmem:[%s17266_s5 + $0x650] sm:$0xff] }
0x11e5   : > { %10391 = vmatpush1.bf16.msra.mxu1 %v10390_v16 }
0x11e6   : > { %10393 = vmatprep.subr.bf16.mxu1 %v10392_v52  ;;  %v6847_v52 = vld [vmem:[%s17266_s5 + $0x98] sm:$0xff] }
0x11e8   : > { %10831 = vset.pattern.permute.xlu1 %v11030_v20  ;;  %v6934_v20 = vld [vmem:[%s17266_s5 + $0x350] sm:$0xff] }
0x11e9   : > { %10395 = vmatpush1.bf16.msra.mxu1 %v10394_v35  ;;  %7421 = vperm.xlu1 %10831, %v15647_v54  }
0x11ea   : > { %10397 = vmatprep.subr.bf16.mxu1 %v10396_v18  ;;  %v10420_v18 = vpack.c.bf16 %v6855_v27, %v6847_v52  ;;  %v10444_v52 = vpack.c.bf16 %v6951_v48, %v6943_v17  ;;  %v6942_v27 = vld [vmem:[%s17266_s5 + $0x390] sm:$0xff]  ;;  %v7055_v17 = vld [vmem:[%s17266_s5 + $0x718] sm:$0xff] }
0x11eb   : > { %v7063_v48 = vld [vmem:[%s17266_s5 + $0x758] sm:$0xff] }
0x11ed   : > { %10399 = vmatpush1.bf16.msra.mxu1 %v10398_v2  ;;  %7425 = vperm.xlu1 %10831, %v15654_v44  }
0x11ee   : > { %10401 = vmatprep.subr.bf16.mxu1 %v10400_v31  ;;  %v10422_v31 = vpack.c.bf16 %v6854_v40, %v6846_v57 }
0x11f1   : > { %10403 = vmatpush1.bf16.msra.mxu1 %v10402_v0  ;;  %v10426_v0 = vpack.c.bf16 %v6870_v4, %v6862_v14  ;;  %v6974_v14 = vld [vmem:[%s17266_s5 + $0x490] sm:$0xff] }
0x11f2   : > { %10405 = vmatprep.subr.bf16.mxu1 %v10404_v26  ;;  %v6982_v4 = vld [vmem:[%s17266_s5 + $0x4d0] sm:$0xff] }
0x11f5   : > { %10407 = vmatpush1.bf16.msra.mxu1 %v10406_v23  ;;  %v10430_v23 = vpack.c.bf16 %v6886_v39, %v6878_v45  ;;  %v6990_v45 = vld [vmem:[%s17266_s5 + $0x510] sm:$0xff] }
0x11f6   : > { %10409 = vmatprep.subr.bf16.mxu1 %v10408_v55  ;;  %v10432_v55 = vpack.c.bf16 %v6903_v8, %v6895_v12  ;;  %v6998_v39 = vld [vmem:[%s17266_s5 + $0x550] sm:$0xff]  ;;  %v7007_v12 = vld [vmem:[%s17266_s5 + $0x598] sm:$0xff] }
0x11f7   : > { %v7015_v8 = vld [vmem:[%s17266_s5 + $0x5d8] sm:$0xff] }
0x11f9   : > { %10411 = vmatpush1.bf16.msra.mxu1 %v10410_v59  ;;  %v6911_v59 = vld [vmem:[%s17266_s5 + $0x298] sm:$0xff] }
0x11fa   : > { %10413 = vmatprep.subr.bf16.mxu1 %v10412_v46  ;;  %v10436_v46 = vpack.c.bf16 %v6919_v24, %v6911_v59  ;;  %v7023_v59 = vld [vmem:[%s17266_s5 + $0x618] sm:$0xff] }
0x11fb   : > { %v7031_v24 = vld [vmem:[%s17266_s5 + $0x658] sm:$0xff] }
0x11fd   : > { %10415 = vmatpush1.bf16.msra.mxu1 %v10414_v37  ;;  %v6927_v37 = vld [vmem:[%s17266_s5 + $0x318] sm:$0xff] }
0x11fe   : > { %10417 = vmatprep.subr.bf16.mxu1 %v10416_v43  ;;  %v10440_v43 = vpack.c.bf16 %v6935_v63, %v6927_v37  ;;  %v7039_v37 = vld [vmem:[%s17266_s5 + $0x698] sm:$0xff] }
0x11ff   : > { %v7047_v63 = vld [vmem:[%s17266_s5 + $0x6d8] sm:$0xff] }
0x1293   : > { %v6817_v16 = vpop.f32.mrb[60].mxu1 }
0x1294   : > { %v6819_v51 = vpop.f32.mrb[61].mxu1  ;;  %v15674_v35 = vadd.f32 %v6817_v16, %v15349_v38  ;;  %v6871_v38 = vld [vmem:[%s17266_s5 + $0x158] sm:$0xff]  ;;  %v10442_v16 = vpack.c.bf16 %v6934_v20, %v6926_v60  ;;  %v7038_v60 = vld [vmem:[%s17266_s5 + $0x690] sm:$0xff] }
0x1295   : > { %v15671_v25 = vadd.f32 %v6819_v51, %v15352_v22  ;;  %v6863_v22 = vld [vmem:[%s17266_s5 + $0x118] sm:$0xff]  ;;  %v6950_v51 = vld [vmem:[%s17266_s5 + $0x3d0] sm:$0xff] }
0x1296   : > { %v10424_v50 = vpack.c.bf16 %v6871_v38, %v6863_v22  ;;  %v10446_v57 = vpack.c.bf16 %v6950_v51, %v6942_v27  ;;  %v6966_v22 = vld [vmem:[%s17266_s5 + $0x450] sm:$0xff]  ;;  %v6975_v38 = vld [vmem:[%s17266_s5 + $0x498] sm:$0xff] }
0x1297   : > { %v6823_v28 = vpop.f32.mrb[62].mxu1  ;;  %7148 = vmatprep.mubr.f32.mxu1 %v15671_v25  ;;  %v7046_v20 = vld [vmem:[%s17266_s5 + $0x6d0] sm:$0xff] }
0x1298   : > { %v6825_v19 = vpop.f32.mrb[63].mxu1  ;;  %7149 = vmatmul.mubr.f32.vlgmr.msra.gmra.mrb[64].mxu1 %v15674_v35  ;;  %v15694_v36 = vadd.f32 %v6823_v28, %v15357_v61  ;;  %v6887_v61 = vld [vmem:[%s17266_s5 + $0x1d8] sm:$0xff]  ;;  %v6958_v28 = vld [vmem:[%s17266_s5 + $0x410] sm:$0xff] }
0x1299   : > { %v15691_v2 = vadd.f32 %v6825_v19, %v15360_v6  ;;  %10419 = vmatpush1.bf16.msra.mxu1 %v10418_v58  ;;  %v6879_v6 = vld [vmem:[%s17266_s5 + $0x198] sm:$0xff]  ;;  %v7054_v27 = vld [vmem:[%s17266_s5 + $0x710] sm:$0xff] }
0x129a   : > { %10421 = vmatprep.subr.bf16.mxu1 %v10420_v18  ;;  %v10428_v26 = vpack.c.bf16 %v6887_v61, %v6879_v6  ;;  %v6959_v58 = vld [vmem:[%s17266_s5 + $0x418] sm:$0xff]  ;;  %v7062_v51 = vld [vmem:[%s17266_s5 + $0x750] sm:$0xff] }
0x129b   : > { %7154 = vmatprep.mubr.f32.mxu1 %v15691_v2  ;;  %v6967_v18 = vld [vmem:[%s17266_s5 + $0x458] sm:$0xff] }
0x129c   : > { %7155 = vmatmul.mubr.f32.gmra.mrb[66].mxu1 %v15694_v36  ;;  %v10448_v40 = vpack.c.bf16 %v6967_v18, %v6959_v58  ;;  %v6983_v19 = vld [vmem:[%s17266_s5 + $0x4d8] sm:$0xff] }
0x129d   : > { %10423 = vmatpush1.bf16.msra.mxu1 %v10422_v31  ;;  %7225 = vmatprep.mubr.f32.mxu1 %v15671_v25  ;;  %v10450_v31 = vpack.c.bf16 %v6966_v22, %v6958_v28  ;;  %v6991_v6 = vld [vmem:[%s17266_s5 + $0x518] sm:$0xff]  ;;  %v7070_v28 = vld [vmem:[%s17266_s5 + $0x790] sm:$0xff] }
0x129e   : > { %10425 = vmatprep.subr.bf16.mxu1 %v10424_v50  ;;  %v10452_v50 = vpack.c.bf16 %v6983_v19, %v6975_v38  ;;  %v6999_v61 = vld [vmem:[%s17266_s5 + $0x558] sm:$0xff]  ;;  %v7078_v22 = vld [vmem:[%s17266_s5 + $0x7d0] sm:$0xff]  ;;  %v6833_v38 = vld [vmem:[%s17266_s5 + $0x28] sm:$0xff] }
0x129f   : > { %v7071_v58 = vld [vmem:[%s17266_s5 + $0x798] sm:$0xff]  ;;  %v6841_v19 = vld [vmem:[%s17266_s5 + $0x68] sm:$0xff] }
0x12a0   : > { %v7079_v18 = vld [vmem:[%s17266_s5 + $0x7d8] sm:$0xff] }
0x12a1   : > { %10427 = vmatpush1.bf16.msra.mxu1 %v10426_v0  ;;  %v10454_v0 = vpack.c.bf16 %v6982_v4, %v6974_v14  ;;  %v6832_v14 = vld [vmem:[%s17266_s5 + $0x20] sm:$0xff] }
0x12a2   : > { %10429 = vmatprep.subr.bf16.mxu1 %v10428_v26  ;;  %v10456_v26 = vpack.c.bf16 %v6999_v61, %v6991_v6  ;;  %v6840_v4 = vld [vmem:[%s17266_s5 + $0x60] sm:$0xff]  ;;  %v6849_v6 = vld [vmem:[%s17266_s5 + $0xa8] sm:$0xff] }
0x12a3   : > { %v6857_v61 = vld [vmem:[%s17266_s5 + $0xe8] sm:$0xff] }
0x12a5   : > { %10431 = vmatpush1.bf16.msra.mxu1 %v10430_v23  ;;  %v10458_v23 = vpack.c.bf16 %v6998_v39, %v6990_v45  ;;  %v6848_v45 = vld [vmem:[%s17266_s5 + $0xa0] sm:$0xff] }
0x12a6   : > { %10433 = vmatprep.subr.bf16.mxu1 %v10432_v55  ;;  %v10460_v55 = vpack.c.bf16 %v7015_v8, %v7007_v12  ;;  %v6856_v39 = vld [vmem:[%s17266_s5 + $0xe0] sm:$0xff]  ;;  %v6865_v12 = vld [vmem:[%s17266_s5 + $0x128] sm:$0xff] }
0x12a7   : > { %v6873_v8 = vld [vmem:[%s17266_s5 + $0x168] sm:$0xff] }
0x12a9   : > { %10435 = vmatpush1.bf16.msra.mxu1 %v10434_v62  ;;  %v10462_v62 = vpack.c.bf16 %v7014_v1, %v7006_v53  ;;  %v6864_v53 = vld [vmem:[%s17266_s5 + $0x120] sm:$0xff] }
0x12aa   : > { %10437 = vmatprep.subr.bf16.mxu1 %v10436_v46  ;;  %v10464_v46 = vpack.c.bf16 %v7031_v24, %v7023_v59  ;;  %v6872_v1 = vld [vmem:[%s17266_s5 + $0x160] sm:$0xff]  ;;  %v6881_v59 = vld [vmem:[%s17266_s5 + $0x1a8] sm:$0xff] }
0x12ab   : > { %v6889_v24 = vld [vmem:[%s17266_s5 + $0x1e8] sm:$0xff] }
0x12ad   : > { %10439 = vmatpush1.bf16.msra.mxu1 %v10438_v42  ;;  %v10466_v42 = vpack.c.bf16 %v7030_v7, %v7022_v41  ;;  %v6880_v41 = vld [vmem:[%s17266_s5 + $0x1a0] sm:$0xff] }
0x12ae   : > { %10441 = vmatprep.subr.bf16.mxu1 %v10440_v43  ;;  %v10468_v43 = vpack.c.bf16 %v7047_v63, %v7039_v37  ;;  %v6888_v7 = vld [vmem:[%s17266_s5 + $0x1e0] sm:$0xff]  ;;  %v6897_v37 = vld [vmem:[%s17266_s5 + $0x228] sm:$0xff] }
0x12af   : > { %v6905_v63 = vld [vmem:[%s17266_s5 + $0x268] sm:$0xff] }
0x12b1   : > { %10443 = vmatpush1.bf16.msra.mxu1 %v10442_v16  ;;  %v10470_v16 = vpack.c.bf16 %v7046_v20, %v7038_v60  ;;  %v6896_v60 = vld [vmem:[%s17266_s5 + $0x220] sm:$0xff] }
0x12b2   : > { %10445 = vmatprep.subr.bf16.mxu1 %v10444_v52  ;;  %v10472_v52 = vpack.c.bf16 %v7063_v48, %v7055_v17  ;;  %v6904_v20 = vld [vmem:[%s17266_s5 + $0x260] sm:$0xff]  ;;  %v6913_v17 = vld [vmem:[%s17266_s5 + $0x2a8] sm:$0xff] }
0x12b3   : > { %v6921_v48 = vld [vmem:[%s17266_s5 + $0x2e8] sm:$0xff] }
0x12b5   : > { %10447 = vmatpush1.bf16.msra.mxu1 %v10446_v57  ;;  %v10474_v57 = vpack.c.bf16 %v7062_v51, %v7054_v27  ;;  %v6912_v27 = vld [vmem:[%s17266_s5 + $0x2a0] sm:$0xff] }
0x12b6   : > { %10449 = vmatprep.subr.bf16.mxu1 %v10448_v40  ;;  %v10476_v40 = vpack.c.bf16 %v7079_v18, %v7071_v58  ;;  %v6920_v51 = vld [vmem:[%s17266_s5 + $0x2e0] sm:$0xff]  ;;  %v6929_v58 = vld [vmem:[%s17266_s5 + $0x328] sm:$0xff] }
0x12b7   : > { %v6937_v18 = vld [vmem:[%s17266_s5 + $0x368] sm:$0xff] }
0x12b9   : > { %10451 = vmatpush1.bf16.msra.mxu1 %v10450_v31  ;;  %v10478_v31 = vpack.c.bf16 %v7078_v22, %v7070_v28  ;;  %v6928_v28 = vld [vmem:[%s17266_s5 + $0x320] sm:$0xff] }
0x12ba   : > { %10453 = vmatprep.subr.bf16.mxu1 %v10452_v50  ;;  %v10480_v50 = vpack.c.bf16 %v6841_v19, %v6833_v38  ;;  %v6936_v22 = vld [vmem:[%s17266_s5 + $0x360] sm:$0xff]  ;;  %v6945_v38 = vld [vmem:[%s17266_s5 + $0x3a8] sm:$0xff] }
0x12bb   : > { %v6953_v19 = vld [vmem:[%s17266_s5 + $0x3e8] sm:$0xff] }
0x12bd   : > { %10455 = vmatpush1.bf16.msra.mxu1 %v10454_v0  ;;  %v10482_v0 = vpack.c.bf16 %v6840_v4, %v6832_v14  ;;  %v6944_v14 = vld [vmem:[%s17266_s5 + $0x3a0] sm:$0xff] }
0x12be   : > { %10457 = vmatprep.subr.bf16.mxu1 %v10456_v26  ;;  %v10484_v26 = vpack.c.bf16 %v6857_v61, %v6849_v6  ;;  %v6952_v4 = vld [vmem:[%s17266_s5 + $0x3e0] sm:$0xff]  ;;  %v6961_v6 = vld [vmem:[%s17266_s5 + $0x428] sm:$0xff] }
0x12bf   : > { %v6969_v61 = vld [vmem:[%s17266_s5 + $0x468] sm:$0xff] }
0x12c1   : > { %10459 = vmatpush1.bf16.msra.mxu1 %v10458_v23  ;;  %v10486_v23 = vpack.c.bf16 %v6856_v39, %v6848_v45  ;;  %v6960_v45 = vld [vmem:[%s17266_s5 + $0x420] sm:$0xff] }
0x12c2   : > { %10461 = vmatprep.subr.bf16.mxu1 %v10460_v55  ;;  %v10488_v55 = vpack.c.bf16 %v6873_v8, %v6865_v12  ;;  %v6968_v39 = vld [vmem:[%s17266_s5 + $0x460] sm:$0xff]  ;;  %v6977_v12 = vld [vmem:[%s17266_s5 + $0x4a8] sm:$0xff] }
0x12c3   : > { %v6985_v8 = vld [vmem:[%s17266_s5 + $0x4e8] sm:$0xff] }
0x12c5   : > { %10463 = vmatpush1.bf16.msra.mxu1 %v10462_v62  ;;  %v10490_v62 = vpack.c.bf16 %v6872_v1, %v6864_v53  ;;  %v6976_v53 = vld [vmem:[%s17266_s5 + $0x4a0] sm:$0xff] }
0x12c6   : > { %10465 = vmatprep.subr.bf16.mxu1 %v10464_v46  ;;  %v10492_v46 = vpack.c.bf16 %v6889_v24, %v6881_v59  ;;  %v6984_v1 = vld [vmem:[%s17266_s5 + $0x4e0] sm:$0xff]  ;;  %v6993_v59 = vld [vmem:[%s17266_s5 + $0x528] sm:$0xff] }
0x12c7   : > { %v7001_v24 = vld [vmem:[%s17266_s5 + $0x568] sm:$0xff] }
0x12c9   : > { %10467 = vmatpush1.bf16.msra.mxu1 %v10466_v42  ;;  %v10494_v42 = vpack.c.bf16 %v6888_v7, %v6880_v41  ;;  %v6992_v41 = vld [vmem:[%s17266_s5 + $0x520] sm:$0xff] }
0x12ca   : > { %10469 = vmatprep.subr.bf16.mxu1 %v10468_v43  ;;  %v10496_v43 = vpack.c.bf16 %v6905_v63, %v6897_v37  ;;  %v7000_v7 = vld [vmem:[%s17266_s5 + $0x560] sm:$0xff]  ;;  %v7009_v37 = vld [vmem:[%s17266_s5 + $0x5a8] sm:$0xff] }
0x12cb   : > { %v7017_v63 = vld [vmem:[%s17266_s5 + $0x5e8] sm:$0xff] }
0x12cd   : > { %10471 = vmatpush1.bf16.msra.mxu1 %v10470_v16  ;;  %v10498_v16 = vpack.c.bf16 %v6904_v20, %v6896_v60  ;;  %v7008_v60 = vld [vmem:[%s17266_s5 + $0x5a0] sm:$0xff] }
0x12ce   : > { %10473 = vmatprep.subr.bf16.mxu1 %v10472_v52  ;;  %v10500_v52 = vpack.c.bf16 %v6921_v48, %v6913_v17  ;;  %v7016_v20 = vld [vmem:[%s17266_s5 + $0x5e0] sm:$0xff]  ;;  %v7025_v17 = vld [vmem:[%s17266_s5 + $0x628] sm:$0xff] }
0x12cf   : > { %v7033_v48 = vld [vmem:[%s17266_s5 + $0x668] sm:$0xff] }
0x12d1   : > { %10475 = vmatpush1.bf16.msra.mxu1 %v10474_v57  ;;  %v10502_v57 = vpack.c.bf16 %v6920_v51, %v6912_v27  ;;  %v7024_v27 = vld [vmem:[%s17266_s5 + $0x620] sm:$0xff] }
0x12d2   : > { %10477 = vmatprep.subr.bf16.mxu1 %v10476_v40  ;;  %v10504_v40 = vpack.c.bf16 %v6937_v18, %v6929_v58  ;;  %v7032_v51 = vld [vmem:[%s17266_s5 + $0x660] sm:$0xff]  ;;  %v7041_v58 = vld [vmem:[%s17266_s5 + $0x6a8] sm:$0xff] }
0x12d3   : > { %v7049_v18 = vld [vmem:[%s17266_s5 + $0x6e8] sm:$0xff] }
0x12d5   : > { %10479 = vmatpush1.bf16.msra.mxu1 %v10478_v31  ;;  %v10506_v31 = vpack.c.bf16 %v6936_v22, %v6928_v28  ;;  %v7040_v28 = vld [vmem:[%s17266_s5 + $0x6a0] sm:$0xff] }
0x12d6   : > { %10481 = vmatprep.subr.bf16.mxu1 %v10480_v50  ;;  %v10508_v50 = vpack.c.bf16 %v6953_v19, %v6945_v38  ;;  %v7048_v22 = vld [vmem:[%s17266_s5 + $0x6e0] sm:$0xff]  ;;  %v7057_v38 = vld [vmem:[%s17266_s5 + $0x728] sm:$0xff] }
0x12d7   : > { %v7065_v19 = vld [vmem:[%s17266_s5 + $0x768] sm:$0xff] }
0x12d8   : > { %7226 = vmatmul.mubr.f32.vlgmr.msra.gmra.mrb[68].mxu1 %v15674_v35 }
0x12d9   : > { %7231 = vmatprep.mubr.f32.mxu1 %v15691_v2  ;;  %10483 = vmatpush1.bf16.msra.mxu1 %v10482_v0  ;;  %v10510_v0 = vpack.c.bf16 %v6952_v4, %v6944_v14  ;;  %v7056_v14 = vld [vmem:[%s17266_s5 + $0x720] sm:$0xff] }
0x12da   : > { %10485 = vmatprep.subr.bf16.mxu1 %v10484_v26  ;;  %v10512_v26 = vpack.c.bf16 %v6969_v61, %v6961_v6  ;;  %v7064_v4 = vld [vmem:[%s17266_s5 + $0x760] sm:$0xff]  ;;  %v7073_v6 = vld [vmem:[%s17266_s5 + $0x7a8] sm:$0xff] }
0x12db   : > { %v7081_v61 = vld [vmem:[%s17266_s5 + $0x7e8] sm:$0xff] }
0x12dc   : > { %7232 = vmatmul.mubr.f32.gmra.mrb[70].mxu1 %v15694_v36 }
0x12dd   : > { %10487 = vmatpush1.bf16.msra.mxu1 %v10486_v23  ;;  %7302 = vmatprep.mubr.f32.mxu1 %v15671_v25  ;;  %v10514_v23 = vpack.c.bf16 %v6968_v39, %v6960_v45  ;;  %v7072_v45 = vld [vmem:[%s17266_s5 + $0x7a0] sm:$0xff] }
0x12de   : > { %10489 = vmatprep.subr.bf16.mxu1 %v10488_v55  ;;  %v10516_v55 = vpack.c.bf16 %v6985_v8, %v6977_v12  ;;  %v7080_v39 = vld [vmem:[%s17266_s5 + $0x7e0] sm:$0xff]  ;;  %v6835_v12 = vld [vmem:[%s17266_s5 + $0x38] sm:$0xff] }
0x12df   : > { %v6843_v8 = vld [vmem:[%s17266_s5 + $0x78] sm:$0xff] }
0x12e1   : > { %10491 = vmatpush1.bf16.msra.mxu1 %v10490_v62  ;;  %v10518_v62 = vpack.c.bf16 %v6984_v1, %v6976_v53  ;;  %v6834_v53 = vld [vmem:[%s17266_s5 + $0x30] sm:$0xff] }
0x12e2   : > { %10493 = vmatprep.subr.bf16.mxu1 %v10492_v46  ;;  %v10520_v46 = vpack.c.bf16 %v7001_v24, %v6993_v59  ;;  %v6842_v1 = vld [vmem:[%s17266_s5 + $0x70] sm:$0xff]  ;;  %v6851_v59 = vld [vmem:[%s17266_s5 + $0xb8] sm:$0xff] }
0x12e3   : > { %v6859_v24 = vld [vmem:[%s17266_s5 + $0xf8] sm:$0xff] }
0x12e5   : > { %10495 = vmatpush1.bf16.msra.mxu1 %v10494_v42  ;;  %v10522_v42 = vpack.c.bf16 %v7000_v7, %v6992_v41  ;;  %v6850_v41 = vld [vmem:[%s17266_s5 + $0xb0] sm:$0xff] }
0x12e6   : > { %10497 = vmatprep.subr.bf16.mxu1 %v10496_v43  ;;  %v10524_v43 = vpack.c.bf16 %v7017_v63, %v7009_v37  ;;  %v6858_v7 = vld [vmem:[%s17266_s5 + $0xf0] sm:$0xff]  ;;  %v6867_v37 = vld [vmem:[%s17266_s5 + $0x138] sm:$0xff] }
0x12e7   : > { %v6875_v63 = vld [vmem:[%s17266_s5 + $0x178] sm:$0xff] }
0x12e9   : > { %10499 = vmatpush1.bf16.msra.mxu1 %v10498_v16  ;;  %v10526_v16 = vpack.c.bf16 %v7016_v20, %v7008_v60  ;;  %v6866_v60 = vld [vmem:[%s17266_s5 + $0x130] sm:$0xff] }
0x12ea   : > { %10501 = vmatprep.subr.bf16.mxu1 %v10500_v52  ;;  %v10528_v52 = vpack.c.bf16 %v7033_v48, %v7025_v17  ;;  %v6874_v20 = vld [vmem:[%s17266_s5 + $0x170] sm:$0xff]  ;;  %v6883_v17 = vld [vmem:[%s17266_s5 + $0x1b8] sm:$0xff] }
0x12eb   : > { %v6891_v48 = vld [vmem:[%s17266_s5 + $0x1f8] sm:$0xff] }
0x12ed   : > { %10503 = vmatpush1.bf16.msra.mxu1 %v10502_v57  ;;  %v10530_v57 = vpack.c.bf16 %v7032_v51, %v7024_v27  ;;  %v6882_v27 = vld [vmem:[%s17266_s5 + $0x1b0] sm:$0xff] }
0x12ee   : > { %10505 = vmatprep.subr.bf16.mxu1 %v10504_v40  ;;  %v10532_v40 = vpack.c.bf16 %v7049_v18, %v7041_v58  ;;  %v6890_v51 = vld [vmem:[%s17266_s5 + $0x1f0] sm:$0xff]  ;;  %v6899_v58 = vld [vmem:[%s17266_s5 + $0x238] sm:$0xff] }
0x12ef   : > { %v6907_v18 = vld [vmem:[%s17266_s5 + $0x278] sm:$0xff] }
0x12f1   : > { %10507 = vmatpush1.bf16.msra.mxu1 %v10506_v31  ;;  %v10534_v31 = vpack.c.bf16 %v7048_v22, %v7040_v28  ;;  %v6906_v28 = vld [vmem:[%s17266_s5 + $0x270] sm:$0xff]  ;;  %v6915_v22 = vld [vmem:[%s17266_s5 + $0x2b8] sm:$0xff] }
0x12f2   : > { %10509 = vmatprep.subr.bf16.mxu1 %v10508_v50  ;;  %v10536_v50 = vpack.c.bf16 %v7065_v19, %v7057_v38  ;;  %v6923_v38 = vld [vmem:[%s17266_s5 + $0x2f8] sm:$0xff] }
0x12f5   : > { %10511 = vmatpush1.bf16.msra.mxu1 %v10510_v0  ;;  %v10538_v0 = vpack.c.bf16 %v7064_v4, %v7056_v14  ;;  %v6922_v14 = vld [vmem:[%s17266_s5 + $0x2f0] sm:$0xff]  ;;  %v6931_v4 = vld [vmem:[%s17266_s5 + $0x338] sm:$0xff] }
0x12f6   : > { %10513 = vmatprep.subr.bf16.mxu1 %v10512_v26  ;;  %v10540_v26 = vpack.c.bf16 %v7081_v61, %v7073_v6  ;;  %v6939_v6 = vld [vmem:[%s17266_s5 + $0x378] sm:$0xff] }
0x12f9   : > { %10515 = vmatpush1.bf16.msra.mxu1 %v10514_v23  ;;  %v10542_v23 = vpack.c.bf16 %v7080_v39, %v7072_v45  ;;  %v6938_v45 = vld [vmem:[%s17266_s5 + $0x370] sm:$0xff]  ;;  %v6947_v39 = vld [vmem:[%s17266_s5 + $0x3b8] sm:$0xff] }
0x12fa   : > { %10517 = vmatprep.subr.bf16.mxu1 %v10516_v55  ;;  %v10544_v55 = vpack.c.bf16 %v6843_v8, %v6835_v12  ;;  %v6955_v12 = vld [vmem:[%s17266_s5 + $0x3f8] sm:$0xff] }
0x12fd   : > { %10519 = vmatpush1.bf16.msra.mxu1 %v10518_v62  ;;  %v10546_v62 = vpack.c.bf16 %v6842_v1, %v6834_v53  ;;  %v6954_v53 = vld [vmem:[%s17266_s5 + $0x3f0] sm:$0xff]  ;;  %v6963_v1 = vld [vmem:[%s17266_s5 + $0x438] sm:$0xff] }
0x12fe   : > { %10521 = vmatprep.subr.bf16.mxu1 %v10520_v46  ;;  %v10548_v46 = vpack.c.bf16 %v6859_v24, %v6851_v59  ;;  %v6971_v59 = vld [vmem:[%s17266_s5 + $0x478] sm:$0xff] }
0x1301   : > { %10523 = vmatpush1.bf16.msra.mxu1 %v10522_v42  ;;  %v10550_v42 = vpack.c.bf16 %v6858_v7, %v6850_v41  ;;  %v6970_v41 = vld [vmem:[%s17266_s5 + $0x470] sm:$0xff]  ;;  %v6979_v7 = vld [vmem:[%s17266_s5 + $0x4b8] sm:$0xff] }
0x1302   : > { %10525 = vmatprep.subr.bf16.mxu1 %v10524_v43  ;;  %v10552_v43 = vpack.c.bf16 %v6875_v63, %v6867_v37  ;;  %v6987_v37 = vld [vmem:[%s17266_s5 + $0x4f8] sm:$0xff] }
0x1305   : > { %10527 = vmatpush1.bf16.msra.mxu1 %v10526_v16  ;;  %v10554_v16 = vpack.c.bf16 %v6874_v20, %v6866_v60  ;;  %v6986_v60 = vld [vmem:[%s17266_s5 + $0x4f0] sm:$0xff]  ;;  %v6995_v20 = vld [vmem:[%s17266_s5 + $0x538] sm:$0xff] }
0x1306   : > { %10529 = vmatprep.subr.bf16.mxu1 %v10528_v52  ;;  %v10556_v52 = vpack.c.bf16 %v6891_v48, %v6883_v17  ;;  %v7003_v17 = vld [vmem:[%s17266_s5 + $0x578] sm:$0xff] }
0x1309   : > { %10531 = vmatpush1.bf16.msra.mxu1 %v10530_v57  ;;  %v10560_v57 = vpack.c.bf16 %v6907_v18, %v6899_v58  ;;  %v7019_v58 = vld [vmem:[%s17266_s5 + $0x5f8] sm:$0xff] }
0x130a   : > { %10533 = vmatprep.subr.bf16.mxu1 %v10532_v40  ;;  %v6898_v40 = vld [vmem:[%s17266_s5 + $0x230] sm:$0xff] }
0x130b   : > { %v10562_v19 = vpack.c.bf16 %v6906_v28, %v6898_v40  ;;  %v7018_v40 = vld [vmem:[%s17266_s5 + $0x5f0] sm:$0xff]  ;;  %v7027_v28 = vld [vmem:[%s17266_s5 + $0x638] sm:$0xff] }
0x130d   : > { %10535 = vmatpush1.bf16.msra.mxu1 %v10534_v31  ;;  %v10564_v31 = vpack.c.bf16 %v6923_v38, %v6915_v22  ;;  %v7035_v22 = vld [vmem:[%s17266_s5 + $0x678] sm:$0xff] }
0x130e   : > { %10537 = vmatprep.subr.bf16.mxu1 %v10536_v50  ;;  %v6914_v50 = vld [vmem:[%s17266_s5 + $0x2b0] sm:$0xff] }
0x130f   : > { %v10566_v61 = vpack.c.bf16 %v6922_v14, %v6914_v50  ;;  %v7034_v50 = vld [vmem:[%s17266_s5 + $0x670] sm:$0xff]  ;;  %v7043_v14 = vld [vmem:[%s17266_s5 + $0x6b8] sm:$0xff] }
0x1311   : > { %10539 = vmatpush1.bf16.msra.mxu1 %v10538_v0  ;;  %v10568_v0 = vpack.c.bf16 %v6939_v6, %v6931_v4  ;;  %v7051_v4 = vld [vmem:[%s17266_s5 + $0x6f8] sm:$0xff]  ;;  %v11031_v6 = vmov 34  }
0x1312   : > { %10541 = vmatprep.subr.bf16.mxu1 %v10540_v26  ;;  %v6930_v26 = vld [vmem:[%s17266_s5 + $0x330] sm:$0xff]  ;;  %10833 = vset.pattern.permute.xlu1 %v11031_v6 }
0x1313   : > { %v10570_v8 = vpack.c.bf16 %v6938_v45, %v6930_v26  ;;  %10832 = vset.pattern.permute.xlu0 %v11031_v6  ;;  %7777 = vperm.xlu1 %10833, %v15654_v44   ;;  %v7042_v26 = vld [vmem:[%s17266_s5 + $0x6b0] sm:$0xff] }
0x1314   : > { %v7050_v45 = vld [vmem:[%s17266_s5 + $0x6f0] sm:$0xff]  ;;  %7773 = vperm.xlu0 %10832, %v15647_v54  }
0x1315   : > { %10543 = vmatpush1.bf16.msra.mxu1 %v10542_v23  ;;  %v10572_v23 = vpack.c.bf16 %v6955_v12, %v6947_v39  ;;  %v7059_v39 = vld [vmem:[%s17266_s5 + $0x738] sm:$0xff] }
0x1316   : > { %10545 = vmatprep.subr.bf16.mxu1 %v10544_v55  ;;  %v6946_v55 = vld [vmem:[%s17266_s5 + $0x3b0] sm:$0xff]  ;;  %v7067_v12 = vld [vmem:[%s17266_s5 + $0x778] sm:$0xff] }
0x1317   : > { %v10574_v24 = vpack.c.bf16 %v6954_v53, %v6946_v55  ;;  %v10600_v55 = vpack.c.bf16 %v7067_v12, %v7059_v39  ;;  %v7058_v53 = vld [vmem:[%s17266_s5 + $0x730] sm:$0xff] }
0x1318   : > { %7303 = vmatmul.mubr.f32.vlgmr.msra.gmra.mrb[72].mxu1 %v15674_v35 }
0x1319   : > { %7308 = vmatprep.mubr.f32.mxu1 %v15691_v2  ;;  %10547 = vmatpush1.bf16.msra.mxu1 %v10546_v62  ;;  %v10576_v62 = vpack.c.bf16 %v6971_v59, %v6963_v1  ;;  %v7066_v1 = vld [vmem:[%s17266_s5 + $0x770] sm:$0xff]  ;;  %v7075_v59 = vld [vmem:[%s17266_s5 + $0x7b8] sm:$0xff] }
0x131a   : > { %10549 = vmatprep.subr.bf16.mxu1 %v10548_v46  ;;  %v6962_v46 = vld [vmem:[%s17266_s5 + $0x430] sm:$0xff] }
0x131b   : > { %v10578_v63 = vpack.c.bf16 %v6970_v41, %v6962_v46  ;;  %v7074_v41 = vld [vmem:[%s17266_s5 + $0x7b0] sm:$0xff] }
0x131c   : > { %7309 = vmatmul.mubr.f32.gmra.mrb[74].mxu1 %v15694_v36 }
0x131d   : > { %10551 = vmatpush1.bf16.msra.mxu1 %v10550_v42  ;;  %7379 = vmatprep.mubr.f32.mxu1 %v15671_v25  ;;  %v10558_v25 = vpack.c.bf16 %v6890_v51, %v6882_v27  ;;  %v10580_v42 = vpack.c.bf16 %v6987_v37, %v6979_v7  ;;  %v7002_v27 = vld [vmem:[%s17266_s5 + $0x570] sm:$0xff]  ;;  %v7011_v51 = vld [vmem:[%s17266_s5 + $0x5b8] sm:$0xff] }
0x131e   : > { %10553 = vmatprep.subr.bf16.mxu1 %v10552_v43  ;;  %v6978_v43 = vld [vmem:[%s17266_s5 + $0x4b0] sm:$0xff] }
0x131f   : > { %v10582_v48 = vpack.c.bf16 %v6986_v60, %v6978_v43  ;;  %v7082_v7 = vld [vmem:[%s17266_s5 + $0x7f0] sm:$0xff]  ;;  %v18420_v43 = vld [vmem:[#allocation112_spill] sm:$0xff]  ;;  %v18421_v60 = vld [vmem:[#allocation10_spill] sm:$0xff] }
0x1320   : > { %v10606_v37 = vpack.c.bf16 %v7082_v7, %v7074_v41 }
0x1321   : > { %10555 = vmatpush1.bf16.msra.mxu1 %v10554_v16  ;;  %v10584_v16 = vpack.c.bf16 %v7003_v17, %v6995_v20  ;;  %v18422_v20 = vld [vmem:[#allocation169_spill] sm:$0xff] }
0x1322   : > { %10557 = vmatprep.subr.bf16.mxu1 %v10556_v52  ;;  %v6994_v52 = vld [vmem:[%s17266_s5 + $0x530] sm:$0xff]  ;;  %v16275_v17 = vadd.f32 %v18422_v20, %v18421_v60  ;;  %v18430_v60 = vld [vmem:[#allocation95_spill] sm:$0xff] }
0x1323   : > { %v10586_v18 = vpack.c.bf16 %v7002_v27, %v6994_v52  ;;  %v18423_v52 = vld [vmem:[#allocation102_spill] sm:$0xff]  ;;  %v18424_v27 = vld [vmem:[#allocation220_spill] sm:$0xff] }
0x1325   : > { %10559 = vmatpush1.bf16.msra.mxu1 %v10558_v25  ;;  %v10588_v25 = vpack.c.bf16 %v7019_v58, %v7011_v51  ;;  %v16283_v51 = vadd.f32 %v18424_v27, %v18423_v52 }
0x1326   : > { %10561 = vmatprep.subr.bf16.mxu1 %v10560_v57  ;;  %v7010_v57 = vld [vmem:[%s17266_s5 + $0x5b0] sm:$0xff] }
0x1327   : > { %v10590_v38 = vpack.c.bf16 %v7018_v40, %v7010_v57 }
0x1329   : > { %10563 = vmatpush1.bf16.msra.mxu1 %v10562_v19  ;;  %v10592_v19 = vpack.c.bf16 %v7035_v22, %v7027_v28  ;;  %v16291_v22 = vpop.permute.xlu0 %7401 }
0x132a   : > { %10565 = vmatprep.subr.bf16.mxu1 %v10564_v31  ;;  %v7026_v31 = vld [vmem:[%s17266_s5 + $0x630] sm:$0xff] }
0x132d   : > { %10567 = vmatpush1.bf16.msra.mxu1 %v10566_v61  ;;  %v10594_v61 = vpack.c.bf16 %v7034_v50, %v7026_v31 }
0x132e   : > { %10569 = vmatprep.subr.bf16.mxu1 %v10568_v0  ;;  %v10596_v0 = vpack.c.bf16 %v7051_v4, %v7043_v14 }
0x1331   : > { %10571 = vmatpush1.bf16.msra.mxu1 %v10570_v8  ;;  %v10598_v8 = vpack.c.bf16 %v7050_v45, %v7042_v26 }
0x1332   : > { %10573 = vmatprep.subr.bf16.mxu1 %v10572_v23  ;;  %v11032_v23 = vmov 35  }
0x1333   : > { %10834 = vset.pattern.permute.xlu1 %v11032_v23  ;;  %10835 = vset.pattern.permute.xlu0 %v11032_v23 }
0x1334   : > { %7797 = vperm.xlu1 %10834, %v15647_v54   ;;  %7801 = vperm.xlu0 %10835, %v15654_v44  }
0x1335   : > { %10575 = vmatpush1.bf16.msra.mxu1 %v10574_v24  ;;  %v7083_v24 = vld [vmem:[%s17266_s5 + $0x7f8] sm:$0xff] }
0x1336   : > { %10577 = vmatprep.subr.bf16.mxu1 %v10576_v62  ;;  %v10602_v62 = vpack.c.bf16 %v7066_v1, %v7058_v53  ;;  %v10604_v46 = vpack.c.bf16 %v7083_v24, %v7075_v59  ;;  %v18427_v53 = vld [vmem:[#allocation101_spill] sm:$0xff]  ;;  %v18428_v59 = vld [vmem:[#allocation100_spill] sm:$0xff] }
0x1337   : > { %v16311_v1 = vadd.f32 %v15102_v5, %v18427_v53  ;;  %v16315_v24 = vadd.f32 %v15104_v10, %v18428_v59  ;;  %v16326_v5 = vadd.f32 %v15108_v13, %v18430_v60  ;;  %v18438_v53 = vld [vmem:[#allocation174_spill] sm:$0xff] }
0x1338   : > { %7836 = vrot.lane.b32.xlu1 %v15647_v54, %s11012_s18  ;;  %10836 = vset.pattern.permute.xlu0 %v18410_v30 }
0x1339   : > { %10579 = vmatpush1.bf16.msra.mxu1 %v10578_v63  ;;  %10837 = vset.pattern.permute.xlu1 %v18410_v30  ;;  %v16267_v63 = vpop.permute.xlu1 %7396 }
0x133a   : > { %10581 = vmatprep.subr.bf16.mxu1 %v10580_v42  ;;  %v18419_v42 = vld [vmem:[#allocation96_spill] sm:$0xff] }
0x133b   : > { %v16271_v30 = vadd.f32 %v18420_v43, %v18419_v42 }
0x133c   : > { %7838 = vrot.lane.b32.xlu1 %v15654_v44, %s11012_s18 }
0x133d   : > { %10583 = vmatpush1.bf16.msra.mxu1 %v10582_v48 }
0x133e   : > { %10585 = vmatprep.subr.bf16.mxu1 %v10584_v16  ;;  %v16277_v16 = vpop.permute.xlu1 %7421 }
0x1341   : > { %10587 = vmatpush1.bf16.msra.mxu1 %v10586_v18  ;;  %v18425_v18 = vld [vmem:[#allocation103_spill] sm:$0xff] }
0x1342   : > { %10589 = vmatprep.subr.bf16.mxu1 %v10588_v25  ;;  %v18426_v25 = vld [vmem:[#allocation125_spill] sm:$0xff]  ;;  %v16295_v50 = vpop.permute.xlu1 %7425 }
0x1343   : > { %v16288_v57 = vadd.f32 %v18426_v25, %v18425_v18 }
0x1345   : > { %10591 = vmatpush1.bf16.msra.mxu1 %v10590_v38 }
0x1346   : > { %10593 = vmatprep.subr.bf16.mxu1 %v10592_v19 }
0x1349   : > { %10595 = vmatpush1.bf16.msra.mxu1 %v10594_v61 }
0x134a   : > { %10597 = vmatprep.subr.bf16.mxu1 %v10596_v0 }
0x134d   : > { %10599 = vmatpush1.bf16.msra.mxu1 %v10598_v8 }
0x134e   : > { %10601 = vmatprep.subr.bf16.mxu1 %v10600_v55 }
0x1351   : > { %10603 = vmatpush1.bf16.msra.mxu1 %v10602_v62 }
0x1352   : > { %10605 = vmatprep.subr.bf16.mxu1 %v10604_v46 }
0x1355   : > { %10607 = vmatpush1.bf16.msra.mxu1 %v10606_v37  ;;  %v18429_v37 = vld [vmem:[#allocation99_spill] sm:$0xff] }
0x1356   : > { %v16321_v42 = vadd.f32 %v15106_v3, %v18429_v37 }
0x1358   : > { %7380 = vmatmul.mubr.f32.vlgmr.msra.gmra.mrb[76].mxu1 %v15674_v35 }
0x1359   : > { %7385 = vmatprep.mubr.f32.mxu1 %v15691_v2 }
0x135c   : > { %7386 = vmatmul.mubr.f32.gmra.mrb[78].mxu1 %v15694_v36 }
0x135d   : > { %8398 = vmatprep.mubr.f32.mxu1 %v18401_v47 }
0x136b   : > { %v7150_v48 = vpop.f32.mrb[64].mxu1 }
0x136c   : > { %v7151_v35 = vadd.f32 %v7150_v48, %v16271_v30  ;;  %v7152_v2 = vpop.f32.mrb[65].mxu1 }
0x136d   : > { %v7153_v36 = vadd.f32 %v7152_v2, %v16275_v17 }
0x136e   : > { %v7404_v58 = vmul.f32 %v16267_v63, %v7151_v35 }
0x136f   : > { %v7405_v40 = vmul.f32 %v16267_v63, %v7153_v36  ;;  %v7156_v28 = vpop.f32.mrb[66].mxu1 }
0x1370   : > { %v7157_v38 = vadd.f32 %v7156_v28, %v16283_v51  ;;  %v7158_v19 = vpop.f32.mrb[67].mxu1  ;;  %v7428_v4 = vadd.f32 %v16277_v16, %v7404_v58 }
0x1371   : > { %v7159_v31 = vadd.f32 %v7158_v19, %v16288_v57  ;;  %v7429_v61 = vadd.f32 %v16277_v16, %v7405_v40 }
0x1372   : > { %v7412_v14 = vmul.f32 %v16291_v22, %v7157_v38  ;;  %v7444_v45 = vmax.f32 %v7428_v4, 0.0 }
0x1373   : > { %v7413_v6 = vmul.f32 %v16291_v22, %v7159_v31  ;;  %v7445_v12 = vmax.f32 %v7429_v61, 0.0  ;;  %v18431_v31 = vld [vmem:[#allocation108_spill] sm:$0xff]  ;;  %v18434_v61 = vld [vmem:[#allocation171_spill] sm:$0xff] }
0x1374   : > { %v7436_v0 = vadd.f32 %v16295_v50, %v7412_v14  ;;  %v18432_v14 = vld [vmem:[#allocation123_spill] sm:$0xff] }
0x1375   : > { %v7437_v26 = vadd.f32 %v16295_v50, %v7413_v6  ;;  %v16345_v4 = vadd.f32 %v18432_v14, %v18431_v31  ;;  %v18433_v6 = vld [vmem:[#allocation109_spill] sm:$0xff] }
0x1376   : > { %v7452_v39 = vmax.f32 %v7436_v0, 0.0  ;;  %v16349_v0 = vadd.f32 %v18434_v61, %v18433_v6  ;;  %v18441_v61 = vld [vmem:[#allocation106_spill] sm:$0xff] }
0x1377   : > { %v7453_v8 = vmax.f32 %v7437_v26, 0.0 }
0x1378   : > { %v10610_v23 = vpack.c.bf16 %v7452_v39, %v7444_v45 }
0x1379   : > { %v10608_v55 = vpack.c.bf16 %v7453_v8, %v7445_v12  ;;  %v18435_v12 = vld [vmem:[#allocation110_spill] sm:$0xff]  ;;  %v18436_v8 = vld [vmem:[#allocation149_spill] sm:$0xff] }
0x137b   : > { %10609 = vmatprep.subr.bf16.mxu0 %v10608_v55  ;;  %v18437_v55 = vld [vmem:[#allocation111_spill] sm:$0xff] }
0x137c   : > { %10611 = vmatpush1.bf16.msra.mxu0 %v10610_v23  ;;  %v16355_v23 = vadd.f32 %v18436_v8, %v18435_v12  ;;  %v16360_v59 = vadd.f32 %v18438_v53, %v18437_v55 }
0x137f   : > { %9777 = vmatmul.mubr.msk.f32.vlgmr.msra.gmra.mrb[52].mxu0 %vm433_vm0, %v15647_v54 }
0x1380   : > { %7534 = vmatprep.mubr.f32.mxu0 %v18401_v47 }
0x1383   : > { %9778 = vmatmul.mubr.msk.f32.gmra.mrb[54].mxu0 %vm433_vm0, %v15654_v44 }
0x1384   : > { %7605 = vmatprep.mubr.f32.mxu0 %v18401_v47 }
0x13ab   : > { %v7227_v62 = vpop.f32.mrb[68].mxu1 }
0x13ac   : > { %v7228_v46 = vadd.f32 %v7227_v62, %v16311_v1  ;;  %v7229_v41 = vpop.f32.mrb[69].mxu1 }
0x13ad   : > { %v7230_v7 = vadd.f32 %v7229_v41, %v16315_v24 }
0x13ae   : > { %v7406_v43 = vmul.f32 %v16267_v63, %v7228_v46 }
0x13af   : > { %v7407_v20 = vmul.f32 %v16267_v63, %v7230_v7  ;;  %v7233_v10 = vpop.f32.mrb[70].mxu1 }
0x13b0   : > { %v7234_v48 = vadd.f32 %v7233_v10, %v16321_v42  ;;  %v7235_v35 = vpop.f32.mrb[71].mxu1  ;;  %v7430_v36 = vadd.f32 %v16277_v16, %v7406_v43 }
0x13b1   : > { %v7236_v2 = vadd.f32 %v7235_v35, %v16326_v5  ;;  %v7431_v3 = vadd.f32 %v16277_v16, %v7407_v20 }
0x13b2   : > { %v7414_v52 = vmul.f32 %v16291_v22, %v7234_v48  ;;  %v7446_v18 = vmax.f32 %v7430_v36, 0.0 }
0x13b3   : > { %v7415_v27 = vmul.f32 %v16291_v22, %v7236_v2  ;;  %v7447_v40 = vmax.f32 %v7431_v3, 0.0 }
0x13b4   : > { %v7438_v58 = vadd.f32 %v16295_v50, %v7414_v52 }
0x13b5   : > { %v7439_v13 = vadd.f32 %v16295_v50, %v7415_v27 }
0x13b6   : > { %v7454_v25 = vmax.f32 %v7438_v58, 0.0 }
0x13b7   : > { %v7455_v28 = vmax.f32 %v7439_v13, 0.0  ;;  %v10936_v13 = vld [vmem:[%s17262_s1 + $0x30] sm:$0xff] }
0x13b8   : > { %v10614_v38 = vpack.c.bf16 %v7454_v25, %v7446_v18  ;;  %v10937_v18 = vld [vmem:[%s17262_s1 + $0x68] sm:$0xff] }
0x13b9   : > { %v10612_v19 = vpack.c.bf16 %v7455_v28, %v7447_v40  ;;  %v18439_v25 = vld [vmem:[#allocation104_spill] sm:$0xff]  ;;  %v18440_v28 = vld [vmem:[#allocation105_spill] sm:$0xff] }
0x13ba   : > { %v16383_v40 = vadd.f32 %v15125_v21, %v18439_v25 }
0x13bb   : > { %10613 = vmatprep.subr.bf16.mxu0 %v10612_v19 }
0x13bc   : > { %10615 = vmatpush1.bf16.msra.mxu0 %v10614_v38  ;;  %v16387_v38 = vadd.f32 %v15127_v49, %v18440_v28 }
0x13bf   : > { %9779 = vmatmul.mubr.msk.f32.vlgmr.msra.gmra.mrb[56].mxu0 %vm433_vm0, %v15647_v54 }
0x13c0   : > { %7611 = vmatprep.mubr.f32.mxu0 %v18401_v47 }
0x13c3   : > { %9780 = vmatmul.mubr.msk.f32.gmra.mrb[58].mxu0 %vm433_vm0, %v15654_v44 }
0x13c4   : > { %7682 = vmatprep.mubr.f32.mxu0 %v18401_v47 }
0x13eb   : > { %v7304_v26 = vpop.f32.mrb[72].mxu1 }
0x13ec   : > { %v7305_v45 = vadd.f32 %v7304_v26, %v16345_v4  ;;  %v7306_v39 = vpop.f32.mrb[73].mxu1  ;;  %v16393_v26 = vadd.f32 %v15129_v56, %v18441_v61 }
0x13ed   : > { %v7307_v54 = vadd.f32 %v7306_v39, %v16349_v0  ;;  %v18442_v39 = vld [vmem:[#allocation107_spill] sm:$0xff] }
0x13ee   : > { %v7408_v44 = vmul.f32 %v16267_v63, %v7305_v45  ;;  %v16398_v21 = vadd.f32 %v15131_v9, %v18442_v39 }
0x13ef   : > { %v7409_v62 = vmul.f32 %v16267_v63, %v7307_v54  ;;  %v7310_v46 = vpop.f32.mrb[74].mxu1 }
0x13f0   : > { %v7311_v41 = vadd.f32 %v7310_v46, %v16355_v23  ;;  %v7312_v7 = vpop.f32.mrb[75].mxu1  ;;  %v7432_v43 = vadd.f32 %v16277_v16, %v7408_v44 }
0x13f1   : > { %v7313_v37 = vadd.f32 %v7312_v7, %v16360_v59  ;;  %v7433_v20 = vadd.f32 %v16277_v16, %v7409_v62 }
0x13f2   : > { %v7416_v60 = vmul.f32 %v16291_v22, %v7311_v41  ;;  %v7448_v2 = vmax.f32 %v7432_v43, 0.0 }
0x13f3   : > { %v7417_v10 = vmul.f32 %v16291_v22, %v7313_v37  ;;  %v7449_v52 = vmax.f32 %v7433_v20, 0.0 }
0x13f4   : > { %v7440_v48 = vadd.f32 %v16295_v50, %v7416_v60 }
0x13f5   : > { %v7441_v35 = vadd.f32 %v16295_v50, %v7417_v10 }
0x13f6   : > { %v7456_v36 = vmax.f32 %v7440_v48, 0.0 }
0x13f7   : > { %v7457_v3 = vmax.f32 %v7441_v35, 0.0 }
0x13f8   : > { %v10618_v27 = vpack.c.bf16 %v7456_v36, %v7448_v2 }
0x13f9   : > { %v10616_v58 = vpack.c.bf16 %v7457_v3, %v7449_v52 }
0x13fb   : > { %10617 = vmatprep.subr.bf16.mxu0 %v10616_v58 }
0x13fc   : > { %10619 = vmatpush1.bf16.msra.mxu0 %v10618_v27 }
0x13ff   : > { %9781 = vmatmul.mubr.msk.f32.vlgmr.msra.gmra.mrb[60].mxu0 %vm433_vm0, %v10936_v13 }
0x1400   : > { %7688 = vmatprep.mubr.f32.mxu0 %v18401_v47 }
0x1403   : > { %9782 = vmatmul.mubr.msk.f32.gmra.mrb[62].mxu0 %vm433_vm0, %v10937_v18 }
0x1404   : > { %7759 = vmatprep.mubr.f32.mxu0 %v18401_v47 }
0x142b   : > { %v7381_v19 = vpop.f32.mrb[76].mxu1 }
0x142c   : > { %v7382_v31 = vadd.f32 %v7381_v19, %v16383_v40  ;;  %v7383_v14 = vpop.f32.mrb[77].mxu1 }
0x142d   : > { %v7384_v6 = vadd.f32 %v7383_v14, %v16387_v38 }
0x142e   : > { %v7410_v45 = vmul.f32 %v16267_v63, %v7382_v31 }
0x142f   : > { %v7411_v54 = vmul.f32 %v16267_v63, %v7384_v6  ;;  %v7387_v49 = vpop.f32.mrb[78].mxu1 }
0x1430   : > { %v7388_v12 = vadd.f32 %v7387_v49, %v16393_v26  ;;  %v7389_v8 = vpop.f32.mrb[79].mxu1  ;;  %v7434_v55 = vadd.f32 %v16277_v16, %v7410_v45  ;;  %v16435_v45 = vld [vmem:[%s17262_s1 + $0x28] sm:$0xff] }
0x1431   : > { %v7390_v44 = vadd.f32 %v7389_v8, %v16398_v21  ;;  %v7435_v56 = vadd.f32 %v16277_v16, %v7411_v54  ;;  %v16413_v16 = vpop.permute.xlu1 %7777  ;;  %8268 = vperm.xlu0 %10836, %v16435_v45  }
0x1432   : > { %v7418_v53 = vmul.f32 %v16291_v22, %v7388_v12  ;;  %v7450_v41 = vmax.f32 %v7434_v55, 0.0 }
0x1433   : > { %v7419_v62 = vmul.f32 %v16291_v22, %v7390_v44  ;;  %v7451_v7 = vmax.f32 %v7435_v56, 0.0  ;;  %v16415_v22 = vpop.permute.xlu0 %7773 }
0x1434   : > { %v7442_v46 = vadd.f32 %v16295_v50, %v7418_v53 }
0x1435   : > { %v7443_v9 = vadd.f32 %v16295_v50, %v7419_v62  ;;  %v16417_v20 = vpop.permute.xlu1 %7797  ;;  %10839 = vset.pattern.permute.xlu0 %v18414_v11 }
0x1436   : > { %v7458_v63 = vmax.f32 %v7442_v46, 0.0 }
0x1437   : > { %v7459_v37 = vmax.f32 %v7443_v9, 0.0  ;;  %v16422_v52 = vpop.permute.xlu0 %7801 }
0x1438   : > { %v10622_v43 = vpack.c.bf16 %v7458_v63, %v7450_v41 }
0x1439   : > { %v10620_v60 = vpack.c.bf16 %v7459_v37, %v7451_v7  ;;  %v16440_v54 = vpop.permute.xlu1 %7836 }
0x143b   : > { %10621 = vmatprep.subr.bf16.mxu0 %v10620_v60 }
0x143c   : > { %10623 = vmatpush1.bf16.msra.mxu0 %v10622_v43 }
0x143d   : > { %v16447_v49 = vpop.permute.xlu1 %7838 }
0x143f   : > { %9783 = vmatmul.mubr.msk.f32.vlgmr.msra.gmra.mrb[64].mxu0 %vm433_vm0, %v10936_v13 }
0x1440   : > { %7765 = vmatprep.mubr.f32.mxu0 %v18401_v47 }
0x1443   : > { %9784 = vmatmul.mubr.msk.f32.gmra.mrb[66].mxu0 %vm433_vm0, %v10937_v18  ;;  %v8265_v18 = vld [vmem:[%s17262_s1 + $0x60] sm:$0xff] }
0x1444   : > { %7908 = vmatprep.mubr.f32.mxu0 %v18401_v47  ;;  %8273 = vperm.xlu1 %10837, %v8265_v18  }
0x1445   : > { %8297 = vperm.xlu0 %10839, %v8265_v18  }
0x1448   : > { %10838 = vset.pattern.permute.xlu1 %v18414_v11 }
0x1449   : > { %8293 = vperm.xlu1 %10838, %v16435_v45   ;;  %10843 = vset.pattern.permute.xlu0 %v18418_v29 }
0x144d   : > { %10840 = vset.pattern.permute.xlu1 %v18415_v15 }
0x144e   : > { %8619 = vperm.xlu1 %10840, %v16435_v45  }
0x1452   : > { %v7530_v50 = vpop.f32.mrb[52].mxu0  ;;  %10841 = vset.pattern.permute.xlu1 %v18417_v32 }
0x1453   : > { %v7532_v10 = vpop.f32.mrb[53].mxu0  ;;  %v7780_v48 = vmul.f32 %v16415_v22, %v7530_v50  ;;  %8631 = vperm.xlu1 %10841, %v16435_v45  }
0x1454   : > { %v7781_v35 = vmul.f32 %v16415_v22, %v7532_v10 }
0x1455   : > { %v7804_v2 = vadd.f32 %v16417_v20, %v7780_v48 }
0x1456   : > { %v7536_v36 = vpop.f32.mrb[54].mxu0  ;;  %v7805_v3 = vadd.f32 %v16417_v20, %v7781_v35 }
0x1457   : > { %v7788_v27 = vmul.f32 %v16413_v16, %v7536_v36  ;;  %v7538_v58 = vpop.f32.mrb[55].mxu0  ;;  %v7820_v28 = vmax.f32 %v7804_v2, 0.0  ;;  %10842 = vset.pattern.permute.xlu1 %v18416_v34 }
0x1458   : > { %v7789_v13 = vmul.f32 %v16413_v16, %v7538_v58  ;;  %v7821_v31 = vmax.f32 %v7805_v3, 0.0 }
0x1459   : > { %v7812_v25 = vadd.f32 %v16422_v52, %v7788_v27 }
0x145a   : > { %v7813_v19 = vadd.f32 %v16422_v52, %v7789_v13 }
0x145b   : > { %v7828_v14 = vmax.f32 %v7812_v25, 0.0 }
0x145c   : > { %v7829_v6 = vmax.f32 %v7813_v19, 0.0 }
0x145d   : > { %v10626_v61 = vpack.c.bf16 %v7828_v14, %v7820_v28 }
0x145e   : > { %v10624_v39 = vpack.c.bf16 %v7829_v6, %v7821_v31 }
0x1460   : > { %10625 = vmatprep.subr.bf16.mxu0 %v10624_v39 }
0x1461   : > { %10627 = vmatpush1.bf16.msra.mxu0 %v10626_v61 }
0x1464   : > { %9785 = vmatmul.mubr.msk.f32.vlgmr.msra.gmra.mrb[68].mxu0 %vm433_vm0, %v16440_v54 }
0x1465   : > { %7914 = vmatprep.mubr.f32.mxu0 %v18401_v47 }
0x1468   : > { %9786 = vmatmul.mubr.msk.f32.gmra.mrb[70].mxu0 %vm433_vm0, %v16447_v49 }
0x1469   : > { %7985 = vmatprep.mubr.f32.mxu0 %v18401_v47 }
0x1492   : > { %v7607_v11 = vpop.f32.mrb[56].mxu0 }
0x1493   : > { %v7782_v15 = vmul.f32 %v16415_v22, %v7607_v11  ;;  %v7609_v12 = vpop.f32.mrb[57].mxu0 }
0x1494   : > { %v7783_v8 = vmul.f32 %v16415_v22, %v7609_v12 }
0x1495   : > { %v7806_v44 = vadd.f32 %v16417_v20, %v7782_v15 }
0x1496   : > { %v7807_v32 = vadd.f32 %v16417_v20, %v7783_v8  ;;  %v7613_v29 = vpop.f32.mrb[58].mxu0 }
0x1497   : > { %v7790_v55 = vmul.f32 %v16413_v16, %v7613_v29  ;;  %v7615_v53 = vpop.f32.mrb[59].mxu0  ;;  %v7822_v62 = vmax.f32 %v7806_v44, 0.0 }
0x1498   : > { %v7791_v56 = vmul.f32 %v16413_v16, %v7615_v53  ;;  %v7823_v34 = vmax.f32 %v7807_v32, 0.0 }
0x1499   : > { %v7814_v46 = vadd.f32 %v16422_v52, %v7790_v55 }
0x149a   : > { %v7815_v9 = vadd.f32 %v16422_v52, %v7791_v56 }
0x149b   : > { %v7830_v41 = vmax.f32 %v7814_v46, 0.0 }
0x149c   : > { %v7831_v63 = vmax.f32 %v7815_v9, 0.0 }
0x149d   : > { %v10630_v7 = vpack.c.bf16 %v7830_v41, %v7822_v62 }
0x149e   : > { %v10628_v37 = vpack.c.bf16 %v7831_v63, %v7823_v34 }
0x14a0   : > { %10629 = vmatprep.subr.bf16.mxu0 %v10628_v37 }
0x14a1   : > { %10631 = vmatpush1.bf16.msra.mxu0 %v10630_v7 }
0x14a4   : > { %9787 = vmatmul.mubr.msk.f32.vlgmr.msra.gmra.mrb[72].mxu0 %vm433_vm0, %v16440_v54 }
0x14a5   : > { %7991 = vmatprep.mubr.f32.mxu0 %v18401_v47 }
0x14a8   : > { %9788 = vmatmul.mubr.msk.f32.gmra.mrb[74].mxu0 %vm433_vm0, %v16447_v49 }
0x14a9   : > { %8062 = vmatprep.mubr.f32.mxu0 %v18401_v47 }
0x14d2   : > { %v7684_v43 = vpop.f32.mrb[60].mxu0 }
0x14d3   : > { %v7784_v60 = vmul.f32 %v16415_v22, %v7684_v43  ;;  %v7686_v50 = vpop.f32.mrb[61].mxu0 }
0x14d4   : > { %v7785_v10 = vmul.f32 %v16415_v22, %v7686_v50 }
0x14d5   : > { %v7808_v35 = vadd.f32 %v16417_v20, %v7784_v60 }
0x14d6   : > { %v7690_v48 = vpop.f32.mrb[62].mxu0  ;;  %v7809_v3 = vadd.f32 %v16417_v20, %v7785_v10 }
0x14d7   : > { %v7792_v2 = vmul.f32 %v16413_v16, %v7690_v48  ;;  %v7692_v36 = vpop.f32.mrb[63].mxu0  ;;  %v7824_v18 = vmax.f32 %v7808_v35, 0.0 }
0x14d8   : > { %v7793_v27 = vmul.f32 %v16413_v16, %v7692_v36  ;;  %v7825_v28 = vmax.f32 %v7809_v3, 0.0 }
0x14d9   : > { %v7816_v58 = vadd.f32 %v16422_v52, %v7792_v2 }
0x14da   : > { %v7817_v13 = vadd.f32 %v16422_v52, %v7793_v27 }
0x14db   : > { %v7832_v25 = vmax.f32 %v7816_v58, 0.0 }
0x14dc   : > { %v7833_v19 = vmax.f32 %v7817_v13, 0.0 }
0x14dd   : > { %v10634_v31 = vpack.c.bf16 %v7832_v25, %v7824_v18 }
0x14de   : > { %v10632_v14 = vpack.c.bf16 %v7833_v19, %v7825_v28  ;;  %v16499_v28 = vpop.permute.xlu1 %8273 }
0x14e0   : > { %10633 = vmatprep.subr.bf16.mxu0 %v10632_v14  ;;  %v16504_v14 = vpop.permute.xlu0 %8268 }
0x14e1   : > { %10635 = vmatpush1.bf16.msra.mxu0 %v10634_v31 }
0x14e4   : > { %9789 = vmatmul.mubr.msk.f32.vlgmr.msra.gmra.mrb[76].mxu0 %vm433_vm0, %v16440_v54 }
0x14e5   : > { %8068 = vmatprep.mubr.f32.mxu0 %v18401_v47 }
0x14e8   : > { %9790 = vmatmul.mubr.msk.f32.gmra.mrb[78].mxu0 %vm433_vm0, %v16447_v49 }
0x14e9   : > { %8139 = vmatprep.mubr.f32.mxu0 %v18401_v47 }
0x1512   : > { %v7761_v6 = vpop.f32.mrb[64].mxu0 }
0x1513   : > { %v7786_v61 = vmul.f32 %v16415_v22, %v7761_v6  ;;  %v7763_v39 = vpop.f32.mrb[65].mxu0 }
0x1514   : > { %v7787_v11 = vmul.f32 %v16415_v22, %v7763_v39 }
0x1515   : > { %v7810_v12 = vadd.f32 %v16417_v20, %v7786_v61 }
0x1516   : > { %v7767_v15 = vpop.f32.mrb[66].mxu0  ;;  %v7811_v32 = vadd.f32 %v16417_v20, %v7787_v11 }
0x1517   : > { %v7794_v8 = vmul.f32 %v16413_v16, %v7767_v15  ;;  %v7769_v44 = vpop.f32.mrb[67].mxu0  ;;  %v7826_v56 = vmax.f32 %v7810_v12, 0.0 }
0x1518   : > { %v7795_v29 = vmul.f32 %v16413_v16, %v7769_v44  ;;  %v7827_v46 = vmax.f32 %v7811_v32, 0.0  ;;  %v16514_v44 = vpop.permute.xlu1 %8293 }
0x1519   : > { %v7818_v55 = vadd.f32 %v16422_v52, %v7794_v8 }
0x151a   : > { %v7819_v53 = vadd.f32 %v16422_v52, %v7795_v29  ;;  %v16521_v29 = vpop.permute.xlu0 %8297 }
0x151b   : > { %v7834_v62 = vmax.f32 %v7818_v55, 0.0 }
0x151c   : > { %v7835_v34 = vmax.f32 %v7819_v53, 0.0 }
0x151d   : > { %v10638_v9 = vpack.c.bf16 %v7834_v62, %v7826_v56 }
0x151e   : > { %v10636_v22 = vpack.c.bf16 %v7835_v34, %v7827_v46 }
0x1520   : > { %10637 = vmatprep.subr.bf16.mxu0 %v10636_v22 }
0x1521   : > { %10639 = vmatpush1.bf16.msra.mxu0 %v10638_v9 }
0x1524   : > { %9791 = vmatmul.mubr.msk.f32.vlgmr.msra.gmra.mrb[80].mxu0 %vm433_vm0, %v16440_v54 }
0x1525   : > { %8145 = vmatprep.mubr.f32.mxu0 %v18401_v47 }
0x1528   : > { %9792 = vmatmul.mubr.msk.f32.gmra.mrb[82].mxu0 %vm433_vm0, %v16447_v49 }
0x1529   : > { %8469 = vmatprep.mubr.f32.mxu0 %v18401_v47 }
0x1537   : > { %v7910_v16 = vpop.f32.mrb[68].mxu0 }
0x1538   : > { %v8152_v20 = vsub.f32 0.0, %v7910_v16  ;;  %v7912_v52 = vpop.f32.mrb[69].mxu0 }
0x1539   : > { %v8153_v41 = vsub.f32 0.0, %v7912_v52 }
0x153a   : > { %v8168_v63 = vmul.f32 1.442695, %v8152_v20 }
0x153b   : > { %v8170_v7 = vmul.f32 1.442695, %v8153_v41  ;;  %v7916_v37 = vpop.f32.mrb[70].mxu0 }
0x153c   : > { %10844 = vpow2.f32 %v8168_v63  ;;  %v8160_v43 = vsub.f32 0.0, %v7916_v37  ;;  %v7918_v60 = vpop.f32.mrb[71].mxu0 }
0x153d   : > { %10846 = vpow2.f32 %v8170_v7  ;;  %v8161_v50 = vsub.f32 0.0, %v7918_v60 }
0x153e   : > { %v8184_v54 = vmul.f32 1.442695, %v8160_v43 }
0x153f   : > { %v8186_v10 = vmul.f32 1.442695, %v8161_v50 }
0x1540   : > { %10848 = vpow2.f32 %v8184_v54 }
0x1541   : > { %10850 = vpow2.f32 %v8186_v10 }
0x1546   : > { %v10845_v48 = vpop.eup %10844 }
0x1547   : > { %v10847_v49 = vpop.eup %10846  ;;  %v8200_v35 = vadd.f32 1.0, %v10845_v48 }
0x1548   : > { %v8201_v2 = vadd.f32 1.0, %v10847_v49 }
0x1549   : > { %10852 = vrcp.f32 %v8200_v35 }
0x154a   : > { %v10849_v36 = vpop.eup %10848  ;;  %10854 = vrcp.f32 %v8201_v2 }
0x154b   : > { %v10851_v3 = vpop.eup %10850  ;;  %v8208_v27 = vadd.f32 1.0, %v10849_v36 }
0x154c   : > { %v8209_v58 = vadd.f32 1.0, %v10851_v3 }
0x154d   : > { %10856 = vrcp.f32 %v8208_v27 }
0x154e   : > { %10858 = vrcp.f32 %v8209_v58 }
0x1553   : > { %v10853_v13 = vpop.eup %10852 }
0x1554   : > { %v10855_v18 = vpop.eup %10854  ;;  %v8232_v25 = vadd.f32 1.0, %v10853_v13 }
0x1555   : > { %v8233_v19 = vadd.f32 1.0, %v10855_v18 }
0x1556   : > { %v16502_v31 = vmul.f32 %v8232_v25, %v16271_v30 }
0x1557   : > { %v10857_v6 = vpop.eup %10856  ;;  %v16507_v61 = vmul.f32 %v8233_v19, %v16275_v17 }
0x1558   : > { %18443 = vst [vmem:[#allocation173_spill] sm:$0xff] %v16502_v31  ;;  %v10859_v39 = vpop.eup %10858  ;;  %v8240_v11 = vadd.f32 1.0, %v10857_v6  ;;  %v8276_v30 = vmul.f32 %v16504_v14, %v16502_v31 }
0x1559   : > { %18444 = vst [vmem:[#allocation152_spill] sm:$0xff] %v16507_v61  ;;  %v8241_v15 = vadd.f32 1.0, %v10859_v39  ;;  %v8277_v12 = vmul.f32 %v16504_v14, %v16507_v61 }
0x155a   : > { %v16512_v8 = vmul.f32 %v8240_v11, %v16283_v51  ;;  %v8300_v51 = vadd.f32 %v16514_v44, %v8276_v30 }
0x155b   : > { %v16519_v32 = vmul.f32 %v8241_v15, %v16288_v57  ;;  %v8301_v53 = vadd.f32 %v16514_v44, %v8277_v12 }
0x155c   : > { %18445 = vst [vmem:[#allocation177_spill] sm:$0xff] %v16512_v8  ;;  %v8284_v17 = vmul.f32 %v16499_v28, %v16512_v8  ;;  %v8316_v9 = vmax.f32 %v8300_v51, 0.0 }
0x155d   : > { %18446 = vst [vmem:[#allocation176_spill] sm:$0xff] %v16519_v32  ;;  %v8285_v55 = vmul.f32 %v16499_v28, %v16519_v32  ;;  %v8317_v34 = vmax.f32 %v8301_v53, 0.0  ;;  %v18495_v32 = vld [vmem:[#allocation60_spill] sm:$0xff] }
0x155e   : > { %v8308_v56 = vadd.f32 %v16521_v29, %v8284_v17 }
0x155f   : > { %v8309_v62 = vadd.f32 %v16521_v29, %v8285_v55 }
0x1560   : > { %v8324_v46 = vmax.f32 %v8308_v56, 0.0 }
0x1561   : > { %v8325_v57 = vmax.f32 %v8309_v62, 0.0 }
0x1562   : > { %v10642_v16 = vpack.c.bf16 %v8324_v46, %v8316_v9 }
0x1563   : > { %v10640_v22 = vpack.c.bf16 %v8325_v57, %v8317_v34 }
0x1565   : > { %10641 = vmatprep.subr.bf16.mxu1 %v10640_v22 }
0x1566   : > { %10643 = vmatpush1.bf16.msra.mxu1 %v10642_v16 }
0x1569   : > { %9793 = vmatmul.mubr.msk.f32.vlgmr.msra.gmra.mrb[80].mxu1 %vm433_vm0, %v16435_v45 }
0x156a   : > { %8540 = vmatprep.mubr.f32.mxu1 %v18401_v47 }
0x1577   : > { %v7987_v20 = vpop.f32.mrb[72].mxu0 }
0x1578   : > { %v8154_v52 = vsub.f32 0.0, %v7987_v20  ;;  %v7989_v41 = vpop.f32.mrb[73].mxu0 }
0x1579   : > { %v8155_v63 = vsub.f32 0.0, %v7989_v41 }
0x157a   : > { %v8172_v7 = vmul.f32 1.442695, %v8154_v52 }
0x157b   : > { %v8174_v37 = vmul.f32 1.442695, %v8155_v63  ;;  %v7993_v43 = vpop.f32.mrb[74].mxu0 }
0x157c   : > { %10860 = vpow2.f32 %v8172_v7  ;;  %v8162_v60 = vsub.f32 0.0, %v7993_v43  ;;  %v7995_v50 = vpop.f32.mrb[75].mxu0 }
0x157d   : > { %10862 = vpow2.f32 %v8174_v37  ;;  %v8163_v54 = vsub.f32 0.0, %v7995_v50 }
0x157e   : > { %v8188_v10 = vmul.f32 1.442695, %v8162_v60 }
0x157f   : > { %v8190_v48 = vmul.f32 1.442695, %v8163_v54 }
0x1580   : > { %10864 = vpow2.f32 %v8188_v10 }
0x1581   : > { %10866 = vpow2.f32 %v8190_v48 }
0x1586   : > { %v10861_v49 = vpop.eup %10860 }
0x1587   : > { %v10863_v35 = vpop.eup %10862  ;;  %v8202_v2 = vadd.f32 1.0, %v10861_v49 }
0x1588   : > { %v8203_v36 = vadd.f32 1.0, %v10863_v35 }
0x1589   : > { %10868 = vrcp.f32 %v8202_v2 }
0x158a   : > { %v10865_v3 = vpop.eup %10864  ;;  %10870 = vrcp.f32 %v8203_v36 }
0x158b   : > { %v10867_v27 = vpop.eup %10866  ;;  %v8210_v58 = vadd.f32 1.0, %v10865_v3 }
0x158c   : > { %v8211_v13 = vadd.f32 1.0, %v10867_v27 }
0x158d   : > { %10872 = vrcp.f32 %v8210_v58 }
0x158e   : > { %10874 = vrcp.f32 %v8211_v13 }
0x1593   : > { %v10869_v18 = vpop.eup %10868 }
0x1594   : > { %v10871_v25 = vpop.eup %10870  ;;  %v8234_v19 = vadd.f32 1.0, %v10869_v18 }
0x1595   : > { %v8235_v6 = vadd.f32 1.0, %v10871_v25 }
0x1596   : > { %v16535_v39 = vmul.f32 %v8234_v19, %v16311_v1 }
0x1597   : > { %v10873_v11 = vpop.eup %10872  ;;  %v16538_v15 = vmul.f32 %v8235_v6, %v16315_v24 }
0x1598   : > { %v10875_v12 = vpop.eup %10874  ;;  %v8242_v30 = vadd.f32 1.0, %v10873_v11  ;;  %v8278_v53 = vmul.f32 %v16504_v14, %v16535_v39 }
0x1599   : > { %v8243_v17 = vadd.f32 1.0, %v10875_v12  ;;  %v8279_v55 = vmul.f32 %v16504_v14, %v16538_v15 }
0x159a   : > { %v16545_v51 = vmul.f32 %v8242_v30, %v16321_v42  ;;  %v8302_v46 = vadd.f32 %v16514_v44, %v8278_v53 }
0x159b   : > { %v16548_v56 = vmul.f32 %v8243_v17, %v16326_v5  ;;  %v8303_v62 = vadd.f32 %v16514_v44, %v8279_v55 }
0x159c   : > { %18447 = vst [vmem:[#allocation225_spill] sm:$0xff] %v16545_v51  ;;  %v8286_v1 = vmul.f32 %v16499_v28, %v16545_v51  ;;  %v8318_v16 = vmax.f32 %v8302_v46, 0.0 }
0x159d   : > { %18448 = vst [vmem:[#allocation179_spill] sm:$0xff] %v16548_v56  ;;  %v8287_v24 = vmul.f32 %v16499_v28, %v16548_v56  ;;  %v8319_v42 = vmax.f32 %v8303_v62, 0.0 }
0x159e   : > { %v8310_v34 = vadd.f32 %v16521_v29, %v8286_v1 }
0x159f   : > { %v8311_v57 = vadd.f32 %v16521_v29, %v8287_v24 }
0x15a0   : > { %v8326_v9 = vmax.f32 %v8310_v34, 0.0 }
0x15a1   : > { %v8327_v22 = vmax.f32 %v8311_v57, 0.0 }
0x15a2   : > { %v10646_v20 = vpack.c.bf16 %v8326_v9, %v8318_v16 }
0x15a3   : > { %v10644_v5 = vpack.c.bf16 %v8327_v22, %v8319_v42 }
0x15a5   : > { %10645 = vmatprep.subr.bf16.mxu0 %v10644_v5 }
0x15a6   : > { %10647 = vmatpush1.bf16.msra.mxu0 %v10646_v20 }
0x15a9   : > { %9794 = vmatmul.mubr.msk.f32.vlgmr.msra.gmra.mrb[84].mxu0 %vm433_vm0, %v16435_v45 }
0x15aa   : > { %8611 = vmatprep.mubr.f32.mxu0 %v18401_v47 }
0x15b7   : > { %v8064_v52 = vpop.f32.mrb[76].mxu0 }
0x15b8   : > { %v8156_v41 = vsub.f32 0.0, %v8064_v52  ;;  %v8066_v63 = vpop.f32.mrb[77].mxu0 }
0x15b9   : > { %v8157_v7 = vsub.f32 0.0, %v8066_v63 }
0x15ba   : > { %v8176_v37 = vmul.f32 1.442695, %v8156_v41 }
0x15bb   : > { %v8178_v43 = vmul.f32 1.442695, %v8157_v7  ;;  %v8070_v60 = vpop.f32.mrb[78].mxu0 }
0x15bc   : > { %10876 = vpow2.f32 %v8176_v37  ;;  %v8164_v50 = vsub.f32 0.0, %v8070_v60  ;;  %v8072_v54 = vpop.f32.mrb[79].mxu0 }
0x15bd   : > { %10878 = vpow2.f32 %v8178_v43  ;;  %v8165_v10 = vsub.f32 0.0, %v8072_v54 }
0x15be   : > { %v8192_v48 = vmul.f32 1.442695, %v8164_v50 }
0x15bf   : > { %v8194_v49 = vmul.f32 1.442695, %v8165_v10 }
0x15c0   : > { %10880 = vpow2.f32 %v8192_v48 }
0x15c1   : > { %10882 = vpow2.f32 %v8194_v49 }
0x15c6   : > { %v10877_v35 = vpop.eup %10876 }
0x15c7   : > { %v10879_v2 = vpop.eup %10878  ;;  %v8204_v36 = vadd.f32 1.0, %v10877_v35 }
0x15c8   : > { %v8205_v3 = vadd.f32 1.0, %v10879_v2 }
0x15c9   : > { %10884 = vrcp.f32 %v8204_v36 }
0x15ca   : > { %v10881_v27 = vpop.eup %10880  ;;  %10886 = vrcp.f32 %v8205_v3 }
0x15cb   : > { %v10883_v58 = vpop.eup %10882  ;;  %v8212_v13 = vadd.f32 1.0, %v10881_v27 }
0x15cc   : > { %v8213_v18 = vadd.f32 1.0, %v10883_v58 }
0x15cd   : > { %10888 = vrcp.f32 %v8212_v13 }
0x15ce   : > { %10890 = vrcp.f32 %v8213_v18 }
0x15d3   : > { %v10885_v25 = vpop.eup %10884 }
0x15d4   : > { %v10887_v19 = vpop.eup %10886  ;;  %v8236_v6 = vadd.f32 1.0, %v10885_v25 }
0x15d5   : > { %v8237_v11 = vadd.f32 1.0, %v10887_v19 }
0x15d6   : > { %v16562_v12 = vmul.f32 %v8236_v6, %v16345_v4 }
0x15d7   : > { %v10889_v30 = vpop.eup %10888  ;;  %v16565_v17 = vmul.f32 %v8237_v11, %v16349_v0 }
0x15d8   : > { %18449 = vst [vmem:[#allocation182_spill] sm:$0xff] %v16562_v12  ;;  %v10891_v55 = vpop.eup %10890  ;;  %v8244_v53 = vadd.f32 1.0, %v10889_v30  ;;  %v8280_v62 = vmul.f32 %v16504_v14, %v16562_v12 }
0x15d9   : > { %18450 = vst [vmem:[#allocation181_spill] sm:$0xff] %v16565_v17  ;;  %v8245_v1 = vadd.f32 1.0, %v10891_v55  ;;  %v8281_v24 = vmul.f32 %v16504_v14, %v16565_v17  ;;  %v18494_v17 = vld [vmem:[#allocation41_spill] sm:$0xff] }
0x15da   : > { %v16572_v46 = vmul.f32 %v8244_v53, %v16355_v23  ;;  %v8304_v9 = vadd.f32 %v16514_v44, %v8280_v62 }
0x15db   : > { %v16575_v34 = vmul.f32 %v8245_v1, %v16360_v59  ;;  %v8305_v57 = vadd.f32 %v16514_v44, %v8281_v24 }
0x15dc   : > { %18451 = vst [vmem:[#allocation228_spill] sm:$0xff] %v16572_v46  ;;  %v8288_v4 = vmul.f32 %v16499_v28, %v16572_v46  ;;  %v8320_v20 = vmax.f32 %v8304_v9, 0.0 }
0x15dd   : > { %18452 = vst [vmem:[#allocation187_spill] sm:$0xff] %v16575_v34  ;;  %v8289_v0 = vmul.f32 %v16499_v28, %v16575_v34  ;;  %v8321_v23 = vmax.f32 %v8305_v57, 0.0  ;;  %v18471_v34 = vld [vmem:[#allocation19_spill] sm:$0xff] }
0x15de   : > { %v8312_v42 = vadd.f32 %v16521_v29, %v8288_v4 }
0x15df   : > { %v8313_v22 = vadd.f32 %v16521_v29, %v8289_v0 }
0x15e0   : > { %v8328_v16 = vmax.f32 %v8312_v42, 0.0 }
0x15e1   : > { %v8329_v5 = vmax.f32 %v8313_v22, 0.0 }
0x15e2   : > { %v10650_v52 = vpack.c.bf16 %v8328_v16, %v8320_v20 }
0x15e3   : > { %v10648_v59 = vpack.c.bf16 %v8329_v5, %v8321_v23 }
0x15e5   : > { %10649 = vmatprep.subr.bf16.mxu1 %v10648_v59 }
0x15e6   : > { %10651 = vmatpush1.bf16.msra.mxu1 %v10650_v52 }
0x15e9   : > { %9795 = vmatmul.mubr.msk.f32.vlgmr.msra.gmra.mrb[82].mxu1 %vm433_vm0, %v16435_v45 }
0x15ea   : > { %8982 = vmatprep.mubr.f32.mxu1 %v18401_v47 }
0x15f7   : > { %v8141_v41 = vpop.f32.mrb[80].mxu0 }
0x15f8   : > { %v8158_v63 = vsub.f32 0.0, %v8141_v41  ;;  %v8143_v7 = vpop.f32.mrb[81].mxu0 }
0x15f9   : > { %v8159_v37 = vsub.f32 0.0, %v8143_v7 }
0x15fa   : > { %v8180_v43 = vmul.f32 1.442695, %v8158_v63 }
0x15fb   : > { %v8182_v60 = vmul.f32 1.442695, %v8159_v37  ;;  %v8147_v50 = vpop.f32.mrb[82].mxu0 }
0x15fc   : > { %10892 = vpow2.f32 %v8180_v43  ;;  %v8166_v54 = vsub.f32 0.0, %v8147_v50  ;;  %v8149_v10 = vpop.f32.mrb[83].mxu0 }
0x15fd   : > { %10894 = vpow2.f32 %v8182_v60  ;;  %v8167_v48 = vsub.f32 0.0, %v8149_v10 }
0x15fe   : > { %v8196_v49 = vmul.f32 1.442695, %v8166_v54 }
0x15ff   : > { %v8198_v35 = vmul.f32 1.442695, %v8167_v48 }
0x1600   : > { %10896 = vpow2.f32 %v8196_v49 }
0x1601   : > { %10898 = vpow2.f32 %v8198_v35 }
0x1606   : > { %v10893_v2 = vpop.eup %10892 }
0x1607   : > { %v10895_v36 = vpop.eup %10894  ;;  %v8206_v3 = vadd.f32 1.0, %v10893_v2 }
0x1608   : > { %v8207_v27 = vadd.f32 1.0, %v10895_v36 }
0x1609   : > { %10900 = vrcp.f32 %v8206_v3 }
0x160a   : > { %v10897_v58 = vpop.eup %10896  ;;  %10902 = vrcp.f32 %v8207_v27 }
0x160b   : > { %v10899_v13 = vpop.eup %10898  ;;  %v8214_v18 = vadd.f32 1.0, %v10897_v58 }
0x160c   : > { %v8215_v25 = vadd.f32 1.0, %v10899_v13 }
0x160d   : > { %10904 = vrcp.f32 %v8214_v18 }
0x160e   : > { %10906 = vrcp.f32 %v8215_v25 }
0x1613   : > { %v10901_v19 = vpop.eup %10900 }
0x1614   : > { %v10903_v6 = vpop.eup %10902  ;;  %v8238_v11 = vadd.f32 1.0, %v10901_v19 }
0x1615   : > { %v8239_v30 = vadd.f32 1.0, %v10903_v6 }
0x1616   : > { %v16589_v55 = vmul.f32 %v8238_v11, %v16383_v40 }
0x1617   : > { %v10905_v53 = vpop.eup %10904  ;;  %v16592_v1 = vmul.f32 %v8239_v30, %v16387_v38 }
0x1618   : > { %18453 = vst [vmem:[#allocation186_spill] sm:$0xff] %v16589_v55  ;;  %v10907_v24 = vpop.eup %10906  ;;  %v8246_v62 = vadd.f32 1.0, %v10905_v53  ;;  %v8282_v57 = vmul.f32 %v16504_v14, %v16589_v55 }
0x1619   : > { %18454 = vst [vmem:[#allocation184_spill] sm:$0xff] %v16592_v1  ;;  %v8247_v4 = vadd.f32 1.0, %v10907_v24  ;;  %v8283_v0 = vmul.f32 %v16504_v14, %v16592_v1 }
0x161a   : > { %v16599_v9 = vmul.f32 %v8246_v62, %v16393_v26  ;;  %v8306_v16 = vadd.f32 %v16514_v44, %v8282_v57  ;;  %v18458_v57 = vld [vmem:[#allocation13_spill] sm:$0xff] }
0x161b   : > { %v16602_v42 = vmul.f32 %v8247_v4, %v16398_v21  ;;  %v8307_v22 = vadd.f32 %v16514_v44, %v8283_v0 }
0x161c   : > { %18455 = vst [vmem:[#allocation189_spill] sm:$0xff] %v16599_v9  ;;  %v8290_v40 = vmul.f32 %v16499_v28, %v16599_v9  ;;  %v8322_v59 = vmax.f32 %v8306_v16, 0.0  ;;  %v18459_v16 = vld [vmem:[#allocation14_spill] sm:$0xff] }
0x161d   : > { %18456 = vst [vmem:[#allocation126_spill] sm:$0xff] %v16602_v42  ;;  %v8291_v38 = vmul.f32 %v16499_v28, %v16602_v42  ;;  %v8323_v26 = vmax.f32 %v8307_v22, 0.0  ;;  %v16615_v28 = vpop.permute.xlu1 %8619  ;;  %v18470_v42 = vld [vmem:[#allocation18_spill] sm:$0xff] }
0x161e   : > { %v8314_v23 = vadd.f32 %v16521_v29, %v8290_v40 }
0x161f   : > { %v8315_v14 = vadd.f32 %v16521_v29, %v8291_v38 }
0x1620   : > { %v8330_v5 = vmax.f32 %v8314_v23, 0.0 }
0x1621   : > { %v8331_v20 = vmax.f32 %v8315_v14, 0.0  ;;  %v16617_v41 = vpop.permute.xlu1 %8631 }
0x1622   : > { %v10654_v52 = vpack.c.bf16 %v8330_v5, %v8322_v59 }
0x1623   : > { %v10652_v21 = vpack.c.bf16 %v8331_v20, %v8323_v26 }
0x1625   : > { %10653 = vmatprep.subr.bf16.mxu0 %v10652_v21 }
0x1626   : > { %10655 = vmatpush1.bf16.msra.mxu0 %v10654_v52 }
0x1629   : > { %9796 = vmatmul.mubr.msk.f32.vlgmr.msra.gmra.mrb[86].mxu0 %vm433_vm0, %v16435_v45  ;;  %vm18478_vm0 = vcmp.lt.s32.totalorder %v11419_v33, 111 }
0x162a   : > { %9053 = vmatprep.mubr.f32.mxu0 %v18401_v47  ;;  %vm18490_vm8 = vmmov %vm18478_vm0 }
0x162b   : > { %vm18491_vm11 = vmmov %vm18478_vm0 }
0x163c   : > { %v8400_v44 = vpop.f32.mrb[80].mxu1 }
0x163d   : > { %v8622_v29 = vmul.f32 %v16615_v28, %v8400_v44  ;;  %v8402_v63 = vpop.f32.mrb[81].mxu1  ;;  %v18460_v44 = vld [vmem:[#allocation42_spill] sm:$0xff] }
0x163e   : > { %v8623_v43 = vmul.f32 %v16615_v28, %v8402_v63 }
0x163f   : > { %v8634_v7 = vadd.f32 %v16617_v41, %v8622_v29 }
0x1640   : > { %v8635_v60 = vadd.f32 %v16617_v41, %v8623_v43  ;;  %v18461_v43 = vld [vmem:[#allocation39_spill] sm:$0xff] }
0x1641   : > { %v16621_v37 = vmax.f32 %v8634_v7, 0.0 }
0x1642   : > { %v16633_v50 = vmax.f32 %v8635_v60, 0.0 }
0x1643   : > { %8650 = vrot.lane.b32.xlu0 %v16621_v37, %s11014_s20  ;;  %8818 = vrot.lane.b32.xlu1 %v16621_v37, %s11018_s11 }
0x1647   : > { %8682 = vrot.lane.b32.xlu0 %v16621_v37, %s11016_s27  ;;  %8882 = vrot.lane.b32.xlu1 %v16621_v37, %s11019_s12 }
0x164b   : > { %8714 = vrot.lane.b32.xlu0 %v16621_v37, %s18457_s13  ;;  %8652 = vrot.lane.b32.xlu1 %v16633_v50, %s11014_s20 }
0x164f   : > { %8746 = vrot.lane.b32.xlu0 %v16621_v37, %s11017_s8  ;;  %8684 = vrot.lane.b32.xlu1 %v16633_v50, %s11016_s27 }
0x1653   : > { %8786 = vrot.lane.b32.xlu0 %v16621_v37, %s11013_s19  ;;  %8716 = vrot.lane.b32.xlu1 %v16633_v50, %s18457_s13 }
0x1657   : > { %8850 = vrot.lane.b32.xlu0 %v16621_v37, %s11012_s18  ;;  %8748 = vrot.lane.b32.xlu1 %v16633_v50, %s11017_s8 }
0x165b   : > { %8788 = vrot.lane.b32.xlu0 %v16633_v50, %s11013_s19  ;;  %8820 = vrot.lane.b32.xlu1 %v16633_v50, %s11018_s11 }
0x165f   : > { %8852 = vrot.lane.b32.xlu1 %v16633_v50, %s11012_s18 }
0x1663   : > { %8884 = vrot.lane.b32.xlu1 %v16633_v50, %s11019_s12 }
0x167c   : > { %v8471_v54 = vpop.f32.mrb[84].mxu0 }
0x167d   : > { %v8624_v10 = vmul.f32 %v16615_v28, %v8471_v54  ;;  %v8473_v48 = vpop.f32.mrb[85].mxu0 }
0x167e   : > { %v8625_v49 = vmul.f32 %v16615_v28, %v8473_v48 }
0x167f   : > { %v8636_v35 = vadd.f32 %v16617_v41, %v8624_v10 }
0x1680   : > { %v8637_v2 = vadd.f32 %v16617_v41, %v8625_v49 }
0x1681   : > { %v16663_v36 = vmax.f32 %v8636_v35, 0.0  ;;  %v18462_v35 = vld [vmem:[#allocation43_spill] sm:$0xff] }
0x1682   : > { %v16669_v3 = vmax.f32 %v8637_v2, 0.0  ;;  %v16762_v2 = vmul.f32 %v16621_v37, %v18462_v35 }
0x1683   : > { %8790 = vrot.lane.b32.xlu1 %v16663_v36, %s11013_s19  ;;  %8654 = vrot.lane.b32.xlu0 %v16663_v36, %s11014_s20 }
0x1687   : > { %8686 = vrot.lane.b32.xlu0 %v16663_v36, %s11016_s27  ;;  %8656 = vrot.lane.b32.xlu1 %v16669_v3, %s11014_s20 }
0x168b   : > { %8718 = vrot.lane.b32.xlu0 %v16663_v36, %s18457_s13  ;;  %8688 = vrot.lane.b32.xlu1 %v16669_v3, %s11016_s27 }
0x168f   : > { %8750 = vrot.lane.b32.xlu0 %v16663_v36, %s11017_s8  ;;  %8720 = vrot.lane.b32.xlu1 %v16669_v3, %s18457_s13 }
0x1693   : > { %8822 = vrot.lane.b32.xlu0 %v16663_v36, %s11018_s11  ;;  %8752 = vrot.lane.b32.xlu1 %v16669_v3, %s11017_s8 }
0x1697   : > { %8854 = vrot.lane.b32.xlu0 %v16663_v36, %s11012_s18  ;;  %8824 = vrot.lane.b32.xlu1 %v16669_v3, %s11018_s11 }
0x169b   : > { %8886 = vrot.lane.b32.xlu0 %v16663_v36, %s11019_s12  ;;  %8856 = vrot.lane.b32.xlu1 %v16669_v3, %s11012_s18 }
0x169f   : > { %8792 = vrot.lane.b32.xlu0 %v16669_v3, %s11013_s19  ;;  %8888 = vrot.lane.b32.xlu1 %v16669_v3, %s11019_s12 }
0x16b5   : > { %v16699_v27 = vpop.permute.xlu0 %8650  ;;  %v16701_v58 = vpop.permute.xlu1 %8818 }
0x16b9   : > { %v16703_v13 = vpop.permute.xlu0 %8682  ;;  %v16705_v18 = vpop.permute.xlu1 %8882 }
0x16bc   : > { %v8542_v25 = vpop.f32.mrb[82].mxu1 }
0x16bd   : > { %v8626_v19 = vmul.f32 %v16615_v28, %v8542_v25  ;;  %v8544_v6 = vpop.f32.mrb[83].mxu1  ;;  %v16708_v11 = vpop.permute.xlu0 %8714  ;;  %v18463_v25 = vld [vmem:[#allocation51_spill] sm:$0xff] }
0x16be   : > { %v8653_v30 = vpop.permute.xlu1 %8652  ;;  %v8627_v4 = vmul.f32 %v16615_v28, %v8544_v6 }
0x16bf   : > { %v8638_v53 = vadd.f32 %v16617_v41, %v8626_v19  ;;  %v8672_v24 = vsel %vm770_vm1, %v16699_v27, %v8653_v30 }
0x16c0   : > { %v8675_v40 = vmul.f32 %v8672_v24, %v18458_v57  ;;  %v8639_v14 = vadd.f32 %v16617_v41, %v8627_v4  ;;  %v18464_v24 = vld [vmem:[#allocation52_spill] sm:$0xff] }
0x16c1   : > { %v16714_v62 = vmax.f32 %v8638_v53, 0.0  ;;  %v16717_v0 = vpop.permute.xlu0 %8746 }
0x16c2   : > { %v8685_v38 = vpop.permute.xlu1 %8684  ;;  %v16738_v21 = vmax.f32 %v8639_v14, 0.0 }
0x16c3   : > { %8826 = vrot.lane.b32.xlu0 %v16714_v62, %s11018_s11  ;;  %8794 = vrot.lane.b32.xlu1 %v16714_v62, %s11013_s19  ;;  %v8704_v22 = vsel %vm835_vm2, %v16703_v13, %v8685_v38 }
0x16c4   : > { %v8707_v23 = vmul.f32 %v8704_v22, %v18459_v16 }
0x16c5   : > { %v16729_v5 = vpop.permute.xlu0 %8786 }
0x16c6   : > { %v8717_v26 = vpop.permute.xlu1 %8716  ;;  %v10656_v20 = vpack.c.bf16 %v8707_v23, %v8675_v40  ;;  %v18465_v40 = vld [vmem:[#allocation54_spill] sm:$0xff] }
0x16c7   : > { %8858 = vrot.lane.b32.xlu0 %v16714_v62, %s11012_s18  ;;  %8658 = vrot.lane.b32.xlu1 %v16714_v62, %s11014_s20  ;;  %v8736_v59 = vsel %vm900_vm4, %v16708_v11, %v8717_v26 }
0x16c8   : > { %10657 = vmatprep.subr.bf16.mxu1 %v10656_v20  ;;  %v16743_v29 = vmul.f32 %v8736_v59, %v18460_v44  ;;  %v18466_v44 = vld [vmem:[#allocation47_spill] sm:$0xff] }
0x16c9   : > { %v16740_v52 = vpop.permute.xlu0 %8850 }
0x16ca   : > { %v8749_v63 = vpop.permute.xlu1 %8748 }
0x16cb   : > { %8690 = vrot.lane.b32.xlu0 %v16714_v62, %s11016_s27  ;;  %8692 = vrot.lane.b32.xlu1 %v16738_v21, %s11016_s27  ;;  %v8768_v7 = vsel %vm965_vm3, %v16717_v0, %v8749_v63 }
0x16cc   : > { %v16753_v60 = vmul.f32 %v8768_v7, %v18461_v43  ;;  %v18467_v43 = vld [vmem:[#allocation44_spill] sm:$0xff] }
0x16cd   : > { %v8789_v54 = vpop.permute.xlu0 %8788 }
0x16ce   : > { %v8808_v10 = vsel %vm1070_vm5, %v16729_v5, %v8789_v54  ;;  %v8821_v48 = vpop.permute.xlu1 %8820 }
0x16cf   : > { %v16765_v19 = vmul.f32 %v8808_v10, %v18463_v25  ;;  %8890 = vrot.lane.b32.xlu0 %v16714_v62, %s11019_s12  ;;  %8724 = vrot.lane.b32.xlu1 %v16738_v21, %s18457_s13  ;;  %v8840_v6 = vsel %vm1135_vm7, %v16701_v58, %v8821_v48  ;;  %v16803_v10 = vmul.f32 %v16633_v50, %v18467_v43 }
0x16d0   : > { %v16777_v4 = vmul.f32 %v8840_v6, %v18464_v24 }
0x16d2   : > { %v8853_v37 = vpop.permute.xlu1 %8852 }
0x16d3   : > { %8722 = vrot.lane.b32.xlu0 %v16714_v62, %s18457_s13  ;;  %v8872_v57 = vsel %vm1200_vm6, %v16740_v52, %v8853_v37 }
0x16d4   : > { %v16785_v22 = vmul.f32 %v8872_v57, %v18465_v40 }
0x16d6   : > { %v16791_v23 = vpop.permute.xlu1 %8884 }
0x16d7   : > { %8660 = vrot.lane.b32.xlu0 %v16738_v21, %s11014_s20 }
0x16f5   : > { %v16793_v14 = vpop.permute.xlu1 %8790  ;;  %v8655_v20 = vpop.permute.xlu0 %8654 }
0x16f6   : > { %v8807_v59 = vsel %vm1070_vm5, %v8789_v54, %v16793_v14  ;;  %v8671_v24 = vsel %vm770_vm1, %v8653_v30, %v8655_v20 }
0x16f7   : > { %v16799_v7 = vmul.f32 %v8807_v59, %v18466_v44  ;;  %v18468_v59 = vld [vmem:[#allocation20_spill] sm:$0xff]  ;;  %v18469_v44 = vld [vmem:[#allocation17_spill] sm:$0xff] }
0x16f8   : > { %v8676_v50 = vmul.f32 %v8671_v24, %v18468_v59 }
0x16f9   : > { %v8687_v35 = vpop.permute.xlu0 %8686  ;;  %v16805_v25 = vpop.permute.xlu1 %8656 }
0x16fa   : > { %v8703_v57 = vsel %vm835_vm2, %v8685_v38, %v8687_v35  ;;  %v8670_v54 = vsel %vm770_vm1, %v8655_v20, %v16805_v25 }
0x16fb   : > { %v8708_v43 = vmul.f32 %v8703_v57, %v18469_v44  ;;  %v8677_v30 = vmul.f32 %v8670_v54, %v18470_v42 }
0x16fc   : > { %v8613_v40 = vpop.f32.mrb[86].mxu0 }
0x16fd   : > { %v8628_v16 = vmul.f32 %v16615_v28, %v8613_v40  ;;  %v8719_v53 = vpop.permute.xlu0 %8718  ;;  %v8615_v49 = vpop.f32.mrb[87].mxu0  ;;  %v10674_v59 = vpack.c.bf16 %v8708_v43, %v8676_v50  ;;  %v18474_v43 = vld [vmem:[#allocation24_spill] sm:$0xff] }
0x16fe   : > { %v8629_v6 = vmul.f32 %v16615_v28, %v8615_v49  ;;  %v16821_v9 = vpop.permute.xlu1 %8688  ;;  %v8735_v28 = vsel %vm900_vm4, %v8717_v26, %v8719_v53 }
0x16ff   : > { %v8640_v38 = vadd.f32 %v16617_v41, %v8628_v16  ;;  %v8702_v20 = vsel %vm835_vm2, %v8687_v35, %v16821_v9 }
0x1700   : > { %v8709_v24 = vmul.f32 %v8702_v20, %v18471_v34  ;;  %v8641_v40 = vadd.f32 %v16617_v41, %v8629_v6  ;;  %v18472_v41 = vld [vmem:[#allocation26_spill] sm:$0xff]  ;;  %v18473_v6 = vld [vmem:[#allocation23_spill] sm:$0xff]  ;;  %v18475_v20 = vld [vmem:[#allocation25_spill] sm:$0xff] }
0x1701   : > { %v16828_v57 = vmax.f32 %v8640_v38, 0.0  ;;  %v8751_v44 = vpop.permute.xlu0 %8750  ;;  %v8740_v35 = vmul.f32 %v8735_v28, %v18472_v41 }
0x1702   : > { %v8767_v42 = vsel %vm965_vm3, %v8749_v63, %v8751_v44  ;;  %v16835_v49 = vpop.permute.xlu1 %8720  ;;  %v10672_v16 = vpack.c.bf16 %v8709_v24, %v8677_v30  ;;  %v16845_v26 = vmax.f32 %v8641_v40, 0.0  ;;  %v18476_v40 = vld [vmem:[#allocation53_spill] sm:$0xff] }
0x1703   : > { %8694 = vrot.lane.b32.xlu0 %v16828_v57, %s11016_s27  ;;  %8662 = vrot.lane.b32.xlu1 %v16828_v57, %s11014_s20  ;;  %v8734_v34 = vsel %vm900_vm4, %v8719_v53, %v16835_v49  ;;  %v8772_v63 = vmul.f32 %v8767_v42, %v18473_v6 }
0x1704   : > { %10673 = vmatprep.subr.bf16.mxu0 %v10672_v16  ;;  %v8741_v30 = vmul.f32 %v8734_v34, %v18474_v43  ;;  %v18477_v34 = vld [vmem:[#allocation55_spill] sm:$0xff] }
0x1705   : > { %v8823_v54 = vpop.permute.xlu0 %8822  ;;  %10675 = vmatpush1.bf16.msra.mxu0 %v10674_v59  ;;  %v10678_v59 = vpack.c.bf16 %v8772_v63, %v8740_v35  ;;  %v18484_v35 = vld [vmem:[#allocation38_spill] sm:$0xff] }
0x1706   : > { %v8839_v50 = vsel %vm1135_vm7, %v8821_v48, %v8823_v54  ;;  %v16851_v38 = vpop.permute.xlu1 %8752 }
0x1707   : > { %8726 = vrot.lane.b32.xlu0 %v16828_v57, %s18457_s13  ;;  %8696 = vrot.lane.b32.xlu1 %v16845_v26, %s11016_s27  ;;  %v8766_v53 = vsel %vm965_vm3, %v8751_v44, %v16851_v38  ;;  %v16862_v28 = vmul.f32 %v8839_v50, %v18476_v40  ;;  %v18479_v50 = vld [vmem:[#allocation32_spill] sm:$0xff]  ;;  %s17197_s27 = scalar_lea.vmem [#allocation5], %s11167_s9  ;;  %s9815_s9 = sshll.u32 (%p18551_p9), %s11084_s24, 6 }
0x1708   : > { %v8773_v24 = vmul.f32 %v8766_v53, %v18475_v20  ;;  %v8780_v43 = vmul.f32 %v16663_v36, %v18479_v50 }
0x1709   : > { %v8855_v48 = vpop.permute.xlu0 %8854 }
0x170a   : > { %v8871_v42 = vsel %vm1200_vm6, %v8853_v37, %v8855_v48  ;;  %v10676_v16 = vpack.c.bf16 %v8773_v24, %v8741_v30  ;;  %v18480_v30 = vld [vmem:[#allocation29_spill] sm:$0xff]  ;;  %v8825_v36 = vpop.permute.xlu1 %8824 }
0x170b   : > { %v16867_v41 = vmul.f32 %v8871_v42, %v18477_v34  ;;  %8760 = vrot.lane.b32.xlu1 %v16845_v26, %s11017_s8  ;;  %8664 = vrot.lane.b32.xlu0 %v16845_v26, %s11014_s20 }
0x170c   : > { %10677 = vmatprep.subr.bf16.mxu0 %v10676_v16  ;;  %v8838_v16 = vsel %vm1135_vm7, %v8823_v54, %v8825_v36 }
0x170d   : > { %v16873_v44 = vpop.permute.xlu0 %8886  ;;  %10679 = vmatpush1.bf16.msra.mxu0 %v10678_v59 }
0x170e   : > { %v16881_v37 = vsel %vm18478_vm0, %v16791_v23, %v16873_v44 }
0x170f   : > { %8754 = vrot.lane.b32.xlu1 %v16714_v62, %s11017_s8  ;;  %8728 = vrot.lane.b32.xlu0 %v16845_v26, %s18457_s13 }
0x1711   : > { %v8793_v6 = vpop.permute.xlu0 %8792 }
0x1712   : > { %v8806_v63 = vsel %vm1070_vm5, %v16793_v14, %v8793_v6  ;;  %v10938_v14 = vld [vmem:[%s17262_s1 + $0x28] sm:$0xff] }
0x1713   : > { %v8812_v53 = vmul.f32 %v8806_v63, %v18480_v30  ;;  %8758 = vrot.lane.b32.xlu1 %v16828_v57, %s11017_s8  ;;  %8756 = vrot.lane.b32.xlu0 %v16738_v21, %s11017_s8  ;;  %v18482_v63 = vld [vmem:[#allocation30_spill] sm:$0xff] }
0x1715   : > { %v10682_v20 = vpack.c.bf16 %v8812_v53, %v8780_v43  ;;  %v18483_v43 = vld [vmem:[#allocation31_spill] sm:$0xff] }
0x1716   : > { %v8781_v30 = vmul.f32 %v16669_v3, %v18483_v43  ;;  %v10939_v53 = vld [vmem:[%s17262_s1 + $0x60] sm:$0xff]  ;;  %v18486_v43 = vld [vmem:[#allocation36_spill] sm:$0xff] }
0x1717   : > { %8796 = vrot.lane.b32.xlu1 %v16738_v21, %s11013_s19  ;;  %8914 = vrot.lane.b32.xlu0 %v16435_v45, %s11012_s18  ;;  %v8857_v45 = vpop.permute.xlu1 %8856 }
0x1718   : > { %v8870_v34 = vsel %vm1200_vm6, %v8855_v48, %v8857_v45 }
0x171b   : > { %8830 = vrot.lane.b32.xlu1 %v16828_v57, %s11018_s11  ;;  %8798 = vrot.lane.b32.xlu0 %v16828_v57, %s11013_s19  ;;  %v8889_v24 = vpop.permute.xlu1 %8888 }
0x171f   : > { %8860 = vrot.lane.b32.xlu1 %v16738_v21, %s11012_s18  ;;  %8828 = vrot.lane.b32.xlu0 %v16738_v21, %s11018_s11 }
0x1723   : > { %8800 = vrot.lane.b32.xlu1 %v16845_v26, %s11013_s19  ;;  %8862 = vrot.lane.b32.xlu0 %v16828_v57, %s11012_s18 }
0x1727   : > { %8864 = vrot.lane.b32.xlu1 %v16845_v26, %s11012_s18  ;;  %8832 = vrot.lane.b32.xlu0 %v16845_v26, %s11018_s11  ;;  %s18481_s18 = smov 40  }
0x172b   : > { %8894 = vrot.lane.b32.xlu1 %v16828_v57, %s11019_s12  ;;  %8892 = vrot.lane.b32.xlu0 %v16738_v21, %s11019_s12 }
0x172f   : > { %8896 = vrot.lane.b32.xlu0 %v16845_v26, %s11019_s12  ;;  %9203 = vperm.xlu1 %10842, %v10938_v14   ;;  %s9575_s12 = scalar_lea.vmem (%p18551_p9), %s17267_s6, %s9815_s9 }
0x1733   : > { %9215 = vperm.xlu0 %10843, %v10938_v14   ;;  %9234 = vrot.lane.b32.xlu1 %v10938_v14, %s18481_s18 }
0x1735   : > { %v16927_v59 = vpop.permute.xlu0 %8826  ;;  %v16929_v40 = vpop.permute.xlu1 %8794 }
0x1736   : > { %v8805_v42 = vsel %vm1070_vm5, %v8793_v6, %v16929_v40  ;;  %v8837_v6 = vsel %vm1135_vm7, %v8825_v36, %v16927_v59 }
0x1737   : > { %v8813_v50 = vmul.f32 %v8805_v42, %v18482_v63  ;;  %9236 = vrot.lane.b32.xlu1 %v10939_v53, %s18481_s18  ;;  %v8844_v42 = vmul.f32 %v8838_v16, %v18484_v35  ;;  %v18485_v63 = vld [vmem:[#allocation35_spill] sm:$0xff]  ;;  %v8845_v1 = vmul.f32 %v8837_v6, %v18486_v43  ;;  %v18487_v53 = vld [vmem:[#allocation37_spill] sm:$0xff] }
0x1738   : > { %v8876_v46 = vmul.f32 %v8870_v34, %v18485_v63  ;;  %v18488_v34 = vld [vmem:[#allocation56_spill] sm:$0xff]  ;;  %v18489_v6 = vld [vmem:[#allocation57_spill] sm:$0xff] }
0x1739   : > { %v16948_v14 = vpop.permute.xlu0 %8858  ;;  %v16950_v54 = vpop.permute.xlu1 %8658  ;;  %v10680_v48 = vpack.c.bf16 %v8813_v50, %v8781_v30 }
0x173a   : > { %v8869_v3 = vsel %vm1200_vm6, %v8857_v45, %v16948_v14  ;;  %v8669_v36 = vsel %vm770_vm1, %v16805_v25, %v16950_v54  ;;  %v10686_v16 = vpack.c.bf16 %v8876_v46, %v8844_v42  ;;  %v8902_v25 = vsel %vm18490_vm8, %v16873_v44, %v8889_v24  ;;  %v10941_v42 = vld [vmem:[%s17263_s2 + $0x50] ss:$0 sm:$0xff] }
0x173b   : > { %v8877_v55 = vmul.f32 %v8869_v3, %v18487_v53  ;;  %10681 = vmatprep.subr.bf16.mxu0 %v10680_v48  ;;  %v16970_v30 = vmul.f32 %v8669_v36, %v18488_v34  ;;  %v8908_v63 = vmul.f32 %v10941_v42, %v8902_v25 }
0x173c   : > { %10683 = vmatpush1.bf16.msra.mxu0 %v10682_v20 }
0x173d   : > { %v16963_v50 = vpop.permute.xlu0 %8690  ;;  %v10684_v35 = vpack.c.bf16 %v8877_v55, %v8845_v1  ;;  %v8693_v44 = vpop.permute.xlu1 %8692 }
0x173e   : > { %v8701_v45 = vsel %vm835_vm2, %v16821_v9, %v16963_v50  ;;  %v10940_v9 = vld [vmem:[%s17263_s2 + $0x58] ss:$0 sm:$0xff] }
0x173f   : > { %v16973_v48 = vmul.f32 %v8701_v45, %v18489_v6  ;;  %10685 = vmatprep.subr.bf16.mxu0 %v10684_v35 }
0x1740   : > { %10687 = vmatpush1.bf16.msra.mxu0 %v10686_v16 }
0x1741   : > { %v16980_v55 = vpop.permute.xlu0 %8890  ;;  %v16993_v43 = vpop.permute.xlu1 %8724 }
0x1742   : > { %v8901_v1 = vsel %vm18491_vm11, %v8889_v24, %v16980_v55 }
0x1743   : > { %v8909_v20 = vmul.f32 %v10940_v9, %v8901_v1 }
0x1745   : > { %9005 = vmatprep.subr.mxu0 %v8909_v20  ;;  %v16991_v3 = vpop.permute.xlu0 %8722  ;;  %v18492_v20 = vld [vmem:[#allocation40_spill] sm:$0xff] }
0x1746   : > { %9006 = vmatpush1.msra.mxu0 %v8908_v63  ;;  %v18493_v63 = vld [vmem:[#allocation61_spill] sm:$0xff] }
0x1749   : > { %v8661_v53 = vpop.permute.xlu0 %8660 }
0x1775   : > { %v8695_v36 = vpop.permute.xlu0 %8694  ;;  %v8663_v24 = vpop.permute.xlu1 %8662 }
0x1776   : > { %v8699_v51 = vsel %vm835_vm2, %v8693_v44, %v8695_v36 }
0x1779   : > { %v8727_v35 = vpop.permute.xlu0 %8726  ;;  %v8697_v16 = vpop.permute.xlu1 %8696 }
0x177a   : > { %v8698_v45 = vsel %vm835_vm2, %v8695_v36, %v8697_v16  ;;  %v8705_v34 = vsel %vm835_vm2, %v8697_v16, %v16703_v13  ;;  %v18500_v36 = vld [vmem:[#allocation64_spill] sm:$0xff] }
0x177b   : > { %v8706_v42 = vmul.f32 %v8705_v34, %v18492_v20  ;;  %v8713_v46 = vmul.f32 %v8698_v45, %v18493_v63  ;;  %v18496_v45 = vld [vmem:[#allocation49_spill] sm:$0xff]  ;;  %v18497_v34 = vld [vmem:[#allocation48_spill] sm:$0xff] }
0x177d   : > { %v8761_v6 = vpop.permute.xlu1 %8760  ;;  %v8665_v25 = vpop.permute.xlu0 %8664 }
0x177e   : > { %v8666_v1 = vsel %vm770_vm1, %v8663_v24, %v8665_v25  ;;  %v8673_v9 = vsel %vm770_vm1, %v8665_v25, %v16699_v27  ;;  %v8769_v13 = vsel %vm965_vm3, %v8761_v6, %v16717_v0  ;;  %v8667_v27 = vsel %vm770_vm1, %v8661_v53, %v8663_v24  ;;  %v18499_v0 = vld [vmem:[#allocation68_spill] sm:$0xff] }
0x177f   : > { %v8674_v12 = vmul.f32 %v8673_v9, %v18494_v17  ;;  %v8681_v8 = vmul.f32 %v8666_v1, %v18495_v32  ;;  %v8770_v32 = vmul.f32 %v8769_v13, %v18496_v45  ;;  %v8680_v24 = vmul.f32 %v8667_v27, %v18500_v36 }
0x1781   : > { %v10658_v16 = vpack.c.bf16 %v8706_v42, %v8674_v12  ;;  %v8755_v61 = vpop.permute.xlu1 %8754  ;;  %v8729_v31 = vpop.permute.xlu0 %8728  ;;  %v10704_v56 = vpack.c.bf16 %v8713_v46, %v8681_v8  ;;  %v18498_v8 = vpack.c.bf16 %v16753_v60, %v16743_v29  ;;  %v8712_v46 = vmul.f32 %v8699_v51, %v18499_v0  ;;  %v18501_v42 = vld [vmem:[#allocation62_spill] sm:$0xff] }
0x1782   : > { %v8737_v17 = vsel %vm900_vm4, %v8729_v31, %v16708_v11  ;;  %v8730_v12 = vsel %vm900_vm4, %v8727_v35, %v8729_v31  ;;  %v18502_v31 = vld [vmem:[#allocation76_spill] sm:$0xff]  ;;  %v8731_v51 = vsel %vm900_vm4, %v16993_v43, %v8727_v35  ;;  %v18503_v29 = vpack.c.bf16 %v16799_v7, %v16803_v10 }
0x1783   : > { %v8738_v25 = vmul.f32 %v8737_v17, %v18497_v34  ;;  %10659 = vmatpush1.bf16.msra.mxu1 %v10658_v16  ;;  %10705 = vmatprep.subr.bf16.mxu0 %v10704_v56  ;;  %v8745_v63 = vmul.f32 %v8730_v12, %v18501_v42  ;;  %v10706_v60 = vpack.c.bf16 %v8712_v46, %v8680_v24  ;;  %v18504_v16 = vld [vmem:[#allocation75_spill] sm:$0xff]  ;;  %v18505_v34 = vld [vmem:[#allocation66_spill] sm:$0xff]  ;;  %v18512_v24 = vld [vmem:[#allocation69_spill] sm:$0xff] }
0x1784   : > { %10661 = vmatprep.subr.bf16.mxu1 %v18498_v8  ;;  %v8744_v35 = vmul.f32 %v8731_v51, %v18505_v34  ;;  %v18506_v7 = vpack.c.bf16 %v16765_v19, %v16762_v2  ;;  %v18507_v10 = vpack.c.bf16 %v16867_v41, %v16862_v28  ;;  %v10942_v19 = vld [vmem:[%s17263_s2 + $0x48] ss:$0 sm:$0xff]  ;;  %v18509_v41 = vld [vmem:[#allocation63_spill] sm:$0xff]  ;;  %v18510_v0 = vpack.c.bf16 %v16785_v22, %v16777_v4 }
0x1785   : > { %v10662_v1 = vpack.c.bf16 %v8770_v32, %v8738_v25  ;;  %v8759_v9 = vpop.permute.xlu1 %8758  ;;  %v8757_v11 = vpop.permute.xlu0 %8756  ;;  %v8668_v32 = vsel %vm770_vm1, %v16950_v54, %v8661_v53  ;;  %v8700_v25 = vsel %vm835_vm2, %v16963_v50, %v8693_v44  ;;  %vm18508_vm1 = vmmov %vm18478_vm0  ;;  %v8907_v28 = vmul.f32 %v10942_v19, %v16881_v37  ;;  %v18511_v46 = vld [vmem:[#allocation67_spill] sm:$0xff]  ;;  %v18524_v19 = vld [vmem:[#allocation78_spill] sm:$0xff] }
0x1786   : > { %v8762_v20 = vsel %vm965_vm3, %v8759_v9, %v8761_v6  ;;  %v8763_v56 = vsel %vm965_vm3, %v8757_v11, %v8759_v9  ;;  %v8764_v12 = vsel %vm965_vm3, %v8755_v61, %v8757_v11  ;;  %v8904_v2 = vsel %vm18508_vm1, %v16705_v18, %v16791_v23  ;;  %v18514_v42 = vld [vmem:[#allocation59_spill] sm:$0xff]  ;;  %vm18533_vm2 = vmmov %vm18478_vm0 }
0x1787   : > { %v8777_v13 = vmul.f32 %v8762_v20, %v18502_v31  ;;  %10663 = vmatpush1.bf16.msra.mxu1 %v10662_v1  ;;  %v8776_v27 = vmul.f32 %v8763_v56, %v18504_v16  ;;  %v8679_v50 = vmul.f32 %v8668_v32, %v18509_v41  ;;  %v8732_v44 = vsel %vm900_vm4, %v16991_v3, %v16993_v43  ;;  %v10943_v1 = vld [vmem:[%s17263_s2 + $0x40] ss:$0 sm:$0xff]  ;;  %v18515_v31 = vld [vmem:[#allocation45_spill] sm:$0xff]  ;;  %v18518_v16 = vld [vmem:[#allocation70_spill] sm:$0xff] }
0x1788   : > { %10665 = vmatprep.subr.bf16.mxu1 %v18503_v29  ;;  %v8711_v23 = vmul.f32 %v8700_v25, %v18511_v46  ;;  %v8765_v36 = vsel %vm965_vm3, %v16851_v38, %v8755_v61  ;;  %v8775_v37 = vmul.f32 %v8764_v12, %v18512_v24  ;;  %v8906_v9 = vmul.f32 %v10943_v1, %v8904_v2  ;;  %v18513_v38 = vld [vmem:[#allocation65_spill] sm:$0xff]  ;;  %v18517_v29 = vld [vmem:[#allocation46_spill] sm:$0xff]  ;;  %v18527_v46 = vld [vmem:[#allocation72_spill] sm:$0xff] }
0x1789   : > { %v8797_v6 = vpop.permute.xlu1 %8796  ;;  %v17041_v17 = vpop.permute.xlu0 %8914  ;;  %v10708_v45 = vpack.c.bf16 %v8777_v13, %v8745_v63  ;;  %v10710_v54 = vpack.c.bf16 %v8776_v27, %v8744_v35  ;;  %v8733_v61 = vsel %vm900_vm4, %v16835_v49, %v16991_v3  ;;  %v8743_v20 = vmul.f32 %v8732_v44, %v18513_v38  ;;  %v18520_v3 = vld [vmem:[#allocation58_spill] sm:$0xff]  ;;  %v18525_v41 = vld [vmem:[#allocation77_spill] sm:$0xff]  ;;  %vm18534_vm3 = vmmov %vm18478_vm0 }
0x178a   : > { %9798 = vmatmul.mubr.msk.f32.vlgmr.msra.gmra.mrb[88].mxu0 %vm1316_vm9, %v17041_v17  ;;  %v8804_v43 = vsel %vm1070_vm5, %v16929_v40, %v8797_v6  ;;  %v10688_v56 = vpack.c.bf16 %v8711_v23, %v8679_v50  ;;  %v8774_v63 = vmul.f32 %v8765_v36, %v18514_v42  ;;  %v8782_v13 = vmul.f32 %v16714_v62, %v18515_v31  ;;  %v18516_v40 = vld [vmem:[#allocation50_spill] sm:$0xff]  ;;  %v18528_v23 = vld [vmem:[#allocation73_spill] sm:$0xff]  ;;  %vm18535_vm4 = vmmov %vm18478_vm0 }
0x178b   : > { %10707 = vmatpush1.bf16.msra.mxu0 %v10706_v60  ;;  %10667 = vmatpush1.bf16.msra.mxu1 %v18506_v7  ;;  %v8784_v51 = vmul.f32 %v16828_v57, %v18516_v40  ;;  %v8783_v60 = vmul.f32 %v16738_v21, %v18517_v29  ;;  %v8814_v27 = vmul.f32 %v8804_v43, %v18518_v16  ;;  %v18530_v38 = vld [vmem:[#allocation81_spill] sm:$0xff] }
0x178c   : > { %10709 = vmatprep.subr.bf16.mxu0 %v10708_v45  ;;  %10669 = vmatprep.subr.bf16.mxu1 %v18507_v10  ;;  %v10692_v49 = vpack.c.bf16 %v8775_v37, %v8743_v20  ;;  %v8742_v32 = vmul.f32 %v8733_v61, %v18520_v3  ;;  %v18521_v34 = vpack.c.bf16 %v16973_v48, %v16970_v30  ;;  %v18522_v48 = vld [vmem:[#allocation79_spill] sm:$0xff] }
0x178d   : > { %v17060_v53 = vpop.permute.xlu1 %8830  ;;  %v8799_v8 = vpop.permute.xlu0 %8798  ;;  %9195 = vmatprep.mubr.f32.mxu0 %v18401_v47  ;;  %v10945_v3 = vld [vmem:[%s17263_s2 + $0x60] ss:$0 sm:$0xff] }
0x178e   : > { %v8803_v4 = vsel %vm1070_vm5, %v8797_v6, %v8799_v8  ;;  %v18519_v6 = vld [vmem:[#allocation71_spill] sm:$0xff]  ;;  %v10694_v30 = vpack.c.bf16 %v8774_v63, %v8742_v32  ;;  %v18532_v63 = vld [vmem:[#allocation8_spill] sm:$0xff] }
0x178f   : > { %10711 = vmatpush1.bf16.msra.mxu0 %v10710_v54  ;;  %10671 = vmatpush1.bf16.msra.mxu1 %v18510_v0  ;;  %v8815_v45 = vmul.f32 %v8803_v4, %v18519_v6  ;;  %v18523_v54 = vld [vmem:[#allocation80_spill] sm:$0xff] }
0x1790   : > { %8934 = vmatprep.subr.mxu1 %v8907_v28  ;;  %v8785_v28 = vmul.f32 %v16845_v26, %v18524_v19 }
0x1791   : > { %v8861_v22 = vpop.permute.xlu1 %8860  ;;  %v8829_v11 = vpop.permute.xlu0 %8828  ;;  %v10696_v0 = vpack.c.bf16 %v8815_v45, %v8783_v60  ;;  %v10944_v60 = vld [vmem:[%s17263_s2 + $0x68] ss:$0 sm:$0xff] }
0x1792   : > { %v8868_v62 = vsel %vm1200_vm6, %v16948_v14, %v8861_v22  ;;  %v8835_v57 = vsel %vm1135_vm7, %v8829_v11, %v17060_v53  ;;  %v8836_v7 = vsel %vm1135_vm7, %v16927_v59, %v8829_v11  ;;  %v10698_v59 = vpack.c.bf16 %v8814_v27, %v8782_v13  ;;  %v18529_v11 = vld [vmem:[#allocation15_spill] sm:$0xff] }
0x1793   : > { %8935 = vmatpush1.msra.mxu1 %v8906_v9  ;;  %v8878_v50 = vmul.f32 %v8868_v62, %v18525_v41  ;;  %v8847_v36 = vmul.f32 %v8835_v57, %v18528_v23  ;;  %v10947_v57 = vld [vmem:[%s17263_s2 + $0x78] ss:$0 sm:$0xff] }
0x1794   : > { %9797 = vmatmul.mubr.msk.f32.vlgmr.msra.gmra.mrb[84].mxu1 %vm1316_vm9, %v17041_v17  ;;  %10689 = vmatprep.subr.bf16.mxu1 %v10688_v56  ;;  %v18531_v56 = vld [vmem:[#allocation7_spill] sm:$0xff] }
0x1795   : > { %v8801_v21 = vpop.permute.xlu1 %8800  ;;  %10691 = vmatpush1.bf16.msra.mxu1 %v18521_v34  ;;  %v8863_v35 = vpop.permute.xlu0 %8862  ;;  %9124 = vmatprep.mubr.f32.mxu1 %v18401_v47 }
0x1796   : > { %v8802_v10 = vsel %vm1070_vm5, %v8799_v8, %v8801_v21  ;;  %v8809_v14 = vsel %vm1070_vm5, %v8801_v21, %v16729_v5  ;;  %v8867_v25 = vsel %vm1200_vm6, %v8861_v22, %v8863_v35  ;;  %10693 = vmatprep.subr.bf16.mxu1 %v10692_v49  ;;  %v18526_v8 = vld [vmem:[#allocation74_spill] sm:$0xff]  ;;  %v8846_v5 = vmul.f32 %v8836_v7, %v18527_v46  ;;  %vm18536_vm5 = vmmov %vm18478_vm0 }
0x1797   : > { %v8816_v12 = vmul.f32 %v8802_v10, %v18522_v48  ;;  %v8817_v2 = vmul.f32 %v8809_v14, %v18523_v54  ;;  %v8879_v44 = vmul.f32 %v8867_v25, %v18526_v8 }
0x1798   : > { %v10702_v29 = vpack.c.bf16 %v8878_v50, %v8846_v5 }
0x1799   : > { %v10714_v24 = vpack.c.bf16 %v8816_v12, %v8784_v51  ;;  %v8865_v37 = vpop.permute.xlu1 %8864  ;;  %10695 = vmatpush1.bf16.msra.mxu1 %v10694_v30  ;;  %v8833_v1 = vpop.permute.xlu0 %8832  ;;  %v10712_v9 = vpack.c.bf16 %v8817_v2, %v8785_v28 }
0x179a   : > { %v8866_v43 = vsel %vm1200_vm6, %v8863_v35, %v8865_v37  ;;  %v8873_v26 = vsel %vm1200_vm6, %v8865_v37, %v16740_v52  ;;  %v8834_v4 = vsel %vm1135_vm7, %v17060_v53, %v8833_v1  ;;  %v8841_v22 = vsel %vm1135_vm7, %v8833_v1, %v16701_v58  ;;  %10697 = vmatprep.subr.bf16.mxu1 %v10696_v0 }
0x179b   : > { %v8880_v61 = vmul.f32 %v8866_v43, %v18529_v11  ;;  %v8881_v20 = vmul.f32 %v8873_v26, %v18530_v38  ;;  %v8848_v42 = vmul.f32 %v8834_v4, %v18531_v56  ;;  %v8849_v31 = vmul.f32 %v8841_v22, %v18532_v63  ;;  %10713 = vmatprep.subr.bf16.mxu0 %v10712_v9  ;;  %v18537_v63 = vld [vmem:[#allocation225_spill] sm:$0xff] }
0x179c   : > { %10715 = vmatpush1.bf16.msra.mxu0 %v10714_v24  ;;  %v10700_v52 = vpack.c.bf16 %v8879_v44, %v8847_v36 }
0x179d   : > { %v10718_v13 = vpack.c.bf16 %v8880_v61, %v8848_v42  ;;  %v8895_v40 = vpop.permute.xlu1 %8894  ;;  %10699 = vmatpush1.bf16.msra.mxu1 %v10698_v59  ;;  %v8893_v53 = vpop.permute.xlu0 %8892  ;;  %v10716_v51 = vpack.c.bf16 %v8881_v20, %v8849_v31 }
0x179e   : > { %v8899_v58 = vsel %vm18533_vm2, %v8893_v53, %v8895_v40  ;;  %10701 = vmatprep.subr.bf16.mxu1 %v10700_v52  ;;  %v8900_v27 = vsel %vm18534_vm3, %v16980_v55, %v8893_v53  ;;  %v10946_v55 = vld [vmem:[%s17263_s2 + $0x70] ss:$0 sm:$0xff] }
0x179f   : > { %v8911_v16 = vmul.f32 %v10944_v60, %v8899_v58  ;;  %10717 = vmatprep.subr.bf16.mxu0 %v10716_v51  ;;  %v8910_v32 = vmul.f32 %v10945_v3, %v8900_v27  ;;  %v18540_v58 = vld [vmem:[#allocation152_spill] sm:$0xff] }
0x17a0   : > { %10719 = vmatpush1.bf16.msra.mxu0 %v10718_v13 }
0x17a1   : > { %10703 = vmatpush1.bf16.msra.mxu1 %v10702_v29  ;;  %v8897_v6 = vpop.permute.xlu0 %8896 }
0x17a2   : > { %v8898_v45 = vsel %vm18535_vm4, %v8895_v40, %v8897_v6  ;;  %v8905_v49 = vsel %vm18536_vm5, %v8897_v6, %v16705_v18  ;;  %9076 = vmatprep.subr.mxu1 %v8911_v16  ;;  %v18539_v40 = vld [vmem:[#allocation173_spill] sm:$0xff] }
0x17a3   : > { %v8912_v62 = vmul.f32 %v10946_v55, %v8898_v45  ;;  %v8913_v21 = vmul.f32 %v10947_v57, %v8905_v49  ;;  %v18541_v16 = vld [vmem:[#allocation177_spill] sm:$0xff]  ;;  %v18542_v45 = vld [vmem:[#allocation176_spill] sm:$0xff] }
0x17a5   : > { %9077 = vmatpush1.msra.mxu1 %v8910_v32  ;;  %9147 = vmatprep.subr.mxu0 %v8913_v21  ;;  %v18543_v32 = vld [vmem:[#allocation182_spill] sm:$0xff]  ;;  %v18544_v21 = vld [vmem:[#allocation181_spill] sm:$0xff] }
0x17a6   : > { %9799 = vmatmul.mubr.msk.f32.vlgmr.msra.gmra.mrb[86].mxu1 %vm1316_vm9, %v17041_v17  ;;  %9148 = vmatpush1.msra.mxu0 %v8912_v62 }
0x17a7   : > { %9800 = vmatmul.mubr.msk.f32.vlgmr.msra.gmra.mrb[90].mxu0 %vm1316_vm9, %v17041_v17  ;;  %9306 = vmatprep.mubr.f32.mxu1 %v18401_v47 }
0x17a8   : > { %9383 = vmatprep.mubr.f32.mxu0 %v18401_v47 }
0x17ae   : > { %v9204_v33 = vpop.permute.xlu1 %9203 }
0x17b2   : > { %v9216_v34 = vpop.permute.xlu0 %9215  ;;  %v9235_v30 = vpop.permute.xlu1 %9234 }
0x17b6   : > { %v9237_v19 = vpop.permute.xlu1 %9236 }
0x185d   : > { %v9055_v18 = vpop.f32.mrb[88].mxu0 }
0x185e   : > { %v9208_v35 = vmul.f32 %v9204_v33, %v9055_v18  ;;  %v9057_v7 = vpop.f32.mrb[89].mxu0  ;;  %v18545_v18 = vld [vmem:[#allocation186_spill] sm:$0xff] }
0x185f   : > { %v9209_v10 = vmul.f32 %v9204_v33, %v9057_v7  ;;  %v18546_v7 = vld [vmem:[#allocation184_spill] sm:$0xff] }
0x1860   : > { %v9220_v14 = vadd.f32 %v9216_v34, %v9208_v35 }
0x1861   : > { %v9221_v25 = vadd.f32 %v9216_v34, %v9209_v10 }
0x1862   : > { %v9228_v12 = vmax.f32 %v9220_v14, 0.0 }
0x1863   : > { %v9229_v48 = vmax.f32 %v9221_v25, 0.0  ;;  %v18547_v25 = vld [vmem:[#allocation228_spill] sm:$0xff] }
0x1865   : > { %9319 = vmatprep.subr.mxu0 %v9229_v48 }
0x1866   : > { %9320 = vmatpush1.msra.mxu0 %v9228_v12 }
0x1867   : > { %v8984_v54 = vpop.f32.mrb[84].mxu1  ;;  %9803 = vmatmul.mubr.msk.f32.vlgmr.msra.gmra.mrb[92].mxu0 %vm1639_vm10, %v9235_v30 }
0x1868   : > { %v9206_v17 = vmul.f32 %v9204_v33, %v8984_v54  ;;  %v8986_v2 = vpop.f32.mrb[85].mxu1  ;;  %9389 = vmatprep.mubr.f32.mxu0 %v18401_v47  ;;  %v18548_v54 = vld [vmem:[#allocation187_spill] sm:$0xff] }
0x1869   : > { %v9207_v28 = vmul.f32 %v9204_v33, %v8986_v2  ;;  %v18549_v2 = vld [vmem:[#allocation189_spill] sm:$0xff] }
0x186a   : > { %v9218_v59 = vadd.f32 %v9216_v34, %v9206_v17 }
0x186b   : > { %v9219_v41 = vadd.f32 %v9216_v34, %v9207_v28  ;;  %9804 = vmatmul.mubr.msk.f32.gmra.mrb[94].mxu0 %vm1639_vm10, %v9237_v19 }
0x186c   : > { %9537 = vmatprep.mubr.f32.mxu0 %v18401_v47  ;;  %v9226_v8 = vmax.f32 %v9218_v59, 0.0  ;;  %v18550_v59 = vld [vmem:[#allocation126_spill] sm:$0xff] }
0x186d   : > { %v9227_v50 = vmax.f32 %v9219_v41, 0.0 }
0x186f   : > { %9242 = vmatprep.subr.mxu1 %v9227_v50 }
0x1870   : > { %9243 = vmatpush1.msra.mxu1 %v9226_v8 }
0x1871   : > { %9801 = vmatmul.mubr.msk.f32.vlgmr.msra.gmra.mrb[88].mxu1 %vm1639_vm10, %v9235_v30 }
0x1872   : > { %9312 = vmatprep.mubr.f32.mxu1 %v18401_v47 }
0x1875   : > { %9802 = vmatmul.mubr.msk.f32.gmra.mrb[90].mxu1 %vm1639_vm10, %v9237_v19 }
0x1876   : > { %9460 = vmatprep.mubr.f32.mxu1 %v18401_v47 }
0x1879   : > { %v9126_v44 = vpop.f32.mrb[86].mxu1 }
0x187a   : > { %v9210_v0 = vmul.f32 %v9204_v33, %v9126_v44  ;;  %v9128_v46 = vpop.f32.mrb[87].mxu1  ;;  %v9197_v5 = vpop.f32.mrb[90].mxu0 }
0x187b   : > { %v9211_v23 = vmul.f32 %v9204_v33, %v9128_v46  ;;  %v9212_v36 = vmul.f32 %v9204_v33, %v9197_v5  ;;  %v9199_v24 = vpop.f32.mrb[91].mxu0 }
0x187c   : > { %v9222_v37 = vadd.f32 %v9216_v34, %v9210_v0  ;;  %v9213_v1 = vmul.f32 %v9204_v33, %v9199_v24 }
0x187d   : > { %v9223_v9 = vadd.f32 %v9216_v34, %v9211_v23  ;;  %v9224_v43 = vadd.f32 %v9216_v34, %v9212_v36 }
0x187e   : > { %v9225_v26 = vadd.f32 %v9216_v34, %v9213_v1  ;;  %v9230_v22 = vmax.f32 %v9222_v37, 0.0 }
0x187f   : > { %v9231_v4 = vmax.f32 %v9223_v9, 0.0  ;;  %v9232_v61 = vmax.f32 %v9224_v43, 0.0 }
0x1880   : > { %v9233_v11 = vmax.f32 %v9225_v26, 0.0 }
0x1881   : > { %9396 = vmatprep.subr.mxu1 %v9231_v4 }
0x1882   : > { %9397 = vmatpush1.msra.mxu1 %v9230_v22  ;;  %9473 = vmatprep.subr.mxu0 %v9233_v11 }
0x1883   : > { %9805 = vmatmul.mubr.msk.f32.vlgmr.msra.gmra.mrb[92].mxu1 %vm1639_vm10, %v9235_v30  ;;  %9474 = vmatpush1.msra.mxu0 %v9232_v61 }
0x1884   : > { %9807 = vmatmul.mubr.msk.f32.vlgmr.msra.gmra.mrb[96].mxu0 %vm1639_vm10, %v9235_v30  ;;  %9466 = vmatprep.mubr.f32.mxu1 %v18401_v47 }
0x1885   : > { %9543 = vmatprep.mubr.f32.mxu0 %v18401_v47 }
0x1887   : > { %9806 = vmatmul.mubr.msk.f32.gmra.mrb[94].mxu1 %vm1639_vm10, %v9237_v19 }
0x1888   : > { %9808 = vmatmul.mubr.msk.f32.gmra.mrb[98].mxu0 %vm1639_vm10, %v9237_v19 }
0x193a   : > { %v9385_v38 = vpop.f32.mrb[92].mxu0 }
0x193b   : > { %v9386_v20 = vadd.f32 %v9385_v38, %v16535_v39  ;;  %v9387_v56 = vpop.f32.mrb[93].mxu0  ;;  %v18538_v39 = vld [vmem:[#allocation179_spill] sm:$0xff] }
0x193c   : > { %v9388_v42 = vadd.f32 %v9387_v56, %v16538_v15 }
0x193d   : > { %9552 = vst [vmem:[%s17197_s27 + $0x10] sm:$0xff] %v9386_v20 }
0x193e   : > { %9553 = vst [vmem:[%s17197_s27 + $0x18] sm:$0xff] %v9388_v42  ;;  %v9391_v47 = vpop.f32.mrb[94].mxu0 }
0x193f   : > { %v9392_v31 = vadd.f32 %v9391_v47, %v18537_v63  ;;  %v9393_v52 = vpop.f32.mrb[95].mxu0 }
0x1940   : > { %v9394_v13 = vadd.f32 %v9393_v52, %v18538_v39 }
0x1941   : > { %9560 = vst [vmem:[%s17197_s27 + $0x50] sm:$0xff] %v9392_v31 }
0x1942   : > { %9561 = vst [vmem:[%s17197_s27 + $0x58] sm:$0xff] %v9394_v13 }
0x1944   : > { %v9308_v15 = vpop.f32.mrb[88].mxu1  ;;  %v9592_v44 = vld [vmem:[%s17197_s27 + $0x10] sm:$0xff] (%p18551_p9) }
0x1945   : > { %v9309_v53 = vadd.f32 %v9308_v15, %v18539_v40  ;;  %v9310_v51 = vpop.f32.mrb[89].mxu1  ;;  %v9594_v0 = vld [vmem:[%s17197_s27 + $0x18] sm:$0xff] (%p18551_p9)  ;;  %9593 = vst [vmem:[%s9575_s12 + $0x10] sm:$0xff] (%p18551_p9), %v9592_v44 }
0x1946   : > { %v9311_v29 = vadd.f32 %v9310_v51, %v18540_v58  ;;  %9595 = vst [vmem:[%s9575_s12 + $0x18] sm:$0xff] (%p18551_p9), %v9594_v0 }
0x1947   : > { %9550 = vst [vmem:[%s17197_s27] sm:$0xff] %v9309_v53 }
0x1948   : > { %9551 = vst [vmem:[%s17197_s27 + $0x8] sm:$0xff] %v9311_v29  ;;  %v9314_v60 = vpop.f32.mrb[90].mxu1  ;;  %v9608_v1 = vld [vmem:[%s17197_s27 + $0x50] sm:$0xff] (%p18551_p9) }
0x1949   : > { %v9315_v27 = vadd.f32 %v9314_v60, %v18541_v16  ;;  %v9316_v6 = vpop.f32.mrb[91].mxu1  ;;  %v9610_v9 = vld [vmem:[%s17197_s27 + $0x58] sm:$0xff] (%p18551_p9)  ;;  %9609 = vst [vmem:[%s9575_s12 + $0x90] sm:$0xff] (%p18551_p9), %v9608_v1 }
0x194a   : > { %v9317_v49 = vadd.f32 %v9316_v6, %v18542_v45  ;;  %9611 = vst [vmem:[%s9575_s12 + $0x98] sm:$0xff] (%p18551_p9), %v9610_v9 }
0x194b   : > { %9558 = vst [vmem:[%s17197_s27 + $0x40] sm:$0xff] %v9315_v27 }
0x194c   : > { %9559 = vst [vmem:[%s17197_s27 + $0x48] sm:$0xff] %v9317_v49 }
0x194e   : > { %v9588_v50 = vld [vmem:[%s17197_s27] sm:$0xff] (%p18551_p9) }
0x194f   : > { %v9590_v8 = vld [vmem:[%s17197_s27 + $0x8] sm:$0xff] (%p18551_p9)  ;;  %9589 = vst [vmem:[%s9575_s12] sm:$0xff] (%p18551_p9), %v9588_v50 }
0x1950   : > { %9591 = vst [vmem:[%s9575_s12 + $0x8] sm:$0xff] (%p18551_p9), %v9590_v8 }
0x1952   : > { %v9604_v24 = vld [vmem:[%s17197_s27 + $0x40] sm:$0xff] (%p18551_p9) }
0x1953   : > { %9605 = vst [vmem:[%s9575_s12 + $0x80] sm:$0xff] (%p18551_p9), %v9604_v24  ;;  %v9606_v37 = vld [vmem:[%s17197_s27 + $0x48] sm:$0xff] (%p18551_p9) }
0x1954   : > { %9607 = vst [vmem:[%s9575_s12 + $0x88] sm:$0xff] (%p18551_p9), %v9606_v37 }
0x1956   : > { %v9462_v3 = vpop.f32.mrb[92].mxu1 }
0x1957   : > { %v9463_v55 = vadd.f32 %v9462_v3, %v18543_v32  ;;  %v9464_v62 = vpop.f32.mrb[93].mxu1  ;;  %v9539_v57 = vpop.f32.mrb[96].mxu0 }
0x1958   : > { %v9465_v33 = vadd.f32 %v9464_v62, %v18544_v21  ;;  %v9540_v34 = vadd.f32 %v9539_v57, %v18545_v18  ;;  %v9541_v35 = vpop.f32.mrb[97].mxu0 }
0x1959   : > { %9554 = vst [vmem:[%s17197_s27 + $0x20] sm:$0xff] %v9463_v55  ;;  %v9542_v10 = vadd.f32 %v9541_v35, %v18546_v7  ;;  %9572 = sbr.rel (!%p18551_p9) target bundleno = 6504 (0x1968), region = 75 }
0x195a   : > { %9555 = vst [vmem:[%s17197_s27 + $0x28] sm:$0xff] %v9465_v33  ;;  %9556 = vst [vmem:[%s17197_s27 + $0x30] sm:$0xff] %v9540_v34  ;;  %v9468_v14 = vpop.f32.mrb[94].mxu1 }
0x195b   : > { %9557 = vst [vmem:[%s17197_s27 + $0x38] sm:$0xff] %v9542_v10  ;;  %v9469_v30 = vadd.f32 %v9468_v14, %v18547_v25  ;;  %v9470_v48 = vpop.f32.mrb[95].mxu1  ;;  %v9545_v12 = vpop.f32.mrb[98].mxu0 }
0x195c   : > { %v9471_v17 = vadd.f32 %v9470_v48, %v18548_v54  ;;  %v9546_v19 = vadd.f32 %v9545_v12, %v18549_v2  ;;  %v9547_v28 = vpop.f32.mrb[99].mxu0 }
0x195d   : > { %9562 = vst [vmem:[%s17197_s27 + $0x60] sm:$0xff] %v9469_v30  ;;  %v9548_v41 = vadd.f32 %v9547_v28, %v18550_v59 }
0x195e   : > { %9563 = vst [vmem:[%s17197_s27 + $0x68] sm:$0xff] %v9471_v17  ;;  %9564 = vst [vmem:[%s17197_s27 + $0x70] sm:$0xff] %v9546_v19 }
0x195f   : > { %9565 = vst [vmem:[%s17197_s27 + $0x78] sm:$0xff] %v9548_v41 }
0x1960   : > { %v9596_v46 = vld [vmem:[%s17197_s27 + $0x20] sm:$0xff] }
0x1961   : > { %v9598_v5 = vld [vmem:[%s17197_s27 + $0x28] sm:$0xff]  ;;  %9597 = vst [vmem:[%s9575_s12 + $0x20] sm:$0xff] %v9596_v46  ;;  %v9600_v23 = vld [vmem:[%s17197_s27 + $0x30] sm:$0xff] }
0x1962   : > { %9599 = vst [vmem:[%s9575_s12 + $0x28] sm:$0xff] %v9598_v5  ;;  %v9602_v36 = vld [vmem:[%s17197_s27 + $0x38] sm:$0xff]  ;;  %9601 = vst [vmem:[%s9575_s12 + $0x30] sm:$0xff] %v9600_v23 }
0x1963   : > { %9603 = vst [vmem:[%s9575_s12 + $0x38] sm:$0xff] %v9602_v36 }
0x1964   : > { %v9612_v43 = vld [vmem:[%s17197_s27 + $0x60] sm:$0xff] }
0x1965   : > { %v9614_v26 = vld [vmem:[%s17197_s27 + $0x68] sm:$0xff]  ;;  %v9616_v4 = vld [vmem:[%s17197_s27 + $0x70] sm:$0xff]  ;;  %9613 = vst [vmem:[%s9575_s12 + $0xa0] sm:$0xff] %v9612_v43 }
0x1966   : > { %9615 = vst [vmem:[%s9575_s12 + $0xa8] sm:$0xff] %v9614_v26  ;;  %9617 = vst [vmem:[%s9575_s12 + $0xb0] sm:$0xff] %v9616_v4  ;;  %v9618_v22 = vld [vmem:[%s17197_s27 + $0x78] sm:$0xff] }
0x1967   : > { %9619 = vst [vmem:[%s9575_s12 + $0xb8] sm:$0xff] %v9618_v22 }
0x1968 PF: > { %p14_p11 = scmp.ge.s32.totalorder %s11087_s25, 4   ;;  %s18552_s21 = smov %s10998_s22 }
0x1969   : > { %s18553_s22 = smov %s11097_s28  ;;  %s18554_s23 = smov %s11087_s25 }
0x196a   :  { %16 = sbr.rel (!%p14_p11) target bundleno = 2 (0x2), region = 130 }
0x1971   :  { %9635 = vsyncpa [#allocation4], 1 }
0x1972   :  { %9637 = vsyncpa [#allocation4 + $0x1], 1 }

</bundles_post_ra>
